<compile_context>
chip_gen: v7x
topology: tpu7x:2x2x1
jax: 0.10.0
libtpu: 0.0.40
codegen_flags: <defaults>
</compile_context>

<pallas_src>
import functools

import jax
import jax.numpy as jnp
from jax.experimental import pallas as pl
from jax.experimental.pallas import tpu as pltpu


def _round_up(x, m):
    return (x + m - 1) // m * m


def _tree_sum(vals):
    """Pairwise-reduce a list of equal-shaped arrays (log-depth add tree)."""
    vals = list(vals)
    while len(vals) > 1:
        nxt = [vals[a] + vals[a + 1] for a in range(0, len(vals) - 1, 2)]
        if len(vals) % 2:
            nxt.append(vals[-1])
        vals = nxt
    return vals[0]


def _choose_tb(batch, tb_req):
    """Pick the batch tile: multiple of 8, <= tb_req, preferring (a) an exact
    divisor of the batch (no wrapper pad / slice HBM copies) and (b) >= 2 grid
    steps so the parallel axis can be split across TensorCores (v7x)."""
    tb_req = max(8, (int(tb_req) // 8) * 8)
    if batch % 8 == 0 and batch >= 16:
        best = 0
        upper = min(tb_req, batch // 2)
        for t in range(8, upper + 1, 8):
            if batch % t == 0:
                best = t
        if best:
            return best, batch, False            # tb, B_pad, ragged_last
    # Fallback (batch not 8-aligned or too small): pad the batch up to a tile
    # multiple; padded rows are masked out of the loss and sliced off z_q.
    tb = min(tb_req, _round_up(batch, 8))
    B_pad = _round_up(batch, tb)
    if B_pad // tb < 2 and batch > 8:
        tb = _round_up((batch + 1) // 2, 8)       # keep >= 2 grid steps
        B_pad = _round_up(batch, tb)
    return tb, B_pad, B_pad != batch


def _vq_kernel(*refs, n_e, batch, tb, nb, ragged_last, matmul_dtype,
               separate_mm_table):
    if separate_mm_table:
        x_ref, e_ref, e2_ref, em_ref, zq_ref, sse_ref = refs
    else:
        x_ref, e_ref, e2_ref, zq_ref, sse_ref = refs
        em_ref = e_ref

    i = pl.program_id(0)

    x_in = x_ref[...]                                   # (tb, D), native dtype
    x_f32 = x_in.astype(jnp.float32)
    D = x_in.shape[1]

    # --- distances: argmin only needs  ||e||^2 - 2 x.e^T  ------------------
    # (||x||^2 is constant per row and cannot change the argmin.)
    xe = jax.lax.dot_general(                            # MXU, (tb, n_e_pad)
        x_in.astype(matmul_dtype), em_ref[...], (((1,), (1,)), ((), ())),
        preferred_element_type=jnp.float32)
    d = e2_ref[...] - 2.0 * xe                           # f32; pads have +BIG e2

    # --- argmin with first-match tie-break ----------------------------------
    n_e_pad = d.shape[1]
    col = jax.lax.broadcasted_iota(jnp.int32, d.shape, 1)
    dmin = jnp.min(d, axis=1, keepdims=True)
    idx = jnp.min(jnp.where(d == dmin, col, jnp.int32(n_e_pad)),
                  axis=1, keepdims=True)                 # (tb, 1)

    # --- gather z_q = E[idx] -------------------------------------------------
    if n_e <= 16:
        # Tiny codebook: exact VPU compare/select, n_e-1 selects starting from
        # row 0 (no zeros init).  The one-hot MXU path below is an alternative
        # on v7x (frees VALU), but is not bit-exact for f32 codebooks.
        z_q = e_ref[0:1, :].astype(jnp.float32)          # (1, D)
        for k in range(1, n_e):
            row = e_ref[k:k + 1, :].astype(jnp.float32)
            z_q = jnp.where(idx == k, row, z_q)          # (tb, D) after k=1
        if z_q.shape[0] != tb:                           # only when n_e == 1
            z_q = jnp.broadcast_to(z_q, (tb, D))
    else:
        # Larger codebook: lane-dense one-hot MXU matmul (padded rows are zero
        # and never selected thanks to the e2 sentinel).
        onehot = (col == idx).astype(e_ref.dtype)        # (tb, n_e_pad)
        z_q = jax.lax.dot_general(
            onehot, e_ref[...], (((1,), (0,)), ((), ())),
            preferred_element_type=jnp.float32)          # (tb, D)

    zq_ref[...] = z_q.astype(zq_ref.dtype)

    # --- per-tile SSE partial: fused 8-row groups, tree-reduced --------------
    def group_sq(g, lo=None):
        sl = slice(g * 8, (g + 1) * 8)
        diff = z_q[sl, :] - x_f32[sl, :]                 # (8, D) f32
        d2 = diff * diff
        if lo is not None and lo + 8 > batch:            # static partial mask
            row_id = jax.lax.broadcasted_iota(jnp.int32, (8, 1), 0) + lo
            d2 = jnp.where(row_id < batch, d2, 0.0)
        return d2

    n_groups = tb // 8
    if not ragged_last:
        # tb divides the batch: no validity mask anywhere.
        sse_ref[...] = _tree_sum([group_sq(g) for g in range(n_groups)])
    else:
        base = (nb - 1) * tb                             # static last-tile base

        @pl.when(i < nb - 1)
        def _():
            sse_ref[...] = _tree_sum([group_sq(g) for g in range(n_groups)])

        @pl.when(i == nb - 1)
        def _():
            parts = [group_sq(g, lo=base + g * 8)
                     for g in range(n_groups) if base + g * 8 < batch]
            sse_ref[...] = _tree_sum(parts)


def mlp_vq_forward(x, embedding, beta=1.0, *, tb=512, matmul_dtype=None):
    """Pallas implementation of MLP_VQ.forward. Returns (x, z_q, loss)."""
    B, D = x.shape
    n_e, D_e = embedding.shape
    assert D == D_e, "x feature dim must match the codebook dim"

    if matmul_dtype is None:
        # f32 on the MXU is multi-pass bf16 (costly, esp. v5e); default the
        # distance matmul to bf16.  For near-tied codewords the argmin can
        # differ from f32 -- pass matmul_dtype=jnp.float32 for exact behaviour.
        if x.dtype == jnp.float32 and embedding.dtype == jnp.float32:
            matmul_dtype = jnp.bfloat16
        else:
            matmul_dtype = embedding.dtype
    matmul_dtype = jnp.dtype(matmul_dtype)

    # Batch tiling (prefers an exact divisor of B, keeps >= 2 grid steps).
    tb, B_pad, ragged_last = _choose_tb(B, tb)
    nb = B_pad // tb

    # Codebook padded to a lane-dense multiple of 128 rows (not 256: the
    # distance matmul is negligible vs. HBM traffic).  Padded rows are zero
    # and get a huge ||e||^2 sentinel so argmin never selects them.
    n_e_pad = _round_up(max(n_e, 128), 128)
    e_pad = jnp.zeros((n_e_pad, D), embedding.dtype).at[:n_e].set(embedding)
    e2 = jnp.sum(embedding.astype(jnp.float32) ** 2, axis=1)
    e2_pad = jnp.full((1, n_e_pad), 1e30, dtype=jnp.float32).at[0, :n_e].set(e2)

    x_pad = x if B_pad == B else jnp.pad(x, ((0, B_pad - B), (0, 0)))

    separate_mm_table = matmul_dtype != jnp.dtype(e_pad.dtype)

    # Grid-constant codebook blocks: single-buffer them only when the codebook
    # is big enough that double-buffering actually costs VMEM (v7x concern).
    e_itemsize = jnp.dtype(embedding.dtype).itemsize
    cb_bytes = n_e_pad * D * e_itemsize
    if separate_mm_table:
        cb_bytes += n_e_pad * D * matmul_dtype.itemsize
    single_buffer_cb = cb_bytes > (2 << 20)
    cb_mode = pl.Buffered(1) if single_buffer_cb else None

    def cb_spec(shape):
        if cb_mode is None:
            return pl.BlockSpec(shape, lambda i: (0, 0))
        return pl.BlockSpec(shape, lambda i: (0, 0), pipeline_mode=cb_mode)

    inputs = [x_pad, e_pad, e2_pad]
    in_specs = [
        pl.BlockSpec((tb, D), lambda i: (i, 0)),        # x tile (streamed)
        cb_spec((n_e_pad, D)),                          # codebook (gather dtype)
        cb_spec((1, n_e_pad)),                          # ||e||^2 (+sentinel)
    ]
    if separate_mm_table:
        # Downcast the codebook ONCE here for the distance matmul (never
        # re-cast inside the grid loop); the gather still reads full precision.
        inputs.append(e_pad.astype(matmul_dtype))
        in_specs.append(cb_spec((n_e_pad, D)))

    # Explicit VMEM limit only when the estimate exceeds the smallest default
    # scoped budget (v5e: 16 MiB).
    x_itemsize = jnp.dtype(x.dtype).itemsize
    vmem_need = (2 * tb * D * x_itemsize                 # x, double-buffered
                 + 2 * tb * D * x_itemsize               # z_q, double-buffered
                 + (1 if single_buffer_cb else 2) * cb_bytes
                 + 2 * 8 * D * 4                         # SSE partial blocks
                 + 2 * n_e_pad * 4)                      # ||e||^2
    cp_kwargs = dict(dimension_semantics=("parallel",))  # no cross-step carry
    if vmem_need > (12 << 20):
        cp_kwargs["vmem_limit_bytes"] = int(
            min(vmem_need + vmem_need // 2 + (2 << 20), 100 << 20))

    kernel = functools.partial(
        _vq_kernel, n_e=n_e, batch=B, tb=tb, nb=nb, ragged_last=ragged_last,
        matmul_dtype=matmul_dtype, separate_mm_table=separate_mm_table)

    z_q, sse_part = pl.pallas_call(
        kernel,
        out_shape=(
            jax.ShapeDtypeStruct((B_pad, D), x.dtype),
            jax.ShapeDtypeStruct((nb * 8, D), jnp.float32),
        ),
        grid_spec=pltpu.PrefetchScalarGridSpec(
            num_scalar_prefetch=0,
            grid=(nb,),
            in_specs=in_specs,
            out_specs=[
                pl.BlockSpec((tb, D), lambda i: (i, 0)),   # z_q tile
                pl.BlockSpec((8, D), lambda i: (i, 0)),    # SSE partial
            ],
        ),
        compiler_params=pltpu.CompilerParams(**cp_kwargs),
    )(*inputs)

    if B_pad != B:
        z_q = z_q[:B]
    loss = (beta + 1.0) * jnp.sum(sse_part) / (B * D)
    # Straight-through: forward value of z_q is the quantized vector.
    return x, z_q, loss


def mlp_vq_reference(x, embedding, beta=1.0):
    xf = x.astype(jnp.float32)
    ef = embedding.astype(jnp.float32)
    d = (jnp.sum(xf ** 2, axis=1, keepdims=True)
         + jnp.sum(ef ** 2, axis=1)
         - 2.0 * jnp.dot(xf, ef.T, precision=jax.lax.Precision.HIGHEST))
    idx = jnp.argmin(d, axis=1)
    z_q = embedding[idx]
    mse = jnp.mean((z_q.astype(jnp.float32) - xf) ** 2)
    loss = (beta + 1.0) * mse
    return x, z_q, loss


if __name__ == "__main__":
    key = jax.random.PRNGKey(0)
    # Module defaults: output_dim=768, n_e=3.  Inputs are clustered around
    # codewords (the natural VQ regime) so the argmin margin is huge and the
    # bf16 MXU distance matmul cannot flip indices.
    B, D, n_e, beta = 1024, 768, 3, 1.0
    k_e, k_a, k_n = jax.random.split(key, 3)
    embedding = jax.random.normal(k_e, (n_e, D), dtype=jnp.float32)
    assign = jax.random.randint(k_a, (B,), 0, n_e)
    x = embedding[assign] + 0.25 * jax.random.normal(k_n, (B, D), jnp.float32)

    # --- Test 1: f32 inputs, default settings (tb=512 -> nb=2, no padding,
    #     bf16 MXU operands prepared once in the wrapper) --------------------
    x_o, z_q, loss = jax.block_until_ready(
        mlp_vq_forward(x, embedding, beta=beta))
    x_r, zq_r, loss_r = mlp_vq_reference(x, embedding, beta=beta)
    assert jnp.array_equal(x_o, x)
    assert jnp.allclose(z_q, zq_r, atol=1e-6, rtol=0)
    assert jnp.allclose(loss, loss_r, atol=1e-6, rtol=1e-4)

    # --- Test 2: bf16 end-to-end, ragged batch (exercises the masked last
    #     tile fallback and the no-separate-mm-table path) --------------------
    B2 = 100
    assign2 = jax.random.randint(jax.random.PRNGKey(1), (B2,), 0, n_e)
    x2 = (embedding[assign2]
          + 0.25 * jax.random.normal(jax.random.PRNGKey(2), (B2, D), jnp.float32))
    x2_bf = x2.astype(jnp.bfloat16)
    e_bf = embedding.astype(jnp.bfloat16)
    _, zq2, loss2 = jax.block_until_ready(
        mlp_vq_forward(x2_bf, e_bf, beta=beta))
    _, zq2_r, loss2_r = mlp_vq_reference(x2_bf, e_bf, beta=beta)
    assert jnp.allclose(zq2.astype(jnp.float32), zq2_r.astype(jnp.float32),
                        atol=1e-6, rtol=0)
    assert jnp.allclose(loss2, loss2_r, atol=1e-5, rtol=1e-3)

    print("KERNEL_OK")
</pallas_src>

<mosaic_0001>
module attributes {stable_mosaic.version = 11 : i64} {
  func.func @_vq_kernel(%arg0: i32, %arg1: memref<512x768xf32, #tpu.memory_space<vmem>>, %arg2: memref<128x768xf32, #tpu.memory_space<vmem>>, %arg3: memref<1x128xf32, #tpu.memory_space<vmem>>, %arg4: memref<128x768xbf16, #tpu.memory_space<vmem>>, %arg5: memref<512x768xf32, #tpu.memory_space<vmem>>, %arg6: memref<8x768xf32, #tpu.memory_space<vmem>>) attributes {dimension_semantics = [#tpu.dimension_semantics<parallel>], iteration_bounds = array<i64: 2>, scalar_prefetch = 0 : i64, scratch_operands = 0 : i64, tpu.core_type = #tpu.core_type<tc>, window_params = [{transform_indices = @transform_0, window_bounds = array<i64: 512, 768>}, {pipeline_mode = #tpu.pipeline_mode<synchronous>, transform_indices = @transform_1, window_bounds = array<i64: 128, 768>}, {pipeline_mode = #tpu.pipeline_mode<synchronous>, transform_indices = @transform_2, window_bounds = array<i64: 1, 128>}, {pipeline_mode = #tpu.pipeline_mode<synchronous>, transform_indices = @transform_3, window_bounds = array<i64: 128, 768>}, {transform_indices = @transform_4, window_bounds = array<i64: 512, 768>}, {transform_indices = @transform_5, window_bounds = array<i64: 8, 768>}]} {
    %c0 = arith.constant 0 : index
    %c0_0 = arith.constant 0 : index
    %0 = vector.load %arg1[%c0, %c0_0] : memref<512x768xf32, #tpu.memory_space<vmem>>, vector<512x768xf32>
    %1 = arith.truncf %0 : vector<512x768xf32> to vector<512x768xbf16>
    %c0_1 = arith.constant 0 : index
    %c0_2 = arith.constant 0 : index
    %2 = vector.load %arg4[%c0_1, %c0_2] : memref<128x768xbf16, #tpu.memory_space<vmem>>, vector<128x768xbf16>
    %cst = arith.constant dense<0.000000e+00> : vector<512x128xf32>
    %3 = tpu.matmul %1, %2, %cst {dimension_numbers = #tpu.dot_dimension_numbers<[1], [1], [0], [0], [0, 0, 1, 0], [], []>} : vector<512x768xbf16>, vector<128x768xbf16>, vector<512x128xf32> -> vector<512x128xf32>
    %c0_3 = arith.constant 0 : index
    %c0_4 = arith.constant 0 : index
    %4 = vector.load %arg3[%c0_3, %c0_4] : memref<1x128xf32, #tpu.memory_space<vmem>>, vector<1x128xf32>
    %cst_5 = arith.constant 2.000000e+00 : f32
    %5 = vector.broadcast %cst_5 : f32 to vector<512x128xf32>
    %6 = arith.mulf %5, %3 : vector<512x128xf32>
    %7 = vector.broadcast %4 : vector<1x128xf32> to vector<512x128xf32>
    %8 = arith.subf %7, %6 : vector<512x128xf32>
    %9 = tpu.iota {dimensions = array<i32: 1>} : vector<512x128xi32>
    %cst_6 = arith.constant dense<0x7F800000> : vector<512xf32>
    %10 = vector.multi_reduction <minimumf>, %8, %cst_6 [1] : vector<512x128xf32> to vector<512xf32>
    %11 = vector.shape_cast %10 : vector<512xf32> to vector<512x1xf32>
    %12 = vector.broadcast %11 : vector<512x1xf32> to vector<512x128xf32>
    %13 = arith.cmpf oeq, %8, %12 : vector<512x128xf32>
    %c128_i32 = arith.constant 128 : i32
    %14 = vector.broadcast %c128_i32 : i32 to vector<512x128xi32>
    %15 = arith.select %13, %9, %14 : vector<512x128xi1>, vector<512x128xi32>
    %cst_7 = arith.constant dense<2147483647> : vector<512xi32>
    %16 = vector.multi_reduction <minsi>, %15, %cst_7 [1] : vector<512x128xi32> to vector<512xi32>
    %17 = vector.shape_cast %16 : vector<512xi32> to vector<512x1xi32>
    %c0_8 = arith.constant 0 : index
    %c0_9 = arith.constant 0 : index
    %18 = vector.load %arg2[%c0_8, %c0_9] : memref<128x768xf32, #tpu.memory_space<vmem>>, vector<1x768xf32>
    %c1 = arith.constant 1 : index
    %c0_10 = arith.constant 0 : index
    %19 = vector.load %arg2[%c1, %c0_10] : memref<128x768xf32, #tpu.memory_space<vmem>>, vector<1x768xf32>
    %c1_i32 = arith.constant 1 : i32
    %20 = vector.broadcast %c1_i32 : i32 to vector<512x1xi32>
    %21 = arith.cmpi eq, %17, %20 : vector<512x1xi32>
    %22 = vector.shape_cast %21 : vector<512x1xi1> to vector<512x1xi1>
    %23 = vector.broadcast %22 : vector<512x1xi1> to vector<512x768xi1>
    %24 = vector.shape_cast %19 : vector<1x768xf32> to vector<1x768xf32>
    %25 = vector.broadcast %24 : vector<1x768xf32> to vector<512x768xf32>
    %26 = vector.shape_cast %18 : vector<1x768xf32> to vector<1x768xf32>
    %27 = vector.broadcast %26 : vector<1x768xf32> to vector<512x768xf32>
    %28 = arith.select %23, %25, %27 : vector<512x768xi1>, vector<512x768xf32>
    %c2 = arith.constant 2 : index
    %c0_11 = arith.constant 0 : index
    %29 = vector.load %arg2[%c2, %c0_11] : memref<128x768xf32, #tpu.memory_space<vmem>>, vector<1x768xf32>
    %c2_i32 = arith.constant 2 : i32
    %30 = vector.broadcast %c2_i32 : i32 to vector<512x1xi32>
    %31 = arith.cmpi eq, %17, %30 : vector<512x1xi32>
    %32 = vector.shape_cast %31 : vector<512x1xi1> to vector<512x1xi1>
    %33 = vector.broadcast %32 : vector<512x1xi1> to vector<512x768xi1>
    %34 = vector.shape_cast %29 : vector<1x768xf32> to vector<1x768xf32>
    %35 = vector.broadcast %34 : vector<1x768xf32> to vector<512x768xf32>
    %36 = arith.select %33, %35, %28 : vector<512x768xi1>, vector<512x768xf32>
    %c0_12 = arith.constant 0 : index
    %c0_13 = arith.constant 0 : index
    %37 = vector.load %arg5[%c0_12, %c0_13] : memref<512x768xf32, #tpu.memory_space<vmem>>, vector<512x768xf32>
    tpu.vector_store %arg5[%c0_12, %c0_13], %36 {strides = array<i32>} : memref<512x768xf32, #tpu.memory_space<vmem>>, vector<512x768xf32>,
    %38 = vector.extract_strided_slice %36 {offsets = [0, 0], sizes = [8, 768], strides = [1, 1]} : vector<512x768xf32> to vector<8x768xf32>
    %39 = vector.extract_strided_slice %0 {offsets = [0, 0], sizes = [8, 768], strides = [1, 1]} : vector<512x768xf32> to vector<8x768xf32>
    %40 = arith.subf %38, %39 : vector<8x768xf32>
    %41 = arith.mulf %40, %40 : vector<8x768xf32>
    %42 = vector.extract_strided_slice %36 {offsets = [8, 0], sizes = [8, 768], strides = [1, 1]} : vector<512x768xf32> to vector<8x768xf32>
    %43 = vector.extract_strided_slice %0 {offsets = [8, 0], sizes = [8, 768], strides = [1, 1]} : vector<512x768xf32> to vector<8x768xf32>
    %44 = arith.subf %42, %43 : vector<8x768xf32>
    %45 = arith.mulf %44, %44 : vector<8x768xf32>
    %46 = vector.extract_strided_slice %36 {offsets = [16, 0], sizes = [8, 768], strides = [1, 1]} : vector<512x768xf32> to vector<8x768xf32>
    %47 = vector.extract_strided_slice %0 {offsets = [16, 0], sizes = [8, 768], strides = [1, 1]} : vector<512x768xf32> to vector<8x768xf32>
    %48 = arith.subf %46, %47 : vector<8x768xf32>
    %49 = arith.mulf %48, %48 : vector<8x768xf32>
    %50 = vector.extract_strided_slice %36 {offsets = [24, 0], sizes = [8, 768], strides = [1, 1]} : vector<512x768xf32> to vector<8x768xf32>
    %51 = vector.extract_strided_slice %0 {offsets = [24, 0], sizes = [8, 768], strides = [1, 1]} : vector<512x768xf32> to vector<8x768xf32>
    %52 = arith.subf %50, %51 : vector<8x768xf32>
    %53 = arith.mulf %52, %52 : vector<8x768xf32>
    %54 = vector.extract_strided_slice %36 {offsets = [32, 0], sizes = [8, 768], strides = [1, 1]} : vector<512x768xf32> to vector<8x768xf32>
    %55 = vector.extract_strided_slice %0 {offsets = [32, 0], sizes = [8, 768], strides = [1, 1]} : vector<512x768xf32> to vector<8x768xf32>
    %56 = arith.subf %54, %55 : vector<8x768xf32>
    %57 = arith.mulf %56, %56 : vector<8x768xf32>
    %58 = vector.extract_strided_slice %36 {offsets = [40, 0], sizes = [8, 768], strides = [1, 1]} : vector<512x768xf32> to vector<8x768xf32>
    %59 = vector.extract_strided_slice %0 {offsets = [40, 0], sizes = [8, 768], strides = [1, 1]} : vector<512x768xf32> to vector<8x768xf32>
    %60 = arith.subf %58, %59 : vector<8x768xf32>
    %61 = arith.mulf %60, %60 : vector<8x768xf32>
    %62 = vector.extract_strided_slice %36 {offsets = [48, 0], sizes = [8, 768], strides = [1, 1]} : vector<512x768xf32> to vector<8x768xf32>
    %63 = vector.extract_strided_slice %0 {offsets = [48, 0], sizes = [8, 768], strides = [1, 1]} : vector<512x768xf32> to vector<8x768xf32>
    %64 = arith.subf %62, %63 : vector<8x768xf32>
    %65 = arith.mulf %64, %64 : vector<8x768xf32>
    %66 = vector.extract_strided_slice %36 {offsets = [56, 0], sizes = [8, 768], strides = [1, 1]} : vector<512x768xf32> to vector<8x768xf32>
    %67 = vector.extract_strided_slice %0 {offsets = [56, 0], sizes = [8, 768], strides = [1, 1]} : vector<512x768xf32> to vector<8x768xf32>
    %68 = arith.subf %66, %67 : vector<8x768xf32>
    %69 = arith.mulf %68, %68 : vector<8x768xf32>
    %70 = vector.extract_strided_slice %36 {offsets = [64, 0], sizes = [8, 768], strides = [1, 1]} : vector<512x768xf32> to vector<8x768xf32>
    %71 = vector.extract_strided_slice %0 {offsets = [64, 0], sizes = [8, 768], strides = [1, 1]} : vector<512x768xf32> to vector<8x768xf32>
    %72 = arith.subf %70, %71 : vector<8x768xf32>
    %73 = arith.mulf %72, %72 : vector<8x768xf32>
    %74 = vector.extract_strided_slice %36 {offsets = [72, 0], sizes = [8, 768], strides = [1, 1]} : vector<512x768xf32> to vector<8x768xf32>
    %75 = vector.extract_strided_slice %0 {offsets = [72, 0], sizes = [8, 768], strides = [1, 1]} : vector<512x768xf32> to vector<8x768xf32>
    %76 = arith.subf %74, %75 : vector<8x768xf32>
    %77 = arith.mulf %76, %76 : vector<8x768xf32>
    %78 = vector.extract_strided_slice %36 {offsets = [80, 0], sizes = [8, 768], strides = [1, 1]} : vector<512x768xf32> to vector<8x768xf32>
    %79 = vector.extract_strided_slice %0 {offsets = [80, 0], sizes = [8, 768], strides = [1, 1]} : vector<512x768xf32> to vector<8x768xf32>
    %80 = arith.subf %78, %79 : vector<8x768xf32>
    %81 = arith.mulf %80, %80 : vector<8x768xf32>
    %82 = vector.extract_strided_slice %36 {offsets = [88, 0], sizes = [8, 768], strides = [1, 1]} : vector<512x768xf32> to vector<8x768xf32>
    %83 = vector.extract_strided_slice %0 {offsets = [88, 0], sizes = [8, 768], strides = [1, 1]} : vector<512x768xf32> to vector<8x768xf32>
    %84 = arith.subf %82, %83 : vector<8x768xf32>
    %85 = arith.mulf %84, %84 : vector<8x768xf32>
    %86 = vector.extract_strided_slice %36 {offsets = [96, 0], sizes = [8, 768], strides = [1, 1]} : vector<512x768xf32> to vector<8x768xf32>
    %87 = vector.extract_strided_slice %0 {offsets = [96, 0], sizes = [8, 768], strides = [1, 1]} : vector<512x768xf32> to vector<8x768xf32>
    %88 = arith.subf %86, %87 : vector<8x768xf32>
    %89 = arith.mulf %88, %88 : vector<8x768xf32>
    %90 = vector.extract_strided_slice %36 {offsets = [104, 0], sizes = [8, 768], strides = [1, 1]} : vector<512x768xf32> to vector<8x768xf32>
    %91 = vector.extract_strided_slice %0 {offsets = [104, 0], sizes = [8, 768], strides = [1, 1]} : vector<512x768xf32> to vector<8x768xf32>
    %92 = arith.subf %90, %91 : vector<8x768xf32>
    %93 = arith.mulf %92, %92 : vector<8x768xf32>
    %94 = vector.extract_strided_slice %36 {offsets = [112, 0], sizes = [8, 768], strides = [1, 1]} : vector<512x768xf32> to vector<8x768xf32>
    %95 = vector.extract_strided_slice %0 {offsets = [112, 0], sizes = [8, 768], strides = [1, 1]} : vector<512x768xf32> to vector<8x768xf32>
    %96 = arith.subf %94, %95 : vector<8x768xf32>
    %97 = arith.mulf %96, %96 : vector<8x768xf32>
    %98 = vector.extract_strided_slice %36 {offsets = [120, 0], sizes = [8, 768], strides = [1, 1]} : vector<512x768xf32> to vector<8x768xf32>
    %99 = vector.extract_strided_slice %0 {offsets = [120, 0], sizes = [8, 768], strides = [1, 1]} : vector<512x768xf32> to vector<8x768xf32>
    %100 = arith.subf %98, %99 : vector<8x768xf32>
    %101 = arith.mulf %100, %100 : vector<8x768xf32>
    %102 = vector.extract_strided_slice %36 {offsets = [128, 0], sizes = [8, 768], strides = [1, 1]} : vector<512x768xf32> to vector<8x768xf32>
    %103 = vector.extract_strided_slice %0 {offsets = [128, 0], sizes = [8, 768], strides = [1, 1]} : vector<512x768xf32> to vector<8x768xf32>
    %104 = arith.subf %102, %103 : vector<8x768xf32>
    %105 = arith.mulf %104, %104 : vector<8x768xf32>
    %106 = vector.extract_strided_slice %36 {offsets = [136, 0], sizes = [8, 768], strides = [1, 1]} : vector<512x768xf32> to vector<8x768xf32>
    %107 = vector.extract_strided_slice %0 {offsets = [136, 0], sizes = [8, 768], strides = [1, 1]} : vector<512x768xf32> to vector<8x768xf32>
    %108 = arith.subf %106, %107 : vector<8x768xf32>
    %109 = arith.mulf %108, %108 : vector<8x768xf32>
    %110 = vector.extract_strided_slice %36 {offsets = [144, 0], sizes = [8, 768], strides = [1, 1]} : vector<512x768xf32> to vector<8x768xf32>
    %111 = vector.extract_strided_slice %0 {offsets = [144, 0], sizes = [8, 768], strides = [1, 1]} : vector<512x768xf32> to vector<8x768xf32>
    %112 = arith.subf %110, %111 : vector<8x768xf32>
    %113 = arith.mulf %112, %112 : vector<8x768xf32>
    %114 = vector.extract_strided_slice %36 {offsets = [152, 0], sizes = [8, 768], strides = [1, 1]} : vector<512x768xf32> to vector<8x768xf32>
    %115 = vector.extract_strided_slice %0 {offsets = [152, 0], sizes = [8, 768], strides = [1, 1]} : vector<512x768xf32> to vector<8x768xf32>
    %116 = arith.subf %114, %115 : vector<8x768xf32>
    %117 = arith.mulf %116, %116 : vector<8x768xf32>
    %118 = vector.extract_strided_slice %36 {offsets = [160, 0], sizes = [8, 768], strides = [1, 1]} : vector<512x768xf32> to vector<8x768xf32>
    %119 = vector.extract_strided_slice %0 {offsets = [160, 0], sizes = [8, 768], strides = [1, 1]} : vector<512x768xf32> to vector<8x768xf32>
    %120 = arith.subf %118, %119 : vector<8x768xf32>
    %121 = arith.mulf %120, %120 : vector<8x768xf32>
    %122 = vector.extract_strided_slice %36 {offsets = [168, 0], sizes = [8, 768], strides = [1, 1]} : vector<512x768xf32> to vector<8x768xf32>
    %123 = vector.extract_strided_slice %0 {offsets = [168, 0], sizes = [8, 768], strides = [1, 1]} : vector<512x768xf32> to vector<8x768xf32>
    %124 = arith.subf %122, %123 : vector<8x768xf32>
    %125 = arith.mulf %124, %124 : vector<8x768xf32>
    %126 = vector.extract_strided_slice %36 {offsets = [176, 0], sizes = [8, 768], strides = [1, 1]} : vector<512x768xf32> to vector<8x768xf32>
    %127 = vector.extract_strided_slice %0 {offsets = [176, 0], sizes = [8, 768], strides = [1, 1]} : vector<512x768xf32> to vector<8x768xf32>
    %128 = arith.subf %126, %127 : vector<8x768xf32>
    %129 = arith.mulf %128, %128 : vector<8x768xf32>
    %130 = vector.extract_strided_slice %36 {offsets = [184, 0], sizes = [8, 768], strides = [1, 1]} : vector<512x768xf32> to vector<8x768xf32>
    %131 = vector.extract_strided_slice %0 {offsets = [184, 0], sizes = [8, 768], strides = [1, 1]} : vector<512x768xf32> to vector<8x768xf32>
    %132 = arith.subf %130, %131 : vector<8x768xf32>
    %133 = arith.mulf %132, %132 : vector<8x768xf32>
    %134 = vector.extract_strided_slice %36 {offsets = [192, 0], sizes = [8, 768], strides = [1, 1]} : vector<512x768xf32> to vector<8x768xf32>
    %135 = vector.extract_strided_slice %0 {offsets = [192, 0], sizes = [8, 768], strides = [1, 1]} : vector<512x768xf32> to vector<8x768xf32>
    %136 = arith.subf %134, %135 : vector<8x768xf32>
    %137 = arith.mulf %136, %136 : vector<8x768xf32>
    %138 = vector.extract_strided_slice %36 {offsets = [200, 0], sizes = [8, 768], strides = [1, 1]} : vector<512x768xf32> to vector<8x768xf32>
    %139 = vector.extract_strided_slice %0 {offsets = [200, 0], sizes = [8, 768], strides = [1, 1]} : vector<512x768xf32> to vector<8x768xf32>
    %140 = arith.subf %138, %139 : vector<8x768xf32>
    %141 = arith.mulf %140, %140 : vector<8x768xf32>
    %142 = vector.extract_strided_slice %36 {offsets = [208, 0], sizes = [8, 768], strides = [1, 1]} : vector<512x768xf32> to vector<8x768xf32>
    %143 = vector.extract_strided_slice %0 {offsets = [208, 0], sizes = [8, 768], strides = [1, 1]} : vector<512x768xf32> to vector<8x768xf32>
    %144 = arith.subf %142, %143 : vector<8x768xf32>
    %145 = arith.mulf %144, %144 : vector<8x768xf32>
    %146 = vector.extract_strided_slice %36 {offsets = [216, 0], sizes = [8, 768], strides = [1, 1]} : vector<512x768xf32> to vector<8x768xf32>
    %147 = vector.extract_strided_slice %0 {offsets = [216, 0], sizes = [8, 768], strides = [1, 1]} : vector<512x768xf32> to vector<8x768xf32>
    %148 = arith.subf %146, %147 : vector<8x768xf32>
    %149 = arith.mulf %148, %148 : vector<8x768xf32>
    %150 = vector.extract_strided_slice %36 {offsets = [224, 0], sizes = [8, 768], strides = [1, 1]} : vector<512x768xf32> to vector<8x768xf32>
    %151 = vector.extract_strided_slice %0 {offsets = [224, 0], sizes = [8, 768], strides = [1, 1]} : vector<512x768xf32> to vector<8x768xf32>
    %152 = arith.subf %150, %151 : vector<8x768xf32>
    %153 = arith.mulf %152, %152 : vector<8x768xf32>
    %154 = vector.extract_strided_slice %36 {offsets = [232, 0], sizes = [8, 768], strides = [1, 1]} : vector<512x768xf32> to vector<8x768xf32>
    %155 = vector.extract_strided_slice %0 {offsets = [232, 0], sizes = [8, 768], strides = [1, 1]} : vector<512x768xf32> to vector<8x768xf32>
    %156 = arith.subf %154, %155 : vector<8x768xf32>
    %157 = arith.mulf %156, %156 : vector<8x768xf32>
    %158 = vector.extract_strided_slice %36 {offsets = [240, 0], sizes = [8, 768], strides = [1, 1]} : vector<512x768xf32> to vector<8x768xf32>
    %159 = vector.extract_strided_slice %0 {offsets = [240, 0], sizes = [8, 768], strides = [1, 1]} : vector<512x768xf32> to vector<8x768xf32>
    %160 = arith.subf %158, %159 : vector<8x768xf32>
    %161 = arith.mulf %160, %160 : vector<8x768xf32>
    %162 = vector.extract_strided_slice %36 {offsets = [248, 0], sizes = [8, 768], strides = [1, 1]} : vector<512x768xf32> to vector<8x768xf32>
    %163 = vector.extract_strided_slice %0 {offsets = [248, 0], sizes = [8, 768], strides = [1, 1]} : vector<512x768xf32> to vector<8x768xf32>
    %164 = arith.subf %162, %163 : vector<8x768xf32>
    %165 = arith.mulf %164, %164 : vector<8x768xf32>
    %166 = vector.extract_strided_slice %36 {offsets = [256, 0], sizes = [8, 768], strides = [1, 1]} : vector<512x768xf32> to vector<8x768xf32>
    %167 = vector.extract_strided_slice %0 {offsets = [256, 0], sizes = [8, 768], strides = [1, 1]} : vector<512x768xf32> to vector<8x768xf32>
    %168 = arith.subf %166, %167 : vector<8x768xf32>
    %169 = arith.mulf %168, %168 : vector<8x768xf32>
    %170 = vector.extract_strided_slice %36 {offsets = [264, 0], sizes = [8, 768], strides = [1, 1]} : vector<512x768xf32> to vector<8x768xf32>
    %171 = vector.extract_strided_slice %0 {offsets = [264, 0], sizes = [8, 768], strides = [1, 1]} : vector<512x768xf32> to vector<8x768xf32>
    %172 = arith.subf %170, %171 : vector<8x768xf32>
    %173 = arith.mulf %172, %172 : vector<8x768xf32>
    %174 = vector.extract_strided_slice %36 {offsets = [272, 0], sizes = [8, 768], strides = [1, 1]} : vector<512x768xf32> to vector<8x768xf32>
    %175 = vector.extract_strided_slice %0 {offsets = [272, 0], sizes = [8, 768], strides = [1, 1]} : vector<512x768xf32> to vector<8x768xf32>
    %176 = arith.subf %174, %175 : vector<8x768xf32>
    %177 = arith.mulf %176, %176 : vector<8x768xf32>
    %178 = vector.extract_strided_slice %36 {offsets = [280, 0], sizes = [8, 768], strides = [1, 1]} : vector<512x768xf32> to vector<8x768xf32>
    %179 = vector.extract_strided_slice %0 {offsets = [280, 0], sizes = [8, 768], strides = [1, 1]} : vector<512x768xf32> to vector<8x768xf32>
    %180 = arith.subf %178, %179 : vector<8x768xf32>
    %181 = arith.mulf %180, %180 : vector<8x768xf32>
    %182 = vector.extract_strided_slice %36 {offsets = [288, 0], sizes = [8, 768], strides = [1, 1]} : vector<512x768xf32> to vector<8x768xf32>
    %183 = vector.extract_strided_slice %0 {offsets = [288, 0], sizes = [8, 768], strides = [1, 1]} : vector<512x768xf32> to vector<8x768xf32>
    %184 = arith.subf %182, %183 : vector<8x768xf32>
    %185 = arith.mulf %184, %184 : vector<8x768xf32>
    %186 = vector.extract_strided_slice %36 {offsets = [296, 0], sizes = [8, 768], strides = [1, 1]} : vector<512x768xf32> to vector<8x768xf32>
    %187 = vector.extract_strided_slice %0 {offsets = [296, 0], sizes = [8, 768], strides = [1, 1]} : vector<512x768xf32> to vector<8x768xf32>
    %188 = arith.subf %186, %187 : vector<8x768xf32>
    %189 = arith.mulf %188, %188 : vector<8x768xf32>
    %190 = vector.extract_strided_slice %36 {offsets = [304, 0], sizes = [8, 768], strides = [1, 1]} : vector<512x768xf32> to vector<8x768xf32>
    %191 = vector.extract_strided_slice %0 {offsets = [304, 0], sizes = [8, 768], strides = [1, 1]} : vector<512x768xf32> to vector<8x768xf32>
    %192 = arith.subf %190, %191 : vector<8x768xf32>
    %193 = arith.mulf %192, %192 : vector<8x768xf32>
    %194 = vector.extract_strided_slice %36 {offsets = [312, 0], sizes = [8, 768], strides = [1, 1]} : vector<512x768xf32> to vector<8x768xf32>
    %195 = vector.extract_strided_slice %0 {offsets = [312, 0], sizes = [8, 768], strides = [1, 1]} : vector<512x768xf32> to vector<8x768xf32>
    %196 = arith.subf %194, %195 : vector<8x768xf32>
    %197 = arith.mulf %196, %196 : vector<8x768xf32>
    %198 = vector.extract_strided_slice %36 {offsets = [320, 0], sizes = [8, 768], strides = [1, 1]} : vector<512x768xf32> to vector<8x768xf32>
    %199 = vector.extract_strided_slice %0 {offsets = [320, 0], sizes = [8, 768], strides = [1, 1]} : vector<512x768xf32> to vector<8x768xf32>
    %200 = arith.subf %198, %199 : vector<8x768xf32>
    %201 = arith.mulf %200, %200 : vector<8x768xf32>
    %202 = vector.extract_strided_slice %36 {offsets = [328, 0], sizes = [8, 768], strides = [1, 1]} : vector<512x768xf32> to vector<8x768xf32>
    %203 = vector.extract_strided_slice %0 {offsets = [328, 0], sizes = [8, 768], strides = [1, 1]} : vector<512x768xf32> to vector<8x768xf32>
    %204 = arith.subf %202, %203 : vector<8x768xf32>
    %205 = arith.mulf %204, %204 : vector<8x768xf32>
    %206 = vector.extract_strided_slice %36 {offsets = [336, 0], sizes = [8, 768], strides = [1, 1]} : vector<512x768xf32> to vector<8x768xf32>
    %207 = vector.extract_strided_slice %0 {offsets = [336, 0], sizes = [8, 768], strides = [1, 1]} : vector<512x768xf32> to vector<8x768xf32>
    %208 = arith.subf %206, %207 : vector<8x768xf32>
    %209 = arith.mulf %208, %208 : vector<8x768xf32>
    %210 = vector.extract_strided_slice %36 {offsets = [344, 0], sizes = [8, 768], strides = [1, 1]} : vector<512x768xf32> to vector<8x768xf32>
    %211 = vector.extract_strided_slice %0 {offsets = [344, 0], sizes = [8, 768], strides = [1, 1]} : vector<512x768xf32> to vector<8x768xf32>
    %212 = arith.subf %210, %211 : vector<8x768xf32>
    %213 = arith.mulf %212, %212 : vector<8x768xf32>
    %214 = vector.extract_strided_slice %36 {offsets = [352, 0], sizes = [8, 768], strides = [1, 1]} : vector<512x768xf32> to vector<8x768xf32>
    %215 = vector.extract_strided_slice %0 {offsets = [352, 0], sizes = [8, 768], strides = [1, 1]} : vector<512x768xf32> to vector<8x768xf32>
    %216 = arith.subf %214, %215 : vector<8x768xf32>
    %217 = arith.mulf %216, %216 : vector<8x768xf32>
    %218 = vector.extract_strided_slice %36 {offsets = [360, 0], sizes = [8, 768], strides = [1, 1]} : vector<512x768xf32> to vector<8x768xf32>
    %219 = vector.extract_strided_slice %0 {offsets = [360, 0], sizes = [8, 768], strides = [1, 1]} : vector<512x768xf32> to vector<8x768xf32>
    %220 = arith.subf %218, %219 : vector<8x768xf32>
    %221 = arith.mulf %220, %220 : vector<8x768xf32>
    %222 = vector.extract_strided_slice %36 {offsets = [368, 0], sizes = [8, 768], strides = [1, 1]} : vector<512x768xf32> to vector<8x768xf32>
    %223 = vector.extract_strided_slice %0 {offsets = [368, 0], sizes = [8, 768], strides = [1, 1]} : vector<512x768xf32> to vector<8x768xf32>
    %224 = arith.subf %222, %223 : vector<8x768xf32>
    %225 = arith.mulf %224, %224 : vector<8x768xf32>
    %226 = vector.extract_strided_slice %36 {offsets = [376, 0], sizes = [8, 768], strides = [1, 1]} : vector<512x768xf32> to vector<8x768xf32>
    %227 = vector.extract_strided_slice %0 {offsets = [376, 0], sizes = [8, 768], strides = [1, 1]} : vector<512x768xf32> to vector<8x768xf32>
    %228 = arith.subf %226, %227 : vector<8x768xf32>
    %229 = arith.mulf %228, %228 : vector<8x768xf32>
    %230 = vector.extract_strided_slice %36 {offsets = [384, 0], sizes = [8, 768], strides = [1, 1]} : vector<512x768xf32> to vector<8x768xf32>
    %231 = vector.extract_strided_slice %0 {offsets = [384, 0], sizes = [8, 768], strides = [1, 1]} : vector<512x768xf32> to vector<8x768xf32>
    %232 = arith.subf %230, %231 : vector<8x768xf32>
    %233 = arith.mulf %232, %232 : vector<8x768xf32>
    %234 = vector.extract_strided_slice %36 {offsets = [392, 0], sizes = [8, 768], strides = [1, 1]} : vector<512x768xf32> to vector<8x768xf32>
    %235 = vector.extract_strided_slice %0 {offsets = [392, 0], sizes = [8, 768], strides = [1, 1]} : vector<512x768xf32> to vector<8x768xf32>
    %236 = arith.subf %234, %235 : vector<8x768xf32>
    %237 = arith.mulf %236, %236 : vector<8x768xf32>
    %238 = vector.extract_strided_slice %36 {offsets = [400, 0], sizes = [8, 768], strides = [1, 1]} : vector<512x768xf32> to vector<8x768xf32>
    %239 = vector.extract_strided_slice %0 {offsets = [400, 0], sizes = [8, 768], strides = [1, 1]} : vector<512x768xf32> to vector<8x768xf32>
    %240 = arith.subf %238, %239 : vector<8x768xf32>
    %241 = arith.mulf %240, %240 : vector<8x768xf32>
    %242 = vector.extract_strided_slice %36 {offsets = [408, 0], sizes = [8, 768], strides = [1, 1]} : vector<512x768xf32> to vector<8x768xf32>
    %243 = vector.extract_strided_slice %0 {offsets = [408, 0], sizes = [8, 768], strides = [1, 1]} : vector<512x768xf32> to vector<8x768xf32>
    %244 = arith.subf %242, %243 : vector<8x768xf32>
    %245 = arith.mulf %244, %244 : vector<8x768xf32>
    %246 = vector.extract_strided_slice %36 {offsets = [416, 0], sizes = [8, 768], strides = [1, 1]} : vector<512x768xf32> to vector<8x768xf32>
    %247 = vector.extract_strided_slice %0 {offsets = [416, 0], sizes = [8, 768], strides = [1, 1]} : vector<512x768xf32> to vector<8x768xf32>
    %248 = arith.subf %246, %247 : vector<8x768xf32>
    %249 = arith.mulf %248, %248 : vector<8x768xf32>
    %250 = vector.extract_strided_slice %36 {offsets = [424, 0], sizes = [8, 768], strides = [1, 1]} : vector<512x768xf32> to vector<8x768xf32>
    %251 = vector.extract_strided_slice %0 {offsets = [424, 0], sizes = [8, 768], strides = [1, 1]} : vector<512x768xf32> to vector<8x768xf32>
    %252 = arith.subf %250, %251 : vector<8x768xf32>
    %253 = arith.mulf %252, %252 : vector<8x768xf32>
    %254 = vector.extract_strided_slice %36 {offsets = [432, 0], sizes = [8, 768], strides = [1, 1]} : vector<512x768xf32> to vector<8x768xf32>
    %255 = vector.extract_strided_slice %0 {offsets = [432, 0], sizes = [8, 768], strides = [1, 1]} : vector<512x768xf32> to vector<8x768xf32>
    %256 = arith.subf %254, %255 : vector<8x768xf32>
    %257 = arith.mulf %256, %256 : vector<8x768xf32>
    %258 = vector.extract_strided_slice %36 {offsets = [440, 0], sizes = [8, 768], strides = [1, 1]} : vector<512x768xf32> to vector<8x768xf32>
    %259 = vector.extract_strided_slice %0 {offsets = [440, 0], sizes = [8, 768], strides = [1, 1]} : vector<512x768xf32> to vector<8x768xf32>
    %260 = arith.subf %258, %259 : vector<8x768xf32>
    %261 = arith.mulf %260, %260 : vector<8x768xf32>
    %262 = vector.extract_strided_slice %36 {offsets = [448, 0], sizes = [8, 768], strides = [1, 1]} : vector<512x768xf32> to vector<8x768xf32>
    %263 = vector.extract_strided_slice %0 {offsets = [448, 0], sizes = [8, 768], strides = [1, 1]} : vector<512x768xf32> to vector<8x768xf32>
    %264 = arith.subf %262, %263 : vector<8x768xf32>
    %265 = arith.mulf %264, %264 : vector<8x768xf32>
    %266 = vector.extract_strided_slice %36 {offsets = [456, 0], sizes = [8, 768], strides = [1, 1]} : vector<512x768xf32> to vector<8x768xf32>
    %267 = vector.extract_strided_slice %0 {offsets = [456, 0], sizes = [8, 768], strides = [1, 1]} : vector<512x768xf32> to vector<8x768xf32>
    %268 = arith.subf %266, %267 : vector<8x768xf32>
    %269 = arith.mulf %268, %268 : vector<8x768xf32>
    %270 = vector.extract_strided_slice %36 {offsets = [464, 0], sizes = [8, 768], strides = [1, 1]} : vector<512x768xf32> to vector<8x768xf32>
    %271 = vector.extract_strided_slice %0 {offsets = [464, 0], sizes = [8, 768], strides = [1, 1]} : vector<512x768xf32> to vector<8x768xf32>
    %272 = arith.subf %270, %271 : vector<8x768xf32>
    %273 = arith.mulf %272, %272 : vector<8x768xf32>
    %274 = vector.extract_strided_slice %36 {offsets = [472, 0], sizes = [8, 768], strides = [1, 1]} : vector<512x768xf32> to vector<8x768xf32>
    %275 = vector.extract_strided_slice %0 {offsets = [472, 0], sizes = [8, 768], strides = [1, 1]} : vector<512x768xf32> to vector<8x768xf32>
    %276 = arith.subf %274, %275 : vector<8x768xf32>
    %277 = arith.mulf %276, %276 : vector<8x768xf32>
    %278 = vector.extract_strided_slice %36 {offsets = [480, 0], sizes = [8, 768], strides = [1, 1]} : vector<512x768xf32> to vector<8x768xf32>
    %279 = vector.extract_strided_slice %0 {offsets = [480, 0], sizes = [8, 768], strides = [1, 1]} : vector<512x768xf32> to vector<8x768xf32>
    %280 = arith.subf %278, %279 : vector<8x768xf32>
    %281 = arith.mulf %280, %280 : vector<8x768xf32>
    %282 = vector.extract_strided_slice %36 {offsets = [488, 0], sizes = [8, 768], strides = [1, 1]} : vector<512x768xf32> to vector<8x768xf32>
    %283 = vector.extract_strided_slice %0 {offsets = [488, 0], sizes = [8, 768], strides = [1, 1]} : vector<512x768xf32> to vector<8x768xf32>
    %284 = arith.subf %282, %283 : vector<8x768xf32>
    %285 = arith.mulf %284, %284 : vector<8x768xf32>
    %286 = vector.extract_strided_slice %36 {offsets = [496, 0], sizes = [8, 768], strides = [1, 1]} : vector<512x768xf32> to vector<8x768xf32>
    %287 = vector.extract_strided_slice %0 {offsets = [496, 0], sizes = [8, 768], strides = [1, 1]} : vector<512x768xf32> to vector<8x768xf32>
    %288 = arith.subf %286, %287 : vector<8x768xf32>
    %289 = arith.mulf %288, %288 : vector<8x768xf32>
    %290 = vector.extract_strided_slice %36 {offsets = [504, 0], sizes = [8, 768], strides = [1, 1]} : vector<512x768xf32> to vector<8x768xf32>
    %291 = vector.extract_strided_slice %0 {offsets = [504, 0], sizes = [8, 768], strides = [1, 1]} : vector<512x768xf32> to vector<8x768xf32>
    %292 = arith.subf %290, %291 : vector<8x768xf32>
    %293 = arith.mulf %292, %292 : vector<8x768xf32>
    %294 = arith.addf %41, %45 : vector<8x768xf32>
    %295 = arith.addf %49, %53 : vector<8x768xf32>
    %296 = arith.addf %57, %61 : vector<8x768xf32>
    %297 = arith.addf %65, %69 : vector<8x768xf32>
    %298 = arith.addf %73, %77 : vector<8x768xf32>
    %299 = arith.addf %81, %85 : vector<8x768xf32>
    %300 = arith.addf %89, %93 : vector<8x768xf32>
    %301 = arith.addf %97, %101 : vector<8x768xf32>
    %302 = arith.addf %105, %109 : vector<8x768xf32>
    %303 = arith.addf %113, %117 : vector<8x768xf32>
    %304 = arith.addf %121, %125 : vector<8x768xf32>
    %305 = arith.addf %129, %133 : vector<8x768xf32>
    %306 = arith.addf %137, %141 : vector<8x768xf32>
    %307 = arith.addf %145, %149 : vector<8x768xf32>
    %308 = arith.addf %153, %157 : vector<8x768xf32>
    %309 = arith.addf %161, %165 : vector<8x768xf32>
    %310 = arith.addf %169, %173 : vector<8x768xf32>
    %311 = arith.addf %177, %181 : vector<8x768xf32>
    %312 = arith.addf %185, %189 : vector<8x768xf32>
    %313 = arith.addf %193, %197 : vector<8x768xf32>
    %314 = arith.addf %201, %205 : vector<8x768xf32>
    %315 = arith.addf %209, %213 : vector<8x768xf32>
    %316 = arith.addf %217, %221 : vector<8x768xf32>
    %317 = arith.addf %225, %229 : vector<8x768xf32>
    %318 = arith.addf %233, %237 : vector<8x768xf32>
    %319 = arith.addf %241, %245 : vector<8x768xf32>
    %320 = arith.addf %249, %253 : vector<8x768xf32>
    %321 = arith.addf %257, %261 : vector<8x768xf32>
    %322 = arith.addf %265, %269 : vector<8x768xf32>
    %323 = arith.addf %273, %277 : vector<8x768xf32>
    %324 = arith.addf %281, %285 : vector<8x768xf32>
    %325 = arith.addf %289, %293 : vector<8x768xf32>
    %326 = arith.addf %294, %295 : vector<8x768xf32>
    %327 = arith.addf %296, %297 : vector<8x768xf32>
    %328 = arith.addf %298, %299 : vector<8x768xf32>
    %329 = arith.addf %300, %301 : vector<8x768xf32>
    %330 = arith.addf %302, %303 : vector<8x768xf32>
    %331 = arith.addf %304, %305 : vector<8x768xf32>
    %332 = arith.addf %306, %307 : vector<8x768xf32>
    %333 = arith.addf %308, %309 : vector<8x768xf32>
    %334 = arith.addf %310, %311 : vector<8x768xf32>
    %335 = arith.addf %312, %313 : vector<8x768xf32>
    %336 = arith.addf %314, %315 : vector<8x768xf32>
    %337 = arith.addf %316, %317 : vector<8x768xf32>
    %338 = arith.addf %318, %319 : vector<8x768xf32>
    %339 = arith.addf %320, %321 : vector<8x768xf32>
    %340 = arith.addf %322, %323 : vector<8x768xf32>
    %341 = arith.addf %324, %325 : vector<8x768xf32>
    %342 = arith.addf %326, %327 : vector<8x768xf32>
    %343 = arith.addf %328, %329 : vector<8x768xf32>
    %344 = arith.addf %330, %331 : vector<8x768xf32>
    %345 = arith.addf %332, %333 : vector<8x768xf32>
    %346 = arith.addf %334, %335 : vector<8x768xf32>
    %347 = arith.addf %336, %337 : vector<8x768xf32>
    %348 = arith.addf %338, %339 : vector<8x768xf32>
    %349 = arith.addf %340, %341 : vector<8x768xf32>
    %350 = arith.addf %342, %343 : vector<8x768xf32>
    %351 = arith.addf %344, %345 : vector<8x768xf32>
    %352 = arith.addf %346, %347 : vector<8x768xf32>
    %353 = arith.addf %348, %349 : vector<8x768xf32>
    %354 = arith.addf %350, %351 : vector<8x768xf32>
    %355 = arith.addf %352, %353 : vector<8x768xf32>
    %356 = arith.addf %354, %355 : vector<8x768xf32>
    %c0_14 = arith.constant 0 : index
    %c0_15 = arith.constant 0 : index
    %357 = vector.load %arg6[%c0_14, %c0_15] : memref<8x768xf32, #tpu.memory_space<vmem>>, vector<8x768xf32>
    tpu.vector_store %arg6[%c0_14, %c0_15], %356 {strides = array<i32>} : memref<8x768xf32, #tpu.memory_space<vmem>>, vector<8x768xf32>,
    return
  }
  func.func @transform_0(%arg0: i32) -> (i32, i32) {
    %c0_i32 = arith.constant 0 : i32
    %c0_i32_0 = arith.constant 0 : i32
    return %arg0, %c0_i32 : i32, i32
  }
  func.func @transform_1(%arg0: i32) -> (i32, i32) {
    %c0_i32 = arith.constant 0 : i32
    %c0_i32_0 = arith.constant 0 : i32
    %c0_i32_1 = arith.constant 0 : i32
    return %c0_i32, %c0_i32_0 : i32, i32
  }
  func.func @transform_2(%arg0: i32) -> (i32, i32) {
    %c0_i32 = arith.constant 0 : i32
    %c0_i32_0 = arith.constant 0 : i32
    %c0_i32_1 = arith.constant 0 : i32
    return %c0_i32, %c0_i32_0 : i32, i32
  }
  func.func @transform_3(%arg0: i32) -> (i32, i32) {
    %c0_i32 = arith.constant 0 : i32
    %c0_i32_0 = arith.constant 0 : i32
    %c0_i32_1 = arith.constant 0 : i32
    return %c0_i32, %c0_i32_0 : i32, i32
  }
  func.func @transform_4(%arg0: i32) -> (i32, i32) {
    %c0_i32 = arith.constant 0 : i32
    %c0_i32_0 = arith.constant 0 : i32
    return %arg0, %c0_i32 : i32, i32
  }
  func.func @transform_5(%arg0: i32) -> (i32, i32) {
    %c0_i32 = arith.constant 0 : i32
    %c0_i32_0 = arith.constant 0 : i32
    return %arg0, %c0_i32 : i32, i32
  }
}

</mosaic_0001>

<bundles_post_ra>
// kernel: tpu_custom_call.1
= control target key start
LH: loop header
LB: loop body
LE: loop exit
PB: predicated region body
PF: predicated region fallthrough
CT: control target
= control target key end

     0   :  { %11 = vsyncpa [#allocation3], 0  ;;  %s13923_s0 = inlined_call_operand.hbm [shape: f32[1024,768], index: 0, kind: input, shape index: {}]   ;;  %s13924_s1 = inlined_call_operand.hbm [shape: f32[128,768], index: 1, kind: input, shape index: {}]   ;;  %s13925_s2 = inlined_call_operand.hbm [shape: f32[1,128], index: 2, kind: input, shape index: {}]   ;;  %s13926_s3 = inlined_call_operand.hbm [shape: bf16[128,768], index: 3, kind: input, shape index: {}]   ;;  %s13927_s4 = inlined_call_operand.hbm [shape: f32[1024,768], index: 4, kind: output, shape index: {0}]   ;;  %s13928_s5 = inlined_call_operand.hbm [shape: f32[16,768], index: 5, kind: output, shape index: {1}]  }
   0x1   :  { %13 = vsyncpa [#allocation3 + $0x1], 0 }
   0x2   :  { %14 = vsyncpa [#allocation6], 0 }
   0x3   :  { %15 = vsyncpa [#allocation9], 0 }
   0x4   :  { %16 = vsyncpa [#allocation4], 0 }
   0x5   :  { %18 = vsyncpa [#allocation4 + $0x1], 0 }
   0x6   :  { %19 = vsyncpa [#allocation12], 0 }
   0x7   :  { %21 = vsyncpa [#allocation12 + $0x1], 0  ;;  %s7371_s18 = smov 0   ;;  %s7373_s19 = smov 0  }
   0x8   :  { %s7375_s20 = smov 0   ;;  %s7377_s21 = smov 0  }
   0x9 LB: > { %s7392_s22 = sadd.s32 4294967295, %s7327_s21   ;;  %s6280_s23 = sadd.s32 4294967294, %s7327_s21   ;;  %s7327_s21 = sphi %s7377_s21, %s14783_s21   ;;  %s7323_s20 = sphi %s7375_s20, %s14782_s20   ;;  %s7319_s19 = sphi %s7373_s19, %s14781_s19   ;;  %s7315_s18 = sphi %s7371_s18, %s14780_s18  }
   0xa   : > { %p47_p0 = scmp.ne.s32.totalorder %s7319_s19, %s7315_s18  ;;  %p13929_p1 = scmp.eq.s32.totalorder %s7392_s22, 0 }
   0xb   : > { %p140_p3 = scmp.eq.s32.totalorder %s6280_s23, 1  ;;  %p6281_p5 = scmp.ge.s32.totalorder %s7327_s21, 1 }
   0xc   : > { %p7401_p4 = por %p13929_p1, %p47_p0  ;;  %p173_p7 = scmp.lt.s32.totalorder %s7327_s21, 3 }
   0xd   : > { %p7406_p6 = por %p140_p3, %p47_p0  ;;  %s7329_s27 = smov [#allocation5]  }
   0xe   : > { %s14060_s24 = scalar_select %p7401_p4, 1, 0 }
   0xf   : > { %s14061_s25 = scalar_select %p7406_p6, 1, 0 }
  0x10   : > { %p7411_p8 = pnand %p6281_p5, %p173_p7  ;;  %s185_s28 = sshll.u32 %s7329_s27, 4  ;;  %s7415_s28 = int_to_ptr.vmem [resolvable:$true] %s185_s28 }
  0x11   : > { %s7330_s30 = smov [#allocation7]   ;;  %s7331_s7 = smov [#allocation8]  }
  0x12   : > { %s14062_s26 = scalar_select %p7411_p8, 1, 0 }
  0x13   : > { %p6580_p9 = pneg %p7411_p8  ;;  %s199_s6 = sshll.u32 %s7330_s30, 4  ;;  %s7426_s6 = int_to_ptr.vmem [resolvable:$true] %s199_s6 }
  0x14   : > { %s7428_s8 = sshll.u32 %s7331_s7, 4  ;;  %s7107_s11 = scalar_lea.hbm %s13924_s1, 12288  ;;  %s210_s8 = int_to_ptr.vmem [resolvable:$true] %s7428_s8 }
  0x15   : > { %p7422_p11 = pnand %p6580_p9, %p13929_p1  ;;  %p7108_p12 = scmp.ne.s32.totalorder %s13924_s1, %s7107_s11 }
  0x16   : > { %p7114_p5 = scmp.lt.u32.totalorder %s7107_s11, %s13924_s1 }
  0x17   : > { %p7438_p13 = pneg %p7422_p11 }
  0x19   : > { %p7110_p0 = pnand %p7438_p13, %p7108_p12 }
  0x1b   : > { %p7111_p3 = pneg %p7110_p0 }
  0x1d   : > { %p7116_p7 = pnand %p7114_p5, %p7111_p3 }
  0x1f   : > { %7119 = shalt.err (!%p7116_p7)
}
  0x20   : > { %s7120_s17 = scalar_lea.vmem %s7415_s28, 12288  ;;  %p7128_p2 = scmp.lt.s32.totalorder %s7415_s28, %s7415_s28 }
  0x21   : > { %p7121_p9 = scmp.ne.s32.totalorder %s7415_s28, %s7120_s17  ;;  %p7129_p6 = scmp.lt.s32.totalorder %s7120_s17, %s7120_s17 }
  0x23   : > { %p7123_p10 = pnand %p7121_p9, %p7438_p13  ;;  %p7130_p12 = por %p7129_p6, %p7128_p2 }
  0x25   : > { %p7124_p1 = pneg %p7123_p10 }
  0x27   : > { %p7131_p0 = pnand %p7130_p12, %p7124_p1 }
  0x29   : > { %7134 = shalt.err (!%p7131_p0)
}
  0x2a   : > { %s13932_s23 = smov 768   ;;  %s7333_s27 = smov 48  }
  0x2b   : > { %6583 = dma.hbm_to_vmem [thread:$0]  (!%p7422_p11), %s13924_s1, 12288, %s7415_s28, [#allocation6], %s13932_s23, %s13932_s23, %s7333_s27  }
  0x2c   : > { %s7135_s11 = scalar_lea.hbm %s13925_s2, 16 }
  0x2d   : > { %p7136_p1 = scmp.ne.s32.totalorder %s13925_s2, %s7135_s11  ;;  %p7142_p10 = scmp.lt.u32.totalorder %s7135_s11, %s13925_s2 }
  0x2f   : > { %p7138_p2 = pnand %p7136_p1, %p7438_p13 }
  0x31   : > { %p7139_p6 = pneg %p7138_p2 }
  0x33   : > { %p7144_p3 = pnand %p7142_p10, %p7139_p6 }
  0x35   : > { %7147 = shalt.err (!%p7144_p3)
}
  0x36   : > { %s7148_s28 = scalar_lea.vmem %s7426_s6, 16  ;;  %s7155_s17 = scalar_lea.vmem %s7426_s6, 32 }
  0x37   : > { %p7149_p5 = scmp.ne.s32.totalorder %s7426_s6, %s7148_s28  ;;  %p7156_p12 = scmp.lt.s32.totalorder %s7426_s6, %s7426_s6 }
  0x38   : > { %p7157_p0 = scmp.lt.s32.totalorder %s7155_s17, %s7148_s28 }
  0x39   : > { %p7151_p7 = pnand %p7149_p5, %p7438_p13 }
  0x3a   : > { %p7158_p1 = por %p7157_p0, %p7156_p12 }
  0x3b   : > { %p7152_p9 = pneg %p7151_p7 }
  0x3d   : > { %p7159_p2 = pnand %p7158_p1, %p7152_p9 }
  0x3f   : > { %7162 = shalt.err (!%p7159_p2)
}
  0x40   : > { %6586 = dma.hbm_to_vmem [thread:$0]  (!%p7422_p11), %s13925_s2, 16, %s7426_s6, [#allocation6]  }
  0x41   : > { %s7163_s11 = scalar_lea.hbm %s13926_s3, 6144 }
  0x42   : > { %p7164_p6 = scmp.ne.s32.totalorder %s13926_s3, %s7163_s11  ;;  %p7170_p5 = scmp.lt.u32.totalorder %s7163_s11, %s13926_s3 }
  0x44   : > { %p7166_p10 = pnand %p7164_p6, %p7438_p13 }
  0x46   : > { %p7167_p3 = pneg %p7166_p10 }
  0x48   : > { %p7172_p7 = pnand %p7170_p5, %p7167_p3 }
  0x4a   : > { %7175 = shalt.err (!%p7172_p7)
}
  0x4b   : > { %s7176_s28 = scalar_lea.vmem %s210_s8, 6144  ;;  %p7184_p1 = scmp.lt.s32.totalorder %s210_s8, %s210_s8 }
  0x4c   : > { %p7177_p9 = scmp.ne.s32.totalorder %s210_s8, %s7176_s28  ;;  %p7185_p2 = scmp.lt.s32.totalorder %s7176_s28, %s7176_s28 }
  0x4e   : > { %p7179_p12 = pnand %p7177_p9, %p7438_p13  ;;  %p7186_p4 = por %p7185_p2, %p7184_p1 }
  0x50   : > { %p7180_p0 = pneg %p7179_p12 }
  0x52   : > { %p7187_p8 = pnand %p7186_p4, %p7180_p0 }
  0x54   : > { %7190 = shalt.err (!%p7187_p8)
}
  0x55   : > { %s7334_s6 = smov 384   ;;  %s7335_s14 = smov 24  }
  0x56   : > { %6589 = dma.hbm_to_vmem [thread:$0]  (!%p7422_p11), %s13926_s3, 6144, %s210_s8, [#allocation9], %s7334_s6, %s7334_s6, %s7335_s14  }
  0x57   : > { %s7506_s7 = sadd.s32 1, %s7327_s21   ;;  %s34_s10 = sadd.s32 1, %s7323_s20 }
  0x58   : > { %s31_s9 = ssub.s32 %s7327_s21, %s7506_s7  ;;  %p41_p8 = scmp.ne.s32.totalorder %s7323_s20, %s7319_s19 }
  0x59   : > { %p32_p4 = scmp.eq.s32.totalorder %s31_s9, 0  ;;  %p42_p13 = scmp.eq.s32.totalorder %s7327_s21, 0 }
  0x5a   : > { %p6604_p6 = scmp.lt.s32.totalorder %s7327_s21, 2  ;;  %p14065_p3 = scmp.eq.s32.totalorder %s7392_s22, 1 }
  0x5b   : > { %s7516_s11 = scalar_select %p32_p4, %s7323_s20, %s34_s10  }
  0x5c   : > { %p43_p10 = por %p42_p13, %p41_p8  ;;  %p7520_p5 = por %p14065_p3, %p41_p8 }
  0x5d   : > { %s223_s29 = sand.u32 1, %s7323_s20   ;;  %s6557_s13 = smul.u32 49152, %s7327_s21 }
  0x5e   : > { %s6556_s8 = smul.u32 3072, %s223_s29  ;;  %p7526_p11 = pnand %p6604_p6, %p43_p10 }
  0x5f   : > { %s7533_s6 = scalar_lea.hbm %s13923_s0, %s6557_s13  ;;  %s7537_s30 = scalar_lea.sflag [#allocation3], %s223_s29 }
  0x60   : > { %s227_s14 = scalar_lea.vmem [#allocation2], %s6556_s8  ;;  %s7191_s9 = scalar_lea.hbm %s7533_s6, 49152 }
  0x61   : > { %s235_s17 = sshll.u32 %s227_s14, 4  ;;  %p7192_p7 = scmp.ne.s32.totalorder %s7533_s6, %s7191_s9  ;;  %s7535_s17 = int_to_ptr.vmem [resolvable:$true] %s235_s17 }
  0x62   : > { %p7193_p9 = pneg %p7526_p11  ;;  %s7196_s16 = scalar_lea.hbm %s13923_s0, 98304 }
  0x63   : > { %p7197_p1 = scmp.lt.u32.totalorder %s7533_s6, %s13923_s0  ;;  %p7198_p2 = scmp.lt.u32.totalorder %s7196_s16, %s7191_s9 }
  0x64   : > { %p7194_p12 = pnand %p7193_p9, %p7192_p7  ;;  %p7200_p8 = scmp.lt.u32.totalorder %s7191_s9, %s7533_s6 }
  0x65   : > { %p7199_p4 = por %p7198_p2, %p7197_p1 }
  0x66   : > { %p7195_p0 = pneg %p7194_p12 }
  0x67   : > { %p7201_p13 = por %p7200_p8, %p7199_p4 }
  0x69   : > { %p7202_p6 = pnand %p7201_p13, %p7195_p0 }
  0x6b   : > { %7205 = shalt.err (!%p7202_p6)
}
  0x6c   : > { %s7206_s29 = scalar_lea.vmem %s7535_s17, 49152  ;;  %s7336_s8 = smov [#allocation2]  }
  0x6d   : > { %p7207_p10 = scmp.ne.s32.totalorder %s7535_s17, %s7206_s29  ;;  %s7211_s14 = sshll.u32 %s7336_s8, 4  ;;  %s7212_s14 = int_to_ptr.vmem [resolvable:$false] %s7211_s14 }
  0x6e   : > { %s7213_s23 = scalar_lea.vmem %s7212_s14, 98304  ;;  %p7214_p12 = scmp.lt.s32.totalorder %s7535_s17, %s7212_s14 }
  0x6f   : > { %p7209_p3 = pnand %p7207_p10, %p7193_p9  ;;  %p7215_p1 = scmp.lt.s32.totalorder %s7213_s23, %s7206_s29 }
  0x71   : > { %p7210_p7 = pneg %p7209_p3  ;;  %p7216_p2 = por %p7215_p1, %p7214_p12 }
  0x73   : > { %p7217_p4 = pnand %p7216_p2, %p7210_p7 }
  0x75   : > { %7220 = shalt.err (!%p7217_p4)
}
  0x76   : > { %s14068_s9 = smov 768   ;;  %p14069_p9 = scmp.ne.s32.totalorder %s14062_s26, 0 }
  0x77   : > { %6593 = dma.hbm_to_vmem [thread:$0]  (!%p7526_p11), %s7533_s6, 49152, %s7535_s17, %s7537_s30, %s14068_s9, %s14068_s9, %s7333_s27  }
  0x78   : > { %247 = sbr.rel (%p14069_p9) target bundleno = 1632 (0x660), region = 36 }
  0x7f   : > { %s7571_s10 = sand.u32 1, %s7319_s19   ;;  %p14070_p0 = scmp.ne.s32.totalorder %s14060_s24, 0 }
  0x80   : > { %s6558_s13 = smul.u32 3072, %s7571_s10  ;;  %s250_s16 = scalar_lea.sflag [#allocation3], %s7571_s10 }
  0x82   : > { %s7577_s15 = scalar_lea.vmem [#allocation2], %s6558_s13 }
  0x83   : > { %7294 = dma.done.wait (%p14070_p0), %s250_s16, 49152  }
  0x84   : > { %7296 = vsyncadd (%p14070_p0), %s250_s16, 4294918144  ;;  %p14071_p11 = scmp.eq.s32.totalorder %s7392_s22, 0 }
  0x86   : > { %7298 = dma.done.wait (%p14071_p11), [#allocation6], 12304   ;;  %p14072_p8 = pmov %p14071_p11 }
  0x88   : > { %7300 = vsyncadd (%p14072_p8), [#allocation6], 4294954992  ;;  %p14073_p13 = pmov %p14072_p8 }
  0x89   : > { %p14074_p6 = pmov %p14072_p8 }
  0x8a   : > { %7302 = dma.done.wait (%p14073_p13), [#allocation9], 6144  }
  0x8b   : > { %7304 = vsyncadd (%p14074_p6), [#allocation9], 4294961152  ;;  %v6650_v0 = vld [vmem:[#allocation8 + $0x4] ss:$24 sps:$4 sm:$0xff]   ;;  %v6654_v2 = vld [vmem:[#allocation8] ss:$24 sps:$4 sm:$0xff]  }
  0x8c   : > { %v7591_v1 = vld [vmem:[#allocation8 + $0xc] ss:$24 sps:$4 sm:$0xff]   ;;  %1164 = vmatprep.subr.bf16.mxu1 %v6650_v0  ;;  %v7593_v3 = vld [vmem:[#allocation8 + $0x8] ss:$24 sps:$4 sm:$0xff]   ;;  %v7597_v5 = vld [vmem:[#allocation8 + $0x3c] ss:$24 sps:$4 sm:$0xff]  }
  0x8d   : > { %1453 = vmatprep.subr.bf16.mxu0 %v7591_v1  ;;  %v6656_v4 = vld [vmem:[#allocation8 + $0x34] ss:$24 sps:$4 sm:$0xff]   ;;  %1165 = vmatpush1.bf16.xpose.msra.mxu1 %v6654_v2  ;;  %v6660_v6 = vld [vmem:[#allocation8 + $0x30] ss:$24 sps:$4 sm:$0xff]   ;;  %v6662_v8 = vld [vmem:[#allocation8 + $0x64] ss:$24 sps:$4 sm:$0xff]  }
  0x8e   : > { %1454 = vmatpush1.bf16.xpose.msra.mxu0 %v7593_v3  ;;  %1166 = vmatprep.subr.bf16.mxu1 %v6656_v4  ;;  %v7600_v7 = vld [vmem:[#allocation8 + $0x38] ss:$24 sps:$4 sm:$0xff]   ;;  %v7602_v9 = vld [vmem:[#allocation8 + $0x6c] ss:$24 sps:$4 sm:$0xff]   ;;  %v7606_v11 = vld [vmem:[#allocation8 + $0x68] ss:$24 sps:$4 sm:$0xff]  }
  0x8f   : > { %1455 = vmatprep.subr.bf16.mxu0 %v7597_v5  ;;  %v6666_v10 = vld [vmem:[#allocation8 + $0x60] ss:$24 sps:$4 sm:$0xff]   ;;  %v6668_v12 = vld [vmem:[#allocation8 + $0x94] ss:$24 sps:$4 sm:$0xff]   ;;  %v6672_v19 = vld [vmem:[#allocation8 + $0x90] ss:$24 sps:$4 sm:$0xff]  }
  0x90   : > { %v7608_v13 = vld [vmem:[#allocation8 + $0x9c] ss:$24 sps:$4 sm:$0xff]   ;;  %v301_v14 = vld [vmem:[%s7577_s15 + $0x8] sm:$0xff]  ;;  %v7616_v21 = vld [vmem:[#allocation8 + $0x98] ss:$24 sps:$4 sm:$0xff]   ;;  %s9411_s24 = scalar_lea.vmem [#allocation10], %s6558_s13 }
  0x91   : > { %v307_v15 = vld [vmem:[%s7577_s15 + $0x38] sm:$0xff]  ;;  %v309_v18 = vld [vmem:[%s7577_s15 + $0x48] sm:$0xff]  ;;  %v300_v39 = vld [vmem:[%s7577_s15] sm:$0xff]  ;;  %s6560_s26 = smul.u32 49152, %s7392_s22  ;;  %s6132_s27 = sshll.u32 %s9411_s24, 4  ;;  %s13784_s27 = int_to_ptr.vmem [resolvable:$true] %s6132_s27 }
  0x92   : > { %v685_v16 = vpack.c.bf16 %v307_v15, %v301_v14  ;;  %v303_v17 = vld [vmem:[%s7577_s15 + $0x18] sm:$0xff]  ;;  %v7618_v23 = vld [vmem:[#allocation8 + $0xcc] ss:$24 sps:$4 sm:$0xff]   ;;  %v7622_v25 = vld [vmem:[#allocation8 + $0xc8] ss:$24 sps:$4 sm:$0xff]   ;;  %s6113_s28 = scalar_lea.sflag [#allocation4], %s7571_s10 }
  0x93   : > { %v687_v20 = vpack.c.bf16 %v309_v18, %v303_v17  ;;  %v6674_v22 = vld [vmem:[#allocation8 + $0xc4] ss:$24 sps:$4 sm:$0xff]   ;;  %v6678_v24 = vld [vmem:[#allocation8 + $0xc0] ss:$24 sps:$4 sm:$0xff]   ;;  %v6680_v26 = vld [vmem:[#allocation8 + $0xf4] ss:$24 sps:$4 sm:$0xff]   ;;  %s13768_s30 = scalar_lea.hbm %s13927_s4, %s6560_s26 }
  0x94   : > { %1196 = vmatprep.mubr.bf16.mxu1 %v685_v16  ;;  %v7624_v27 = vld [vmem:[#allocation8 + $0xfc] ss:$24 sps:$4 sm:$0xff]   ;;  %v6684_v28 = vld [vmem:[#allocation8 + $0xf0] ss:$24 sps:$4 sm:$0xff]   ;;  %v7630_v31 = vld [vmem:[#allocation8 + $0x12c] ss:$24 sps:$4 sm:$0xff]  }
  0x95   : > { %1167 = vmatpush1.bf16.xpose.msra.mxu1 %v6660_v6  ;;  %1485 = vmatprep.mubr.bf16.mxu0 %v687_v20  ;;  %v7628_v29 = vld [vmem:[#allocation8 + $0xf8] ss:$24 sps:$4 sm:$0xff]   ;;  %v6686_v30 = vld [vmem:[#allocation8 + $0x124] ss:$24 sps:$4 sm:$0xff]   ;;  %v7634_v33 = vld [vmem:[#allocation8 + $0x128] ss:$24 sps:$4 sm:$0xff]  }
  0x96   : > { %1456 = vmatpush1.bf16.xpose.msra.mxu0 %v7600_v7  ;;  %1168 = vmatprep.subr.bf16.mxu1 %v6662_v8  ;;  %v6690_v32 = vld [vmem:[#allocation8 + $0x120] ss:$24 sps:$4 sm:$0xff]   ;;  %v6692_v34 = vld [vmem:[#allocation8 + $0x154] ss:$24 sps:$4 sm:$0xff]   ;;  %v6696_v36 = vld [vmem:[#allocation8 + $0x150] ss:$24 sps:$4 sm:$0xff]  }
  0x97   : > { %1457 = vmatprep.subr.bf16.mxu0 %v7602_v9  ;;  %v7636_v35 = vld [vmem:[#allocation8 + $0x15c] ss:$24 sps:$4 sm:$0xff]   ;;  %v7640_v37 = vld [vmem:[#allocation8 + $0x158] ss:$24 sps:$4 sm:$0xff]   ;;  %v313_v43 = vld [vmem:[%s7577_s15 + $0x68] sm:$0xff]  ;;  %s7221_s29 = scalar_lea.vmem %s13784_s27, 49152 }
  0x98   : > { %v6700_v38 = vld [vmem:[#allocation8 + $0x14] ss:$24 sps:$4 sm:$0xff]   ;;  %v308_v42 = vld [vmem:[%s7577_s15 + $0x40] sm:$0xff]  ;;  %v6698_v49 = vld [vmem:[#allocation8 + $0x10] ss:$24 sps:$4 sm:$0xff]   ;;  %p7222_p10 = scmp.ne.s32.totalorder %s13784_s27, %s7221_s29  ;;  %s7337_s8 = smov [#allocation10]  }
  0x99   : > { %v306_v40 = vld [vmem:[%s7577_s15 + $0x30] sm:$0xff]  ;;  %v319_v44 = vld [vmem:[%s7577_s15 + $0x98] sm:$0xff]  ;;  %v321_v46 = vld [vmem:[%s7577_s15 + $0xa8] sm:$0xff]  ;;  %s7225_s14 = sshll.u32 %s7337_s8, 4  ;;  %s7226_s14 = int_to_ptr.vmem [resolvable:$false] %s7225_s14 }
  0x9a   : > { %v302_v41 = vld [vmem:[%s7577_s15 + $0x10] sm:$0xff]  ;;  %v315_v45 = vld [vmem:[%s7577_s15 + $0x78] sm:$0xff]  ;;  %v684_v47 = vpack.c.bf16 %v306_v40, %v300_v39  ;;  %v691_v50 = vpack.c.bf16 %v319_v44, %v313_v43  ;;  %v312_v53 = vld [vmem:[%s7577_s15 + $0x60] sm:$0xff]  ;;  %p7223_p3 = pnand %p7222_p10, %p7520_p5  ;;  %s7227_s23 = scalar_lea.vmem %s7226_s14, 98304 }
  0x9b   : > { %v686_v48 = vpack.c.bf16 %v308_v42, %v302_v41  ;;  %v693_v51 = vpack.c.bf16 %v321_v46, %v315_v45  ;;  %v6703_v52 = vld [vmem:[#allocation8 + $0x44] ss:$24 sps:$4 sm:$0xff]   ;;  %v318_v54 = vld [vmem:[%s7577_s15 + $0x90] sm:$0xff]  ;;  %v6707_v40 = vld [vmem:[#allocation8 + $0xa0] ss:$24 sps:$4 sm:$0xff]   ;;  %p7228_p12 = scmp.lt.s32.totalorder %s13784_s27, %s7226_s14  ;;  %p7229_p1 = scmp.lt.s32.totalorder %s7227_s23, %s7221_s29 }
  0x9c   : > { %v314_v55 = vld [vmem:[%s7577_s15 + $0x70] sm:$0xff]  ;;  %v320_v56 = vld [vmem:[%s7577_s15 + $0xa0] sm:$0xff]  ;;  %v325_v57 = vld [vmem:[%s7577_s15 + $0xc8] sm:$0xff]  ;;  %v690_v61 = vpack.c.bf16 %v318_v54, %v312_v53  ;;  %p7224_p7 = pneg %p7223_p3 }
  0x9d   : > { %1169 = vmatpush1.bf16.xpose.msra.mxu1 %v6666_v10  ;;  %v331_v58 = vld [vmem:[%s7577_s15 + $0xf8] sm:$0xff]  ;;  %v333_v60 = vld [vmem:[%s7577_s15 + $0x108] sm:$0xff]  ;;  %v692_v62 = vpack.c.bf16 %v320_v56, %v314_v55  ;;  %v330_v4 = vld [vmem:[%s7577_s15 + $0xf0] sm:$0xff]  ;;  %p7230_p2 = por %p7229_p1, %p7228_p12 }
  0x9e   : > { %1458 = vmatpush1.bf16.xpose.msra.mxu0 %v7606_v11  ;;  %1170 = vmatprep.subr.bf16.mxu1 %v6668_v12  ;;  %v327_v59 = vld [vmem:[%s7577_s15 + $0xd8] sm:$0xff]  ;;  %v697_v63 = vpack.c.bf16 %v331_v58, %v325_v57  ;;  %v326_v6 = vld [vmem:[%s7577_s15 + $0xd0] sm:$0xff]  ;;  %v332_v8 = vld [vmem:[%s7577_s15 + $0x100] sm:$0xff] }
  0x9f   : > { %1459 = vmatprep.subr.bf16.mxu0 %v7608_v13  ;;  %v699_v0 = vpack.c.bf16 %v333_v60, %v327_v59  ;;  %v6706_v2 = vld [vmem:[#allocation8 + $0x74] ss:$24 sps:$4 sm:$0xff]   ;;  %v698_v16 = vpack.c.bf16 %v332_v8, %v326_v6  ;;  %v6709_v20 = vld [vmem:[#allocation8 + $0xa4] ss:$24 sps:$4 sm:$0xff]   ;;  %p7231_p4 = pnand %p7230_p2, %p7224_p7 }
  0xa0   : > { %v337_v10 = vld [vmem:[%s7577_s15 + $0x128] sm:$0xff]  ;;  %v339_v12 = vld [vmem:[%s7577_s15 + $0x138] sm:$0xff]  ;;  %v348_v42 = vld [vmem:[%s7577_s15 + $0x180] sm:$0xff] }
  0xa1   : > { %v345_v14 = vld [vmem:[%s7577_s15 + $0x168] sm:$0xff]  ;;  %v354_v43 = vld [vmem:[%s7577_s15 + $0x1b0] sm:$0xff]  ;;  %v356_v44 = vld [vmem:[%s7577_s15 + $0x1c0] sm:$0xff] }
  0xa2   : > { %v705_v18 = vpack.c.bf16 %v345_v14, %v339_v12  ;;  %v6712_v41 = vld [vmem:[#allocation8 + $0xd4] ss:$24 sps:$4 sm:$0xff]   ;;  %v6715_v53 = vld [vmem:[#allocation8 + $0x104] ss:$24 sps:$4 sm:$0xff]  }
  0xa3   : > { %v361_v45 = vld [vmem:[%s7577_s15 + $0x1e8] sm:$0xff]  ;;  %v363_v46 = vld [vmem:[%s7577_s15 + $0x1f8] sm:$0xff]  ;;  %v360_v54 = vld [vmem:[%s7577_s15 + $0x1e0] sm:$0xff] }
  0xa4   : > { %v366_v55 = vld [vmem:[%s7577_s15 + $0x210] sm:$0xff]  ;;  %v368_v56 = vld [vmem:[%s7577_s15 + $0x220] sm:$0xff]  ;;  %v373_v57 = vld [vmem:[%s7577_s15 + $0x248] sm:$0xff] }
  0xa5   : > { %1171 = vmatpush1.bf16.xpose.msra.mxu1 %v6672_v19  ;;  %v6704_v19 = vld [vmem:[#allocation8 + $0x70] ss:$24 sps:$4 sm:$0xff]   ;;  %v375_v58 = vld [vmem:[%s7577_s15 + $0x258] sm:$0xff]  ;;  %v714_v60 = vpack.c.bf16 %v366_v55, %v360_v54  ;;  %v420_v55 = vld [vmem:[%s7577_s15 + $0x3c0] sm:$0xff] }
  0xa6   : > { %1460 = vmatpush1.bf16.xpose.msra.mxu0 %v7616_v21  ;;  %1172 = vmatprep.subr.bf16.mxu1 %v6674_v22  ;;  %v336_v22 = vld [vmem:[%s7577_s15 + $0x120] sm:$0xff]  ;;  %v381_v59 = vld [vmem:[%s7577_s15 + $0x288] sm:$0xff]  ;;  %v387_v8 = vld [vmem:[%s7577_s15 + $0x2b8] sm:$0xff] }
  0xa7   : > { %1461 = vmatprep.subr.bf16.mxu0 %v7618_v23  ;;  %v385_v6 = vld [vmem:[%s7577_s15 + $0x2a8] sm:$0xff] }
  0xad   : > { %1173 = vmatpush1.bf16.xpose.msra.mxu1 %v6678_v24  ;;  %v342_v24 = vld [vmem:[%s7577_s15 + $0x150] sm:$0xff] }
  0xae   : > { %1462 = vmatpush1.bf16.xpose.msra.mxu0 %v7622_v25  ;;  %1174 = vmatprep.subr.bf16.mxu1 %v6680_v26  ;;  %v344_v26 = vld [vmem:[%s7577_s15 + $0x160] sm:$0xff] }
  0xaf   : > { %1463 = vmatprep.subr.bf16.mxu0 %v7624_v27 }
  0xb5   : > { %1175 = vmatpush1.bf16.xpose.msra.mxu1 %v6684_v28  ;;  %v349_v28 = vld [vmem:[%s7577_s15 + $0x188] sm:$0xff] }
  0xb6   : > { %1464 = vmatpush1.bf16.xpose.msra.mxu0 %v7628_v29  ;;  %1176 = vmatprep.subr.bf16.mxu1 %v6686_v30  ;;  %v351_v30 = vld [vmem:[%s7577_s15 + $0x198] sm:$0xff] }
  0xb7   : > { %1465 = vmatprep.subr.bf16.mxu0 %v7630_v31 }
  0xbd   : > { %1177 = vmatpush1.bf16.xpose.msra.mxu1 %v6690_v32  ;;  %v357_v32 = vld [vmem:[%s7577_s15 + $0x1c8] sm:$0xff] }
  0xbe   : > { %1466 = vmatpush1.bf16.xpose.msra.mxu0 %v7634_v33  ;;  %1178 = vmatprep.subr.bf16.mxu1 %v6692_v34  ;;  %v702_v34 = vpack.c.bf16 %v342_v24, %v336_v22  ;;  %v711_v39 = vpack.c.bf16 %v357_v32, %v351_v30  ;;  %v397_v22 = vld [vmem:[%s7577_s15 + $0x308] sm:$0xff]  ;;  %v399_v24 = vld [vmem:[%s7577_s15 + $0x318] sm:$0xff] }
  0xbf   : > { %1467 = vmatprep.subr.bf16.mxu0 %v7636_v35  ;;  %v6719_v32 = vld [vmem:[#allocation8 + $0x160] ss:$24 sps:$4 sm:$0xff]  }
  0xc5   : > { %1179 = vmatpush1.bf16.xpose.msra.mxu1 %v6696_v36 }
  0xc6   : > { %1468 = vmatpush1.bf16.xpose.msra.mxu0 %v7640_v37  ;;  %6348 = vmatprep.subr.bf16.mxu1 %v7591_v1  ;;  %v6701_v1 = vld [vmem:[#allocation8 + $0x40] ss:$24 sps:$4 sm:$0xff]  }
  0xc7   : > { %1742 = vmatprep.subr.bf16.mxu0 %v6700_v38 }
  0xcc   : > { %1197 = vmatmul.mubr.bf16.vlgmr.msra.gmra.mrb[0].mxu1 %v684_v47  ;;  %v369_v47 = vld [vmem:[%s7577_s15 + $0x228] sm:$0xff] }
  0xcd   : > { %1486 = vmatmul.mubr.bf16.vlgmr.msra.gmra.mrb[0].mxu0 %v686_v48  ;;  %6356 = vmatpush1.bf16.xpose.msra.mxu1 %v7593_v3  ;;  %v324_v3 = vld [vmem:[%s7577_s15 + $0xc0] sm:$0xff]  ;;  %v708_v48 = vpack.c.bf16 %v354_v43, %v348_v42 }
  0xce   : > { %1743 = vmatpush1.bf16.xpose.msra.mxu0 %v6698_v49  ;;  %1204 = vmatprep.mubr.bf16.mxu1 %v691_v50  ;;  %v696_v15 = vpack.c.bf16 %v330_v4, %v324_v3  ;;  %v378_v3 = vld [vmem:[%s7577_s15 + $0x270] sm:$0xff]  ;;  %v380_v4 = vld [vmem:[%s7577_s15 + $0x280] sm:$0xff] }
  0xcf   : > { %1493 = vmatprep.mubr.bf16.mxu0 %v693_v51  ;;  %1744 = vmatprep.subr.bf16.mxu0 %v6703_v52  ;;  %v717_v51 = vpack.c.bf16 %v369_v47, %v363_v46  ;;  %v6710_v52 = vld [vmem:[#allocation8 + $0xd0] ss:$24 sps:$4 sm:$0xff]   ;;  %v416_v47 = vld [vmem:[%s7577_s15 + $0x3a0] sm:$0xff] }
  0xd0   : > { %6349 = vmatprep.subr.bf16.mxu1 %v7597_v5  ;;  %v343_v5 = vld [vmem:[%s7577_s15 + $0x158] sm:$0xff]  ;;  %v410_v46 = vld [vmem:[%s7577_s15 + $0x370] sm:$0xff] }
  0xd1   : > { %v703_v17 = vpack.c.bf16 %v343_v5, %v337_v10  ;;  %v393_v10 = vld [vmem:[%s7577_s15 + $0x2e8] sm:$0xff] }
  0xd4   : > { %1205 = vmatmul.mubr.bf16.gmra.mrb[4].mxu1 %v690_v61 }
  0xd5   : > { %1494 = vmatmul.mubr.bf16.gmra.mrb[4].mxu0 %v692_v62  ;;  %1212 = vmatprep.mubr.bf16.mxu1 %v697_v63  ;;  %v723_v63 = vpack.c.bf16 %v381_v59, %v375_v58  ;;  %v439_v58 = vld [vmem:[%s7577_s15 + $0x458] sm:$0xff] }
  0xd6   : > { %1501 = vmatprep.mubr.bf16.mxu0 %v699_v0  ;;  %1745 = vmatpush1.bf16.xpose.msra.mxu0 %v6701_v1  ;;  %v6713_v0 = vld [vmem:[#allocation8 + $0x100] ss:$24 sps:$4 sm:$0xff]   ;;  %v6718_v1 = vld [vmem:[#allocation8 + $0x134] ss:$24 sps:$4 sm:$0xff]  }
  0xd7   : > { %6357 = vmatpush1.bf16.xpose.msra.mxu1 %v7600_v7  ;;  %1746 = vmatprep.subr.bf16.mxu0 %v6706_v2  ;;  %v338_v7 = vld [vmem:[%s7577_s15 + $0x130] sm:$0xff]  ;;  %v372_v2 = vld [vmem:[%s7577_s15 + $0x240] sm:$0xff]  ;;  %v435_v59 = vld [vmem:[%s7577_s15 + $0x438] sm:$0xff] }
  0xd8   : > { %6350 = vmatprep.subr.bf16.mxu1 %v7602_v9  ;;  %v355_v9 = vld [vmem:[%s7577_s15 + $0x1b8] sm:$0xff]  ;;  %v704_v36 = vpack.c.bf16 %v344_v26, %v338_v7  ;;  %v720_v5 = vpack.c.bf16 %v378_v3, %v372_v2  ;;  %v405_v7 = vld [vmem:[%s7577_s15 + $0x348] sm:$0xff]  ;;  %v438_v2 = vld [vmem:[%s7577_s15 + $0x450] sm:$0xff] }
  0xd9   : > { %v709_v38 = vpack.c.bf16 %v355_v9, %v349_v28  ;;  %v735_v30 = vpack.c.bf16 %v405_v7, %v399_v24  ;;  %v434_v3 = vld [vmem:[%s7577_s15 + $0x430] sm:$0xff] }
  0xdc   : > { %1213 = vmatmul.mubr.bf16.gmra.mrb[8].mxu1 %v696_v15  ;;  %v729_v15 = vpack.c.bf16 %v393_v10, %v387_v8  ;;  %v453_v8 = vld [vmem:[%s7577_s15 + $0x4c8] sm:$0xff] }
  0xdd   : > { %1502 = vmatmul.mubr.bf16.gmra.mrb[8].mxu0 %v698_v16  ;;  %1220 = vmatprep.mubr.bf16.mxu1 %v703_v17  ;;  %v6716_v16 = vld [vmem:[#allocation8 + $0x130] ss:$24 sps:$4 sm:$0xff]   ;;  %v6721_v17 = vld [vmem:[#allocation8 + $0x164] ss:$24 sps:$4 sm:$0xff]  }
  0xde   : > { %1509 = vmatprep.mubr.bf16.mxu0 %v705_v18  ;;  %1747 = vmatpush1.bf16.xpose.msra.mxu0 %v6704_v19  ;;  %v384_v18 = vld [vmem:[%s7577_s15 + $0x2a0] sm:$0xff]  ;;  %v390_v19 = vld [vmem:[%s7577_s15 + $0x2d0] sm:$0xff] }
  0xdf   : > { %6358 = vmatpush1.bf16.xpose.msra.mxu1 %v7606_v11  ;;  %1748 = vmatprep.subr.bf16.mxu0 %v6709_v20  ;;  %v350_v11 = vld [vmem:[%s7577_s15 + $0x190] sm:$0xff]  ;;  %v392_v20 = vld [vmem:[%s7577_s15 + $0x2e0] sm:$0xff]  ;;  %v726_v26 = vpack.c.bf16 %v390_v19, %v384_v18  ;;  %v457_v19 = vld [vmem:[%s7577_s15 + $0x4e8] sm:$0xff] }
  0xe0   : > { %6351 = vmatprep.subr.bf16.mxu1 %v7608_v13  ;;  %v367_v13 = vld [vmem:[%s7577_s15 + $0x218] sm:$0xff]  ;;  %v710_v49 = vpack.c.bf16 %v356_v44, %v350_v11  ;;  %v452_v18 = vld [vmem:[%s7577_s15 + $0x4c0] sm:$0xff] }
  0xe1   : > { %v715_v50 = vpack.c.bf16 %v367_v13, %v361_v45  ;;  %v408_v45 = vld [vmem:[%s7577_s15 + $0x360] sm:$0xff]  ;;  %v414_v13 = vld [vmem:[%s7577_s15 + $0x390] sm:$0xff] }
  0xe4   : > { %1221 = vmatmul.mubr.bf16.gmra.mrb[12].mxu1 %v702_v34  ;;  %v396_v34 = vld [vmem:[%s7577_s15 + $0x300] sm:$0xff] }
  0xe5   : > { %1510 = vmatmul.mubr.bf16.gmra.mrb[12].mxu0 %v704_v36  ;;  %1228 = vmatprep.mubr.bf16.mxu1 %v709_v38  ;;  %v402_v36 = vld [vmem:[%s7577_s15 + $0x330] sm:$0xff]  ;;  %v404_v38 = vld [vmem:[%s7577_s15 + $0x340] sm:$0xff] }
  0xe6   : > { %1517 = vmatprep.mubr.bf16.mxu0 %v711_v39  ;;  %1749 = vmatpush1.bf16.xpose.msra.mxu0 %v6707_v40  ;;  %v409_v39 = vld [vmem:[%s7577_s15 + $0x368] sm:$0xff]  ;;  %v411_v40 = vld [vmem:[%s7577_s15 + $0x378] sm:$0xff]  ;;  %v732_v42 = vpack.c.bf16 %v402_v36, %v396_v34 }
  0xe7   : > { %6359 = vmatpush1.bf16.xpose.msra.mxu1 %v7616_v21  ;;  %1750 = vmatprep.subr.bf16.mxu0 %v6712_v41  ;;  %v362_v21 = vld [vmem:[%s7577_s15 + $0x1f0] sm:$0xff]  ;;  %v417_v41 = vld [vmem:[%s7577_s15 + $0x3a8] sm:$0xff]  ;;  %v475_v36 = vld [vmem:[%s7577_s15 + $0x578] sm:$0xff] }
  0xe8   : > { %6352 = vmatprep.subr.bf16.mxu1 %v7618_v23  ;;  %v379_v23 = vld [vmem:[%s7577_s15 + $0x278] sm:$0xff]  ;;  %v716_v61 = vpack.c.bf16 %v368_v56, %v362_v21  ;;  %v741_v44 = vpack.c.bf16 %v417_v41, %v411_v40  ;;  %v426_v21 = vld [vmem:[%s7577_s15 + $0x3f0] sm:$0xff]  ;;  %v469_v34 = vld [vmem:[%s7577_s15 + $0x548] sm:$0xff] }
  0xe9   : > { %v721_v62 = vpack.c.bf16 %v379_v23, %v373_v57  ;;  %v422_v56 = vld [vmem:[%s7577_s15 + $0x3d0] sm:$0xff]  ;;  %v428_v57 = vld [vmem:[%s7577_s15 + $0x400] sm:$0xff]  ;;  %v433_v23 = vld [vmem:[%s7577_s15 + $0x428] sm:$0xff]  ;;  %v769_v40 = vpack.c.bf16 %v475_v36, %v469_v34 }
  0xec   : > { %1229 = vmatmul.mubr.bf16.gmra.mrb[16].mxu1 %v708_v48  ;;  %v421_v48 = vld [vmem:[%s7577_s15 + $0x3c8] sm:$0xff] }
  0xed   : > { %1518 = vmatmul.mubr.bf16.gmra.mrb[16].mxu0 %v710_v49  ;;  %1236 = vmatprep.mubr.bf16.mxu1 %v715_v50  ;;  %v423_v49 = vld [vmem:[%s7577_s15 + $0x3d8] sm:$0xff]  ;;  %v429_v50 = vld [vmem:[%s7577_s15 + $0x408] sm:$0xff] }
  0xee   : > { %1525 = vmatprep.mubr.bf16.mxu0 %v717_v51  ;;  %1751 = vmatpush1.bf16.xpose.msra.mxu0 %v6710_v52  ;;  %v738_v51 = vpack.c.bf16 %v414_v13, %v408_v45  ;;  %v740_v52 = vpack.c.bf16 %v416_v47, %v410_v46  ;;  %v747_v54 = vpack.c.bf16 %v429_v50, %v423_v49  ;;  %v481_v45 = vld [vmem:[%s7577_s15 + $0x5a8] sm:$0xff]  ;;  %v487_v13 = vld [vmem:[%s7577_s15 + $0x5d8] sm:$0xff] }
  0xef   : > { %6360 = vmatpush1.bf16.xpose.msra.mxu1 %v7622_v25  ;;  %1752 = vmatprep.subr.bf16.mxu0 %v6715_v53  ;;  %v374_v25 = vld [vmem:[%s7577_s15 + $0x250] sm:$0xff]  ;;  %v483_v46 = vld [vmem:[%s7577_s15 + $0x5b8] sm:$0xff]  ;;  %v489_v47 = vld [vmem:[%s7577_s15 + $0x5e8] sm:$0xff]  ;;  %v775_v49 = vpack.c.bf16 %v487_v13, %v481_v45 }
  0xf0   : > { %6353 = vmatprep.subr.bf16.mxu1 %v7624_v27  ;;  %v391_v27 = vld [vmem:[%s7577_s15 + $0x2d8] sm:$0xff]  ;;  %v722_v12 = vpack.c.bf16 %v380_v4, %v374_v25  ;;  %v440_v25 = vld [vmem:[%s7577_s15 + $0x460] sm:$0xff]  ;;  %v445_v4 = vld [vmem:[%s7577_s15 + $0x488] sm:$0xff]  ;;  %v777_v50 = vpack.c.bf16 %v489_v47, %v483_v46 }
  0xf1   : > { %v727_v14 = vpack.c.bf16 %v391_v27, %v385_v6  ;;  %v451_v6 = vld [vmem:[%s7577_s15 + $0x4b8] sm:$0xff] }
  0xf2   : > { %v447_v27 = vld [vmem:[%s7577_s15 + $0x498] sm:$0xff] }
  0xf4   : > { %1237 = vmatmul.mubr.bf16.gmra.mrb[20].mxu1 %v714_v60  ;;  %v441_v60 = vld [vmem:[%s7577_s15 + $0x468] sm:$0xff] }
  0xf5   : > { %1526 = vmatmul.mubr.bf16.gmra.mrb[20].mxu0 %v716_v61  ;;  %1244 = vmatprep.mubr.bf16.mxu1 %v721_v62  ;;  %v744_v61 = vpack.c.bf16 %v426_v21, %v420_v55  ;;  %v746_v62 = vpack.c.bf16 %v428_v57, %v422_v56  ;;  %v493_v55 = vld [vmem:[%s7577_s15 + $0x608] sm:$0xff]  ;;  %v499_v21 = vld [vmem:[%s7577_s15 + $0x638] sm:$0xff] }
  0xf6   : > { %1533 = vmatprep.mubr.bf16.mxu0 %v723_v63  ;;  %1753 = vmatpush1.bf16.xpose.msra.mxu0 %v6713_v0  ;;  %v751_v63 = vpack.c.bf16 %v439_v58, %v433_v23  ;;  %v753_v0 = vpack.c.bf16 %v441_v60, %v435_v59  ;;  %v305_v56 = vld [vmem:[%s7577_s15 + $0x28] sm:$0xff]  ;;  %v311_v57 = vld [vmem:[%s7577_s15 + $0x58] sm:$0xff]  ;;  %v781_v59 = vpack.c.bf16 %v499_v21, %v493_v55 }
  0xf7   : > { %6361 = vmatpush1.bf16.xpose.msra.mxu1 %v7628_v29  ;;  %1754 = vmatprep.subr.bf16.mxu0 %v6718_v1  ;;  %v386_v29 = vld [vmem:[%s7577_s15 + $0x2b0] sm:$0xff]  ;;  %v432_v1 = vld [vmem:[%s7577_s15 + $0x420] sm:$0xff]  ;;  %v689_v60 = vpack.c.bf16 %v311_v57, %v305_v56 }
  0xf8   : > { %6354 = vmatprep.subr.bf16.mxu1 %v7630_v31  ;;  %v403_v31 = vld [vmem:[%s7577_s15 + $0x338] sm:$0xff]  ;;  %v728_v28 = vpack.c.bf16 %v392_v20, %v386_v29  ;;  %v750_v10 = vpack.c.bf16 %v438_v2, %v432_v1  ;;  %v505_v1 = vld [vmem:[%s7577_s15 + $0x668] sm:$0xff] }
  0xf9   : > { %v733_v9 = vpack.c.bf16 %v403_v31, %v397_v22  ;;  %v463_v29 = vld [vmem:[%s7577_s15 + $0x518] sm:$0xff]  ;;  %v465_v22 = vld [vmem:[%s7577_s15 + $0x528] sm:$0xff] }
  0xfa   : > { %v459_v20 = vld [vmem:[%s7577_s15 + $0x4f8] sm:$0xff]  ;;  %v763_v7 = vpack.c.bf16 %v463_v29, %v457_v19 }
  0xfb   : > { %v511_v2 = vld [vmem:[%s7577_s15 + $0x698] sm:$0xff] }
  0xfc   : > { %1245 = vmatmul.mubr.bf16.gmra.mrb[24].mxu1 %v720_v5  ;;  %v752_v5 = vpack.c.bf16 %v440_v25, %v434_v3  ;;  %v317_v3 = vld [vmem:[%s7577_s15 + $0x88] sm:$0xff]  ;;  %v323_v25 = vld [vmem:[%s7577_s15 + $0xb8] sm:$0xff] }
  0xfd   : > { %1534 = vmatmul.mubr.bf16.gmra.mrb[24].mxu0 %v722_v12  ;;  %1252 = vmatprep.mubr.bf16.mxu1 %v727_v14  ;;  %v757_v12 = vpack.c.bf16 %v451_v6, %v445_v4  ;;  %v759_v14 = vpack.c.bf16 %v453_v8, %v447_v27  ;;  %v787_v27 = vpack.c.bf16 %v511_v2, %v505_v1 }
  0xfe   : > { %1541 = vmatprep.mubr.bf16.mxu0 %v729_v15  ;;  %1755 = vmatpush1.bf16.xpose.msra.mxu0 %v6716_v16  ;;  %v444_v15 = vld [vmem:[%s7577_s15 + $0x480] sm:$0xff]  ;;  %v450_v16 = vld [vmem:[%s7577_s15 + $0x4b0] sm:$0xff]  ;;  %v695_v8 = vpack.c.bf16 %v323_v25, %v317_v3 }
  0xff   : > { %6362 = vmatpush1.bf16.xpose.msra.mxu1 %v7634_v33  ;;  %1756 = vmatprep.subr.bf16.mxu0 %v6721_v17  ;;  %v398_v33 = vld [vmem:[%s7577_s15 + $0x310] sm:$0xff]  ;;  %v756_v31 = vpack.c.bf16 %v450_v16, %v444_v15  ;;  %v517_v15 = vld [vmem:[%s7577_s15 + $0x6c8] sm:$0xff]  ;;  %v523_v16 = vld [vmem:[%s7577_s15 + $0x6f8] sm:$0xff] }
 0x100   : > { %6355 = vmatprep.subr.bf16.mxu1 %v7636_v35  ;;  %v415_v35 = vld [vmem:[%s7577_s15 + $0x398] sm:$0xff]  ;;  %v734_v43 = vpack.c.bf16 %v404_v38, %v398_v33  ;;  %v446_v17 = vld [vmem:[%s7577_s15 + $0x490] sm:$0xff]  ;;  %v477_v38 = vld [vmem:[%s7577_s15 + $0x588] sm:$0xff] }
 0x101   : > { %v739_v11 = vpack.c.bf16 %v415_v35, %v409_v39  ;;  %v758_v24 = vpack.c.bf16 %v452_v18, %v446_v17  ;;  %v471_v33 = vld [vmem:[%s7577_s15 + $0x558] sm:$0xff]  ;;  %v329_v17 = vld [vmem:[%s7577_s15 + $0xe8] sm:$0xff] }
 0x102   : > { %v771_v41 = vpack.c.bf16 %v477_v38, %v471_v33  ;;  %v335_v18 = vld [vmem:[%s7577_s15 + $0x118] sm:$0xff] }
 0x104   : > { %1253 = vmatmul.mubr.bf16.gmra.mrb[28].mxu1 %v726_v26  ;;  %v765_v26 = vpack.c.bf16 %v465_v22, %v459_v20  ;;  %v793_v20 = vpack.c.bf16 %v523_v16, %v517_v15  ;;  %v701_v22 = vpack.c.bf16 %v335_v18, %v329_v17 }
 0x105   : > { %1542 = vmatmul.mubr.bf16.gmra.mrb[28].mxu0 %v728_v28  ;;  %1260 = vmatprep.mubr.bf16.mxu1 %v733_v9  ;;  %v456_v28 = vld [vmem:[%s7577_s15 + $0x4e0] sm:$0xff]  ;;  %v462_v9 = vld [vmem:[%s7577_s15 + $0x510] sm:$0xff] }
 0x106   : > { %1549 = vmatprep.mubr.bf16.mxu0 %v735_v30  ;;  %1757 = vmatpush1.bf16.xpose.msra.mxu0 %v6719_v32  ;;  %v458_v30 = vld [vmem:[%s7577_s15 + $0x4f0] sm:$0xff]  ;;  %v464_v32 = vld [vmem:[%s7577_s15 + $0x520] sm:$0xff]  ;;  %v762_v39 = vpack.c.bf16 %v462_v9, %v456_v28  ;;  %v529_v28 = vld [vmem:[%s7577_s15 + $0x728] sm:$0xff] }
 0x107   : > { %6363 = vmatpush1.bf16.xpose.msra.mxu1 %v7640_v37  ;;  %v427_v37 = vld [vmem:[%s7577_s15 + $0x3f8] sm:$0xff]  ;;  %v764_v35 = vpack.c.bf16 %v464_v32, %v458_v30  ;;  %v341_v30 = vld [vmem:[%s7577_s15 + $0x148] sm:$0xff] }
 0x108   : > { %v745_v53 = vpack.c.bf16 %v427_v37, %v421_v48  ;;  %v535_v9 = vld [vmem:[%s7577_s15 + $0x758] sm:$0xff] }
 0x109   : > { %v347_v32 = vld [vmem:[%s7577_s15 + $0x178] sm:$0xff]  ;;  %v799_v33 = vpack.c.bf16 %v535_v9, %v529_v28 }
 0x10a   : > { %v707_v38 = vpack.c.bf16 %v347_v32, %v341_v30 }
 0x10c   : > { %1261 = vmatmul.mubr.bf16.gmra.mrb[32].mxu1 %v732_v42  ;;  %v468_v42 = vld [vmem:[%s7577_s15 + $0x540] sm:$0xff] }
 0x10d   : > { %1550 = vmatmul.mubr.bf16.gmra.mrb[32].mxu0 %v734_v43  ;;  %1268 = vmatprep.mubr.bf16.mxu1 %v739_v11  ;;  %v474_v43 = vld [vmem:[%s7577_s15 + $0x570] sm:$0xff] }
 0x10e   : > { %1557 = vmatprep.mubr.bf16.mxu0 %v741_v44  ;;  %v470_v11 = vld [vmem:[%s7577_s15 + $0x550] sm:$0xff]  ;;  %v476_v44 = vld [vmem:[%s7577_s15 + $0x580] sm:$0xff]  ;;  %v768_v48 = vpack.c.bf16 %v474_v43, %v468_v42  ;;  %v541_v42 = vld [vmem:[%s7577_s15 + $0x788] sm:$0xff] }
 0x10f   : > { %v770_v37 = vpack.c.bf16 %v476_v44, %v470_v11  ;;  %v547_v43 = vld [vmem:[%s7577_s15 + $0x7b8] sm:$0xff]  ;;  %v353_v11 = vld [vmem:[%s7577_s15 + $0x1a8] sm:$0xff] }
 0x110   : > { %v359_v44 = vld [vmem:[%s7577_s15 + $0x1d8] sm:$0xff]  ;;  %v805_v46 = vpack.c.bf16 %v547_v43, %v541_v42 }
 0x111   : > { %v713_v47 = vpack.c.bf16 %v359_v44, %v353_v11 }
 0x114   : > { %1269 = vmatmul.mubr.bf16.gmra.mrb[36].mxu1 %v738_v51  ;;  %v480_v51 = vld [vmem:[%s7577_s15 + $0x5a0] sm:$0xff] }
 0x115   : > { %1558 = vmatmul.mubr.bf16.gmra.mrb[36].mxu0 %v740_v52  ;;  %1276 = vmatprep.mubr.bf16.mxu1 %v745_v53  ;;  %v486_v52 = vld [vmem:[%s7577_s15 + $0x5d0] sm:$0xff] }
 0x116   : > { %1565 = vmatprep.mubr.bf16.mxu0 %v747_v54  ;;  %v482_v53 = vld [vmem:[%s7577_s15 + $0x5b0] sm:$0xff]  ;;  %v488_v54 = vld [vmem:[%s7577_s15 + $0x5e0] sm:$0xff]  ;;  %v774_v23 = vpack.c.bf16 %v486_v52, %v480_v51  ;;  %v553_v51 = vld [vmem:[%s7577_s15 + $0x7e8] sm:$0xff] }
 0x117   : > { %v776_v58 = vpack.c.bf16 %v488_v54, %v482_v53  ;;  %v559_v52 = vld [vmem:[%s7577_s15 + $0x818] sm:$0xff]  ;;  %v365_v53 = vld [vmem:[%s7577_s15 + $0x208] sm:$0xff] }
 0x118   : > { %v371_v54 = vld [vmem:[%s7577_s15 + $0x238] sm:$0xff]  ;;  %v811_v56 = vpack.c.bf16 %v559_v52, %v553_v51 }
 0x119   : > { %v719_v57 = vpack.c.bf16 %v371_v54, %v365_v53 }
 0x11c   : > { %1277 = vmatmul.mubr.bf16.gmra.mrb[40].mxu1 %v744_v61  ;;  %v492_v61 = vld [vmem:[%s7577_s15 + $0x600] sm:$0xff] }
 0x11d   : > { %1566 = vmatmul.mubr.bf16.gmra.mrb[40].mxu0 %v746_v62  ;;  %1284 = vmatprep.mubr.bf16.mxu1 %v751_v63  ;;  %v498_v62 = vld [vmem:[%s7577_s15 + $0x630] sm:$0xff]  ;;  %v304_v63 = vld [vmem:[%s7577_s15 + $0x20] sm:$0xff] }
 0x11e   : > { %1573 = vmatprep.mubr.bf16.mxu0 %v753_v0  ;;  %v310_v0 = vld [vmem:[%s7577_s15 + $0x50] sm:$0xff]  ;;  %v780_v4 = vpack.c.bf16 %v498_v62, %v492_v61  ;;  %v565_v61 = vld [vmem:[%s7577_s15 + $0x848] sm:$0xff]  ;;  %v571_v62 = vld [vmem:[%s7577_s15 + $0x878] sm:$0xff] }
 0x11f   : > { %v688_v6 = vpack.c.bf16 %v310_v0, %v304_v63  ;;  %v377_v63 = vld [vmem:[%s7577_s15 + $0x268] sm:$0xff]  ;;  %v383_v0 = vld [vmem:[%s7577_s15 + $0x298] sm:$0xff]  ;;  %v817_v3 = vpack.c.bf16 %v571_v62, %v565_v61 }
 0x120   : > { %v725_v25 = vpack.c.bf16 %v383_v0, %v377_v63 }
 0x124   : > { %1285 = vmatmul.mubr.bf16.gmra.mrb[44].mxu1 %v750_v10  ;;  %v504_v10 = vld [vmem:[%s7577_s15 + $0x660] sm:$0xff] }
 0x125   : > { %1574 = vmatmul.mubr.bf16.gmra.mrb[44].mxu0 %v752_v5  ;;  %1292 = vmatprep.mubr.bf16.mxu1 %v757_v12  ;;  %v510_v5 = vld [vmem:[%s7577_s15 + $0x690] sm:$0xff]  ;;  %v316_v12 = vld [vmem:[%s7577_s15 + $0x80] sm:$0xff] }
 0x126   : > { %1581 = vmatprep.mubr.bf16.mxu0 %v759_v14  ;;  %v322_v14 = vld [vmem:[%s7577_s15 + $0xb0] sm:$0xff]  ;;  %v786_v19 = vpack.c.bf16 %v510_v5, %v504_v10  ;;  %v577_v10 = vld [vmem:[%s7577_s15 + $0x8a8] sm:$0xff]  ;;  %v583_v5 = vld [vmem:[%s7577_s15 + $0x8d8] sm:$0xff] }
 0x127   : > { %v694_v29 = vpack.c.bf16 %v322_v14, %v316_v12  ;;  %v389_v12 = vld [vmem:[%s7577_s15 + $0x2c8] sm:$0xff]  ;;  %v395_v14 = vld [vmem:[%s7577_s15 + $0x2f8] sm:$0xff]  ;;  %v823_v17 = vpack.c.bf16 %v583_v5, %v577_v10 }
 0x128   : > { %v731_v18 = vpack.c.bf16 %v395_v14, %v389_v12 }
 0x12c   : > { %1293 = vmatmul.mubr.bf16.gmra.mrb[48].mxu1 %v756_v31  ;;  %v516_v31 = vld [vmem:[%s7577_s15 + $0x6c0] sm:$0xff] }
 0x12d   : > { %1582 = vmatmul.mubr.bf16.gmra.mrb[48].mxu0 %v758_v24  ;;  %1300 = vmatprep.mubr.bf16.mxu1 %v763_v7  ;;  %v522_v24 = vld [vmem:[%s7577_s15 + $0x6f0] sm:$0xff]  ;;  %v328_v7 = vld [vmem:[%s7577_s15 + $0xe0] sm:$0xff] }
 0x12e   : > { %1589 = vmatprep.mubr.bf16.mxu0 %v765_v26  ;;  %v334_v26 = vld [vmem:[%s7577_s15 + $0x110] sm:$0xff]  ;;  %v792_v34 = vpack.c.bf16 %v522_v24, %v516_v31  ;;  %v589_v31 = vld [vmem:[%s7577_s15 + $0x908] sm:$0xff]  ;;  %v595_v24 = vld [vmem:[%s7577_s15 + $0x938] sm:$0xff] }
 0x12f   : > { %v700_v36 = vpack.c.bf16 %v334_v26, %v328_v7  ;;  %v401_v7 = vld [vmem:[%s7577_s15 + $0x328] sm:$0xff]  ;;  %v407_v26 = vld [vmem:[%s7577_s15 + $0x358] sm:$0xff]  ;;  %v829_v30 = vpack.c.bf16 %v595_v24, %v589_v31 }
 0x130   : > { %v737_v32 = vpack.c.bf16 %v407_v26, %v401_v7  ;;  %v649_v31 = vld [vmem:[%s7577_s15 + $0xae8] sm:$0xff]  ;;  %v655_v24 = vld [vmem:[%s7577_s15 + $0xb18] sm:$0xff] }
 0x131   : > { %v461_v7 = vld [vmem:[%s7577_s15 + $0x508] sm:$0xff]  ;;  %v467_v26 = vld [vmem:[%s7577_s15 + $0x538] sm:$0xff] }
 0x134   : > { %1301 = vmatmul.mubr.bf16.gmra.mrb[52].mxu1 %v762_v39  ;;  %v528_v39 = vld [vmem:[%s7577_s15 + $0x720] sm:$0xff] }
 0x135   : > { %1590 = vmatmul.mubr.bf16.gmra.mrb[52].mxu0 %v764_v35  ;;  %1308 = vmatprep.mubr.bf16.mxu1 %v769_v40  ;;  %v534_v35 = vld [vmem:[%s7577_s15 + $0x750] sm:$0xff]  ;;  %v340_v40 = vld [vmem:[%s7577_s15 + $0x140] sm:$0xff] }
 0x136   : > { %1597 = vmatprep.mubr.bf16.mxu0 %v771_v41  ;;  %v346_v41 = vld [vmem:[%s7577_s15 + $0x170] sm:$0xff]  ;;  %v798_v45 = vpack.c.bf16 %v534_v35, %v528_v39  ;;  %v601_v39 = vld [vmem:[%s7577_s15 + $0x968] sm:$0xff]  ;;  %v607_v35 = vld [vmem:[%s7577_s15 + $0x998] sm:$0xff] }
 0x137   : > { %v706_v13 = vpack.c.bf16 %v346_v41, %v340_v40  ;;  %v413_v40 = vld [vmem:[%s7577_s15 + $0x388] sm:$0xff]  ;;  %v419_v41 = vld [vmem:[%s7577_s15 + $0x3b8] sm:$0xff]  ;;  %v835_v11 = vpack.c.bf16 %v607_v35, %v601_v39  ;;  %v648_v39 = vld [vmem:[%s7577_s15 + $0xae0] sm:$0xff] }
 0x138   : > { %v743_v44 = vpack.c.bf16 %v419_v41, %v413_v40  ;;  %v654_v35 = vld [vmem:[%s7577_s15 + $0xb10] sm:$0xff]  ;;  %v460_v40 = vld [vmem:[%s7577_s15 + $0x500] sm:$0xff] }
 0x139   : > { %v466_v41 = vld [vmem:[%s7577_s15 + $0x530] sm:$0xff] }
 0x13c   : > { %1309 = vmatmul.mubr.bf16.gmra.mrb[56].mxu1 %v768_v48  ;;  %v540_v48 = vld [vmem:[%s7577_s15 + $0x780] sm:$0xff] }
 0x13d   : > { %1598 = vmatmul.mubr.bf16.gmra.mrb[56].mxu0 %v770_v37  ;;  %1316 = vmatprep.mubr.bf16.mxu1 %v775_v49  ;;  %v546_v37 = vld [vmem:[%s7577_s15 + $0x7b0] sm:$0xff]  ;;  %v352_v49 = vld [vmem:[%s7577_s15 + $0x1a0] sm:$0xff] }
 0x13e   : > { %1605 = vmatprep.mubr.bf16.mxu0 %v777_v50  ;;  %v358_v50 = vld [vmem:[%s7577_s15 + $0x1d0] sm:$0xff]  ;;  %v804_v55 = vpack.c.bf16 %v546_v37, %v540_v48  ;;  %v613_v48 = vld [vmem:[%s7577_s15 + $0x9c8] sm:$0xff]  ;;  %v619_v37 = vld [vmem:[%s7577_s15 + $0x9f8] sm:$0xff] }
 0x13f   : > { %v712_v21 = vpack.c.bf16 %v358_v50, %v352_v49  ;;  %v425_v49 = vld [vmem:[%s7577_s15 + $0x3e8] sm:$0xff]  ;;  %v431_v50 = vld [vmem:[%s7577_s15 + $0x418] sm:$0xff]  ;;  %v841_v53 = vpack.c.bf16 %v619_v37, %v613_v48 }
 0x140   : > { %v749_v54 = vpack.c.bf16 %v431_v50, %v425_v49 }
 0x144   : > { %1317 = vmatmul.mubr.bf16.gmra.mrb[60].mxu1 %v774_v23  ;;  %v552_v23 = vld [vmem:[%s7577_s15 + $0x7e0] sm:$0xff] }
 0x145   : > { %1606 = vmatmul.mubr.bf16.gmra.mrb[60].mxu0 %v776_v58  ;;  %1324 = vmatprep.mubr.bf16.mxu1 %v781_v59  ;;  %v558_v58 = vld [vmem:[%s7577_s15 + $0x810] sm:$0xff]  ;;  %v364_v59 = vld [vmem:[%s7577_s15 + $0x200] sm:$0xff] }
 0x146   : > { %1774 = vmatprep.mubr.bf16.mxu0 %v689_v60  ;;  %v370_v60 = vld [vmem:[%s7577_s15 + $0x230] sm:$0xff]  ;;  %v810_v1 = vpack.c.bf16 %v558_v58, %v552_v23  ;;  %v625_v23 = vld [vmem:[%s7577_s15 + $0xa28] sm:$0xff]  ;;  %v631_v58 = vld [vmem:[%s7577_s15 + $0xa58] sm:$0xff] }
 0x147   : > { %v718_v2 = vpack.c.bf16 %v370_v60, %v364_v59  ;;  %v437_v59 = vld [vmem:[%s7577_s15 + $0x448] sm:$0xff]  ;;  %v443_v60 = vld [vmem:[%s7577_s15 + $0x478] sm:$0xff]  ;;  %v847_v63 = vpack.c.bf16 %v631_v58, %v625_v23 }
 0x148   : > { %v755_v0 = vpack.c.bf16 %v443_v60, %v437_v59 }
 0x14c   : > { %1325 = vmatmul.mubr.bf16.gmra.mrb[64].mxu1 %v780_v4  ;;  %v564_v4 = vld [vmem:[%s7577_s15 + $0x840] sm:$0xff] }
 0x14d   : > { %1775 = vmatmul.mubr.bf16.vlgmr.msra.gmra.mrb[0].mxu0 %v688_v6  ;;  %1332 = vmatprep.mubr.bf16.mxu1 %v787_v27  ;;  %v570_v6 = vld [vmem:[%s7577_s15 + $0x870] sm:$0xff]  ;;  %v376_v27 = vld [vmem:[%s7577_s15 + $0x260] sm:$0xff] }
 0x14e   : > { %1782 = vmatprep.mubr.bf16.mxu0 %v695_v8  ;;  %v382_v8 = vld [vmem:[%s7577_s15 + $0x290] sm:$0xff]  ;;  %v816_v15 = vpack.c.bf16 %v570_v6, %v564_v4  ;;  %v637_v4 = vld [vmem:[%s7577_s15 + $0xa88] sm:$0xff]  ;;  %v643_v6 = vld [vmem:[%s7577_s15 + $0xab8] sm:$0xff] }
 0x14f   : > { %v724_v16 = vpack.c.bf16 %v382_v8, %v376_v27  ;;  %v449_v27 = vld [vmem:[%s7577_s15 + $0x4a8] sm:$0xff]  ;;  %v455_v8 = vld [vmem:[%s7577_s15 + $0x4d8] sm:$0xff] }
 0x154   : > { %1333 = vmatmul.mubr.bf16.gmra.mrb[68].mxu1 %v786_v19  ;;  %v576_v19 = vld [vmem:[%s7577_s15 + $0x8a0] sm:$0xff] }
 0x155   : > { %1783 = vmatmul.mubr.bf16.gmra.mrb[4].mxu0 %v694_v29  ;;  %1340 = vmatprep.mubr.bf16.mxu1 %v793_v20  ;;  %v582_v29 = vld [vmem:[%s7577_s15 + $0x8d0] sm:$0xff]  ;;  %v388_v20 = vld [vmem:[%s7577_s15 + $0x2c0] sm:$0xff] }
 0x156   : > { %1790 = vmatprep.mubr.bf16.mxu0 %v701_v22  ;;  %v394_v22 = vld [vmem:[%s7577_s15 + $0x2f0] sm:$0xff]  ;;  %v822_v28 = vpack.c.bf16 %v582_v29, %v576_v19  ;;  %v636_v19 = vld [vmem:[%s7577_s15 + $0xa80] sm:$0xff] }
 0x157   : > { %v730_v9 = vpack.c.bf16 %v394_v22, %v388_v20  ;;  %v642_v29 = vld [vmem:[%s7577_s15 + $0xab0] sm:$0xff]  ;;  %v448_v20 = vld [vmem:[%s7577_s15 + $0x4a0] sm:$0xff] }
 0x158   : > { %v454_v22 = vld [vmem:[%s7577_s15 + $0x4d0] sm:$0xff] }
 0x15c   : > { %1341 = vmatmul.mubr.bf16.gmra.mrb[72].mxu1 %v792_v34  ;;  %v588_v34 = vld [vmem:[%s7577_s15 + $0x900] sm:$0xff] }
 0x15d   : > { %1791 = vmatmul.mubr.bf16.gmra.mrb[8].mxu0 %v700_v36  ;;  %1348 = vmatprep.mubr.bf16.mxu1 %v799_v33  ;;  %v594_v36 = vld [vmem:[%s7577_s15 + $0x930] sm:$0xff]  ;;  %v400_v33 = vld [vmem:[%s7577_s15 + $0x320] sm:$0xff] }
 0x15e   : > { %1798 = vmatprep.mubr.bf16.mxu0 %v707_v38  ;;  %v406_v38 = vld [vmem:[%s7577_s15 + $0x350] sm:$0xff]  ;;  %v828_v42 = vpack.c.bf16 %v594_v36, %v588_v34  ;;  %v859_v36 = vpack.c.bf16 %v655_v24, %v649_v31  ;;  %v496_v31 = vld [vmem:[%s7577_s15 + $0x620] sm:$0xff] }
 0x15f   : > { %v736_v43 = vpack.c.bf16 %v406_v38, %v400_v33  ;;  %v767_v33 = vpack.c.bf16 %v467_v26, %v461_v7  ;;  %v502_v24 = vld [vmem:[%s7577_s15 + $0x650] sm:$0xff]  ;;  %v507_v7 = vld [vmem:[%s7577_s15 + $0x678] sm:$0xff]  ;;  %v513_v26 = vld [vmem:[%s7577_s15 + $0x6a8] sm:$0xff] }
 0x164   : > { %1349 = vmatmul.mubr.bf16.gmra.mrb[76].mxu1 %v798_v45  ;;  %v600_v45 = vld [vmem:[%s7577_s15 + $0x960] sm:$0xff] }
 0x165   : > { %1799 = vmatmul.mubr.bf16.gmra.mrb[12].mxu0 %v706_v13  ;;  %1356 = vmatprep.mubr.bf16.mxu1 %v805_v46  ;;  %v606_v13 = vld [vmem:[%s7577_s15 + $0x990] sm:$0xff]  ;;  %v412_v46 = vld [vmem:[%s7577_s15 + $0x380] sm:$0xff] }
 0x166   : > { %1806 = vmatprep.mubr.bf16.mxu0 %v713_v47  ;;  %v418_v47 = vld [vmem:[%s7577_s15 + $0x3b0] sm:$0xff]  ;;  %v834_v51 = vpack.c.bf16 %v606_v13, %v600_v45 }
 0x167   : > { %v742_v52 = vpack.c.bf16 %v418_v47, %v412_v46  ;;  %v858_v46 = vpack.c.bf16 %v654_v35, %v648_v39  ;;  %v766_v47 = vpack.c.bf16 %v466_v41, %v460_v40  ;;  %v789_v35 = vpack.c.bf16 %v513_v26, %v507_v7 }
 0x16c   : > { %1357 = vmatmul.mubr.bf16.gmra.mrb[80].mxu1 %v804_v55  ;;  %v612_v55 = vld [vmem:[%s7577_s15 + $0x9c0] sm:$0xff] }
 0x16d   : > { %1807 = vmatmul.mubr.bf16.gmra.mrb[16].mxu0 %v712_v21  ;;  %1364 = vmatprep.mubr.bf16.mxu1 %v811_v56  ;;  %v618_v21 = vld [vmem:[%s7577_s15 + $0x9f0] sm:$0xff]  ;;  %v424_v56 = vld [vmem:[%s7577_s15 + $0x3e0] sm:$0xff] }
 0x16e   : > { %1814 = vmatprep.mubr.bf16.mxu0 %v719_v57  ;;  %v430_v57 = vld [vmem:[%s7577_s15 + $0x410] sm:$0xff]  ;;  %v840_v61 = vpack.c.bf16 %v618_v21, %v612_v55  ;;  %v673_v55 = vld [vmem:[%s7577_s15 + $0xba8] sm:$0xff]  ;;  %v679_v21 = vld [vmem:[%s7577_s15 + $0xbd8] sm:$0xff] }
 0x16f   : > { %v748_v62 = vpack.c.bf16 %v430_v57, %v424_v56  ;;  %v485_v56 = vld [vmem:[%s7577_s15 + $0x5c8] sm:$0xff]  ;;  %v491_v57 = vld [vmem:[%s7577_s15 + $0x5f8] sm:$0xff] }
 0x174   : > { %1365 = vmatmul.mubr.bf16.gmra.mrb[84].mxu1 %v810_v1  ;;  %v624_v1 = vld [vmem:[%s7577_s15 + $0xa20] sm:$0xff] }
 0x175   : > { %1815 = vmatmul.mubr.bf16.gmra.mrb[20].mxu0 %v718_v2  ;;  %1372 = vmatprep.mubr.bf16.mxu1 %v817_v3  ;;  %v630_v2 = vld [vmem:[%s7577_s15 + $0xa50] sm:$0xff]  ;;  %v436_v3 = vld [vmem:[%s7577_s15 + $0x440] sm:$0xff] }
 0x176   : > { %1822 = vmatprep.mubr.bf16.mxu0 %v725_v25  ;;  %v442_v25 = vld [vmem:[%s7577_s15 + $0x470] sm:$0xff]  ;;  %v846_v12 = vpack.c.bf16 %v630_v2, %v624_v1  ;;  %v672_v1 = vld [vmem:[%s7577_s15 + $0xba0] sm:$0xff] }
 0x177   : > { %v754_v14 = vpack.c.bf16 %v442_v25, %v436_v3  ;;  %v678_v2 = vld [vmem:[%s7577_s15 + $0xbd0] sm:$0xff]  ;;  %v484_v3 = vld [vmem:[%s7577_s15 + $0x5c0] sm:$0xff] }
 0x178   : > { %v490_v25 = vld [vmem:[%s7577_s15 + $0x5f0] sm:$0xff] }
 0x17c   : > { %1373 = vmatmul.mubr.bf16.gmra.mrb[88].mxu1 %v816_v15 }
 0x17d   : > { %1823 = vmatmul.mubr.bf16.gmra.mrb[24].mxu0 %v724_v16  ;;  %1380 = vmatprep.mubr.bf16.mxu1 %v823_v17  ;;  %v853_v16 = vpack.c.bf16 %v643_v6, %v637_v4  ;;  %v761_v17 = vpack.c.bf16 %v455_v8, %v449_v27  ;;  %v495_v4 = vld [vmem:[%s7577_s15 + $0x618] sm:$0xff]  ;;  %v501_v6 = vld [vmem:[%s7577_s15 + $0x648] sm:$0xff] }
 0x17e   : > { %1830 = vmatprep.mubr.bf16.mxu0 %v731_v18  ;;  %v497_v27 = vld [vmem:[%s7577_s15 + $0x628] sm:$0xff]  ;;  %v503_v8 = vld [vmem:[%s7577_s15 + $0x658] sm:$0xff] }
 0x184   : > { %1381 = vmatmul.mubr.bf16.gmra.mrb[92].mxu1 %v822_v28 }
 0x185   : > { %1831 = vmatmul.mubr.bf16.gmra.mrb[28].mxu0 %v730_v9  ;;  %1388 = vmatprep.mubr.bf16.mxu1 %v829_v30  ;;  %v852_v30 = vpack.c.bf16 %v642_v29, %v636_v19  ;;  %v785_v19 = vpack.c.bf16 %v503_v8, %v497_v27 }
 0x186   : > { %1838 = vmatprep.mubr.bf16.mxu0 %v737_v32  ;;  %v760_v32 = vpack.c.bf16 %v454_v22, %v448_v20  ;;  %v494_v20 = vld [vmem:[%s7577_s15 + $0x610] sm:$0xff]  ;;  %v500_v22 = vld [vmem:[%s7577_s15 + $0x640] sm:$0xff] }
 0x18c   : > { %1389 = vmatmul.mubr.bf16.gmra.mrb[96].mxu1 %v828_v42  ;;  %v661_v42 = vld [vmem:[%s7577_s15 + $0xb48] sm:$0xff] }
 0x18d   : > { %1839 = vmatmul.mubr.bf16.gmra.mrb[32].mxu0 %v736_v43  ;;  %1396 = vmatprep.mubr.bf16.mxu1 %v835_v11  ;;  %v667_v43 = vld [vmem:[%s7577_s15 + $0xb78] sm:$0xff]  ;;  %v473_v11 = vld [vmem:[%s7577_s15 + $0x568] sm:$0xff] }
 0x18e   : > { %1846 = vmatprep.mubr.bf16.mxu0 %v743_v44  ;;  %v479_v44 = vld [vmem:[%s7577_s15 + $0x598] sm:$0xff]  ;;  %v865_v37 = vpack.c.bf16 %v667_v43, %v661_v42  ;;  %v506_v42 = vld [vmem:[%s7577_s15 + $0x670] sm:$0xff]  ;;  %v512_v43 = vld [vmem:[%s7577_s15 + $0x6a0] sm:$0xff] }
 0x18f   : > { %v773_v49 = vpack.c.bf16 %v479_v44, %v473_v11  ;;  %v508_v11 = vld [vmem:[%s7577_s15 + $0x680] sm:$0xff]  ;;  %v514_v44 = vld [vmem:[%s7577_s15 + $0x6b0] sm:$0xff] }
 0x194   : > { %1397 = vmatmul.mubr.bf16.gmra.mrb[100].mxu1 %v834_v51  ;;  %v660_v51 = vld [vmem:[%s7577_s15 + $0xb40] sm:$0xff] }
 0x195   : > { %1847 = vmatmul.mubr.bf16.gmra.mrb[36].mxu0 %v742_v52  ;;  %1404 = vmatprep.mubr.bf16.mxu1 %v841_v53  ;;  %v666_v52 = vld [vmem:[%s7577_s15 + $0xb70] sm:$0xff]  ;;  %v472_v53 = vld [vmem:[%s7577_s15 + $0x560] sm:$0xff] }
 0x196   : > { %1854 = vmatprep.mubr.bf16.mxu0 %v749_v54  ;;  %v478_v54 = vld [vmem:[%s7577_s15 + $0x590] sm:$0xff]  ;;  %v864_v59 = vpack.c.bf16 %v666_v52, %v660_v51  ;;  %v788_v51 = vpack.c.bf16 %v512_v43, %v506_v42  ;;  %v790_v52 = vpack.c.bf16 %v514_v44, %v508_v11  ;;  %v555_v42 = vld [vmem:[%s7577_s15 + $0x7f8] sm:$0xff]  ;;  %v561_v43 = vld [vmem:[%s7577_s15 + $0x828] sm:$0xff] }
 0x197   : > { %v772_v60 = vpack.c.bf16 %v478_v54, %v472_v53  ;;  %v557_v11 = vld [vmem:[%s7577_s15 + $0x808] sm:$0xff]  ;;  %v563_v44 = vld [vmem:[%s7577_s15 + $0x838] sm:$0xff] }
 0x19c   : > { %1405 = vmatmul.mubr.bf16.gmra.mrb[104].mxu1 %v840_v61 }
 0x19d   : > { %1855 = vmatmul.mubr.bf16.gmra.mrb[40].mxu0 %v748_v62  ;;  %1412 = vmatprep.mubr.bf16.mxu1 %v847_v63  ;;  %v871_v62 = vpack.c.bf16 %v679_v21, %v673_v55  ;;  %v779_v63 = vpack.c.bf16 %v491_v57, %v485_v56  ;;  %v518_v56 = vld [vmem:[%s7577_s15 + $0x6d0] sm:$0xff]  ;;  %v524_v57 = vld [vmem:[%s7577_s15 + $0x700] sm:$0xff] }
 0x19e   : > { %1862 = vmatprep.mubr.bf16.mxu0 %v755_v0 }
 0x19f   : > { %v7883_v10 = vpop.f32.mrb[0].mxu1 }
 0x1a0   : > { %v1200_v5 = vpop.f32.mrb[1].mxu1 }
 0x1a1   : > { %v7885_v15 = vpop.f32.mrb[2].mxu1 }
 0x1a2   : > { %v1203_v18 = vpop.f32.mrb[3].mxu1 }
 0x1a3   : > { %v783_v18 = vpack.c.bf16 %v501_v6, %v495_v4 }
 0x1a4   : > { %1413 = vmatmul.mubr.bf16.gmra.mrb[108].mxu1 %v846_v12 }
 0x1a5   : > { %1863 = vmatmul.mubr.bf16.gmra.mrb[44].mxu0 %v754_v14  ;;  %1420 = vmatprep.mubr.bf16.mxu1 %v853_v16  ;;  %v870_v14 = vpack.c.bf16 %v678_v2, %v672_v1  ;;  %v778_v16 = vpack.c.bf16 %v490_v25, %v484_v3  ;;  %v794_v3 = vpack.c.bf16 %v524_v57, %v518_v56  ;;  %v556_v56 = vld [vmem:[%s7577_s15 + $0x800] sm:$0xff]  ;;  %v562_v57 = vld [vmem:[%s7577_s15 + $0x830] sm:$0xff] }
 0x1a6   : > { %1870 = vmatprep.mubr.bf16.mxu0 %v761_v17 }
 0x1a7   : > { %v7895_v28 = vpop.f32.mrb[4].mxu1 }
 0x1a8   : > { %v1208_v9 = vpop.f32.mrb[5].mxu1 }
 0x1a9   : > { %v7897_v34 = vpop.f32.mrb[6].mxu1  ;;  %v509_v9 = vld [vmem:[%s7577_s15 + $0x688] sm:$0xff] }
 0x1aa   : > { %v1211_v38 = vpop.f32.mrb[7].mxu1 }
 0x1ab   : > { %v784_v38 = vpack.c.bf16 %v502_v24, %v496_v31 }
 0x1ac   : > { %1421 = vmatmul.mubr.bf16.gmra.mrb[112].mxu1 %v852_v30  ;;  %v515_v30 = vld [vmem:[%s7577_s15 + $0x6b8] sm:$0xff] }
 0x1ad   : > { %1871 = vmatmul.mubr.bf16.gmra.mrb[48].mxu0 %v760_v32  ;;  %1428 = vmatprep.mubr.bf16.mxu1 %v859_v36  ;;  %v791_v40 = vpack.c.bf16 %v515_v30, %v509_v9 }
 0x1ae   : > { %1878 = vmatprep.mubr.bf16.mxu0 %v767_v33  ;;  %v782_v33 = vpack.c.bf16 %v500_v22, %v494_v20  ;;  %v545_v20 = vld [vmem:[%s7577_s15 + $0x7a8] sm:$0xff]  ;;  %v551_v22 = vld [vmem:[%s7577_s15 + $0x7d8] sm:$0xff] }
 0x1af   : > { %v7907_v45 = vpop.f32.mrb[8].mxu1 }
 0x1b0   : > { %v1216_v13 = vpop.f32.mrb[9].mxu1 }
 0x1b1   : > { %v7909_v48 = vpop.f32.mrb[10].mxu1  ;;  %v519_v13 = vld [vmem:[%s7577_s15 + $0x6d8] sm:$0xff] }
 0x1b2   : > { %v1219_v50 = vpop.f32.mrb[11].mxu1 }
 0x1b4   : > { %1429 = vmatmul.mubr.bf16.gmra.mrb[116].mxu1 %v858_v46  ;;  %v525_v46 = vld [vmem:[%s7577_s15 + $0x708] sm:$0xff] }
 0x1b5   : > { %1879 = vmatmul.mubr.bf16.gmra.mrb[52].mxu0 %v766_v47  ;;  %1436 = vmatprep.mubr.bf16.mxu1 %v865_v37  ;;  %v521_v47 = vld [vmem:[%s7577_s15 + $0x6e8] sm:$0xff]  ;;  %v527_v37 = vld [vmem:[%s7577_s15 + $0x718] sm:$0xff]  ;;  %v795_v54 = vpack.c.bf16 %v525_v46, %v519_v13 }
 0x1b6   : > { %1886 = vmatprep.mubr.bf16.mxu0 %v773_v49  ;;  %v797_v55 = vpack.c.bf16 %v527_v37, %v521_v47 }
 0x1b7   : > { %v7919_v23 = vpop.f32.mrb[12].mxu1 }
 0x1b8   : > { %v1224_v58 = vpop.f32.mrb[13].mxu1 }
 0x1b9   : > { %v7921_v61 = vpop.f32.mrb[14].mxu1  ;;  %v520_v58 = vld [vmem:[%s7577_s15 + $0x6e0] sm:$0xff] }
 0x1ba   : > { %v1227_v0 = vpop.f32.mrb[15].mxu1 }
 0x1bb   : > { %v539_v0 = vld [vmem:[%s7577_s15 + $0x778] sm:$0xff] }
 0x1bc   : > { %1437 = vmatmul.mubr.bf16.gmra.mrb[120].mxu1 %v864_v59  ;;  %v526_v59 = vld [vmem:[%s7577_s15 + $0x710] sm:$0xff] }
 0x1bd   : > { %1887 = vmatmul.mubr.bf16.gmra.mrb[56].mxu0 %v772_v60  ;;  %1444 = vmatprep.mubr.bf16.mxu1 %v871_v62  ;;  %v531_v60 = vld [vmem:[%s7577_s15 + $0x738] sm:$0xff]  ;;  %v537_v62 = vld [vmem:[%s7577_s15 + $0x768] sm:$0xff]  ;;  %v796_v25 = vpack.c.bf16 %v526_v59, %v520_v58 }
 0x1be   : > { %1894 = vmatprep.mubr.bf16.mxu0 %v779_v63  ;;  %v533_v63 = vld [vmem:[%s7577_s15 + $0x748] sm:$0xff]  ;;  %v801_v6 = vpack.c.bf16 %v537_v62, %v531_v60  ;;  %v567_v58 = vld [vmem:[%s7577_s15 + $0x858] sm:$0xff] }
 0x1bf   : > { %v7931_v5 = vpop.f32.mrb[16].mxu1  ;;  %v803_v27 = vpack.c.bf16 %v539_v0, %v533_v63  ;;  %v573_v59 = vld [vmem:[%s7577_s15 + $0x888] sm:$0xff]  ;;  %v575_v62 = vld [vmem:[%s7577_s15 + $0x898] sm:$0xff] }
 0x1c0   : > { %v1232_v12 = vpop.f32.mrb[17].mxu1  ;;  %v569_v60 = vld [vmem:[%s7577_s15 + $0x868] sm:$0xff] }
 0x1c1   : > { %v7933_v17 = vpop.f32.mrb[18].mxu1  ;;  %v530_v12 = vld [vmem:[%s7577_s15 + $0x730] sm:$0xff] }
 0x1c2   : > { %v1235_v29 = vpop.f32.mrb[19].mxu1 }
 0x1c3   : > { %v549_v29 = vld [vmem:[%s7577_s15 + $0x7c8] sm:$0xff] }
 0x1c4   : > { %1445 = vmatmul.mubr.bf16.gmra.mrb[124].mxu1 %v870_v14  ;;  %v536_v14 = vld [vmem:[%s7577_s15 + $0x760] sm:$0xff] }
 0x1c5   : > { %1895 = vmatmul.mubr.bf16.gmra.mrb[60].mxu0 %v778_v16  ;;  %1613 = vmatprep.mubr.bf16.mxu1 %v783_v18  ;;  %v532_v16 = vld [vmem:[%s7577_s15 + $0x740] sm:$0xff]  ;;  %v538_v18 = vld [vmem:[%s7577_s15 + $0x770] sm:$0xff]  ;;  %v800_v7 = vpack.c.bf16 %v536_v14, %v530_v12 }
 0x1c6   : > { %1902 = vmatprep.mubr.bf16.mxu0 %v785_v19  ;;  %v543_v19 = vld [vmem:[%s7577_s15 + $0x798] sm:$0xff]  ;;  %v802_v26 = vpack.c.bf16 %v538_v18, %v532_v16  ;;  %v566_v12 = vld [vmem:[%s7577_s15 + $0x850] sm:$0xff]  ;;  %v572_v14 = vld [vmem:[%s7577_s15 + $0x880] sm:$0xff] }
 0x1c7   : > { %v7943_v32 = vpop.f32.mrb[20].mxu1  ;;  %v807_v30 = vpack.c.bf16 %v549_v29, %v543_v19  ;;  %v568_v16 = vld [vmem:[%s7577_s15 + $0x860] sm:$0xff]  ;;  %v574_v18 = vld [vmem:[%s7577_s15 + $0x890] sm:$0xff]  ;;  %v579_v19 = vld [vmem:[%s7577_s15 + $0x8b8] sm:$0xff] }
 0x1c8   : > { %v1240_v36 = vpop.f32.mrb[21].mxu1  ;;  %v585_v29 = vld [vmem:[%s7577_s15 + $0x8e8] sm:$0xff] }
 0x1c9   : > { %v7945_v39 = vpop.f32.mrb[22].mxu1  ;;  %v809_v36 = vpack.c.bf16 %v551_v22, %v545_v20  ;;  %v581_v20 = vld [vmem:[%s7577_s15 + $0x8c8] sm:$0xff]  ;;  %v587_v22 = vld [vmem:[%s7577_s15 + $0x8f8] sm:$0xff] }
 0x1ca   : > { %v1243_v41 = vpop.f32.mrb[23].mxu1 }
 0x1cb   : > { %v550_v41 = vld [vmem:[%s7577_s15 + $0x7d0] sm:$0xff] }
 0x1cc   : > { %1614 = vmatmul.mubr.bf16.vlgmr.msra.gmra.mrb[64].mxu1 %v782_v33 }
 0x1cd   : > { %1903 = vmatmul.mubr.bf16.gmra.mrb[64].mxu0 %v784_v38  ;;  %1621 = vmatprep.mubr.bf16.mxu1 %v789_v35  ;;  %v542_v38 = vld [vmem:[%s7577_s15 + $0x790] sm:$0xff]  ;;  %v548_v35 = vld [vmem:[%s7577_s15 + $0x7c0] sm:$0xff] }
 0x1ce   : > { %1910 = vmatprep.mubr.bf16.mxu0 %v791_v40  ;;  %v544_v40 = vld [vmem:[%s7577_s15 + $0x7a0] sm:$0xff]  ;;  %v806_v47 = vpack.c.bf16 %v548_v35, %v542_v38  ;;  %v827_v38 = vpack.c.bf16 %v587_v22, %v581_v20  ;;  %v602_v20 = vld [vmem:[%s7577_s15 + $0x970] sm:$0xff] }
 0x1cf   : > { %v7955_v49 = vpop.f32.mrb[24].mxu1  ;;  %v808_v37 = vpack.c.bf16 %v550_v41, %v544_v40  ;;  %v578_v40 = vld [vmem:[%s7577_s15 + $0x8b0] sm:$0xff]  ;;  %v584_v41 = vld [vmem:[%s7577_s15 + $0x8e0] sm:$0xff] }
 0x1d0   : > { %v1248_v50 = vpop.f32.mrb[25].mxu1  ;;  %v608_v22 = vld [vmem:[%s7577_s15 + $0x9a0] sm:$0xff] }
 0x1d1   : > { %v7957_v53 = vpop.f32.mrb[26].mxu1 }
 0x1d2   : > { %v1251_v21 = vpop.f32.mrb[27].mxu1 }
 0x1d3   : > { %v560_v21 = vld [vmem:[%s7577_s15 + $0x820] sm:$0xff] }
 0x1d4   : > { %1622 = vmatmul.mubr.bf16.gmra.mrb[68].mxu1 %v788_v51  ;;  %v813_v51 = vpack.c.bf16 %v561_v43, %v555_v42  ;;  %v580_v42 = vld [vmem:[%s7577_s15 + $0x8c0] sm:$0xff]  ;;  %v586_v43 = vld [vmem:[%s7577_s15 + $0x8f0] sm:$0xff] }
 0x1d5   : > { %1911 = vmatmul.mubr.bf16.gmra.mrb[68].mxu0 %v790_v52  ;;  %1629 = vmatprep.mubr.bf16.mxu1 %v795_v54  ;;  %v815_v52 = vpack.c.bf16 %v563_v44, %v557_v11  ;;  %v591_v11 = vld [vmem:[%s7577_s15 + $0x918] sm:$0xff]  ;;  %v597_v44 = vld [vmem:[%s7577_s15 + $0x948] sm:$0xff] }
 0x1d6   : > { %1918 = vmatprep.mubr.bf16.mxu0 %v797_v55  ;;  %v554_v55 = vld [vmem:[%s7577_s15 + $0x7f0] sm:$0xff] }
 0x1d7   : > { %v7967_v1 = vpop.f32.mrb[28].mxu1 }
 0x1d8   : > { %v1256_v2 = vpop.f32.mrb[29].mxu1 }
 0x1d9   : > { %v7969_v4 = vpop.f32.mrb[30].mxu1  ;;  %v812_v2 = vpack.c.bf16 %v560_v21, %v554_v55  ;;  %v831_v21 = vpack.c.bf16 %v597_v44, %v591_v11 }
 0x1da   : > { %v1259_v8 = vpop.f32.mrb[31].mxu1 }
 0x1dc   : > { %1630 = vmatmul.mubr.bf16.gmra.mrb[72].mxu1 %v794_v3  ;;  %v814_v3 = vpack.c.bf16 %v562_v57, %v556_v56 }
 0x1dd   : > { %1919 = vmatmul.mubr.bf16.gmra.mrb[72].mxu0 %v796_v25  ;;  %1637 = vmatprep.mubr.bf16.mxu1 %v801_v6  ;;  %v819_v6 = vpack.c.bf16 %v573_v59, %v567_v58  ;;  %v590_v58 = vld [vmem:[%s7577_s15 + $0x910] sm:$0xff]  ;;  %v596_v59 = vld [vmem:[%s7577_s15 + $0x940] sm:$0xff] }
 0x1de   : > { %1926 = vmatprep.mubr.bf16.mxu0 %v803_v27  ;;  %v821_v27 = vpack.c.bf16 %v575_v62, %v569_v60  ;;  %v592_v60 = vld [vmem:[%s7577_s15 + $0x920] sm:$0xff]  ;;  %v598_v62 = vld [vmem:[%s7577_s15 + $0x950] sm:$0xff] }
 0x1df   : > { %v7979_v31 = vpop.f32.mrb[32].mxu1 }
 0x1e0   : > { %v1264_v24 = vpop.f32.mrb[33].mxu1 }
 0x1e1   : > { %v7981_v9 = vpop.f32.mrb[34].mxu1 }
 0x1e2   : > { %v1267_v33 = vpop.f32.mrb[35].mxu1 }
 0x1e3   : > { %v825_v33 = vpack.c.bf16 %v585_v29, %v579_v19 }
 0x1e4   : > { %1638 = vmatmul.mubr.bf16.gmra.mrb[76].mxu1 %v800_v7 }
 0x1e5   : > { %1927 = vmatmul.mubr.bf16.gmra.mrb[76].mxu0 %v802_v26  ;;  %1645 = vmatprep.mubr.bf16.mxu1 %v807_v30  ;;  %v818_v26 = vpack.c.bf16 %v572_v14, %v566_v12  ;;  %v820_v30 = vpack.c.bf16 %v574_v18, %v568_v16  ;;  %v830_v12 = vpack.c.bf16 %v596_v59, %v590_v58  ;;  %v629_v58 = vld [vmem:[%s7577_s15 + $0xa48] sm:$0xff]  ;;  %v635_v59 = vld [vmem:[%s7577_s15 + $0xa78] sm:$0xff] }
 0x1e6   : > { %1934 = vmatprep.mubr.bf16.mxu0 %v809_v36  ;;  %v832_v14 = vpack.c.bf16 %v598_v62, %v592_v60 }
 0x1e7   : > { %v7991_v13 = vpop.f32.mrb[36].mxu1 }
 0x1e8   : > { %v1272_v46 = vpop.f32.mrb[37].mxu1 }
 0x1e9   : > { %v7993_v50 = vpop.f32.mrb[38].mxu1  ;;  %v593_v46 = vld [vmem:[%s7577_s15 + $0x928] sm:$0xff] }
 0x1ea   : > { %v1275_v54 = vpop.f32.mrb[39].mxu1 }
 0x1eb   : > { %v826_v54 = vpack.c.bf16 %v586_v43, %v580_v42  ;;  %v836_v42 = vpack.c.bf16 %v608_v22, %v602_v20  ;;  %v639_v20 = vld [vmem:[%s7577_s15 + $0xa98] sm:$0xff]  ;;  %v645_v22 = vld [vmem:[%s7577_s15 + $0xac8] sm:$0xff] }
 0x1ec   : > { %1646 = vmatmul.mubr.bf16.gmra.mrb[80].mxu1 %v806_v47  ;;  %v599_v47 = vld [vmem:[%s7577_s15 + $0x958] sm:$0xff] }
 0x1ed   : > { %1935 = vmatmul.mubr.bf16.gmra.mrb[80].mxu0 %v808_v37  ;;  %1653 = vmatprep.mubr.bf16.mxu1 %v813_v51  ;;  %v833_v56 = vpack.c.bf16 %v599_v47, %v593_v46 }
 0x1ee   : > { %1942 = vmatprep.mubr.bf16.mxu0 %v815_v52  ;;  %v824_v52 = vpack.c.bf16 %v584_v41, %v578_v40 }
 0x1ef   : > { %v8003_v63 = vpop.f32.mrb[40].mxu1 }
 0x1f0   : > { %v1280_v0 = vpop.f32.mrb[41].mxu1 }
 0x1f1   : > { %v8005_v25 = vpop.f32.mrb[42].mxu1  ;;  %v603_v0 = vld [vmem:[%s7577_s15 + $0x978] sm:$0xff] }
 0x1f2   : > { %v1283_v8 = vpop.f32.mrb[43].mxu1 }
 0x1f4   : > { %1654 = vmatmul.mubr.bf16.gmra.mrb[84].mxu1 %v812_v2  ;;  %v609_v2 = vld [vmem:[%s7577_s15 + $0x9a8] sm:$0xff] }
 0x1f5   : > { %1943 = vmatmul.mubr.bf16.gmra.mrb[84].mxu0 %v814_v3  ;;  %1661 = vmatprep.mubr.bf16.mxu1 %v819_v6  ;;  %v605_v3 = vld [vmem:[%s7577_s15 + $0x988] sm:$0xff]  ;;  %v611_v6 = vld [vmem:[%s7577_s15 + $0x9b8] sm:$0xff]  ;;  %v837_v18 = vpack.c.bf16 %v609_v2, %v603_v0 }
 0x1f6   : > { %1950 = vmatprep.mubr.bf16.mxu0 %v821_v27  ;;  %v839_v19 = vpack.c.bf16 %v611_v6, %v605_v3 }
 0x1f7   : > { %v8015_v24 = vpop.f32.mrb[44].mxu1 }
 0x1f8   : > { %v1288_v7 = vpop.f32.mrb[45].mxu1 }
 0x1f9   : > { %v8017_v36 = vpop.f32.mrb[46].mxu1  ;;  %v604_v7 = vld [vmem:[%s7577_s15 + $0x980] sm:$0xff] }
 0x1fa   : > { %v1291_v35 = vpop.f32.mrb[47].mxu1 }
 0x1fb   : > { %v623_v35 = vld [vmem:[%s7577_s15 + $0xa18] sm:$0xff] }
 0x1fc   : > { %1662 = vmatmul.mubr.bf16.gmra.mrb[88].mxu1 %v818_v26  ;;  %v610_v26 = vld [vmem:[%s7577_s15 + $0x9b0] sm:$0xff] }
 0x1fd   : > { %1951 = vmatmul.mubr.bf16.gmra.mrb[88].mxu0 %v820_v30  ;;  %1669 = vmatprep.mubr.bf16.mxu1 %v825_v33  ;;  %v615_v30 = vld [vmem:[%s7577_s15 + $0x9d8] sm:$0xff]  ;;  %v621_v33 = vld [vmem:[%s7577_s15 + $0xa08] sm:$0xff]  ;;  %v838_v43 = vpack.c.bf16 %v610_v26, %v604_v7 }
 0x1fe   : > { %1958 = vmatprep.mubr.bf16.mxu0 %v827_v38  ;;  %v617_v38 = vld [vmem:[%s7577_s15 + $0x9e8] sm:$0xff]  ;;  %v843_v44 = vpack.c.bf16 %v621_v33, %v615_v30  ;;  %v647_v26 = vld [vmem:[%s7577_s15 + $0xad8] sm:$0xff] }
 0x1ff   : > { %v8027_v37 = vpop.f32.mrb[48].mxu1  ;;  %v845_v46 = vpack.c.bf16 %v623_v35, %v617_v38  ;;  %v641_v7 = vld [vmem:[%s7577_s15 + $0xaa8] sm:$0xff] }
 0x200   : > { %v1296_v51 = vpop.f32.mrb[49].mxu1 }
 0x201   : > { %v8029_v55 = vpop.f32.mrb[50].mxu1  ;;  %v614_v51 = vld [vmem:[%s7577_s15 + $0x9d0] sm:$0xff] }
 0x202   : > { %v1299_v57 = vpop.f32.mrb[51].mxu1 }
 0x203   : > { %v633_v57 = vld [vmem:[%s7577_s15 + $0xa68] sm:$0xff] }
 0x204   : > { %1670 = vmatmul.mubr.bf16.gmra.mrb[92].mxu1 %v824_v52  ;;  %v620_v52 = vld [vmem:[%s7577_s15 + $0xa00] sm:$0xff] }
 0x205   : > { %1959 = vmatmul.mubr.bf16.gmra.mrb[92].mxu0 %v826_v54  ;;  %1677 = vmatprep.mubr.bf16.mxu1 %v831_v21  ;;  %v616_v54 = vld [vmem:[%s7577_s15 + $0x9e0] sm:$0xff]  ;;  %v622_v21 = vld [vmem:[%s7577_s15 + $0xa10] sm:$0xff]  ;;  %v842_v0 = vpack.c.bf16 %v620_v52, %v614_v51 }
 0x206   : > { %1966 = vmatprep.mubr.bf16.mxu0 %v833_v56  ;;  %v627_v56 = vld [vmem:[%s7577_s15 + $0xa38] sm:$0xff]  ;;  %v844_v2 = vpack.c.bf16 %v622_v21, %v616_v54  ;;  %v638_v21 = vld [vmem:[%s7577_s15 + $0xa90] sm:$0xff] }
 0x207   : > { %v8039_v27 = vpop.f32.mrb[52].mxu1  ;;  %v849_v6 = vpack.c.bf16 %v633_v57, %v627_v56  ;;  %v644_v56 = vld [vmem:[%s7577_s15 + $0xac0] sm:$0xff] }
 0x208   : > { %v1304_v8 = vpop.f32.mrb[53].mxu1  ;;  %v640_v57 = vld [vmem:[%s7577_s15 + $0xaa0] sm:$0xff] }
 0x209   : > { %v8041_v16 = vpop.f32.mrb[54].mxu1  ;;  %v851_v8 = vpack.c.bf16 %v635_v59, %v629_v58  ;;  %v646_v58 = vld [vmem:[%s7577_s15 + $0xad0] sm:$0xff]  ;;  %v651_v59 = vld [vmem:[%s7577_s15 + $0xaf8] sm:$0xff] }
 0x20a   : > { %v1307_v29 = vpop.f32.mrb[55].mxu1 }
 0x20b   : > { %v634_v29 = vld [vmem:[%s7577_s15 + $0xa70] sm:$0xff] }
 0x20c   : > { %1678 = vmatmul.mubr.bf16.gmra.mrb[96].mxu1 %v830_v12 }
 0x20d   : > { %1967 = vmatmul.mubr.bf16.gmra.mrb[96].mxu0 %v832_v14  ;;  %1685 = vmatprep.mubr.bf16.mxu1 %v837_v18  ;;  %v626_v14 = vld [vmem:[%s7577_s15 + $0xa30] sm:$0xff]  ;;  %v632_v18 = vld [vmem:[%s7577_s15 + $0xa60] sm:$0xff] }
 0x20e   : > { %1974 = vmatprep.mubr.bf16.mxu0 %v839_v19  ;;  %v628_v19 = vld [vmem:[%s7577_s15 + $0xa40] sm:$0xff]  ;;  %v848_v35 = vpack.c.bf16 %v632_v18, %v626_v14  ;;  %v854_v14 = vpack.c.bf16 %v644_v56, %v638_v21  ;;  %v856_v18 = vpack.c.bf16 %v646_v58, %v640_v57 }
 0x20f   : > { %v8051_v40 = vpop.f32.mrb[56].mxu1 }
 0x210   : > { %v1312_v41 = vpop.f32.mrb[57].mxu1 }
 0x211   : > { %v8053_v11 = vpop.f32.mrb[58].mxu1  ;;  %v850_v41 = vpack.c.bf16 %v634_v29, %v628_v19 }
 0x212   : > { %v1315_v47 = vpop.f32.mrb[59].mxu1 }
 0x214   : > { %1686 = vmatmul.mubr.bf16.gmra.mrb[100].mxu1 %v836_v42 }
 0x215   : > { %1975 = vmatmul.mubr.bf16.gmra.mrb[100].mxu0 %v838_v43  ;;  %1693 = vmatprep.mubr.bf16.mxu1 %v843_v44  ;;  %v8076_v43 = vld [vmem:[#allocation7] ss:$0 sm:$0xff]  ;;  %v855_v44 = vpack.c.bf16 %v645_v22, %v639_v20 }
 0x216   : > { %1982 = vmatprep.mubr.bf16.mxu0 %v845_v46  ;;  %v857_v46 = vpack.c.bf16 %v647_v26, %v641_v7 }
 0x217   : > { %v8063_v60 = vpop.f32.mrb[60].mxu1 }
 0x218   : > { %v1320_v62 = vpop.f32.mrb[61].mxu1 }
 0x219   : > { %v8065_v3 = vpop.f32.mrb[62].mxu1  ;;  %v657_v62 = vld [vmem:[%s7577_s15 + $0xb28] sm:$0xff] }
 0x21a   : > { %v1323_v12 = vpop.f32.mrb[63].mxu1  ;;  %v861_v29 = vpack.c.bf16 %v657_v62, %v651_v59 }
 0x21c   : > { %1694 = vmatmul.mubr.bf16.gmra.mrb[104].mxu1 %v842_v0  ;;  %v653_v0 = vld [vmem:[%s7577_s15 + $0xb08] sm:$0xff] }
 0x21d   : > { %1983 = vmatmul.mubr.bf16.gmra.mrb[104].mxu0 %v844_v2  ;;  %1701 = vmatprep.mubr.bf16.mxu1 %v849_v6 }
 0x21e   : > { %1990 = vmatprep.mubr.bf16.mxu0 %v851_v8 }
 0x220   : > { %v1776_v30 = vpop.f32.mrb[0].mxu0 }
 0x221   : > { %v6364_v33 = vadd.f32 %v1776_v30, %v7883_v10  ;;  %v1778_v38 = vpop.f32.mrb[1].mxu0 }
 0x222   : > { %v1779_v42 = vpop.f32.mrb[2].mxu0  ;;  %v656_v38 = vld [vmem:[%s7577_s15 + $0xb20] sm:$0xff] }
 0x223   : > { %v2032_v47 = vmul.f32 2.0, %v6364_v33  ;;  %v6365_v51 = vadd.f32 %v1779_v42, %v7885_v15  ;;  %v1781_v52 = vpop.f32.mrb[3].mxu0  ;;  %v659_v15 = vld [vmem:[%s7577_s15 + $0xb38] sm:$0xff]  ;;  %v650_v33 = vld [vmem:[%s7577_s15 + $0xaf0] sm:$0xff] }
 0x224   : > { %1702 = vmatmul.mubr.bf16.gmra.mrb[108].mxu1 %v848_v35  ;;  %v863_v20 = vpack.c.bf16 %v659_v15, %v653_v0  ;;  %v652_v35 = vld [vmem:[%s7577_s15 + $0xb00] sm:$0xff]  ;;  %v663_v42 = vld [vmem:[%s7577_s15 + $0xb58] sm:$0xff]  ;;  %v860_v21 = vpack.c.bf16 %v656_v38, %v650_v33 }
 0x225   : > { %v2033_v10 = vmul.f32 2.0, %v6365_v51  ;;  %1991 = vmatmul.mubr.bf16.gmra.mrb[108].mxu0 %v850_v41  ;;  %v8080_v54 = vsub.f32 %v8076_v43, %v2032_v47  ;;  %1709 = vmatprep.mubr.bf16.mxu1 %v855_v44  ;;  %v658_v41 = vld [vmem:[%s7577_s15 + $0xb30] sm:$0xff]  ;;  %v665_v44 = vld [vmem:[%s7577_s15 + $0xb68] sm:$0xff] }
 0x226   : > { %1998 = vmatprep.mubr.bf16.mxu0 %v857_v46  ;;  %v671_v46 = vld [vmem:[%s7577_s15 + $0xb98] sm:$0xff]  ;;  %v862_v56 = vpack.c.bf16 %v658_v41, %v652_v35 }
 0x227   : > { %2168 = vmin.xlane.f32.xlu0 %v8080_v54  ;;  %v8093_v12 = vsub.f32 %v8076_v43, %v2033_v10  ;;  %v869_v59 = vpack.c.bf16 %v671_v46, %v665_v44 }
 0x228   : > { %v1784_v2 = vpop.f32.mrb[4].mxu0 }
 0x229   : > { %v6366_v6 = vadd.f32 %v1784_v2, %v7895_v28  ;;  %v1786_v8 = vpop.f32.mrb[5].mxu0 }
 0x22a   : > { %v1787_v19 = vpop.f32.mrb[6].mxu0  ;;  %v668_v8 = vld [vmem:[%s7577_s15 + $0xb80] sm:$0xff] }
 0x22b   : > { %v2034_v22 = vmul.f32 2.0, %v6366_v6  ;;  %v6367_v7 = vadd.f32 %v1787_v19, %v7897_v34  ;;  %v1789_v28 = vpop.f32.mrb[7].mxu0  ;;  %2170 = vmin.xlane.f32.xlu0 %v8093_v12  ;;  %v669_v34 = vld [vmem:[%s7577_s15 + $0xb88] sm:$0xff]  ;;  %v662_v6 = vld [vmem:[%s7577_s15 + $0xb50] sm:$0xff]  ;;  %v675_v19 = vld [vmem:[%s7577_s15 + $0xbb8] sm:$0xff] }
 0x22c   : > { %1710 = vmatmul.mubr.bf16.gmra.mrb[112].mxu1 %v854_v14  ;;  %v867_v58 = vpack.c.bf16 %v669_v34, %v663_v42  ;;  %v664_v14 = vld [vmem:[%s7577_s15 + $0xb60] sm:$0xff]  ;;  %v866_v33 = vpack.c.bf16 %v668_v8, %v662_v6 }
 0x22d   : > { %v2035_v26 = vmul.f32 2.0, %v6367_v7  ;;  %1999 = vmatmul.mubr.bf16.gmra.mrb[112].mxu0 %v856_v18  ;;  %v8098_v30 = vsub.f32 %v8076_v43, %v2034_v22  ;;  %1717 = vmatprep.mubr.bf16.mxu1 %v861_v29  ;;  %v670_v18 = vld [vmem:[%s7577_s15 + $0xb90] sm:$0xff]  ;;  %v681_v29 = vld [vmem:[%s7577_s15 + $0xbe8] sm:$0xff]  ;;  %v683_v22 = vld [vmem:[%s7577_s15 + $0xbf8] sm:$0xff] }
 0x22e   : > { %2006 = vmatprep.mubr.bf16.mxu0 %v863_v20  ;;  %v677_v20 = vld [vmem:[%s7577_s15 + $0xbc8] sm:$0xff]  ;;  %v868_v38 = vpack.c.bf16 %v670_v18, %v664_v14  ;;  %v873_v41 = vpack.c.bf16 %v681_v29, %v675_v19 }
 0x22f   : > { %2172 = vmin.xlane.f32.xlu1 %v8098_v30  ;;  %v8111_v10 = vsub.f32 %v8076_v43, %v2035_v26  ;;  %v875_v42 = vpack.c.bf16 %v683_v22, %v677_v20 }
 0x230   : > { %v1792_v47 = vpop.f32.mrb[8].mxu0 }
 0x231   : > { %v6368_v51 = vadd.f32 %v1792_v47, %v7907_v45  ;;  %v1794_v52 = vpop.f32.mrb[9].mxu0 }
 0x232   : > { %v1795_v57 = vpop.f32.mrb[10].mxu0  ;;  %v680_v52 = vld [vmem:[%s7577_s15 + $0xbe0] sm:$0xff] }
 0x233   : > { %v2036_v62 = vmul.f32 2.0, %v6368_v51  ;;  %v6369_v0 = vadd.f32 %v1795_v57, %v7909_v48  ;;  %v1797_v15 = vpop.f32.mrb[11].mxu0  ;;  %2174 = vmin.xlane.f32.xlu1 %v8111_v10  ;;  %v674_v51 = vld [vmem:[%s7577_s15 + $0xbb0] sm:$0xff] }
 0x234   : > { %1718 = vmatmul.mubr.bf16.gmra.mrb[116].mxu1 %v860_v21  ;;  %v676_v21 = vld [vmem:[%s7577_s15 + $0xbc0] sm:$0xff] }
 0x235   : > { %v2037_v45 = vmul.f32 2.0, %v6369_v0  ;;  %2007 = vmatmul.mubr.bf16.gmra.mrb[116].mxu0 %v862_v56  ;;  %v8116_v2 = vsub.f32 %v8076_v43, %v2036_v62  ;;  %1725 = vmatprep.mubr.bf16.mxu1 %v867_v58  ;;  %v682_v56 = vld [vmem:[%s7577_s15 + $0xbf0] sm:$0xff]  ;;  %v872_v62 = vpack.c.bf16 %v680_v52, %v674_v51 }
 0x236   : > { %2014 = vmatprep.mubr.bf16.mxu0 %v869_v59  ;;  %v874_v0 = vpack.c.bf16 %v682_v56, %v676_v21 }
 0x237   : > { %2176 = vmin.xlane.f32.xlu0 %v8116_v2  ;;  %v8125_v48 = vsub.f32 %v8076_v43, %v2037_v45 }
 0x238   : > { %v1800_v7 = vpop.f32.mrb[12].mxu0 }
 0x239   : > { %v6370_v28 = vadd.f32 %v1800_v7, %v7919_v23  ;;  %v1802_v26 = vpop.f32.mrb[13].mxu0  ;;  %2178 = vmin.xlane.f32.xlu1 %v8125_v48 }
 0x23a   : > { %v1803_v35 = vpop.f32.mrb[14].mxu0 }
 0x23b   : > { %v2038_v34 = vmul.f32 2.0, %v6370_v28  ;;  %v6371_v44 = vadd.f32 %v1803_v35, %v7921_v61  ;;  %v1805_v46 = vpop.f32.mrb[15].mxu0 }
 0x23c   : > { %1726 = vmatmul.mubr.bf16.gmra.mrb[120].mxu1 %v866_v33 }
 0x23d   : > { %v2039_v47 = vmul.f32 2.0, %v6371_v44  ;;  %2015 = vmatmul.mubr.bf16.gmra.mrb[120].mxu0 %v868_v38  ;;  %v8134_v23 = vsub.f32 %v8076_v43, %v2038_v34  ;;  %1733 = vmatprep.mubr.bf16.mxu1 %v873_v41 }
 0x23e   : > { %2022 = vmatprep.mubr.bf16.mxu0 %v875_v42 }
 0x23f   : > { %2180 = vmin.xlane.f32.xlu0 %v8134_v23  ;;  %v8142_v57 = vsub.f32 %v8076_v43, %v2039_v47 }
 0x240   : > { %v1808_v58 = vpop.f32.mrb[16].mxu0 }
 0x241   : > { %v6372_v61 = vadd.f32 %v1808_v58, %v7931_v5  ;;  %v1810_v59 = vpop.f32.mrb[17].mxu0  ;;  %2182 = vmin.xlane.f32.xlu1 %v8142_v57 }
 0x242   : > { %v1811_v15 = vpop.f32.mrb[18].mxu0 }
 0x243   : > { %v2040_v45 = vmul.f32 2.0, %v6372_v61  ;;  %v6373_v6 = vadd.f32 %v1811_v15, %v7933_v17  ;;  %v1813_v8 = vpop.f32.mrb[19].mxu0 }
 0x244   : > { %1734 = vmatmul.mubr.bf16.gmra.mrb[124].mxu1 %v872_v62 }
 0x245   : > { %v2041_v14 = vmul.f32 2.0, %v6373_v6  ;;  %2023 = vmatmul.mubr.bf16.gmra.mrb[124].mxu0 %v874_v0  ;;  %v8148_v18 = vsub.f32 %v8076_v43, %v2040_v45 }
 0x247   : > { %2184 = vmin.xlane.f32.xlu0 %v8148_v18  ;;  %v8152_v5 = vsub.f32 %v8076_v43, %v2041_v14 }
 0x248   : > { %v1816_v19 = vpop.f32.mrb[20].mxu0 }
 0x249   : > { %v6374_v29 = vadd.f32 %v1816_v19, %v7943_v32  ;;  %v1818_v20 = vpop.f32.mrb[21].mxu0  ;;  %2186 = vmin.xlane.f32.xlu1 %v8152_v5 }
 0x24a   : > { %v1819_v22 = vpop.f32.mrb[22].mxu0 }
 0x24b   : > { %v2042_v17 = vmul.f32 2.0, %v6374_v29  ;;  %v6375_v7 = vadd.f32 %v1819_v22, %v7945_v39  ;;  %v1821_v28 = vpop.f32.mrb[23].mxu0 }
 0x24d   : > { %v2043_v26 = vmul.f32 2.0, %v6375_v7  ;;  %v8158_v33 = vsub.f32 %v8076_v43, %v2042_v17 }
 0x24f   : > { %2188 = vmin.xlane.f32.xlu0 %v8158_v33  ;;  %v8162_v38 = vsub.f32 %v8076_v43, %v2043_v26 }
 0x250   : > { %v1824_v35 = vpop.f32.mrb[24].mxu0 }
 0x251   : > { %v6376_v32 = vadd.f32 %v1824_v35, %v7955_v49  ;;  %v1826_v41 = vpop.f32.mrb[25].mxu0  ;;  %2190 = vmin.xlane.f32.xlu1 %v8162_v38 }
 0x252   : > { %v1827_v42 = vpop.f32.mrb[26].mxu0 }
 0x253   : > { %v2044_v34 = vmul.f32 2.0, %v6376_v32  ;;  %v6377_v39 = vadd.f32 %v1827_v42, %v7957_v53  ;;  %v1829_v44 = vpop.f32.mrb[27].mxu0 }
 0x255   : > { %v2045_v46 = vmul.f32 2.0, %v6377_v39  ;;  %v8168_v47 = vsub.f32 %v8076_v43, %v2044_v34 }
 0x257   : > { %2192 = vmin.xlane.f32.xlu0 %v8168_v47  ;;  %v8172_v51 = vsub.f32 %v8076_v43, %v2045_v46 }
 0x258   : > { %v1832_v52 = vpop.f32.mrb[28].mxu0 }
 0x259   : > { %v6378_v49 = vadd.f32 %v1832_v52, %v7967_v1  ;;  %v1834_v21 = vpop.f32.mrb[29].mxu0  ;;  %2194 = vmin.xlane.f32.xlu1 %v8172_v51 }
 0x25a   : > { %v1835_v56 = vpop.f32.mrb[30].mxu0 }
 0x25b   : > { %v2046_v58 = vmul.f32 2.0, %v6378_v49  ;;  %v6379_v53 = vadd.f32 %v1835_v56, %v7969_v4  ;;  %v1837_v61 = vpop.f32.mrb[31].mxu0 }
 0x25d   : > { %v2047_v59 = vmul.f32 2.0, %v6379_v53  ;;  %v8178_v62 = vsub.f32 %v8076_v43, %v2046_v58 }
 0x25f   : > { %2196 = vmin.xlane.f32.xlu0 %v8178_v62  ;;  %v8182_v0 = vsub.f32 %v8076_v43, %v2047_v59 }
 0x260   : > { %v1840_v15 = vpop.f32.mrb[32].mxu0 }
 0x261   : > { %v6380_v1 = vadd.f32 %v1840_v15, %v7979_v31  ;;  %v1842_v45 = vpop.f32.mrb[33].mxu0  ;;  %2198 = vmin.xlane.f32.xlu1 %v8182_v0 }
 0x262   : > { %v1843_v6 = vpop.f32.mrb[34].mxu0 }
 0x263   : > { %v2048_v8 = vmul.f32 2.0, %v6380_v1  ;;  %v6381_v4 = vadd.f32 %v1843_v6, %v7981_v9  ;;  %v1845_v14 = vpop.f32.mrb[35].mxu0 }
 0x265   : > { %v2049_v19 = vmul.f32 2.0, %v6381_v4  ;;  %v8188_v29 = vsub.f32 %v8076_v43, %v2048_v8 }
 0x267   : > { %2200 = vmin.xlane.f32.xlu0 %v8188_v29  ;;  %v8192_v20 = vsub.f32 %v8076_v43, %v2049_v19 }
 0x268   : > { %v1848_v22 = vpop.f32.mrb[36].mxu0 }
 0x269   : > { %v6382_v31 = vadd.f32 %v1848_v22, %v7991_v13  ;;  %v1850_v17 = vpop.f32.mrb[37].mxu0  ;;  %2202 = vmin.xlane.f32.xlu1 %v8192_v20 }
 0x26a   : > { %v1851_v7 = vpop.f32.mrb[38].mxu0 }
 0x26b   : > { %v2050_v28 = vmul.f32 2.0, %v6382_v31  ;;  %v6383_v9 = vadd.f32 %v1851_v7, %v7993_v50  ;;  %v1853_v26 = vpop.f32.mrb[39].mxu0 }
 0x26d   : > { %v2051_v35 = vmul.f32 2.0, %v6383_v9  ;;  %v8198_v32 = vsub.f32 %v8076_v43, %v2050_v28 }
 0x26f   : > { %2204 = vmin.xlane.f32.xlu0 %v8198_v32  ;;  %v8202_v41 = vsub.f32 %v8076_v43, %v2051_v35 }
 0x270   : > { %v1856_v42 = vpop.f32.mrb[40].mxu0 }
 0x271   : > { %v6384_v13 = vadd.f32 %v1856_v42, %v8003_v63  ;;  %v1858_v34 = vpop.f32.mrb[41].mxu0  ;;  %2206 = vmin.xlane.f32.xlu1 %v8202_v41 }
 0x272   : > { %v1859_v39 = vpop.f32.mrb[42].mxu0 }
 0x273   : > { %v2052_v44 = vmul.f32 2.0, %v6384_v13  ;;  %v6385_v50 = vadd.f32 %v1859_v39, %v8005_v25  ;;  %v1861_v46 = vpop.f32.mrb[43].mxu0 }
 0x275   : > { %v2053_v52 = vmul.f32 2.0, %v6385_v50  ;;  %v8208_v49 = vsub.f32 %v8076_v43, %v2052_v44 }
 0x277   : > { %2208 = vmin.xlane.f32.xlu0 %v8208_v49  ;;  %v8212_v21 = vsub.f32 %v8076_v43, %v2053_v52 }
 0x278   : > { %v1864_v56 = vpop.f32.mrb[44].mxu0 }
 0x279   : > { %v6386_v63 = vadd.f32 %v1864_v56, %v8015_v24  ;;  %v1866_v58 = vpop.f32.mrb[45].mxu0  ;;  %2210 = vmin.xlane.f32.xlu1 %v8212_v21 }
 0x27a   : > { %v1867_v53 = vpop.f32.mrb[46].mxu0 }
 0x27b   : > { %v2054_v61 = vmul.f32 2.0, %v6386_v63  ;;  %v6387_v25 = vadd.f32 %v1867_v53, %v8017_v36  ;;  %v1869_v59 = vpop.f32.mrb[47].mxu0 }
 0x27d   : > { %v2055_v15 = vmul.f32 2.0, %v6387_v25  ;;  %v8218_v1 = vsub.f32 %v8076_v43, %v2054_v61 }
 0x27f   : > { %2212 = vmin.xlane.f32.xlu0 %v8218_v1  ;;  %v8222_v45 = vsub.f32 %v8076_v43, %v2055_v15 }
 0x280   : > { %v1872_v6 = vpop.f32.mrb[48].mxu0 }
 0x281   : > { %v6388_v24 = vadd.f32 %v1872_v6, %v8027_v37  ;;  %v1874_v8 = vpop.f32.mrb[49].mxu0  ;;  %2214 = vmin.xlane.f32.xlu1 %v8222_v45 }
 0x282   : > { %v1875_v4 = vpop.f32.mrb[50].mxu0 }
 0x283   : > { %v2056_v14 = vmul.f32 2.0, %v6388_v24  ;;  %v6389_v36 = vadd.f32 %v1875_v4, %v8029_v55  ;;  %v1877_v19 = vpop.f32.mrb[51].mxu0 }
 0x285   : > { %v2057_v22 = vmul.f32 2.0, %v6389_v36  ;;  %v8228_v31 = vsub.f32 %v8076_v43, %v2056_v14 }
 0x287   : > { %2216 = vmin.xlane.f32.xlu0 %v8228_v31  ;;  %v8232_v17 = vsub.f32 %v8076_v43, %v2057_v22 }
 0x288   : > { %v1880_v7 = vpop.f32.mrb[52].mxu0 }
 0x289   : > { %v6390_v37 = vadd.f32 %v1880_v7, %v8039_v27  ;;  %v1882_v28 = vpop.f32.mrb[53].mxu0  ;;  %2218 = vmin.xlane.f32.xlu1 %v8232_v17 }
 0x28a   : > { %v1883_v9 = vpop.f32.mrb[54].mxu0 }
 0x28b   : > { %v2058_v26 = vmul.f32 2.0, %v6390_v37  ;;  %v6391_v55 = vadd.f32 %v1883_v9, %v8041_v16  ;;  %v1885_v35 = vpop.f32.mrb[55].mxu0 }
 0x28d   : > { %v2059_v42 = vmul.f32 2.0, %v6391_v55  ;;  %v8238_v13 = vsub.f32 %v8076_v43, %v2058_v26 }
 0x28f   : > { %2220 = vmin.xlane.f32.xlu0 %v8238_v13  ;;  %v8242_v34 = vsub.f32 %v8076_v43, %v2059_v42 }
 0x290   : > { %v1888_v39 = vpop.f32.mrb[56].mxu0 }
 0x291   : > { %v6392_v27 = vadd.f32 %v1888_v39, %v8051_v40  ;;  %v1890_v44 = vpop.f32.mrb[57].mxu0  ;;  %2222 = vmin.xlane.f32.xlu1 %v8242_v34 }
 0x292   : > { %v1891_v50 = vpop.f32.mrb[58].mxu0 }
 0x293   : > { %v2060_v46 = vmul.f32 2.0, %v6392_v27  ;;  %v6393_v16 = vadd.f32 %v1891_v50, %v8053_v11  ;;  %v1893_v52 = vpop.f32.mrb[59].mxu0 }
 0x295   : > { %v2061_v56 = vmul.f32 2.0, %v6393_v16  ;;  %v8248_v63 = vsub.f32 %v8076_v43, %v2060_v46 }
 0x297   : > { %2224 = vmin.xlane.f32.xlu0 %v8248_v63  ;;  %v8252_v58 = vsub.f32 %v8076_v43, %v2061_v56 }
 0x298   : > { %v1896_v53 = vpop.f32.mrb[60].mxu0 }
 0x299   : > { %v6394_v40 = vadd.f32 %v1896_v53, %v8063_v60  ;;  %v1898_v61 = vpop.f32.mrb[61].mxu0  ;;  %2226 = vmin.xlane.f32.xlu1 %v8252_v58 }
 0x29a   : > { %v1899_v25 = vpop.f32.mrb[62].mxu0 }
 0x29b   : > { %v2062_v59 = vmul.f32 2.0, %v6394_v40  ;;  %v6395_v11 = vadd.f32 %v1899_v25, %v8065_v3  ;;  %v1901_v15 = vpop.f32.mrb[63].mxu0 }
 0x29d   : > { %v2063_v6 = vmul.f32 2.0, %v6395_v11  ;;  %v8258_v24 = vsub.f32 %v8076_v43, %v2062_v59  ;;  %v13933_v59 = vlaneseq }
 0x29f   : > { %2228 = vmin.xlane.f32.xlu0 %v8258_v24  ;;  %v8262_v8 = vsub.f32 %v8076_v43, %v2063_v6  ;;  %v1615_v4 = vpop.f32.mrb[64].mxu1 }
 0x2a0   : > { %v1904_v14 = vpop.f32.mrb[64].mxu0  ;;  %v1617_v19 = vpop.f32.mrb[65].mxu1 }
 0x2a1   : > { %v6396_v60 = vadd.f32 %v1904_v14, %v1615_v4  ;;  %v1906_v36 = vpop.f32.mrb[65].mxu0  ;;  %2230 = vmin.xlane.f32.xlu1 %v8262_v8  ;;  %v1618_v22 = vpop.f32.mrb[66].mxu1 }
 0x2a2   : > { %v1907_v7 = vpop.f32.mrb[66].mxu0  ;;  %v1620_v28 = vpop.f32.mrb[67].mxu1 }
 0x2a3   : > { %v2064_v3 = vmul.f32 2.0, %v6396_v60  ;;  %v6397_v37 = vadd.f32 %v1907_v7, %v1618_v22  ;;  %v1909_v9 = vpop.f32.mrb[67].mxu0  ;;  %v8282_v22 = vand.u32 127, %v13933_v59 }
 0x2a5   : > { %v2065_v26 = vmul.f32 2.0, %v6397_v37  ;;  %v8266_v55 = vsub.f32 %v8076_v43, %v2064_v3 }
 0x2a7   : > { %2232 = vmin.xlane.f32.xlu0 %v8266_v55  ;;  %v8270_v35 = vsub.f32 %v8076_v43, %v2065_v26  ;;  %v1623_v42 = vpop.f32.mrb[68].mxu1 }
 0x2a8   : > { %v1912_v39 = vpop.f32.mrb[68].mxu0  ;;  %v1625_v50 = vpop.f32.mrb[69].mxu1 }
 0x2a9   : > { %v6398_v27 = vadd.f32 %v1912_v39, %v1623_v42  ;;  %v1914_v44 = vpop.f32.mrb[69].mxu0  ;;  %2234 = vmin.xlane.f32.xlu1 %v8270_v35  ;;  %v1626_v46 = vpop.f32.mrb[70].mxu1 }
 0x2aa   : > { %v1915_v16 = vpop.f32.mrb[70].mxu0  ;;  %v1628_v53 = vpop.f32.mrb[71].mxu1 }
 0x2ab   : > { %v2066_v52 = vmul.f32 2.0, %v6398_v27  ;;  %v6399_v56 = vadd.f32 %v1915_v16, %v1626_v46  ;;  %v1917_v40 = vpop.f32.mrb[71].mxu0 }
 0x2ad   : > { %v2067_v61 = vmul.f32 2.0, %v6399_v56  ;;  %v8274_v25 = vsub.f32 %v8076_v43, %v2066_v52 }
 0x2af   : > { %2236 = vmin.xlane.f32.xlu0 %v8274_v25  ;;  %v8278_v11 = vsub.f32 %v8076_v43, %v2067_v61  ;;  %v1631_v15 = vpop.f32.mrb[72].mxu1 }
 0x2b0   : > { %v1920_v6 = vpop.f32.mrb[72].mxu0  ;;  %v1633_v60 = vpop.f32.mrb[73].mxu1 }
 0x2b1   : > { %v6400_v4 = vadd.f32 %v1920_v6, %v1631_v15  ;;  %v1922_v14 = vpop.f32.mrb[73].mxu0  ;;  %2238 = vmin.xlane.f32.xlu1 %v8278_v11  ;;  %v1634_v36 = vpop.f32.mrb[74].mxu1 }
 0x2b2   : > { %v1923_v19 = vpop.f32.mrb[74].mxu0  ;;  %v1636_v37 = vpop.f32.mrb[75].mxu1 }
 0x2b3   : > { %v2068_v7 = vmul.f32 2.0, %v6400_v4  ;;  %v6401_v3 = vadd.f32 %v1923_v19, %v1634_v36  ;;  %v1925_v28 = vpop.f32.mrb[75].mxu0 }
 0x2b4   : > { %v2169_v9 = vpop.xlane.xlu0 %2168 }
 0x2b5   : > { %v2069_v26 = vmul.f32 2.0, %v6401_v3  ;;  %vm2296_vm0 = vcmp.eq.f32.partialorder %v8080_v54, %v2169_v9  ;;  %v8286_v42 = vsub.f32 %v8076_v43, %v2068_v7 }
 0x2b6   : > { %v8289_v39 = vsel %vm2296_vm0, %v8282_v22, 128 }
 0x2b7   : > { %2240 = vmin.xlane.f32.xlu0 %v8286_v42  ;;  %v8293_v27 = vsub.f32 %v8076_v43, %v2069_v26  ;;  %v2425_v44 = vshra.s32 %v8289_v39, 16  ;;  %v1639_v16 = vpop.f32.mrb[76].mxu1 }
 0x2b8   : > { %v1928_v50 = vpop.f32.mrb[76].mxu0  ;;  %v2171_v46 = vpop.xlane.xlu0 %2170 }
 0x2b9   : > { %vm2297_vm1 = vcmp.eq.f32.partialorder %v8093_v12, %v2171_v46  ;;  %v1930_v52 = vpop.f32.mrb[77].mxu0  ;;  %2242 = vmin.xlane.f32.xlu1 %v8293_v27  ;;  %v8298_v54 = vcvt.s32.f32 %v2425_v44  ;;  %v6402_v53 = vadd.f32 %v1928_v50, %v1639_v16  ;;  %v1641_v40 = vpop.f32.mrb[77].mxu1 }
 0x2ba   : > { %v8301_v56 = vsel %vm2297_vm1, %v8282_v22, 128  ;;  %v1931_v61 = vpop.f32.mrb[78].mxu0  ;;  %v1642_v15 = vpop.f32.mrb[78].mxu1 }
 0x2bb   : > { %2428 = vmin.xlane.f32.xlu0 %v8298_v54  ;;  %v1933_v6 = vpop.f32.mrb[79].mxu0  ;;  %v2439_v4 = vshra.s32 %v8301_v56, 16  ;;  %v6403_v14 = vadd.f32 %v1931_v61, %v1642_v15  ;;  %v1644_v12 = vpop.f32.mrb[79].mxu1  ;;  %v2070_v36 = vmul.f32 2.0, %v6402_v53 }
 0x2bc   : > { %v2173_v60 = vpop.xlane.xlu1 %2172 }
 0x2bd   : > { %vm2298_vm2 = vcmp.eq.f32.partialorder %v8098_v30, %v2173_v60  ;;  %v8306_v19 = vcvt.s32.f32 %v2439_v4  ;;  %v2071_v7 = vmul.f32 2.0, %v6403_v14  ;;  %v8317_v50 = vsub.f32 %v8076_v43, %v2070_v36 }
 0x2be   : > { %v8309_v3 = vsel %vm2298_vm2, %v8282_v22, 128 }
 0x2bf   : > { %2442 = vmin.xlane.f32.xlu0 %v8306_v19  ;;  %v8313_v9 = vsub.f32 %v8076_v43, %v2071_v7  ;;  %v1647_v26 = vpop.f32.mrb[80].mxu1  ;;  %v2453_v30 = vshra.s32 %v8309_v3, 16 }
 0x2c0   : > { %v1936_v37 = vpop.f32.mrb[80].mxu0  ;;  %v2175_v28 = vpop.xlane.xlu1 %2174 }
 0x2c1   : > { %vm2299_vm3 = vcmp.eq.f32.partialorder %v8111_v10, %v2175_v28  ;;  %v1938_v44 = vpop.f32.mrb[81].mxu0  ;;  %v6404_v16 = vadd.f32 %v1936_v37, %v1647_v26  ;;  %2246 = vmin.xlane.f32.xlu1 %v8313_v9  ;;  %v1649_v52 = vpop.f32.mrb[81].mxu1  ;;  %v8325_v4 = vcvt.s32.f32 %v2453_v30 }
 0x2c2   : > { %v8321_v46 = vsel %vm2299_vm3, %v8282_v22, 128  ;;  %v1939_v53 = vpop.f32.mrb[82].mxu0  ;;  %v1650_v40 = vpop.f32.mrb[82].mxu1 }
 0x2c3   : > { %2244 = vmin.xlane.f32.xlu0 %v8317_v50  ;;  %v1941_v61 = vpop.f32.mrb[83].mxu0  ;;  %v6405_v10 = vadd.f32 %v1939_v53, %v1650_v40  ;;  %v1652_v15 = vpop.f32.mrb[83].mxu1  ;;  %v2467_v14 = vshra.s32 %v8321_v46, 16  ;;  %v2072_v28 = vmul.f32 2.0, %v6404_v16 }
 0x2c4   : > { %v2177_v6 = vpop.xlane.xlu0 %2176 }
 0x2c5   : > { %v2073_v12 = vmul.f32 2.0, %v6405_v10  ;;  %vm2300_vm4 = vcmp.eq.f32.partialorder %v8116_v2, %v2177_v6  ;;  %v8333_v53 = vcvt.s32.f32 %v2467_v14  ;;  %v8342_v6 = vsub.f32 %v8076_v43, %v2072_v28 }
 0x2c6   : > { %v2179_v60 = vpop.xlane.xlu1 %2178  ;;  %v8336_v30 = vsel %vm2300_vm4, %v8282_v22, 128 }
 0x2c7   : > { %2456 = vmin.xlane.f32.xlu0 %v8325_v4  ;;  %v1655_v36 = vpop.f32.mrb[84].mxu1  ;;  %v8331_v37 = vsub.f32 %v8076_v43, %v2073_v12  ;;  %vm2301_vm5 = vcmp.eq.f32.partialorder %v8125_v48, %v2179_v60  ;;  %14076 = vst [vmem:[#allocation19_spill] sm:$0xff] %v8342_v6  ;;  %v2481_v14 = vshra.s32 %v8336_v30, 16 }
 0x2c8   : > { %v1944_v7 = vpop.f32.mrb[84].mxu0  ;;  %v1657_v52 = vpop.f32.mrb[85].mxu1  ;;  %v8346_v12 = vsel %vm2301_vm5, %v8282_v22, 128 }
 0x2c9   : > { %14075 = vst [vmem:[#allocation18_spill] sm:$0xff] %v8331_v37  ;;  %v6406_v26 = vadd.f32 %v1944_v7, %v1655_v36  ;;  %v1946_v44 = vpop.f32.mrb[85].mxu0  ;;  %2250 = vmin.xlane.f32.xlu1 %v8331_v37  ;;  %v1658_v2 = vpop.f32.mrb[86].mxu1  ;;  %v8353_v28 = vcvt.s32.f32 %v2481_v14 }
 0x2ca   : > { %v1947_v40 = vpop.f32.mrb[86].mxu0  ;;  %v1660_v10 = vpop.f32.mrb[87].mxu1 }
 0x2cb   : > { %v6407_v61 = vadd.f32 %v1947_v40, %v1658_v2  ;;  %2470 = vmin.xlane.f32.xlu0 %v8333_v53  ;;  %v1949_v15 = vpop.f32.mrb[87].mxu0  ;;  %v2495_v40 = vshra.s32 %v8346_v12, 16 }
 0x2cc   : > { %v2181_v36 = vpop.xlane.xlu0 %2180 }
 0x2cd   : > { %v2075_v16 = vmul.f32 2.0, %v6407_v61  ;;  %vm2302_vm6 = vcmp.eq.f32.partialorder %v8134_v23, %v2181_v36 }
 0x2ce   : > { %v2183_v37 = vpop.xlane.xlu1 %2182 }
 0x2cf   : > { %2248 = vmin.xlane.f32.xlu0 %v8342_v6  ;;  %v8350_v7 = vsub.f32 %v8076_v43, %v2075_v16  ;;  %v1663_v48 = vpop.f32.mrb[88].mxu1  ;;  %v2074_v6 = vmul.f32 2.0, %v6406_v26  ;;  %vm2303_vm7 = vcmp.eq.f32.partialorder %v8142_v57, %v2183_v37 }
 0x2d0   : > { %v1952_v60 = vpop.f32.mrb[88].mxu0  ;;  %v1665_v2 = vpop.f32.mrb[89].mxu1  ;;  %v8374_v57 = vsel %vm2303_vm7, %v8282_v22, 128 }
 0x2d1   : > { %v6408_v44 = vadd.f32 %v1952_v60, %v1663_v48  ;;  %v1954_v52 = vpop.f32.mrb[89].mxu0  ;;  %2254 = vmin.xlane.f32.xlu1 %v8350_v7  ;;  %v1666_v61 = vpop.f32.mrb[90].mxu1  ;;  %v8358_v60 = vcvt.s32.f32 %v2495_v40  ;;  %v8370_v40 = vsub.f32 %v8076_v43, %v2074_v6  ;;  %14081 = vst [vmem:[#allocation24_spill] sm:$0xff] %v8374_v57 }
 0x2d2   : > { %v1955_v10 = vpop.f32.mrb[90].mxu0  ;;  %v1668_v16 = vpop.f32.mrb[91].mxu1  ;;  %v8361_v52 = vsel %vm2302_vm6, %v8282_v22, 128 }
 0x2d3   : > { %v6409_v15 = vadd.f32 %v1955_v10, %v1666_v61  ;;  %2484 = vmin.xlane.f32.xlu0 %v8353_v28  ;;  %v1957_v59 = vpop.f32.mrb[91].mxu0  ;;  %14077 = vst [vmem:[#allocation20_spill] sm:$0xff] %v8358_v60  ;;  %14078 = vst [vmem:[#allocation21_spill] sm:$0xff] %v8361_v52  ;;  %v2509_v10 = vshra.s32 %v8361_v52, 16 }
 0x2d4   : > { %v2185_v14 = vpop.xlane.xlu0 %2184  ;;  %14080 = vst [vmem:[#allocation23_spill] sm:$0xff] %v8370_v40 }
 0x2d5   : > { %v2077_v48 = vmul.f32 2.0, %v6409_v15  ;;  %vm2304_vm8 = vcmp.eq.f32.partialorder %v8148_v18, %v2185_v14 }
 0x2d6   : > { %v2187_v6 = vpop.xlane.xlu1 %2186  ;;  %v8391_v18 = vsel %vm2304_vm8, %v8282_v22, 128 }
 0x2d7   : > { %2498 = vmin.xlane.f32.xlu0 %v8358_v60  ;;  %v8366_v23 = vsub.f32 %v8076_v43, %v2077_v48  ;;  %v1671_v36 = vpop.f32.mrb[92].mxu1  ;;  %14085 = vst [vmem:[#allocation28_spill] sm:$0xff] %v8391_v18  ;;  %vm2305_vm9 = vcmp.eq.f32.partialorder %v8152_v5, %v2187_v6 }
 0x2d8   : > { %v1960_v2 = vpop.f32.mrb[92].mxu0  ;;  %v1673_v26 = vpop.f32.mrb[93].mxu1 }
 0x2d9   : > { %14079 = vst [vmem:[#allocation22_spill] sm:$0xff] %v8366_v23  ;;  %v6410_v61 = vadd.f32 %v1960_v2, %v1671_v36  ;;  %v1962_v59 = vpop.f32.mrb[93].mxu0  ;;  %2258 = vmin.xlane.f32.xlu1 %v8366_v23  ;;  %v1674_v37 = vpop.f32.mrb[94].mxu1  ;;  %v8377_v2 = vcvt.s32.f32 %v2509_v10 }
 0x2da   : > { %v1963_v15 = vpop.f32.mrb[94].mxu0  ;;  %v1676_v48 = vpop.f32.mrb[95].mxu1  ;;  %v2523_v59 = vshra.s32 %v8374_v57, 16 }
 0x2db   : > { %v6411_v16 = vadd.f32 %v1963_v15, %v1674_v37  ;;  %2252 = vmin.xlane.f32.xlu0 %v8370_v40  ;;  %v1965_v60 = vpop.f32.mrb[95].mxu0  ;;  %14082 = vst [vmem:[#allocation25_spill] sm:$0xff] %v8377_v2  ;;  %v2076_v15 = vmul.f32 2.0, %v6408_v44 }
 0x2dc   : > { %v2189_v26 = vpop.xlane.xlu0 %2188 }
 0x2dd   : > { %v2079_v36 = vmul.f32 2.0, %v6411_v16  ;;  %v8388_v16 = vcvt.s32.f32 %v2523_v59  ;;  %v8400_v59 = vsel %vm2305_vm9, %v8282_v22, 128  ;;  %vm2306_vm10 = vcmp.eq.f32.partialorder %v8158_v33, %v2189_v26 }
 0x2df   : > { %2512 = vmin.xlane.f32.xlu0 %v8377_v2  ;;  %v8383_v52 = vsub.f32 %v8076_v43, %v2079_v36  ;;  %v1679_v23 = vpop.f32.mrb[96].mxu1  ;;  %14084 = vst [vmem:[#allocation27_spill] sm:$0xff] %v8388_v16  ;;  %v2191_v2 = vpop.xlane.xlu1 %2190 }
 0x2e0   : > { %v1968_v37 = vpop.f32.mrb[96].mxu0  ;;  %v1681_v10 = vpop.f32.mrb[97].mxu1  ;;  %vm2307_vm11 = vcmp.eq.f32.partialorder %v8162_v38, %v2191_v2 }
 0x2e1   : > { %14083 = vst [vmem:[#allocation26_spill] sm:$0xff] %v8383_v52  ;;  %v8385_v40 = vadd.f32 %v1968_v37, %v1679_v23  ;;  %v1970_v60 = vpop.f32.mrb[97].mxu0  ;;  %2262 = vmin.xlane.f32.xlu1 %v8383_v52  ;;  %v1682_v14 = vpop.f32.mrb[98].mxu1  ;;  %v8396_v37 = vsub.f32 %v8076_v43, %v2076_v15  ;;  %v8434_v2 = vsel %vm2307_vm11, %v8282_v22, 128 }
 0x2e2   : > { %v1971_v48 = vpop.f32.mrb[98].mxu0  ;;  %v1684_v57 = vpop.f32.mrb[99].mxu1  ;;  %v2537_v60 = vshra.s32 %v8391_v18, 16  ;;  %14091 = vst [vmem:[#allocation34_spill] sm:$0xff] %v8434_v2 }
 0x2e3   : > { %v6413_v36 = vadd.f32 %v1971_v48, %v1682_v14  ;;  %2526 = vmin.xlane.f32.xlu0 %v8388_v16  ;;  %v1973_v44 = vpop.f32.mrb[99].mxu0  ;;  %14086 = vst [vmem:[#allocation29_spill] sm:$0xff] %v8396_v37 }
 0x2e4   : > { %v2193_v10 = vpop.xlane.xlu0 %2192  ;;  %v8409_v48 = vcvt.s32.f32 %v2537_v60 }
 0x2e5   : > { %v2081_v23 = vmul.f32 2.0, %v6413_v36  ;;  %v2551_v36 = vshra.s32 %v8400_v59, 16  ;;  %vm2308_vm12 = vcmp.eq.f32.partialorder %v8168_v47, %v2193_v10 }
 0x2e6   : > { %v8454_v47 = vsel %vm2308_vm12, %v8282_v22, 128 }
 0x2e7   : > { %2256 = vmin.xlane.f32.xlu0 %v8396_v37  ;;  %v8404_v52 = vsub.f32 %v8076_v43, %v2081_v23  ;;  %v1687_v5 = vpop.f32.mrb[100].mxu1  ;;  %14095 = vst [vmem:[#allocation38_spill] sm:$0xff] %v8454_v47 }
 0x2e8   : > { %v1976_v6 = vpop.f32.mrb[100].mxu0  ;;  %v1689_v15 = vpop.f32.mrb[101].mxu1 }
 0x2e9   : > { %v8406_v14 = vadd.f32 %v1976_v6, %v1687_v5  ;;  %v1978_v57 = vpop.f32.mrb[101].mxu0  ;;  %2266 = vmin.xlane.f32.xlu1 %v8404_v52  ;;  %v1690_v44 = vpop.f32.mrb[102].mxu1  ;;  %v2078_v5 = vmul.f32 2.0, %v6410_v61  ;;  %v8417_v15 = vsel %vm2306_vm10, %v8282_v22, 128 }
 0x2ea   : > { %v1979_v18 = vpop.f32.mrb[102].mxu0  ;;  %v1692_v23 = vpop.f32.mrb[103].mxu1  ;;  %v8414_v57 = vcvt.s32.f32 %v2551_v36  ;;  %14088 = vst [vmem:[#allocation31_spill] sm:$0xff] %v8417_v15  ;;  %v2565_v38 = vshra.s32 %v8417_v15, 16 }
 0x2eb   : > { %v6415_v37 = vadd.f32 %v1979_v18, %v1690_v44  ;;  %2540 = vmin.xlane.f32.xlu0 %v8409_v48  ;;  %v1981_v16 = vpop.f32.mrb[103].mxu0  ;;  %v8430_v36 = vsub.f32 %v8076_v43, %v2078_v5  ;;  %v2195_v5 = vpop.xlane.xlu1 %2194 }
 0x2ec   : > { %14087 = vst [vmem:[#allocation30_spill] sm:$0xff] %v8414_v57  ;;  %v8420_v60 = vpop.xlane.xlu0 %2196  ;;  %vm2309_vm13 = vcmp.eq.f32.partialorder %v8172_v51, %v2195_v5 }
 0x2ed   : > { %v2083_v6 = vmul.f32 2.0, %v6415_v37  ;;  %14090 = vst [vmem:[#allocation33_spill] sm:$0xff] %v8430_v36  ;;  %vm2310_vm14 = vcmp.eq.f32.partialorder %v8178_v62, %v8420_v60 }
 0x2ef   : > { %2554 = vmin.xlane.f32.xlu0 %v8414_v57  ;;  %v8424_v33 = vsub.f32 %v8076_v43, %v2083_v6  ;;  %v1695_v26 = vpop.f32.mrb[104].mxu1 }
 0x2f0   : > { %v1984_v18 = vpop.f32.mrb[104].mxu0  ;;  %v1697_v37 = vpop.f32.mrb[105].mxu1 }
 0x2f1   : > { %14089 = vst [vmem:[#allocation32_spill] sm:$0xff] %v8424_v33  ;;  %v8426_v16 = vadd.f32 %v1984_v18, %v1695_v26  ;;  %v1986_v61 = vpop.f32.mrb[105].mxu0  ;;  %2270 = vmin.xlane.f32.xlu1 %v8424_v33  ;;  %v1698_v44 = vpop.f32.mrb[106].mxu1  ;;  %v2579_v37 = vshra.s32 %v8434_v2, 16 }
 0x2f2   : > { %v1987_v23 = vpop.f32.mrb[106].mxu0  ;;  %v1700_v57 = vpop.f32.mrb[107].mxu1  ;;  %v8437_v61 = vcvt.s32.f32 %v2565_v38 }
 0x2f3   : > { %v6417_v6 = vadd.f32 %v1987_v23, %v1698_v44  ;;  %2260 = vmin.xlane.f32.xlu0 %v8430_v36  ;;  %v1989_v26 = vpop.f32.mrb[107].mxu0  ;;  %v2080_v57 = vmul.f32 2.0, %v8385_v40  ;;  %v8451_v2 = vcvt.s32.f32 %v2579_v37  ;;  %v8463_v37 = vsel %vm2309_vm13, %v8282_v22, 128 }
 0x2f4   : > { %14092 = vst [vmem:[#allocation35_spill] sm:$0xff] %v8437_v61  ;;  %v8441_v33 = vpop.xlane.xlu0 %2200 }
 0x2f5   : > { %v2085_v18 = vmul.f32 2.0, %v6417_v6  ;;  %14094 = vst [vmem:[#allocation37_spill] sm:$0xff] %v8451_v2  ;;  %vm2312_vm1 = vcmp.eq.f32.partialorder %v8188_v29, %v8441_v33 }
 0x2f6   : > { %v8527_v29 = vsel %vm2312_vm1, %v8282_v22, 128 }
 0x2f7   : > { %2568 = vmin.xlane.f32.xlu0 %v8437_v61  ;;  %v8445_v15 = vsub.f32 %v8076_v43, %v2085_v18  ;;  %v1703_v44 = vpop.f32.mrb[108].mxu1 }
 0x2f8   : > { %v1992_v23 = vpop.f32.mrb[108].mxu0  ;;  %v1705_v6 = vpop.f32.mrb[109].mxu1 }
 0x2f9   : > { %14093 = vst [vmem:[#allocation36_spill] sm:$0xff] %v8445_v15  ;;  %v8448_v26 = vadd.f32 %v1992_v23, %v1703_v44  ;;  %v1994_v38 = vpop.f32.mrb[109].mxu0  ;;  %2274 = vmin.xlane.f32.xlu1 %v8445_v15  ;;  %v1706_v10 = vpop.f32.mrb[110].mxu1  ;;  %v8459_v23 = vsub.f32 %v8076_v43, %v2080_v57  ;;  %v8468_v15 = vld [vmem:[#allocation7] ss:$0 sm:$0xff] }
 0x2fa   : > { %v1995_v61 = vpop.f32.mrb[110].mxu0  ;;  %v1708_v36 = vpop.f32.mrb[111].mxu1  ;;  %v2593_v38 = vshra.s32 %v8454_v47, 16 }
 0x2fb   : > { %v6419_v18 = vadd.f32 %v1995_v61, %v1706_v10  ;;  %2582 = vmin.xlane.f32.xlu0 %v8451_v2  ;;  %v1997_v40 = vpop.f32.mrb[111].mxu0  ;;  %14096 = vst [vmem:[#allocation39_spill] sm:$0xff] %v8459_v23 }
 0x2fc   : > { %v8465_v6 = vpop.xlane.xlu0 %2204  ;;  %v8476_v10 = vcvt.s32.f32 %v2593_v38  ;;  %v8486_v38 = vsel %vm2310_vm14, %v8282_v22, 128 }
 0x2fd   : > { %v2087_v44 = vmul.f32 2.0, %v6419_v18  ;;  %v2607_v18 = vshra.s32 %v8463_v37, 16  ;;  %14099 = vst [vmem:[#allocation42_spill] sm:$0xff] %v8486_v38  ;;  %vm2314_vm4 = vcmp.eq.f32.partialorder %v8198_v32, %v8465_v6 }
 0x2fe   : > { %v8567_v32 = vsel %vm2314_vm4, %v8282_v22, 128 }
 0x2ff   : > { %2264 = vmin.xlane.f32.xlu0 %v8459_v23  ;;  %v8471_v51 = vsub.f32 %v8468_v15, %v2087_v44  ;;  %v1711_v36 = vpop.f32.mrb[112].mxu1 }
 0x300   : > { %v2000_v61 = vpop.f32.mrb[112].mxu0  ;;  %v1713_v57 = vpop.f32.mrb[113].mxu1 }
 0x301   : > { %14097 = vst [vmem:[#allocation40_spill] sm:$0xff] %v8471_v51  ;;  %v8473_v5 = vadd.f32 %v2000_v61, %v1711_v36  ;;  %v2002_v43 = vpop.f32.mrb[113].mxu0  ;;  %2278 = vmin.xlane.f32.xlu1 %v8471_v51  ;;  %v1714_v40 = vpop.f32.mrb[114].mxu1  ;;  %v2082_v61 = vmul.f32 2.0, %v8406_v14  ;;  %v8483_v51 = vcvt.s32.f32 %v2607_v18 }
 0x302   : > { %v2003_v47 = vpop.f32.mrb[114].mxu0  ;;  %v1716_v44 = vpop.f32.mrb[115].mxu1 }
 0x303   : > { %v6421_v23 = vadd.f32 %v2003_v47, %v1714_v40  ;;  %2596 = vmin.xlane.f32.xlu0 %v8476_v10  ;;  %v2005_v2 = vpop.f32.mrb[115].mxu0  ;;  %v2199_v36 = vpop.xlane.xlu1 %2198  ;;  %14098 = vst [vmem:[#allocation41_spill] sm:$0xff] %v8483_v51  ;;  %v8499_v18 = vsub.f32 %v8468_v15, %v2082_v61 }
 0x304   : > { %vm2311_vm15 = vcmp.eq.f32.partialorder %v8182_v0, %v2199_v36  ;;  %v8489_v57 = vpop.xlane.xlu0 %2208  ;;  %v2621_v0 = vshra.s32 %v8486_v38, 16 }
 0x305   : > { %v2089_v43 = vmul.f32 2.0, %v6421_v23  ;;  %v8503_v40 = vsel %vm2311_vm15, %v8282_v22, 128  ;;  %vm2316_vm8 = vcmp.eq.f32.partialorder %v8208_v49, %v8489_v57 }
 0x306   : > { %14101 = vst [vmem:[#allocation44_spill] sm:$0xff] %v8503_v40  ;;  %v2635_v61 = vshra.s32 %v8503_v40, 16 }
 0x307   : > { %2610 = vmin.xlane.f32.xlu0 %v8483_v51  ;;  %v8493_v62 = vsub.f32 %v8468_v15, %v2089_v43  ;;  %v1719_v60 = vpop.f32.mrb[116].mxu1 }
 0x308   : > { %v2008_v2 = vpop.f32.mrb[116].mxu0  ;;  %v1721_v23 = vpop.f32.mrb[117].mxu1  ;;  %v8524_v40 = vcvt.s32.f32 %v2635_v61 }
 0x309   : > { %14100 = vst [vmem:[#allocation43_spill] sm:$0xff] %v8493_v62  ;;  %v8495_v47 = vadd.f32 %v2008_v2, %v1719_v60  ;;  %v2010_v14 = vpop.f32.mrb[117].mxu0  ;;  %2282 = vmin.xlane.f32.xlu1 %v8493_v62  ;;  %v1722_v44 = vpop.f32.mrb[118].mxu1  ;;  %v8507_v23 = vcvt.s32.f32 %v2621_v0  ;;  %v2084_v0 = vmul.f32 2.0, %v8426_v16 }
 0x30a   : > { %v2011_v36 = vpop.f32.mrb[118].mxu0  ;;  %v1724_v51 = vpop.f32.mrb[119].mxu1  ;;  %14104 = vst [vmem:[#allocation47_spill] sm:$0xff] %v8524_v40 }
 0x30b   : > { %v6423_v43 = vadd.f32 %v2011_v36, %v1722_v44  ;;  %2268 = vmin.xlane.f32.xlu0 %v8499_v18  ;;  %v2013_v60 = vpop.f32.mrb[119].mxu0  ;;  %14102 = vst [vmem:[#allocation45_spill] sm:$0xff] %v8507_v23  ;;  %v2203_v62 = vpop.xlane.xlu1 %2202  ;;  %v8536_v61 = vsub.f32 %v8468_v15, %v2084_v0 }
 0x30c   : > { %v2213_v2 = vpop.xlane.xlu0 %2212  ;;  %vm2313_vm2 = vcmp.eq.f32.partialorder %v8192_v20, %v2203_v62 }
 0x30d   : > { %v2091_v14 = vmul.f32 2.0, %v6423_v43  ;;  %vm2318_vm0 = vcmp.eq.f32.partialorder %v8218_v1, %v2213_v2  ;;  %14106 = vst [vmem:[#allocation49_spill] sm:$0xff] %v8536_v61  ;;  %v8540_v20 = vsel %vm2313_vm2, %v8282_v22, 128 }
 0x30e   : > { %v8511_v38 = vsel %vm2318_vm0, %v8282_v22, 128 }
 0x30f   : > { %14103 = vst [vmem:[#allocation46_spill] sm:$0xff] %v8511_v38  ;;  %2624 = vmin.xlane.f32.xlu0 %v8507_v23  ;;  %v8517_v51 = vsub.f32 %v8468_v15, %v2091_v14  ;;  %v2733_v44 = vshra.s32 %v8511_v38, 16  ;;  %v1727_v36 = vpop.f32.mrb[120].mxu1 }
 0x310   : > { %v2016_v1 = vpop.f32.mrb[120].mxu0  ;;  %v1729_v2 = vpop.f32.mrb[121].mxu1 }
 0x311   : > { %v8521_v43 = vadd.f32 %v2016_v1, %v1727_v36  ;;  %v2018_v60 = vpop.f32.mrb[121].mxu0  ;;  %2286 = vmin.xlane.f32.xlu1 %v8517_v51  ;;  %v1730_v33 = vpop.f32.mrb[122].mxu1  ;;  %v8531_v16 = vcvt.s32.f32 %v2733_v44  ;;  %v2649_v2 = vshra.s32 %v8527_v29, 16 }
 0x312   : > { %v2019_v14 = vpop.f32.mrb[122].mxu0  ;;  %v1732_v23 = vpop.f32.mrb[123].mxu1 }
 0x313   : > { %v6425_v38 = vadd.f32 %v2019_v14, %v1730_v33  ;;  %2638 = vmin.xlane.f32.xlu0 %v8524_v40  ;;  %14105 = vst [vmem:[#allocation48_spill] sm:$0xff] %v8531_v16  ;;  %v2021_v36 = vpop.f32.mrb[123].mxu0 }
 0x314   : > { %v2217_v1 = vpop.xlane.xlu0 %2216  ;;  %v8553_v36 = vcvt.s32.f32 %v2649_v2 }
 0x315   : > { %v2093_v60 = vmul.f32 2.0, %v6425_v38  ;;  %vm2320_vm3 = vcmp.eq.f32.partialorder %v8228_v31, %v2217_v1  ;;  %2736 = vmin.xlane.f32.xlu1 %v8531_v16  ;;  %v2663_v1 = vshra.s32 %v8540_v20, 16 }
 0x316   : > { %v8543_v62 = vsel %vm2320_vm3, %v8282_v22, 128 }
 0x317   : > { %14107 = vst [vmem:[#allocation50_spill] sm:$0xff] %v8543_v62  ;;  %2272 = vmin.xlane.f32.xlu0 %v8536_v61  ;;  %v8547_v23 = vsub.f32 %v8468_v15, %v2093_v60  ;;  %v2761_v31 = vshra.s32 %v8543_v62, 16  ;;  %v1735_v38 = vpop.f32.mrb[124].mxu1 }
 0x318   : > { %v2024_v44 = vpop.f32.mrb[124].mxu0  ;;  %v1737_v14 = vpop.f32.mrb[125].mxu1 }
 0x319   : > { %14108 = vst [vmem:[#allocation51_spill] sm:$0xff] %v8547_v23  ;;  %v8550_v33 = vadd.f32 %v2024_v44, %v1735_v38  ;;  %v2026_v0 = vpop.f32.mrb[125].mxu0  ;;  %2290 = vmin.xlane.f32.xlu1 %v8547_v23  ;;  %v1738_v40 = vpop.f32.mrb[126].mxu1  ;;  %v8559_v62 = vcvt.s32.f32 %v2761_v31  ;;  %v2086_v14 = vmul.f32 2.0, %v8448_v26  ;;  %v8564_v23 = vcvt.s32.f32 %v2663_v1 }
 0x31a   : > { %v2027_v16 = vpop.f32.mrb[126].mxu0  ;;  %v1740_v61 = vpop.f32.mrb[127].mxu1 }
 0x31b   : > { %v6427_v60 = vadd.f32 %v2027_v16, %v1738_v40  ;;  %2652 = vmin.xlane.f32.xlu0 %v8553_v36  ;;  %v2029_v38 = vpop.f32.mrb[127].mxu0  ;;  %v2207_v44 = vpop.xlane.xlu1 %2206  ;;  %v2677_v16 = vshra.s32 %v8567_v32, 16 }
 0x31c   : > { %v2221_v0 = vpop.xlane.xlu0 %2220  ;;  %vm2315_vm6 = vcmp.eq.f32.partialorder %v8202_v41, %v2207_v44 }
 0x31d   : > { %v2095_v2 = vmul.f32 2.0, %v6427_v60  ;;  %vm2322_vm5 = vcmp.eq.f32.partialorder %v8238_v13, %v2221_v0  ;;  %2764 = vmin.xlane.f32.xlu1 %v8559_v62  ;;  %v8580_v13 = vsub.f32 %v8468_v15, %v2086_v14  ;;  %v8584_v61 = vsel %vm2315_vm6, %v8282_v22, 128 }
 0x31e   : > { %v8570_v6 = vsel %vm2322_vm5, %v8282_v22, 128  ;;  %v8591_v1 = vcvt.s32.f32 %v2677_v16  ;;  %v2691_v60 = vshra.s32 %v8584_v61, 16  ;;  %v2088_v14 = vmul.f32 2.0, %v8473_v5 }
 0x31f   : > { %2666 = vmin.xlane.f32.xlu0 %v8564_v23  ;;  %v8575_v40 = vsub.f32 %v8468_v15, %v2095_v2  ;;  %v2789_v26 = vshra.s32 %v8570_v6, 16  ;;  %v2211_v0 = vpop.xlane.xlu1 %2210 }
 0x320   : > { %vm2317_vm9 = vcmp.eq.f32.partialorder %v8212_v21, %v2211_v0  ;;  %v8615_v5 = vsub.f32 %v8468_v15, %v2088_v14  ;;  %v2090_v14 = vmul.f32 2.0, %v8495_v47 }
 0x321   : > { %2294 = vmin.xlane.f32.xlu1 %v8575_v40  ;;  %v8587_v41 = vcvt.s32.f32 %v2789_v26  ;;  %v8607_v26 = vsel %vm2316_vm8, %v8282_v22, 128  ;;  %v8618_v16 = vsel %vm2317_vm9, %v8282_v22, 128 }
 0x322   : > { %v2705_v57 = vshra.s32 %v8607_v26, 16  ;;  %14110 = vst [vmem:[#allocation53_spill] sm:$0xff] %v8615_v5 }
 0x323   : > { %2276 = vmin.xlane.f32.xlu0 %v8580_v13 }
 0x324   : > { %v2225_v31 = vpop.xlane.xlu0 %2224  ;;  %v8626_v0 = vcvt.s32.f32 %v2705_v57 }
 0x325   : > { %vm2324_vm7 = vcmp.eq.f32.partialorder %v8248_v63, %v2225_v31  ;;  %2792 = vmin.xlane.f32.xlu1 %v8587_v41  ;;  %v8602_v63 = vcvt.s32.f32 %v2691_v60  ;;  %v2215_v60 = vpop.xlane.xlu1 %2214 }
 0x326   : > { %v8595_v38 = vsel %vm2324_vm7, %v8282_v22, 128  ;;  %14111 = vst [vmem:[#allocation54_spill] sm:$0xff] %v8626_v0  ;;  %vm2319_vm11 = vcmp.eq.f32.partialorder %v8222_v45, %v2215_v60  ;;  %v8646_v60 = vsub.f32 %v8468_v15, %v2090_v14 }
 0x327   : > { %2680 = vmin.xlane.f32.xlu0 %v8591_v1  ;;  %v2817_v44 = vshra.s32 %v8595_v38, 16  ;;  %14109 = vst [vmem:[#allocation52_spill] sm:$0xff] %v8602_v63 }
 0x328   : > { %14114 = vst [vmem:[#allocation57_spill] sm:$0xff] %v8646_v60 }
 0x329   : > { %v8604_v2 = vcvt.s32.f32 %v2817_v44  ;;  %v2719_v44 = vshra.s32 %v8618_v16, 16 }
 0x32b   : > { %2694 = vmin.xlane.f32.xlu0 %v8602_v63  ;;  %2820 = vmin.xlane.f32.xlu1 %v8604_v2 }
 0x32c   : > { %v2229_v49 = vpop.xlane.xlu0 %2228 }
 0x32d   : > { %vm2326_vm10 = vcmp.eq.f32.partialorder %v8258_v24, %v2229_v49  ;;  %v8635_v49 = vcvt.s32.f32 %v2719_v44  ;;  %v2092_v44 = vmul.f32 2.0, %v8521_v43 }
 0x32e   : > { %v8621_v31 = vsel %vm2326_vm10, %v8282_v22, 128 }
 0x32f   : > { %2280 = vmin.xlane.f32.xlu0 %v8615_v5  ;;  %v2845_v21 = vshra.s32 %v8621_v31, 16  ;;  %14113 = vst [vmem:[#allocation56_spill] sm:$0xff] %v8635_v49  ;;  %v8638_v5 = vsel %vm2319_vm11, %v8282_v22, 128 }
 0x330   : > { %v2747_v47 = vshra.s32 %v8638_v5, 16 }
 0x331   : > { %v8628_v63 = vcvt.s32.f32 %v2845_v21  ;;  %v2219_v21 = vpop.xlane.xlu1 %2218 }
 0x332   : > { %vm2321_vm13 = vcmp.eq.f32.partialorder %v8232_v17, %v2219_v21  ;;  %v8667_v21 = vsub.f32 %v8468_v15, %v2092_v44 }
 0x333   : > { %14112 = vst [vmem:[#allocation55_spill] sm:$0xff] %v8628_v63  ;;  %2708 = vmin.xlane.f32.xlu0 %v8626_v0  ;;  %2848 = vmin.xlane.f32.xlu1 %v8628_v63  ;;  %v8659_v14 = vsel %vm2321_vm13, %v8282_v22, 128 }
 0x334   : > { %v2233_v24 = vpop.xlane.xlu0 %2232  ;;  %14117 = vst [vmem:[#allocation60_spill] sm:$0xff] %v8667_v21  ;;  %v2775_v43 = vshra.s32 %v8659_v14, 16 }
 0x335   : > { %vm2328_vm12 = vcmp.eq.f32.partialorder %v8266_v55, %v2233_v24  ;;  %v8656_v24 = vcvt.s32.f32 %v2747_v47 }
 0x336   : > { %v8641_v57 = vsel %vm2328_vm12, %v8282_v22, 128  ;;  %v8678_v44 = vcvt.s32.f32 %v2775_v43 }
 0x337   : > { %2722 = vmin.xlane.f32.xlu0 %v8635_v49  ;;  %v2873_v45 = vshra.s32 %v8641_v57, 16  ;;  %14116 = vst [vmem:[#allocation59_spill] sm:$0xff] %v8656_v24 }
 0x338   : > { %14119 = vst [vmem:[#allocation62_spill] sm:$0xff] %v8678_v44 }
 0x339   : > { %v8649_v63 = vcvt.s32.f32 %v2873_v45  ;;  %v2223_v45 = vpop.xlane.xlu1 %2222 }
 0x33a   : > { %vm2323_vm15 = vcmp.eq.f32.partialorder %v8242_v34, %v2223_v45 }
 0x33b   : > { %14115 = vst [vmem:[#allocation58_spill] sm:$0xff] %v8649_v63  ;;  %2284 = vmin.xlane.f32.xlu0 %v8646_v60  ;;  %2876 = vmin.xlane.f32.xlu1 %v8649_v63  ;;  %v8681_v60 = vsel %vm2323_vm15, %v8282_v22, 128 }
 0x33c   : > { %v2237_v55 = vpop.xlane.xlu0 %2236 }
 0x33d   : > { %vm2330_vm14 = vcmp.eq.f32.partialorder %v8274_v25, %v2237_v55  ;;  %v2227_v25 = vpop.xlane.xlu1 %2226  ;;  %v2424_v55 = vand.u32 65535, %v8289_v39 }
 0x33e   : > { %v8662_v49 = vsel %vm2330_vm14, %v8282_v22, 128  ;;  %vm2325_vm1 = vcmp.eq.f32.partialorder %v8252_v58, %v2227_v25 }
 0x33f   : > { %2750 = vmin.xlane.f32.xlu0 %v8656_v24  ;;  %v2901_v17 = vshra.s32 %v8662_v49, 16  ;;  %v2094_v24 = vmul.f32 2.0, %v8550_v33  ;;  %v2426_v39 = vcvt.s32.f32 %v2424_v55 }
 0x341   : > { %v8670_v63 = vcvt.s32.f32 %v2901_v17  ;;  %v2231_v34 = vpop.xlane.xlu1 %2230  ;;  %v8691_v33 = vsub.f32 %v8468_v15, %v2094_v24  ;;  %v2438_v15 = vand.u32 65535, %v8301_v56 }
 0x342   : > { %vm2327_vm3 = vcmp.eq.f32.partialorder %v8262_v8, %v2231_v34 }
 0x343   : > { %14118 = vst [vmem:[#allocation61_spill] sm:$0xff] %v8670_v63  ;;  %2288 = vmin.xlane.f32.xlu0 %v8667_v21  ;;  %2904 = vmin.xlane.f32.xlu1 %v8670_v63  ;;  %14120 = vst [vmem:[#allocation63_spill] sm:$0xff] %v8691_v33  ;;  %v8711_v63 = vsel %vm2327_vm3, %v8282_v22, 128  ;;  %v2440_v34 = vcvt.s32.f32 %v2438_v15  ;;  %v14142_v21 = vld [vmem:[#allocation26_spill] sm:$0xff] }
 0x344   : > { %v2241_v47 = vpop.xlane.xlu0 %2240 }
 0x345   : > { %vm2332_vm0 = vcmp.eq.f32.partialorder %v8286_v42, %v2241_v47  ;;  %v2803_v42 = vshra.s32 %v8681_v60, 16  ;;  %v8698_v47 = vsel %vm2325_vm1, %v8282_v22, 128  ;;  %v2235_v25 = vpop.xlane.xlu1 %2234 }
 0x346   : > { %v8684_v17 = vsel %vm2332_vm0, %v8282_v22, 128  ;;  %v2831_v24 = vshra.s32 %v8698_v47, 16  ;;  %vm2329_vm4 = vcmp.eq.f32.partialorder %v8270_v35, %v2235_v25 }
 0x347   : > { %2778 = vmin.xlane.f32.xlu0 %v8678_v44  ;;  %v2929_v43 = vshra.s32 %v8684_v17, 16  ;;  %v8706_v44 = vcvt.s32.f32 %v2803_v42  ;;  %v2859_v42 = vshra.s32 %v8711_v63, 16  ;;  %v8724_v35 = vsel %vm2329_vm4, %v8282_v22, 128 }
 0x348   : > { %v8688_v45 = vpop.xlane.xlu0 %2428 }
 0x349   : > { %vm2430_vm2 = vcmp.eq.f32.partialorder %v8298_v54, %v8688_v45  ;;  %14121 = vst [vmem:[#allocation64_spill] sm:$0xff] %v8706_v44  ;;  %v8708_v54 = vcvt.s32.f32 %v2929_v43  ;;  %v2239_v8 = vpop.xlane.xlu1 %2238  ;;  %v8721_v43 = vcvt.s32.f32 %v2831_v24  ;;  %v8734_v24 = vcvt.s32.f32 %v2859_v42 }
 0x34a   : > { %v2431_v58 = vsel %vm2430_vm2, %v2426_v39, inf  ;;  %v2452_v39 = vand.u32 65535, %v8309_v3  ;;  %vm2331_vm7 = vcmp.eq.f32.partialorder %v8278_v11, %v2239_v8  ;;  %v2466_v42 = vand.u32 65535, %v8321_v46 }
 0x34b   : > { %2292 = vmin.xlane.f32.xlu0 %v8691_v33  ;;  %2432 = vmin.xlane.f32.xlu1 %v2431_v58  ;;  %14122 = vst [vmem:[#allocation65_spill] sm:$0xff] %v8708_v54  ;;  %14123 = vst [vmem:[#allocation66_spill] sm:$0xff] %v8721_v43 }
 0x34c   : > { %v8702_v55 = vpop.xlane.xlu0 %2442  ;;  %v2454_v15 = vcvt.s32.f32 %v2452_v39  ;;  %14124 = vst [vmem:[#allocation67_spill] sm:$0xff] %v8734_v24 }
 0x34d   : > { %vm2444_vm5 = vcmp.eq.f32.partialorder %v8306_v19, %v8702_v55  ;;  %v2243_v19 = vpop.xlane.xlu1 %2242 }
 0x34e   : > { %v2445_v25 = vsel %vm2444_vm5, %v2440_v34, inf  ;;  %v8740_v34 = vsel %vm2331_vm7, %v8282_v22, 128  ;;  %vm2333_vm9 = vcmp.eq.f32.partialorder %v8293_v27, %v2243_v19  ;;  %v2468_v19 = vcvt.s32.f32 %v2466_v42 }
 0x34f   : > { %2806 = vmin.xlane.f32.xlu0 %v8706_v44  ;;  %2932 = vmin.xlane.f32.xlu1 %v8708_v54  ;;  %v8753_v54 = vsel %vm2333_vm9, %v8282_v22, 128 }
 0x350   : > { %v2245_v56 = vpop.xlane.xlu0 %2244 }
 0x351   : > { %vm2334_vm6 = vcmp.eq.f32.partialorder %v8317_v50, %v2245_v56  ;;  %v2887_v50 = vshra.s32 %v8724_v35, 16  ;;  %v2247_v8 = vpop.xlane.xlu1 %2246 }
 0x352   : > { %v8727_v58 = vsel %vm2334_vm6, %v8282_v22, 128  ;;  %vm2335_vm10 = vcmp.eq.f32.partialorder %v8313_v9, %v2247_v8 }
 0x353   : > { %2834 = vmin.xlane.f32.xlu0 %v8721_v43  ;;  %2446 = vmin.xlane.f32.xlu1 %v2445_v25  ;;  %v2957_v56 = vshra.s32 %v8727_v58, 16  ;;  %v2915_v25 = vshra.s32 %v8740_v34, 16  ;;  %v8748_v43 = vcvt.s32.f32 %v2887_v50  ;;  %v2943_v50 = vshra.s32 %v8753_v54, 16 }
 0x354   : > { %v8731_v3 = vpop.xlane.xlu0 %2456  ;;  %v8766_v9 = vsel %vm2335_vm10, %v8282_v22, 128 }
 0x355   : > { %vm2458_vm8 = vcmp.eq.f32.partialorder %v8325_v4, %v8731_v3  ;;  %14125 = vst [vmem:[#allocation68_spill] sm:$0xff] %v8748_v43  ;;  %v8750_v4 = vcvt.s32.f32 %v2957_v56  ;;  %v14127_v56 = vld [vmem:[#allocation19_spill] sm:$0xff] }
 0x356   : > { %v2459_v11 = vsel %vm2458_vm8, %v2454_v15, inf  ;;  %v2251_v27 = vpop.xlane.xlu1 %2250  ;;  %v2480_v15 = vand.u32 65535, %v8336_v30 }
 0x357   : > { %2862 = vmin.xlane.f32.xlu0 %v8734_v24  ;;  %2460 = vmin.xlane.f32.xlu1 %v2459_v11  ;;  %14126 = vst [vmem:[#allocation69_spill] sm:$0xff] %v8750_v4  ;;  %v8763_v11 = vcvt.s32.f32 %v2915_v25  ;;  %v8776_v25 = vcvt.s32.f32 %v2943_v50 }
 0x358   : > { %v8744_v39 = vpop.xlane.xlu0 %2470  ;;  %v2482_v42 = vcvt.s32.f32 %v2480_v15 }
 0x359   : > { %vm2472_vm11 = vcmp.eq.f32.partialorder %v8333_v53, %v8744_v39  ;;  %14128 = vst [vmem:[#allocation19_spill] sm:$0xff] %v8763_v11 }
 0x35b   : > { %2890 = vmin.xlane.f32.xlu0 %v8748_v43  ;;  %2960 = vmin.xlane.f32.xlu1 %v8750_v4  ;;  %v2473_v4 = vsel %vm2472_vm11, %v2468_v19, inf  ;;  %v14129_v43 = vld [vmem:[#allocation18_spill] sm:$0xff] }
 0x35c   : > { %v2249_v46 = vpop.xlane.xlu0 %2248  ;;  %vm2337_vm13 = vcmp.eq.f32.partialorder %v14129_v43, %v2251_v27  ;;  %14130 = vst [vmem:[#allocation18_spill] sm:$0xff] %v8776_v25  ;;  %v2494_v27 = vand.u32 65535, %v8346_v12 }
 0x35d   : > { %vm2336_vm12 = vcmp.eq.f32.partialorder %v14127_v56, %v2249_v46  ;;  %v2971_v46 = vshra.s32 %v8766_v9, 16  ;;  %v8782_v19 = vsel %vm2337_vm13, %v8282_v22, 128 }
 0x35e   : > { %v8769_v8 = vsel %vm2336_vm12, %v8282_v22, 128  ;;  %v2255_v53 = vpop.xlane.xlu1 %2254  ;;  %v2999_v15 = vshra.s32 %v8782_v19, 16 }
 0x35f   : > { %2918 = vmin.xlane.f32.xlu0 %v8763_v11  ;;  %2474 = vmin.xlane.f32.xlu1 %v2473_v4  ;;  %v2985_v56 = vshra.s32 %v8769_v8, 16  ;;  %vm2339_vm15 = vcmp.eq.f32.partialorder %v8350_v7, %v2255_v53  ;;  %v8790_v50 = vcvt.s32.f32 %v2971_v46  ;;  %v14134_v7 = vld [vmem:[#allocation20_spill] sm:$0xff]  ;;  %v2496_v53 = vcvt.s32.f32 %v2494_v27 }
 0x360   : > { %v8773_v30 = vpop.xlane.xlu0 %2484  ;;  %v8795_v11 = vsel %vm2339_vm15, %v8282_v22, 128  ;;  %v8805_v44 = vcvt.s32.f32 %v2999_v15  ;;  %v14141_v15 = vld [vmem:[#allocation25_spill] sm:$0xff] }
 0x361   : > { %vm2486_vm14 = vcmp.eq.f32.partialorder %v8353_v28, %v8773_v30  ;;  %14131 = vst [vmem:[#allocation70_spill] sm:$0xff] %v8790_v50  ;;  %v8792_v28 = vcvt.s32.f32 %v2985_v56  ;;  %v3027_v56 = vshra.s32 %v8795_v11, 16 }
 0x362   : > { %v2487_v43 = vsel %vm2486_vm14, %v2482_v42, inf  ;;  %v14133_v42 = vld [vmem:[#allocation22_spill] sm:$0xff] }
 0x363   : > { %2946 = vmin.xlane.f32.xlu0 %v8776_v25  ;;  %2488 = vmin.xlane.f32.xlu1 %v2487_v43  ;;  %14132 = vst [vmem:[#allocation71_spill] sm:$0xff] %v8792_v28  ;;  %v14135_v43 = vld [vmem:[#allocation21_spill] sm:$0xff]  ;;  %v14136_v25 = vld [vmem:[#allocation23_spill] sm:$0xff]  ;;  %14137 = vst [vmem:[#allocation22_spill] sm:$0xff] %v8805_v44 }
 0x364   : > { %v8786_v4 = vpop.xlane.xlu0 %2498  ;;  %v2508_v46 = vand.u32 65535, %v14135_v43 }
 0x365   : > { %vm2500_vm1 = vcmp.eq.f32.partialorder %v14134_v7, %v8786_v4 }
 0x366   : > { %v2259_v24 = vpop.xlane.xlu1 %2258  ;;  %v2510_v27 = vcvt.s32.f32 %v2508_v46 }
 0x367   : > { %vm2341_vm0 = vcmp.eq.f32.partialorder %v14133_v42, %v2259_v24  ;;  %2974 = vmin.xlane.f32.xlu0 %v8790_v50  ;;  %2988 = vmin.xlane.f32.xlu1 %v8792_v28  ;;  %v2501_v42 = vsel %vm2500_vm1, %v2496_v53, inf  ;;  %v14143_v53 = vld [vmem:[#allocation24_spill] sm:$0xff] }
 0x368   : > { %v2253_v12 = vpop.xlane.xlu0 %2252  ;;  %v8808_v33 = vsel %vm2341_vm0, %v8282_v22, 128 }
 0x369   : > { %vm2338_vm2 = vcmp.eq.f32.partialorder %v14136_v25, %v2253_v12  ;;  %v3055_v43 = vshra.s32 %v8808_v33, 16  ;;  %v8818_v25 = vcvt.s32.f32 %v3027_v56 }
 0x36a   : > { %v8811_v24 = vsel %vm2338_vm2, %v8282_v22, 128 }
 0x36b   : > { %14138 = vst [vmem:[#allocation20_spill] sm:$0xff] %v8811_v24  ;;  %3002 = vmin.xlane.f32.xlu0 %v8805_v44  ;;  %2502 = vmin.xlane.f32.xlu1 %v2501_v42  ;;  %v3013_v28 = vshra.s32 %v8811_v24, 16  ;;  %14140 = vst [vmem:[#allocation23_spill] sm:$0xff] %v8818_v25  ;;  %v2522_v42 = vand.u32 65535, %v14143_v53  ;;  %v8831_v0 = vcvt.s32.f32 %v3055_v43  ;;  %v14150_v53 = vld [vmem:[#allocation29_spill] sm:$0xff] }
 0x36c   : > { %v8814_v7 = vpop.xlane.xlu0 %2512 }
 0x36d   : > { %14139 = vst [vmem:[#allocation21_spill] sm:$0xff] %v8814_v7  ;;  %vm2514_vm3 = vcmp.eq.f32.partialorder %v14141_v15, %v8814_v7  ;;  %14146 = vst [vmem:[#allocation24_spill] sm:$0xff] %v8831_v0  ;;  %v8833_v24 = vcvt.s32.f32 %v3013_v28 }
 0x36e   : > { %v2263_v12 = vpop.xlane.xlu1 %2262  ;;  %v2515_v50 = vsel %vm2514_vm3, %v2510_v27, inf }
 0x36f   : > { %vm2343_vm4 = vcmp.eq.f32.partialorder %v14142_v21, %v2263_v12  ;;  %3030 = vmin.xlane.f32.xlu0 %v8818_v25  ;;  %2516 = vmin.xlane.f32.xlu1 %v2515_v50  ;;  %14147 = vst [vmem:[#allocation72_spill] sm:$0xff] %v8833_v24  ;;  %v14148_v21 = vld [vmem:[#allocation27_spill] sm:$0xff]  ;;  %v14149_v50 = vld [vmem:[#allocation28_spill] sm:$0xff]  ;;  %v2524_v12 = vcvt.s32.f32 %v2522_v42 }
 0x370   : > { %v8826_v46 = vsel %vm2343_vm4, %v8282_v22, 128  ;;  %v8828_v44 = vpop.xlane.xlu0 %2526  ;;  %v2536_v27 = vand.u32 65535, %v14149_v50 }
 0x371   : > { %14144 = vst [vmem:[#allocation25_spill] sm:$0xff] %v8826_v46  ;;  %14145 = vst [vmem:[#allocation26_spill] sm:$0xff] %v8828_v44  ;;  %v3083_v56 = vshra.s32 %v8826_v46, 16  ;;  %vm2528_vm5 = vcmp.eq.f32.partialorder %v14148_v21, %v8828_v44 }
 0x372   : > { %v2529_v46 = vsel %vm2528_vm5, %v2524_v12, inf  ;;  %v2538_v42 = vcvt.s32.f32 %v2536_v27 }
 0x373   : > { %3058 = vmin.xlane.f32.xlu0 %v8831_v0  ;;  %3016 = vmin.xlane.f32.xlu1 %v8833_v24  ;;  %v8841_v25 = vcvt.s32.f32 %v3083_v56  ;;  %v14159_v0 = vld [vmem:[#allocation30_spill] sm:$0xff] }
 0x374   : > { %v2257_v15 = vpop.xlane.xlu0 %2256 }
 0x375   : > { %vm2340_vm6 = vcmp.eq.f32.partialorder %v14150_v53, %v2257_v15  ;;  %14151 = vst [vmem:[#allocation27_spill] sm:$0xff] %v8841_v25 }
 0x376   : > { %v8844_v43 = vsel %vm2340_vm6, %v8282_v22, 128  ;;  %v2267_v28 = vpop.xlane.xlu1 %2266 }
 0x377   : > { %14152 = vst [vmem:[#allocation28_spill] sm:$0xff] %v8844_v43  ;;  %vm2345_vm7 = vcmp.eq.f32.partialorder %v8404_v52, %v2267_v28  ;;  %3086 = vmin.xlane.f32.xlu0 %v8841_v25  ;;  %2530 = vmin.xlane.f32.xlu1 %v2529_v46  ;;  %v3041_v15 = vshra.s32 %v8844_v43, 16  ;;  %v2550_v52 = vand.u32 65535, %v8400_v59  ;;  %v14158_v25 = vld [vmem:[#allocation32_spill] sm:$0xff] }
 0x378   : > { %v8849_v21 = vsel %vm2345_vm7, %v8282_v22, 128  ;;  %v8851_v50 = vpop.xlane.xlu0 %2540 }
 0x379   : > { %14153 = vst [vmem:[#allocation29_spill] sm:$0xff] %v8849_v21  ;;  %14154 = vst [vmem:[#allocation73_spill] sm:$0xff] %v8851_v50  ;;  %v3111_v56 = vshra.s32 %v8849_v21, 16  ;;  %vm2542_vm8 = vcmp.eq.f32.partialorder %v8409_v48, %v8851_v50  ;;  %v8863_v28 = vcvt.s32.f32 %v3041_v15  ;;  %v14160_v48 = vld [vmem:[#allocation31_spill] sm:$0xff]  ;;  %v14177_v21 = vld [vmem:[#allocation40_spill] sm:$0xff] }
 0x37a   : > { %v2543_v53 = vsel %vm2542_vm8, %v2538_v42, inf  ;;  %v2564_v42 = vand.u32 65535, %v14160_v48 }
 0x37b   : > { %2544 = vmin.xlane.f32.xlu1 %v2543_v53  ;;  %v8857_v12 = vcvt.s32.f32 %v3111_v56  ;;  %14157 = vst [vmem:[#allocation76_spill] sm:$0xff] %v8863_v28  ;;  %v2552_v53 = vcvt.s32.f32 %v2550_v52  ;;  %v14166_v52 = vld [vmem:[#allocation35_spill] sm:$0xff] }
 0x37c   : > { %v8860_v46 = vpop.xlane.xlu0 %2554 }
 0x37d   : > { %14155 = vst [vmem:[#allocation74_spill] sm:$0xff] %v8857_v12  ;;  %14156 = vst [vmem:[#allocation75_spill] sm:$0xff] %v8860_v46  ;;  %3114 = vmin.xlane.f32.xlu0 %v8857_v12  ;;  %vm2556_vm10 = vcmp.eq.f32.partialorder %v14159_v0, %v8860_v46  ;;  %v14162_v12 = vld [vmem:[#allocation33_spill] sm:$0xff]  ;;  %v2566_v0 = vcvt.s32.f32 %v2564_v42 }
 0x37e   : > { %v2271_v27 = vpop.xlane.xlu1 %2270 }
 0x37f   : > { %vm2347_vm9 = vcmp.eq.f32.partialorder %v14158_v25, %v2271_v27  ;;  %3044 = vmin.xlane.f32.xlu1 %v8863_v28  ;;  %v2557_v25 = vsel %vm2556_vm10, %v2552_v53, inf }
 0x380   : > { %v8871_v56 = vsel %vm2347_vm9, %v8282_v22, 128  ;;  %v2261_v59 = vpop.xlane.xlu0 %2260 }
 0x381   : > { %14161 = vst [vmem:[#allocation32_spill] sm:$0xff] %v8871_v56  ;;  %v3139_v24 = vshra.s32 %v8871_v56, 16  ;;  %vm2342_vm11 = vcmp.eq.f32.partialorder %v14162_v12, %v2261_v59  ;;  %v14167_v12 = vld [vmem:[#allocation36_spill] sm:$0xff]  ;;  %v14168_v59 = vld [vmem:[#allocation34_spill] sm:$0xff] }
 0x382   : > { %v8876_v15 = vsel %vm2342_vm11, %v8282_v22, 128  ;;  %v2578_v53 = vand.u32 65535, %v14168_v59  ;;  %v14175_v59 = vld [vmem:[#allocation39_spill] sm:$0xff] }
 0x383   : > { %14163 = vst [vmem:[#allocation30_spill] sm:$0xff] %v8876_v15  ;;  %2558 = vmin.xlane.f32.xlu1 %v2557_v25  ;;  %v8878_v27 = vcvt.s32.f32 %v3139_v24  ;;  %v3069_v48 = vshra.s32 %v8876_v15, 16 }
 0x384   : > { %v8880_v28 = vpop.xlane.xlu0 %2568 }
 0x385   : > { %14164 = vst [vmem:[#allocation31_spill] sm:$0xff] %v8878_v27  ;;  %14165 = vst [vmem:[#allocation33_spill] sm:$0xff] %v8880_v28  ;;  %3142 = vmin.xlane.f32.xlu0 %v8878_v27  ;;  %vm2570_vm12 = vcmp.eq.f32.partialorder %v14166_v52, %v8880_v28  ;;  %v8894_v15 = vcvt.s32.f32 %v3069_v48 }
 0x386   : > { %v2275_v56 = vpop.xlane.xlu1 %2274  ;;  %v2571_v46 = vsel %vm2570_vm12, %v2566_v0, inf  ;;  %v14173_v0 = vld [vmem:[#allocation37_spill] sm:$0xff] }
 0x387   : > { %vm2349_vm13 = vcmp.eq.f32.partialorder %v14167_v12, %v2275_v56  ;;  %2572 = vmin.xlane.f32.xlu1 %v2571_v46  ;;  %14171 = vst [vmem:[#allocation34_spill] sm:$0xff] %v8894_v15  ;;  %v14174_v56 = vld [vmem:[#allocation38_spill] sm:$0xff]  ;;  %v2580_v12 = vcvt.s32.f32 %v2578_v53 }
 0x388   : > { %v8889_v24 = vsel %vm2349_vm13, %v8282_v22, 128  ;;  %v8891_v25 = vpop.xlane.xlu0 %2582  ;;  %v2592_v46 = vand.u32 65535, %v14174_v56 }
 0x389   : > { %14169 = vst [vmem:[#allocation35_spill] sm:$0xff] %v8889_v24  ;;  %14170 = vst [vmem:[#allocation36_spill] sm:$0xff] %v8891_v25  ;;  %v3167_v42 = vshra.s32 %v8889_v24, 16  ;;  %vm2584_vm14 = vcmp.eq.f32.partialorder %v14173_v0, %v8891_v25 }
 0x38a   : > { %v2585_v24 = vsel %vm2584_vm14, %v2580_v12, inf  ;;  %v2594_v56 = vcvt.s32.f32 %v2592_v46 }
 0x38b   : > { %3072 = vmin.xlane.f32.xlu1 %v8894_v15  ;;  %v8897_v27 = vcvt.s32.f32 %v3167_v42  ;;  %v14184_v15 = vld [vmem:[#allocation41_spill] sm:$0xff] }
 0x38c   : > { %v2265_v52 = vpop.xlane.xlu0 %2264 }
 0x38d   : > { %14172 = vst [vmem:[#allocation77_spill] sm:$0xff] %v8897_v27  ;;  %vm2344_vm15 = vcmp.eq.f32.partialorder %v14175_v59, %v2265_v52  ;;  %3170 = vmin.xlane.f32.xlu0 %v8897_v27 }
 0x38e   : > { %v8905_v28 = vsel %vm2344_vm15, %v8282_v22, 128  ;;  %v2279_v48 = vpop.xlane.xlu1 %2278 }
 0x38f   : > { %14176 = vst [vmem:[#allocation37_spill] sm:$0xff] %v8905_v28  ;;  %vm2351_vm0 = vcmp.eq.f32.partialorder %v14177_v21, %v2279_v48  ;;  %2586 = vmin.xlane.f32.xlu1 %v2585_v24  ;;  %v3097_v53 = vshra.s32 %v8905_v28, 16  ;;  %v2606_v21 = vand.u32 65535, %v8463_v37  ;;  %v14183_v48 = vld [vmem:[#allocation43_spill] sm:$0xff] }
 0x390   : > { %v8909_v42 = vsel %vm2351_vm0, %v8282_v22, 128  ;;  %v8911_v0 = vpop.xlane.xlu0 %2596 }
 0x391   : > { %14178 = vst [vmem:[#allocation38_spill] sm:$0xff] %v8909_v42  ;;  %14179 = vst [vmem:[#allocation39_spill] sm:$0xff] %v8911_v0  ;;  %v3195_v52 = vshra.s32 %v8909_v42, 16  ;;  %vm2598_vm1 = vcmp.eq.f32.partialorder %v8476_v10, %v8911_v0  ;;  %v8923_v12 = vcvt.s32.f32 %v3097_v53  ;;  %v14185_v10 = vld [vmem:[#allocation42_spill] sm:$0xff] }
 0x392   : > { %v2599_v59 = vsel %vm2598_vm1, %v2594_v56, inf  ;;  %v2620_v56 = vand.u32 65535, %v14185_v10 }
 0x393   : > { %2600 = vmin.xlane.f32.xlu1 %v2599_v59  ;;  %v8917_v27 = vcvt.s32.f32 %v3195_v52  ;;  %14182 = vst [vmem:[#allocation79_spill] sm:$0xff] %v8923_v12  ;;  %v2608_v59 = vcvt.s32.f32 %v2606_v21  ;;  %v14191_v21 = vld [vmem:[#allocation45_spill] sm:$0xff] }
 0x394   : > { %v8920_v24 = vpop.xlane.xlu0 %2610  ;;  %v2622_v10 = vcvt.s32.f32 %v2620_v56 }
 0x395   : > { %14180 = vst [vmem:[#allocation40_spill] sm:$0xff] %v8917_v27  ;;  %14181 = vst [vmem:[#allocation78_spill] sm:$0xff] %v8920_v24  ;;  %3198 = vmin.xlane.f32.xlu0 %v8917_v27  ;;  %vm2612_vm3 = vcmp.eq.f32.partialorder %v14184_v15, %v8920_v24 }
 0x396   : > { %v2283_v46 = vpop.xlane.xlu1 %2282 }
 0x397   : > { %vm2353_vm2 = vcmp.eq.f32.partialorder %v14183_v48, %v2283_v46  ;;  %3100 = vmin.xlane.f32.xlu1 %v8923_v12  ;;  %v2613_v46 = vsel %vm2612_vm3, %v2608_v59, inf  ;;  %v14189_v12 = vlaneseq  ;;  %v14193_v59 = vld [vmem:[#allocation44_spill] sm:$0xff] }
 0x398   : > { %v8931_v52 = vsel %vm2353_vm2, %v8282_v22, 128  ;;  %v2269_v37 = vpop.xlane.xlu0 %2268  ;;  %v2634_v56 = vand.u32 65535, %v14193_v59 }
 0x399   : > { %14186 = vst [vmem:[#allocation43_spill] sm:$0xff] %v8931_v52  ;;  %v3223_v0 = vshra.s32 %v8931_v52, 16  ;;  %vm2346_vm4 = vcmp.eq.f32.partialorder %v8499_v18, %v2269_v37  ;;  %v3521_v15 = vshrl.u32 %v14189_v12, 7  ;;  %v14192_v18 = vld [vmem:[#allocation46_spill] sm:$0xff] }
 0x39a   : > { %v8936_v53 = vsel %vm2346_vm4, %v8282_v22, 128  ;;  %v2732_v37 = vand.u32 65535, %v14192_v18  ;;  %v2662_v18 = vand.u32 65535, %v8540_v20  ;;  %v14199_v20 = vld [vmem:[#allocation47_spill] sm:$0xff]  ;;  %v2636_v44 = vcvt.s32.f32 %v2634_v56 }
 0x39b   : > { %14187 = vst [vmem:[#allocation41_spill] sm:$0xff] %v8936_v53  ;;  %2614 = vmin.xlane.f32.xlu1 %v2613_v46  ;;  %v8938_v48 = vcvt.s32.f32 %v3223_v0  ;;  %v3125_v24 = vshra.s32 %v8936_v53, 16  ;;  %v8949_v0 = vsub.s32 0, %v3521_v15  ;;  %v8951_v12 = vsub.s32 1, %v3521_v15 }
 0x39c   : > { %v8941_v27 = vpop.xlane.xlu0 %2624  ;;  %v2734_v53 = vcvt.s32.f32 %v2732_v37  ;;  %v8971_v28 = vsub.s32 4, %v3521_v15  ;;  %v14201_v37 = vld [vmem:[#allocation49_spill] sm:$0xff]  ;;  %v2746_v56 = vand.u32 65535, %v8638_v5 }
 0x39d   : > { %14188 = vst [vmem:[#allocation42_spill] sm:$0xff] %v8938_v48  ;;  %14190 = vst [vmem:[#allocation80_spill] sm:$0xff] %v8941_v27  ;;  %3226 = vmin.xlane.f32.xlu0 %v8938_v48  ;;  %vm2626_vm5 = vcmp.eq.f32.partialorder %v14191_v21, %v8941_v27  ;;  %v2648_v21 = vand.u32 65535, %v8527_v29  ;;  %v8962_v27 = vcvt.s32.f32 %v3125_v24  ;;  %v14198_v29 = vld [vmem:[#allocation48_spill] sm:$0xff]  ;;  %v14200_v24 = vld [vmem:[#allocation50_spill] sm:$0xff] }
 0x39e   : > { %v2287_v52 = vpop.xlane.xlu1 %2286  ;;  %v2627_v42 = vsel %vm2626_vm5, %v2622_v10, inf  ;;  %v2676_v10 = vand.u32 65535, %v8567_v32  ;;  %v8979_v32 = vsub.s32 5, %v3521_v15  ;;  %v2760_v50 = vand.u32 65535, %v14200_v24  ;;  %v14202_v24 = vld [vmem:[#allocation51_spill] sm:$0xff] }
 0x39f   : > { %vm2355_vm6 = vcmp.eq.f32.partialorder %v8517_v51, %v2287_v52  ;;  %2628 = vmin.xlane.f32.xlu1 %v2627_v42  ;;  %14196 = vst [vmem:[#allocation44_spill] sm:$0xff] %v8962_v27  ;;  %v8964_v51 = vsub.s32 2, %v3521_v15  ;;  %v8966_v42 = vsub.s32 3, %v3521_v15  ;;  %v2690_v52 = vand.u32 65535, %v8584_v61 }
 0x3a0   : > { %v8955_v46 = vsel %vm2355_vm6, %v8282_v22, 128  ;;  %v8957_v48 = vpop.xlane.xlu0 %2638  ;;  %v2650_v7 = vcvt.s32.f32 %v2648_v21  ;;  %v2774_v21 = vand.u32 65535, %v8659_v14  ;;  %v2830_v14 = vand.u32 65535, %v8698_v47 }
 0x3a1   : > { %14194 = vst [vmem:[#allocation45_spill] sm:$0xff] %v8955_v46  ;;  %14195 = vst [vmem:[#allocation46_spill] sm:$0xff] %v8957_v48  ;;  %v3251_v25 = vshra.s32 %v8955_v46, 16  ;;  %vm2640_vm8 = vcmp.eq.f32.partialorder %v14199_v20, %v8957_v48  ;;  %v8983_v46 = vcvt.s32.f32 %v2662_v18  ;;  %v8991_v48 = vcvt.s32.f32 %v2690_v52 }
 0x3a2   : > { %v8969_v59 = vpop.xlane.xlu1 %2736  ;;  %v2641_v20 = vsel %vm2640_vm8, %v2636_v44, inf  ;;  %v2762_v44 = vcvt.s32.f32 %v2760_v50  ;;  %v2802_v52 = vand.u32 65535, %v8681_v60 }
 0x3a3   : > { %14197 = vst [vmem:[#allocation81_spill] sm:$0xff] %v8969_v59  ;;  %3128 = vmin.xlane.f32.xlu1 %v8962_v27  ;;  %vm2738_vm7 = vcmp.eq.f32.partialorder %v14198_v29, %v8969_v59  ;;  %v8985_v27 = vcvt.s32.f32 %v2676_v10  ;;  %v2704_v29 = vand.u32 65535, %v8607_v26  ;;  %v2788_v26 = vand.u32 65535, %v8570_v6 }
 0x3a4   : > { %v2273_v61 = vpop.xlane.xlu0 %2272  ;;  %v2739_v43 = vsel %vm2738_vm7, %v2734_v53, inf  ;;  %v2718_v53 = vand.u32 65535, %v8618_v16  ;;  %v2816_v16 = vand.u32 65535, %v8595_v38  ;;  %v2844_v6 = vand.u32 65535, %v8621_v31 }
 0x3a5   : > { %vm2348_vm9 = vcmp.eq.f32.partialorder %v14201_v37, %v2273_v61  ;;  %2740 = vmin.xlane.f32.xlu0 %v2739_v43  ;;  %v8996_v43 = vcvt.s32.f32 %v3251_v25  ;;  %v2858_v25 = vand.u32 65535, %v8711_v63  ;;  %v9019_v38 = vcvt.s32.f32 %v2704_v29 }
 0x3a6   : > { %v8989_v59 = vsel %vm2348_vm9, %v8282_v22, 128  ;;  %v2291_v15 = vpop.xlane.xlu1 %2290  ;;  %v9021_v37 = vcvt.s32.f32 %v2718_v53  ;;  %v9028_v63 = vcvt.s32.f32 %v2774_v21  ;;  %v2886_v29 = vand.u32 65535, %v8724_v35 }
 0x3a7   : > { %vm2357_vm10 = vcmp.eq.f32.partialorder %v14202_v24, %v2291_v15  ;;  %2642 = vmin.xlane.f32.xlu1 %v2641_v20  ;;  %14203 = vst [vmem:[#allocation48_spill] sm:$0xff] %v8996_v43  ;;  %v3153_v5 = vshra.s32 %v8989_v59, 16  ;;  %v9026_v15 = vcvt.s32.f32 %v2746_v56  ;;  %v2790_v20 = vcvt.s32.f32 %v2788_v26 }
 0x3a8   : > { %v9001_v18 = vsel %vm2357_vm10, %v8282_v22, 128  ;;  %v9003_v10 = vpop.xlane.xlu0 %2652  ;;  %v9032_v24 = vcvt.s32.f32 %v2816_v16  ;;  %v2900_v56 = vand.u32 65535, %v8662_v49  ;;  %v2914_v35 = vand.u32 65535, %v8740_v34 }
 0x3a9   : > { %3254 = vmin.xlane.f32.xlu0 %v8996_v43  ;;  %vm2654_vm11 = vcmp.eq.f32.partialorder %v8553_v36, %v9003_v10  ;;  %v3279_v60 = vshra.s32 %v9001_v18, 16  ;;  %v2872_v36 = vand.u32 65535, %v8641_v57  ;;  %v9039_v57 = vcvt.s32.f32 %v2830_v14 }
 0x3aa   : > { %v9014_v61 = vpop.xlane.xlu1 %2764  ;;  %v2655_v50 = vsel %vm2654_vm11, %v2650_v7, inf  ;;  %v9030_v7 = vcvt.s32.f32 %v3153_v5  ;;  %v2928_v26 = vand.u32 65535, %v8684_v17  ;;  %v2942_v49 = vand.u32 65535, %v8753_v54 }
 0x3ab   : > { %2656 = vmin.xlane.f32.xlu1 %v2655_v50  ;;  %vm2766_vm12 = vcmp.eq.f32.partialorder %v8559_v62, %v9014_v61  ;;  %v9034_v62 = vcvt.s32.f32 %v2802_v52  ;;  %v9037_v50 = vcvt.s32.f32 %v2844_v6  ;;  %14206 = vst [vmem:[#allocation49_spill] sm:$0xff] %v9039_v57  ;;  %v9046_v21 = vcvt.s32.f32 %v3279_v60  ;;  %v3320_v6 = vld [vmem:[#allocation5] ss:$8 sm:$0xf] }
 0x3ac   : > { %v9024_v47 = vpop.xlane.xlu0 %2666  ;;  %v2767_v31 = vsel %vm2766_vm12, %v2762_v44, inf  ;;  %14204 = vst [vmem:[#allocation47_spill] sm:$0xff] %v9030_v7  ;;  %v9041_v44 = vcvt.s32.f32 %v2858_v25  ;;  %v9055_v5 = vcvt.s32.f32 %v2872_v36  ;;  %v2435_v34 = vcvt.f32.s32 %v8688_v45  ;;  %v3324_v45 = vld [vmem:[#allocation5 + $0x1] ss:$8 sm:$0xf] }
 0x3ad   : > { %2768 = vmin.xlane.f32.xlu0 %v2767_v31  ;;  %14205 = vst [vmem:[#allocation50_spill] sm:$0xff] %v9034_v62  ;;  %14208 = vst [vmem:[#allocation82_spill] sm:$0xff] %v9046_v21  ;;  %vm2668_vm14 = vcmp.eq.f32.partialorder %v8564_v23, %v9024_v47  ;;  %v2956_v17 = vand.u32 65535, %v8727_v58  ;;  %v9076_v31 = vcvt.s32.f32 %v2900_v56  ;;  %v3325_v58 = vld [vmem:[#allocation5 + $0x1] ss:$8 sm:$0x30]  ;;  %v9096_v56 = vcvt.s32.f32 %v2928_v26 }
 0x3ae   : > { %v2295_v53 = vpop.xlane.xlu1 %2294  ;;  %14207 = vst [vmem:[#allocation51_spill] sm:$0xff] %v9041_v44  ;;  %v2669_v54 = vsel %vm2668_vm14, %v8983_v46, inf  ;;  %v9085_v46 = vcvt.s32.f32 %v2914_v35  ;;  %v14233_v44 = vld [vmem:[#allocation55_spill] sm:$0xff] }
 0x3af   : > { %vm2359_vm13 = vcmp.eq.f32.partialorder %v8575_v40, %v2295_v53  ;;  %3156 = vmin.xlane.f32.xlu1 %v9030_v7  ;;  %v2970_v40 = vand.u32 65535, %v8766_v9  ;;  %v3321_v9 = vld [vmem:[#allocation5] ss:$8 sm:$0x30]  ;;  %v9078_v53 = vcvt.s32.f32 %v2886_v29  ;;  %v2477_v7 = vcvt.f32.s32 %v8744_v39  ;;  %14212 = vst [vmem:[#allocation86_spill] sm:$0xff] %v9096_v56 }
 0x3b0   : > { %v9053_v52 = vsel %vm2359_vm13, %v8282_v22, 128  ;;  %v2277_v16 = vpop.xlane.xlu0 %2276  ;;  %14211 = vst [vmem:[#allocation85_spill] sm:$0xff] %v9085_v46  ;;  %v3322_v29 = vor.u32 %v3321_v9, %v3320_v6  ;;  %v3326_v39 = vor.u32 %v3325_v58, %v3324_v45  ;;  %v3967_v9 = vld [vmem:[#allocation5 + $0x2] ss:$8 sm:$0x30]  ;;  %v14227_v46 = vld [vmem:[#allocation21_spill] sm:$0xff] }
 0x3b1   : > { %v3307_v14 = vshra.s32 %v9053_v52, 16  ;;  %vm2350_vm15 = vcmp.eq.f32.partialorder %v8580_v13, %v2277_v16  ;;  %3282 = vmin.xlane.f32.xlu0 %v9046_v21  ;;  %v2449_v13 = vcvt.f32.s32 %v8702_v55  ;;  %14210 = vst [vmem:[#allocation84_spill] sm:$0xff] %v9078_v53  ;;  %v2463_v16 = vcvt.f32.s32 %v8731_v3  ;;  %v14229_v53 = vld [vmem:[#allocation26_spill] sm:$0xff]  ;;  %v14261_v56 = vld [vmem:[#allocation41_spill] sm:$0xff] }
 0x3b2   : > { %v9065_v25 = vsel %vm2350_vm15, %v8282_v22, 128  ;;  %v9067_v60 = vpop.xlane.xlu1 %2792  ;;  %v2998_v21 = vand.u32 65535, %v8782_v19  ;;  %v9093_v3 = vshll.u32 %v2435_v34, 16  ;;  %v9108_v6 = vshll.u32 %v2477_v7, 16 }
 0x3b3   : > { %2670 = vmin.xlane.f32.xlu1 %v2669_v54  ;;  %v9074_v36 = vcvt.s32.f32 %v3307_v14  ;;  %v3181_v55 = vshra.s32 %v9065_v25, 16  ;;  %vm2794_vm1 = vcmp.eq.f32.partialorder %v8587_v41, %v9067_v60  ;;  %v9098_v35 = vshll.u32 %v2449_v13, 16  ;;  %v3966_v14 = vld [vmem:[#allocation5 + $0x2] ss:$8 sm:$0xf] }
 0x3b4   : > { %v9083_v23 = vpop.xlane.xlu0 %2680  ;;  %v9100_v54 = vcvt.s32.f32 %v2956_v17  ;;  %v9106_v43 = vshll.u32 %v2463_v16, 16  ;;  %14218 = vst [vmem:[#allocation92_spill] sm:$0xff] %v9108_v6  ;;  %v2795_v26 = vsel %vm2794_vm1, %v2790_v20, inf  ;;  %v9117_v13 = vcvt.s32.f32 %v2998_v21  ;;  %v14221_v21 = vld [vmem:[#allocation52_spill] sm:$0xff] }
 0x3b5   : > { %14209 = vst [vmem:[#allocation83_spill] sm:$0xff] %v9074_v36  ;;  %3310 = vmin.xlane.f32.xlu0 %v9074_v36  ;;  %vm2682_vm0 = vcmp.eq.f32.partialorder %v8591_v1, %v9083_v23  ;;  %14213 = vst [vmem:[#allocation87_spill] sm:$0xff] %v9098_v35  ;;  %v9102_v36 = vcvt.s32.f32 %v2942_v49  ;;  %v9104_v1 = vcvt.s32.f32 %v2970_v40  ;;  %v2491_v49 = vcvt.f32.s32 %v8773_v30  ;;  %v14257_v35 = vld [vmem:[#allocation57_spill] sm:$0xff] }
 0x3b6   : > { %v2683_v19 = vsel %vm2682_vm0, %v8985_v27, inf  ;;  %14214 = vst [vmem:[#allocation88_spill] sm:$0xff] %v9100_v54  ;;  %14217 = vst [vmem:[#allocation91_spill] sm:$0xff] %v9106_v43  ;;  %v9120_v40 = vcvt.s32.f32 %v3181_v55  ;;  %v9125_v7 = vrot.slane %v3322_v29, %v8949_v0  ;;  %v2984_v17 = vand.u32 65535, %v8769_v8 }
 0x3b7   : > { %2684 = vmin.xlane.f32.xlu1 %v2683_v19  ;;  %14215 = vst [vmem:[#allocation89_spill] sm:$0xff] %v9102_v36  ;;  %14216 = vst [vmem:[#allocation90_spill] sm:$0xff] %v9104_v1  ;;  %v9129_v45 = vrot.slane %v3326_v39, %v8949_v0  ;;  %v9132_v41 = vrot.slane %v3322_v29, %v8951_v12  ;;  %v9135_v20 = vrot.slane %v3322_v29, %v8964_v51  ;;  %v14226_v36 = vld [vmem:[#allocation20_spill] sm:$0xff] }
 0x3b8   : > { %v9110_v34 = vpop.xlane.xlu0 %2694  ;;  %v9112_v27 = vpop.xlane.xlu1 %2820  ;;  %14219 = vst [vmem:[#allocation93_spill] sm:$0xff] %v9117_v13  ;;  %14220 = vst [vmem:[#allocation94_spill] sm:$0xff] %v9120_v40  ;;  %v3026_v30 = vand.u32 65535, %v8795_v11  ;;  %v3968_v8 = vor.u32 %v3967_v9, %v3966_v14  ;;  %v9146_v55 = vrot.slane %v3326_v39, %v8964_v51  ;;  %v9149_v19 = vrot.slane %v3326_v39, %v8966_v42 }
 0x3b9   : > { %2796 = vmin.xlane.f32.xlu0 %v2795_v26  ;;  %vm2822_vm2 = vcmp.eq.f32.partialorder %v8604_v2, %v9112_v27  ;;  %vm2696_vm3 = vcmp.eq.f32.partialorder %v14221_v21, %v9110_v34  ;;  %v9142_v2 = vrot.slane %v3326_v39, %v8951_v12  ;;  %v9152_v11 = vrot.slane %v3326_v39, %v8971_v28  ;;  %v14223_v21 = vld [vmem:[#allocation53_spill] sm:$0xff] }
 0x3ba   : > { %v2823_v16 = vsel %vm2822_vm2, %v9032_v24, inf  ;;  %v9154_v26 = vshll.u32 %v2491_v49, 16  ;;  %v9161_v14 = vrot.slane %v3322_v29, %v8966_v42  ;;  %v2697_v9 = vsel %vm2696_vm3, %v8991_v48, inf }
 0x3bb   : > { %3184 = vmin.xlane.f32.xlu1 %v9120_v40  ;;  %v9158_v40 = vrot.slane %v3326_v39, %v8979_v32  ;;  %v9168_v13 = vrot.slane %v3322_v29, %v8971_v28  ;;  %v9171_v49 = vrot.slane %v3322_v29, %v8979_v32  ;;  %v9175_v39 = vrot.slane %v3968_v8, %v8949_v0 }
 0x3bc   : > { %v2281_v58 = vpop.xlane.xlu0 %2280  ;;  %14222 = vst [vmem:[#allocation52_spill] sm:$0xff] %v9154_v26  ;;  %v3054_v1 = vand.u32 65535, %v8808_v33  ;;  %v3012_v48 = vand.u32 65535, %v14226_v36  ;;  %v2519_v26 = vcvt.f32.s32 %v14227_v46  ;;  %v14231_v33 = vld [vmem:[#allocation28_spill] sm:$0xff]  ;;  %v9208_v43 = vrot.slane %v3968_v8, %v8966_v42 }
 0x3bd   : > { %vm2352_vm4 = vcmp.eq.f32.partialorder %v14223_v21, %v2281_v58  ;;  %2824 = vmin.xlane.f32.xlu0 %v2823_v16  ;;  %v2505_v58 = vcvt.f32.s32 %v8786_v4  ;;  %v9177_v16 = vcvt.s32.f32 %v2984_v17  ;;  %v9179_v21 = vcvt.s32.f32 %v3026_v30 }
 0x3be   : > { %v9164_v24 = vsel %vm2352_vm4, %v8282_v22, 128  ;;  %v9189_v4 = vrot.slane %v3968_v8, %v8951_v12  ;;  %v2533_v17 = vcvt.f32.s32 %v14229_v53  ;;  %v3040_v36 = vand.u32 65535, %v14231_v33  ;;  %v14243_v33 = vld [vmem:[#allocation29_spill] sm:$0xff] }
 0x3bf   : > { %2698 = vmin.xlane.f32.xlu1 %v2697_v9  ;;  %14224 = vst [vmem:[#allocation53_spill] sm:$0xff] %v9177_v16  ;;  %14225 = vst [vmem:[#allocation95_spill] sm:$0xff] %v9179_v21  ;;  %v14228_v9 = vld [vmem:[#allocation25_spill] sm:$0xff]  ;;  %v3209_v30 = vshra.s32 %v9164_v24, 16  ;;  %v14230_v21 = vld [vmem:[#allocation54_spill] sm:$0xff]  ;;  %v9201_v12 = vshll.u32 %v2505_v58, 16  ;;  %v9205_v53 = vrot.slane %v3968_v8, %v8964_v51 }
 0x3c0   : > { %v9184_v6 = vpop.xlane.xlu0 %2708  ;;  %v9186_v29 = vpop.xlane.xlu1 %2848  ;;  %v3082_v0 = vand.u32 65535, %v14228_v9  ;;  %v14232_v16 = vld [vmem:[#allocation73_spill] sm:$0xff]  ;;  %v9224_v51 = vshll.u32 %v2533_v17, 16  ;;  %v14250_v17 = vld [vmem:[#allocation56_spill] sm:$0xff] }
 0x3c1   : > { %vm2710_vm5 = vcmp.eq.f32.partialorder %v14230_v21, %v9184_v6  ;;  %v2547_v46 = vcvt.f32.s32 %v14232_v16  ;;  %vm2850_vm6 = vcmp.eq.f32.partialorder %v14233_v44, %v9186_v29  ;;  %14234 = vst [vmem:[#allocation20_spill] sm:$0xff] %v9201_v12  ;;  %v9213_v16 = vrot.slane %v3968_v8, %v8971_v28  ;;  %v14245_v28 = vld [vmem:[#allocation75_spill] sm:$0xff] }
 0x3c2   : > { %v2711_v54 = vsel %vm2710_vm5, %v9019_v38, inf  ;;  %v2851_v9 = vsel %vm2850_vm6, %v9037_v50, inf  ;;  %v9216_v38 = vrot.slane %v3968_v8, %v8979_v32  ;;  %v9218_v44 = vcvt.s32.f32 %v3012_v48  ;;  %14240 = vst [vmem:[#allocation73_spill] sm:$0xff] %v9224_v51  ;;  %v14247_v8 = vld [vmem:[#allocation32_spill] sm:$0xff] }
 0x3c3   : > { %2712 = vmin.xlane.f32.xlu1 %v2711_v54  ;;  %2852 = vmin.xlane.f32.xlu0 %v2851_v9  ;;  %14235 = vst [vmem:[#allocation21_spill] sm:$0xff] %v9213_v16  ;;  %v9220_v54 = vcvt.s32.f32 %v3054_v1  ;;  %v9222_v50 = vshll.u32 %v2519_v26, 16  ;;  %v9226_v58 = vcvt.s32.f32 %v3209_v30  ;;  %v9228_v42 = vcvt.s32.f32 %v3082_v0  ;;  %v14248_v1 = vld [vmem:[#allocation30_spill] sm:$0xff]  ;;  %v14249_v26 = vld [vmem:[#allocation33_spill] sm:$0xff]  ;;  %v14251_v0 = vld [vmem:[#allocation35_spill] sm:$0xff] }
 0x3c4   : > { %v9210_v21 = vpop.xlane.xlu0 %2722  ;;  %14236 = vst [vmem:[#allocation25_spill] sm:$0xff] %v9216_v38  ;;  %14237 = vst [vmem:[#allocation26_spill] sm:$0xff] %v9218_v44  ;;  %v3110_v9 = vand.u32 65535, %v14243_v33  ;;  %v9231_v12 = vshll.u32 %v2547_v46, 16  ;;  %v2561_v57 = vcvt.f32.s32 %v14245_v28  ;;  %v9234_v32 = vcvt.s32.f32 %v3040_v36  ;;  %v14252_v33 = vld [vmem:[#allocation36_spill] sm:$0xff]  ;;  %v14254_v28 = vld [vmem:[#allocation38_spill] sm:$0xff] }
 0x3c5   : > { %14238 = vst [vmem:[#allocation54_spill] sm:$0xff] %v9220_v54  ;;  %14239 = vst [vmem:[#allocation28_spill] sm:$0xff] %v9222_v50  ;;  %v3138_v48 = vand.u32 65535, %v14247_v8  ;;  %v3068_v54 = vand.u32 65535, %v14248_v1  ;;  %v2575_v44 = vcvt.f32.s32 %v14249_v26  ;;  %vm2724_vm7 = vcmp.eq.f32.partialorder %v14250_v17, %v9210_v21  ;;  %v14255_v8 = vld [vmem:[#allocation39_spill] sm:$0xff]  ;;  %v14256_v50 = vld [vmem:[#allocation78_spill] sm:$0xff] }
 0x3c6   : > { %14241 = vst [vmem:[#allocation55_spill] sm:$0xff] %v9226_v58  ;;  %14242 = vst [vmem:[#allocation96_spill] sm:$0xff] %v9228_v42  ;;  %v3166_v30 = vand.u32 65535, %v14251_v0  ;;  %v2589_v46 = vcvt.f32.s32 %v14252_v33  ;;  %v14253_v42 = vld [vmem:[#allocation37_spill] sm:$0xff]  ;;  %v3194_v36 = vand.u32 65535, %v14254_v28  ;;  %v2603_v1 = vcvt.f32.s32 %v14255_v8  ;;  %v14258_v17 = vld [vmem:[#allocation58_spill] sm:$0xff] }
 0x3c7   : > { %14244 = vst [vmem:[#allocation29_spill] sm:$0xff] %v9231_v12  ;;  %14246 = vst [vmem:[#allocation75_spill] sm:$0xff] %v9234_v32  ;;  %3212 = vmin.xlane.f32.xlu1 %v9226_v58  ;;  %v3096_v12 = vand.u32 65535, %v14253_v42  ;;  %v2617_v26 = vcvt.f32.s32 %v14256_v50  ;;  %v14259_v58 = vld [vmem:[#allocation43_spill] sm:$0xff]  ;;  %v2725_v42 = vsel %vm2724_vm7, %v9021_v37, inf  ;;  %v9259_v62 = vshll.u32 %v2561_v57, 16 }
 0x3c8   : > { %v2285_v32 = vpop.xlane.xlu0 %2284  ;;  %v9246_v51 = vpop.xlane.xlu1 %2876  ;;  %v3222_v0 = vand.u32 65535, %v14259_v58  ;;  %v3124_v8 = vand.u32 65535, %v14261_v56  ;;  %v14263_v58 = vld [vmem:[#allocation80_spill] sm:$0xff]  ;;  %v9270_v16 = vcvt.s32.f32 %v3138_v48  ;;  %v9272_v37 = vcvt.s32.f32 %v3068_v54  ;;  %v14274_v48 = vld [vmem:[#allocation45_spill] sm:$0xff]  ;;  %v14275_v54 = vld [vmem:[#allocation46_spill] sm:$0xff] }
 0x3c9   : > { %vm2354_vm8 = vcmp.eq.f32.partialorder %v14257_v35, %v2285_v32  ;;  %vm2878_vm9 = vcmp.eq.f32.partialorder %v14258_v17, %v9246_v51  ;;  %14260 = vst [vmem:[#allocation32_spill] sm:$0xff] %v9259_v62  ;;  %v9263_v35 = vcvt.s32.f32 %v3110_v9  ;;  %v9265_v32 = vshll.u32 %v2575_v44, 16 }
 0x3ca   : > { %v9255_v33 = vsel %vm2354_vm8, %v8282_v22, 128  ;;  %v2879_v28 = vsel %vm2878_vm9, %v9055_v5, inf  ;;  %v2631_v17 = vcvt.f32.s32 %v14263_v58  ;;  %14264 = vst [vmem:[#allocation33_spill] sm:$0xff] %v9270_v16  ;;  %14265 = vst [vmem:[#allocation56_spill] sm:$0xff] %v9272_v37  ;;  %v9274_v57 = vshll.u32 %v2589_v46, 16  ;;  %v14276_v46 = vld [vmem:[#allocation59_spill] sm:$0xff] }
 0x3cb   : > { %v3237_v50 = vshra.s32 %v9255_v33, 16  ;;  %2726 = vmin.xlane.f32.xlu1 %v2725_v42  ;;  %2880 = vmin.xlane.f32.xlu0 %v2879_v28  ;;  %14262 = vst [vmem:[#allocation30_spill] sm:$0xff] %v9265_v32  ;;  %v9278_v56 = vcvt.s32.f32 %v3166_v30  ;;  %v9280_v42 = vcvt.s32.f32 %v3096_v12  ;;  %v9282_v9 = vshll.u32 %v2603_v1, 16  ;;  %v14279_v1 = vld [vmem:[#allocation81_spill] sm:$0xff] }
 0x3cc   : > { %v9268_v38 = vpop.xlane.xlu0 %2750  ;;  %14266 = vst [vmem:[#allocation35_spill] sm:$0xff] %v9274_v57  ;;  %v9284_v44 = vshll.u32 %v2617_v26, 16  ;;  %v9286_v28 = vcvt.s32.f32 %v3194_v36  ;;  %v9288_v58 = vcvt.s32.f32 %v3222_v0  ;;  %v3250_v16 = vand.u32 65535, %v14274_v48 }
 0x3cd   : > { %v9276_v5 = vcvt.s32.f32 %v3237_v50  ;;  %14268 = vst [vmem:[#allocation37_spill] sm:$0xff] %v9278_v56  ;;  %14269 = vst [vmem:[#allocation38_spill] sm:$0xff] %v9280_v42  ;;  %v2645_v37 = vcvt.f32.s32 %v14275_v54  ;;  %vm2752_vm10 = vcmp.eq.f32.partialorder %v14276_v46, %v9268_v38  ;;  %v9295_v30 = vcvt.s32.f32 %v3124_v8  ;;  %v14280_v46 = vld [vmem:[#allocation60_spill] sm:$0xff]  ;;  %v14281_v8 = vld [vmem:[#allocation61_spill] sm:$0xff] }
 0x3ce   : > { %14270 = vst [vmem:[#allocation39_spill] sm:$0xff] %v9282_v9  ;;  %14271 = vst [vmem:[#allocation78_spill] sm:$0xff] %v9284_v44  ;;  %v9297_v12 = vshll.u32 %v2631_v17, 16  ;;  %v2743_v26 = vcvt.f32.s32 %v14279_v1  ;;  %v3152_v36 = vand.u32 65535, %v8989_v59  ;;  %v2659_v0 = vcvt.f32.s32 %v9003_v10 }
 0x3cf   : > { %14267 = vst [vmem:[#allocation36_spill] sm:$0xff] %v9276_v5  ;;  %14272 = vst [vmem:[#allocation57_spill] sm:$0xff] %v9286_v28  ;;  %3240 = vmin.xlane.f32.xlu1 %v9276_v5  ;;  %v3278_v48 = vand.u32 65535, %v9001_v18  ;;  %v2771_v54 = vcvt.f32.s32 %v9014_v61  ;;  %v2673_v17 = vcvt.f32.s32 %v9024_v47  ;;  %v2753_v59 = vsel %vm2752_vm10, %v9026_v15, inf }
 0x3d0   : > { %14273 = vst [vmem:[#allocation58_spill] sm:$0xff] %v9288_v58  ;;  %14277 = vst [vmem:[#allocation43_spill] sm:$0xff] %v9295_v30  ;;  %v2289_v50 = vpop.xlane.xlu0 %2288  ;;  %v9302_v44 = vpop.xlane.xlu1 %2904  ;;  %v9315_v5 = vshll.u32 %v2645_v37, 16  ;;  %v3306_v18 = vand.u32 65535, %v9053_v52  ;;  %v9323_v47 = vshll.u32 %v2659_v0, 16  ;;  %v9328_v15 = vcvt.s32.f32 %v3152_v36 }
 0x3d1   : > { %14278 = vst [vmem:[#allocation41_spill] sm:$0xff] %v9297_v12  ;;  %vm2356_vm11 = vcmp.eq.f32.partialorder %v14280_v46, %v2289_v50  ;;  %vm2906_vm12 = vcmp.eq.f32.partialorder %v14281_v8, %v9302_v44  ;;  %v9319_v50 = vcvt.s32.f32 %v3250_v16  ;;  %v9321_v46 = vshll.u32 %v2743_v26, 16 }
 0x3d2   : > { %v9311_v1 = vsel %vm2356_vm11, %v8282_v22, 128  ;;  %v2907_v10 = vsel %vm2906_vm12, %v9076_v31, inf  ;;  %14282 = vst [vmem:[#allocation80_spill] sm:$0xff] %v9315_v5  ;;  %14285 = vst [vmem:[#allocation59_spill] sm:$0xff] %v9323_v47  ;;  %v2799_v8 = vcvt.f32.s32 %v9067_v60  ;;  %v3180_v31 = vand.u32 65535, %v9065_v25  ;;  %v14291_v25 = vld [vmem:[#allocation62_spill] sm:$0xff] }
 0x3d3   : > { %v3265_v61 = vshra.s32 %v9311_v1, 16  ;;  %2754 = vmin.xlane.f32.xlu1 %v2753_v59  ;;  %2908 = vmin.xlane.f32.xlu0 %v2907_v10  ;;  %14283 = vst [vmem:[#allocation45_spill] sm:$0xff] %v9319_v50  ;;  %14284 = vst [vmem:[#allocation46_spill] sm:$0xff] %v9321_v46  ;;  %v2687_v52 = vcvt.f32.s32 %v9083_v23  ;;  %v9334_v59 = vcvt.s32.f32 %v3278_v48  ;;  %v9336_v16 = vshll.u32 %v2771_v54, 16  ;;  %v6732_v50 = vld [vmem:[%s7577_s15 + $0x48] sm:$0xff]  ;;  %v6734_v46 = vld [vmem:[%s7577_s15 + $0x58] sm:$0xff] }
 0x3d4   : > { %v9326_v12 = vpop.xlane.xlu0 %2778  ;;  %14286 = vst [vmem:[#allocation81_spill] sm:$0xff] %v9328_v15  ;;  %v9338_v26 = vshll.u32 %v2673_v17, 16  ;;  %v2701_v0 = vcvt.f32.s32 %v9110_v34  ;;  %v2827_v60 = vcvt.f32.s32 %v9112_v27  ;;  %v3208_v10 = vand.u32 65535, %v9164_v24 }
 0x3d5   : > { %v9332_v37 = vcvt.s32.f32 %v3265_v61  ;;  %14288 = vst [vmem:[#allocation61_spill] sm:$0xff] %v9334_v59  ;;  %14289 = vst [vmem:[#allocation97_spill] sm:$0xff] %v9336_v16  ;;  %v2715_v36 = vcvt.f32.s32 %v9184_v6  ;;  %vm2780_vm13 = vcmp.eq.f32.partialorder %v14291_v25, %v9326_v12  ;;  %v9347_v23 = vcvt.s32.f32 %v3306_v18  ;;  %v14295_v6 = vld [vmem:[#allocation63_spill] sm:$0xff] }
 0x3d6   : > { %14290 = vst [vmem:[#allocation98_spill] sm:$0xff] %v9338_v26  ;;  %v9349_v48 = vshll.u32 %v2799_v8, 16  ;;  %v2855_v54 = vcvt.f32.s32 %v9186_v29  ;;  %v2729_v17 = vcvt.f32.s32 %v9210_v21  ;;  %v2883_v34 = vcvt.f32.s32 %v9246_v51 }
 0x3d7   : > { %14287 = vst [vmem:[#allocation60_spill] sm:$0xff] %v9332_v37  ;;  %3268 = vmin.xlane.f32.xlu1 %v9332_v37  ;;  %14292 = vst [vmem:[#allocation62_spill] sm:$0xff] %v9347_v23  ;;  %v9354_v24 = vshll.u32 %v2687_v52, 16  ;;  %v9357_v59 = vcvt.s32.f32 %v3180_v31  ;;  %v9359_v37 = vshll.u32 %v2701_v0, 16  ;;  %v9361_v18 = vshll.u32 %v2827_v60, 16 }
 0x3d8   : > { %14293 = vst [vmem:[#allocation99_spill] sm:$0xff] %v9349_v48  ;;  %v2293_v27 = vpop.xlane.xlu0 %2292  ;;  %v2433_v61 = vpop.xlane.xlu1 %2432  ;;  %v2781_v29 = vsel %vm2780_vm13, %v9028_v63, inf  ;;  %v9370_v21 = vcvt.s32.f32 %v3208_v10  ;;  %v9372_v51 = vshll.u32 %v2715_v36, 16  ;;  %v9376_v0 = vshll.u32 %v2855_v54, 16  ;;  %v14315_v48 = vld [vmem:[#allocation87_spill] sm:$0xff] }
 0x3d9   : > { %14294 = vst [vmem:[#allocation100_spill] sm:$0xff] %v9354_v24  ;;  %vm2358_vm14 = vcmp.eq.f32.partialorder %v14295_v6, %v2293_v27  ;;  %v2434_v26 = vcvt.f32.s32 %v2433_v61  ;;  %14296 = vst [vmem:[#allocation63_spill] sm:$0xff] %v9357_v59  ;;  %v9378_v60 = vshll.u32 %v2729_v17, 16  ;;  %v9381_v27 = vshll.u32 %v2883_v34, 16  ;;  %v6727_v59 = vld [vmem:[%s7577_s15 + $0x20] sm:$0xff]  ;;  %v6728_v24 = vld [vmem:[%s7577_s15 + $0x28] sm:$0xff] }
 0x3da   : > { %14297 = vst [vmem:[#allocation101_spill] sm:$0xff] %v9359_v37  ;;  %14298 = vst [vmem:[#allocation102_spill] sm:$0xff] %v9361_v18  ;;  %v9364_v8 = vsel %vm2358_vm14, %v8282_v22, 128  ;;  %v3236_v22 = vand.u32 65535, %v9255_v33  ;;  %v2757_v10 = vcvt.f32.s32 %v9268_v38 }
 0x3db   : > { %14299 = vst [vmem:[#allocation103_spill] sm:$0xff] %v9370_v21  ;;  %14300 = vst [vmem:[#allocation104_spill] sm:$0xff] %v9372_v51  ;;  %v3293_v52 = vshra.s32 %v9364_v8, 16  ;;  %v2437_v31 = vadd.s32 %v9093_v3, %v2434_v26  ;;  %2782 = vmin.xlane.f32.xlu1 %v2781_v29  ;;  %v6725_v21 = vld [vmem:[%s7577_s15 + $0x10] sm:$0xff] }
 0x3dc   : > { %14301 = vst [vmem:[#allocation105_spill] sm:$0xff] %v9376_v0  ;;  %14302 = vst [vmem:[#allocation106_spill] sm:$0xff] %v9378_v60  ;;  %v9383_v61 = vpop.xlane.xlu0 %2806  ;;  %v9385_v63 = vpop.xlane.xlu1 %2932  ;;  %v14306_v60 = vld [vmem:[#allocation25_spill] sm:$0xff]  ;;  %v9426_v0 = vshll.u32 %v2757_v10, 16 }
 0x3dd   : > { %14303 = vst [vmem:[#allocation107_spill] sm:$0xff] %v9381_v27  ;;  %v9388_v36 = vcvt.s32.f32 %v3293_v52  ;;  %vm3327_vm15 = vcmp.eq.s32.totalorder %v2437_v31, 1  ;;  %vm3969_vm0 = vcmp.eq.s32.totalorder %v2437_v31, 2  ;;  %v14305_v52 = vld [vmem:[#allocation21_spill] sm:$0xff] }
 0x3de   : > { %v3581_v3 = vsel %vm3327_vm15, %v9129_v45, %v9125_v7  ;;  %v3582_v26 = vsel %vm3327_vm15, %v9142_v2, %v9132_v41  ;;  %v3583_v33 = vsel %vm3327_vm15, %v9146_v55, %v9135_v20  ;;  %v3584_v25 = vsel %vm3327_vm15, %v9149_v19, %v9161_v14  ;;  %14308 = vst [vmem:[#allocation25_spill] sm:$0xff] %v9426_v0 }
 0x3df   : > { %14304 = vst [vmem:[#allocation108_spill] sm:$0xff] %v9388_v36  ;;  %v3585_v38 = vsel %vm3327_vm15, %v9152_v11, %v9168_v13  ;;  %v3586_v54 = vsel %vm3327_vm15, %v9158_v40, %v9171_v49  ;;  %v4192_v17 = vsel %vm3969_vm0, %v9175_v39, %v3581_v3  ;;  %v4193_v34 = vsel %vm3969_vm0, %v9189_v4, %v3582_v26 }
 0x3e0   : > { %3296 = vmin.xlane.f32.xlu1 %v9388_v36  ;;  %v4194_v6 = vsel %vm3969_vm0, %v9205_v53, %v3583_v33  ;;  %v4195_v29 = vsel %vm3969_vm0, %v9208_v43, %v3584_v25  ;;  %v4196_v31 = vsel %vm3969_vm0, %v14305_v52, %v3585_v38  ;;  %v4197_v27 = vsel %vm3969_vm0, %v14306_v60, %v3586_v54  ;;  %v9415_v3 = vpop.xlane.xlu0 %2834  ;;  %v2447_v26 = vpop.xlane.xlu1 %2446  ;;  %v6723_v25 = vld [vmem:[%s7577_s15] sm:$0xff]  ;;  %v6724_v54 = vld [vmem:[%s7577_s15 + $0x8] sm:$0xff] }
 0x3e1   : > { %4576 = vst [vmem:[%s9411_s24] sm:$0xff] %v4192_v17  ;;  %4577 = vst [vmem:[%s9411_s24 + $0x8] sm:$0xff] %v4193_v34  ;;  %v9417_v33 = vcvt.s32.f32 %v3236_v22  ;;  %v4960_v38 = vsub.f32 %v4192_v17, %v6723_v25  ;;  %v4961_v36 = vsub.f32 %v4193_v34, %v6724_v54  ;;  %v4962_v51 = vsub.f32 %v4194_v6, %v6725_v21  ;;  %v6726_v22 = vld [vmem:[%s7577_s15 + $0x18] sm:$0xff] }
 0x3e2   : > { %4578 = vst [vmem:[%s9411_s24 + $0x10] sm:$0xff] %v4194_v6  ;;  %4579 = vst [vmem:[%s9411_s24 + $0x18] sm:$0xff] %v4195_v29  ;;  %v4964_v23 = vsub.f32 %v4196_v31, %v6727_v59  ;;  %v4965_v15 = vsub.f32 %v4197_v27, %v6728_v24  ;;  %v14309_v17 = vld [vmem:[#allocation64_spill] sm:$0xff]  ;;  %v14310_v59 = vld [vmem:[#allocation65_spill] sm:$0xff] }
 0x3e3   : > { %14307 = vst [vmem:[#allocation21_spill] sm:$0xff] %v9417_v33  ;;  %4580 = vst [vmem:[%s9411_s24 + $0x20] sm:$0xff] %v4196_v31  ;;  %v4963_v33 = vsub.f32 %v4195_v29, %v6726_v22  ;;  %vm2808_vm1 = vcmp.eq.f32.partialorder %v14309_v17, %v9383_v61  ;;  %v9437_v21 = vmul.f32 %v4960_v38, %v4960_v38  ;;  %v14311_v24 = vld [vmem:[#allocation66_spill] sm:$0xff]  ;;  %v14314_v6 = vld [vmem:[#allocation67_spill] sm:$0xff] }
 0x3e4   : > { %4581 = vst [vmem:[%s9411_s24 + $0x28] sm:$0xff] %v4197_v27  ;;  %v9439_v10 = vmul.f32 %v4961_v36, %v4961_v36  ;;  %v9442_v25 = vpop.xlane.xlu0 %2862  ;;  %v2461_v29 = vpop.xlane.xlu1 %2460  ;;  %v9444_v54 = vmul.f32 %v4962_v51, %v4962_v51  ;;  %vm2934_vm2 = vcmp.eq.f32.partialorder %v14310_v59, %v9385_v63  ;;  %vm2836_vm3 = vcmp.eq.f32.partialorder %v14311_v24, %v9415_v3  ;;  %v14312_v38 = vld [vmem:[#allocation86_spill] sm:$0xff] }
 0x3e5   : > { %v2448_v27 = vcvt.f32.s32 %v2447_v26  ;;  %v9450_v31 = vmul.f32 %v4963_v33, %v4963_v33  ;;  %v2935_v22 = vsel %vm2934_vm2, %v14312_v38, inf  ;;  %v14313_v36 = vld [vmem:[#allocation50_spill] sm:$0xff]  ;;  %vm2864_vm4 = vcmp.eq.f32.partialorder %v14314_v6, %v9442_v25  ;;  %v14316_v38 = vld [vmem:[#allocation49_spill] sm:$0xff]  ;;  %v14318_v6 = vld [vmem:[#allocation51_spill] sm:$0xff] }
 0x3e6   : > { %v2809_v17 = vsel %vm2808_vm1, %v14313_v36, inf  ;;  %v9456_v34 = vmul.f32 %v4964_v23, %v4964_v23  ;;  %v9458_v51 = vmul.f32 %v4965_v15, %v4965_v15  ;;  %2936 = vmin.xlane.f32.xlu0 %v2935_v22  ;;  %v2462_v18 = vcvt.f32.s32 %v2461_v29  ;;  %v14317_v23 = vld [vmem:[#allocation91_spill] sm:$0xff] }
 0x3e7   : > { %v2451_v59 = vadd.s32 %v14315_v48, %v2448_v27  ;;  %2810 = vmin.xlane.f32.xlu1 %v2809_v17  ;;  %v2837_v36 = vsel %vm2836_vm3, %v14316_v38, inf  ;;  %v2865_v48 = vsel %vm2864_vm4, %v14318_v6, inf }
 0x3e8   : > { %v9465_v37 = vpop.xlane.xlu1 %2960  ;;  %v9468_v15 = vadd.s32 %v14317_v23, %v2462_v18  ;;  %v9499_v47 = vpop.xlane.xlu0 %2890 }
 0x3e9   : > { %vm3328_vm5 = vcmp.eq.s32.totalorder %v2451_v59, 1  ;;  %vm3970_vm6 = vcmp.eq.s32.totalorder %v2451_v59, 2 }
 0x3ea   : > { %v3587_v29 = vsel %vm3328_vm5, %v9129_v45, %v9125_v7  ;;  %v3588_v27 = vsel %vm3328_vm5, %v9142_v2, %v9132_v41  ;;  %v3589_v22 = vsel %vm3328_vm5, %v9146_v55, %v9135_v20  ;;  %v3590_v18 = vsel %vm3328_vm5, %v9149_v19, %v9161_v14 }
 0x3eb   : > { %v3591_v17 = vsel %vm3328_vm5, %v9152_v11, %v9168_v13  ;;  %v3592_v59 = vsel %vm3328_vm5, %v9158_v40, %v9171_v49  ;;  %v4198_v38 = vsel %vm3970_vm6, %v9175_v39, %v3587_v29  ;;  %v4199_v23 = vsel %vm3970_vm6, %v9189_v4, %v3588_v27  ;;  %2838 = vmin.xlane.f32.xlu1 %v2837_v36  ;;  %v6729_v29 = vld [vmem:[%s7577_s15 + $0x30] sm:$0xff]  ;;  %v6730_v36 = vld [vmem:[%s7577_s15 + $0x38] sm:$0xff] }
 0x3ec   : > { %v4200_v6 = vsel %vm3970_vm6, %v9205_v53, %v3589_v22  ;;  %v4201_v24 = vsel %vm3970_vm6, %v9208_v43, %v3590_v18  ;;  %v4202_v33 = vsel %vm3970_vm6, %v14305_v52, %v3591_v17  ;;  %v4203_v26 = vsel %vm3970_vm6, %v14306_v60, %v3592_v59  ;;  %4582 = vst [vmem:[%s9411_s24 + $0x30] sm:$0xff] %v4198_v38  ;;  %v6731_v22 = vld [vmem:[%s7577_s15 + $0x40] sm:$0xff]  ;;  %v9501_v17 = vpop.xlane.xlu1 %2474  ;;  %v6733_v59 = vld [vmem:[%s7577_s15 + $0x50] sm:$0xff] }
 0x3ed   : > { %4583 = vst [vmem:[%s9411_s24 + $0x38] sm:$0xff] %v4199_v23  ;;  %4584 = vst [vmem:[%s9411_s24 + $0x40] sm:$0xff] %v4200_v6  ;;  %v4972_v27 = vsub.f32 %v4198_v38, %v6729_v29  ;;  %v4973_v0 = vsub.f32 %v4199_v23, %v6730_v36  ;;  %v4974_v16 = vsub.f32 %v4200_v6, %v6731_v22  ;;  %vm3329_vm7 = vcmp.eq.s32.totalorder %v9468_v15, 1 }
 0x3ee   : > { %4585 = vst [vmem:[%s9411_s24 + $0x48] sm:$0xff] %v4201_v24  ;;  %4586 = vst [vmem:[%s9411_s24 + $0x50] sm:$0xff] %v4202_v33  ;;  %v4975_v18 = vsub.f32 %v4201_v24, %v6732_v50  ;;  %v4976_v5 = vsub.f32 %v4202_v33, %v6733_v59  ;;  %v4977_v30 = vsub.f32 %v4203_v26, %v6734_v46  ;;  %vm3971_vm8 = vcmp.eq.s32.totalorder %v9468_v15, 2 }
 0x3ef   : > { %4587 = vst [vmem:[%s9411_s24 + $0x58] sm:$0xff] %v4203_v26  ;;  %v4978_v58 = vmul.f32 %v4972_v27, %v4972_v27  ;;  %v4979_v38 = vmul.f32 %v4973_v0, %v4973_v0  ;;  %v4980_v29 = vmul.f32 %v4974_v16, %v4974_v16  ;;  %2866 = vmin.xlane.f32.xlu1 %v2865_v48  ;;  %v14319_v59 = vand.u32 65535, %v9311_v1 }
 0x3f0   : > { %v4981_v23 = vmul.f32 %v4975_v18, %v4975_v18  ;;  %v4982_v6 = vmul.f32 %v4976_v5, %v4976_v5  ;;  %v4983_v36 = vmul.f32 %v4977_v30, %v4977_v30  ;;  %v3593_v50 = vsel %vm3329_vm7, %v9129_v45, %v9125_v7  ;;  %v2489_v24 = vpop.xlane.xlu1 %2488 }
 0x3f1   : > { %v3594_v46 = vsel %vm3329_vm7, %v9142_v2, %v9132_v41  ;;  %v9516_v26 = vadd.f32 %v4978_v58, %v9437_v21  ;;  %v9519_v0 = vadd.f32 %v4979_v38, %v9439_v10  ;;  %v9522_v16 = vadd.f32 %v4980_v29, %v9444_v54 }
 0x3f2   : > { %v9525_v5 = vadd.f32 %v4981_v23, %v9450_v31  ;;  %v9528_v30 = vadd.f32 %v4982_v6, %v9456_v34  ;;  %v9531_v33 = vadd.f32 %v4983_v36, %v9458_v51  ;;  %v3595_v58 = vsel %vm3329_vm7, %v9146_v55, %v9135_v20  ;;  %v9555_v51 = vpop.xlane.xlu0 %2918  ;;  %v6735_v6 = vld [vmem:[%s7577_s15 + $0x60] sm:$0xff]  ;;  %v6736_v36 = vld [vmem:[%s7577_s15 + $0x68] sm:$0xff] }
 0x3f3   : > { %v3596_v21 = vsel %vm3329_vm7, %v9149_v19, %v9161_v14  ;;  %v3597_v34 = vsel %vm3329_vm7, %v9152_v11, %v9168_v13  ;;  %v3598_v10 = vsel %vm3329_vm7, %v9158_v40, %v9171_v49  ;;  %v4204_v54 = vsel %vm3971_vm8, %v9175_v39, %v3593_v50 }
 0x3f4   : > { %v4205_v31 = vsel %vm3971_vm8, %v9189_v4, %v3594_v46  ;;  %v4206_v48 = vsel %vm3971_vm8, %v9205_v53, %v3595_v58  ;;  %v4207_v27 = vsel %vm3971_vm8, %v9208_v43, %v3596_v21  ;;  %v4208_v22 = vsel %vm3971_vm8, %v14305_v52, %v3597_v34  ;;  %4588 = vst [vmem:[%s9411_s24 + $0x60] sm:$0xff] %v4204_v54 }
 0x3f5   : > { %v4209_v18 = vsel %vm3971_vm8, %v14306_v60, %v3598_v10  ;;  %4589 = vst [vmem:[%s9411_s24 + $0x68] sm:$0xff] %v4205_v31  ;;  %v9573_v38 = vcvt.s32.f32 %v14319_v59  ;;  %v14321_v29 = vcvt.f32.s32 %v9302_v44  ;;  %4590 = vst [vmem:[%s9411_s24 + $0x70] sm:$0xff] %v4206_v48  ;;  %v4984_v15 = vsub.f32 %v4204_v54, %v6735_v6  ;;  %v6737_v10 = vld [vmem:[%s7577_s15 + $0x70] sm:$0xff]  ;;  %v6738_v6 = vld [vmem:[%s7577_s15 + $0x78] sm:$0xff] }
 0x3f6   : > { %4591 = vst [vmem:[%s9411_s24 + $0x78] sm:$0xff] %v4207_v27  ;;  %4592 = vst [vmem:[%s9411_s24 + $0x80] sm:$0xff] %v4208_v22  ;;  %v4985_v50 = vsub.f32 %v4205_v31, %v6736_v36  ;;  %v14323_v46 = vcvt.f32.s32 %v9326_v12  ;;  %v14325_v58 = vand.u32 65535, %v9364_v8  ;;  %v14327_v21 = vcvt.f32.s32 %v9383_v61  ;;  %v6739_v36 = vld [vmem:[%s7577_s15 + $0x80] sm:$0xff] }
 0x3f7   : > { %14320 = vst [vmem:[#allocation64_spill] sm:$0xff] %v9573_v38  ;;  %v9577_v23 = vshll.u32 %v14321_v29, 16  ;;  %4593 = vst [vmem:[%s9411_s24 + $0x88] sm:$0xff] %v4209_v18  ;;  %v4986_v59 = vsub.f32 %v4206_v48, %v6737_v10  ;;  %v14329_v29 = vcvt.f32.s32 %v9385_v63  ;;  %v4987_v31 = vsub.f32 %v4207_v27, %v6738_v6  ;;  %v6740_v48 = vld [vmem:[%s7577_s15 + $0x88] sm:$0xff]  ;;  %v14340_v63 = vld [vmem:[#allocation92_spill] sm:$0xff] }
 0x3f8   : > { %v9587_v1 = vshll.u32 %v14323_v46, 16  ;;  %v9591_v44 = vcvt.s32.f32 %v14325_v58  ;;  %v9595_v34 = vshll.u32 %v14327_v21, 16  ;;  %v4988_v12 = vsub.f32 %v4208_v22, %v6739_v36  ;;  %v14331_v46 = vld [vmem:[#allocation68_spill] sm:$0xff]  ;;  %v14336_v22 = vld [vmem:[#allocation69_spill] sm:$0xff]  ;;  %v9625_v36 = vpop.xlane.xlu1 %2988 }
 0x3f9   : > { %14322 = vst [vmem:[#allocation65_spill] sm:$0xff] %v9577_v23  ;;  %v9600_v54 = vshll.u32 %v14329_v29, 16  ;;  %vm2892_vm9 = vcmp.eq.f32.partialorder %v14331_v46, %v9499_v47  ;;  %v14332_v8 = vcvt.f32.s32 %v9415_v3  ;;  %v14334_v61 = vcvt.f32.s32 %v9442_v25  ;;  %v9623_v3 = vpop.xlane.xlu0 %2946  ;;  %v14337_v46 = vld [vmem:[#allocation88_spill] sm:$0xff] }
 0x3fa   : > { %14324 = vst [vmem:[#allocation66_spill] sm:$0xff] %v9587_v1  ;;  %14326 = vst [vmem:[#allocation86_spill] sm:$0xff] %v9591_v44  ;;  %v4989_v10 = vsub.f32 %v4209_v18, %v6740_v48  ;;  %v9616_v29 = vmul.f32 %v4984_v15, %v4984_v15  ;;  %v9618_v27 = vmul.f32 %v4985_v50, %v4985_v50  ;;  %v2476_v6 = vcvt.f32.s32 %v9501_v17  ;;  %v14338_v18 = vld [vmem:[#allocation19_spill] sm:$0xff]  ;;  %v14339_v15 = vld [vmem:[#allocation84_spill] sm:$0xff] }
 0x3fb   : > { %14328 = vst [vmem:[#allocation50_spill] sm:$0xff] %v9595_v34  ;;  %14330 = vst [vmem:[#allocation67_spill] sm:$0xff] %v9600_v54  ;;  %v9608_v58 = vshll.u32 %v14332_v8, 16  ;;  %v9612_v21 = vshll.u32 %v14334_v61, 16  ;;  %vm2962_vm10 = vcmp.eq.f32.partialorder %v14336_v22, %v9465_v37  ;;  %v9627_v25 = vmul.f32 %v4986_v59, %v4986_v59  ;;  %v6743_v44 = vld [vmem:[%s7577_s15 + $0xa0] sm:$0xff]  ;;  %v6744_v54 = vld [vmem:[%s7577_s15 + $0xa8] sm:$0xff] }
 0x3fc   : > { %v2963_v8 = vsel %vm2962_vm10, %v14337_v46, inf  ;;  %vm2920_vm11 = vcmp.eq.f32.partialorder %v14338_v18, %v9555_v51  ;;  %v2893_v61 = vsel %vm2892_vm9, %v14339_v15, inf  ;;  %v4993_v50 = vmul.f32 %v4987_v31, %v4987_v31  ;;  %v14341_v46 = vld [vmem:[#allocation52_spill] sm:$0xff]  ;;  %v14342_v15 = vld [vmem:[#allocation85_spill] sm:$0xff] }
 0x3fd   : > { %14333 = vst [vmem:[#allocation87_spill] sm:$0xff] %v9608_v58  ;;  %14335 = vst [vmem:[#allocation49_spill] sm:$0xff] %v9612_v21  ;;  %v4994_v48 = vmul.f32 %v4988_v12, %v4988_v12  ;;  %2964 = vmin.xlane.f32.xlu0 %v2963_v8  ;;  %v2479_v22 = vadd.s32 %v14340_v63, %v2476_v6  ;;  %2894 = vmin.xlane.f32.xlu1 %v2893_v61  ;;  %v2490_v17 = vcvt.f32.s32 %v2489_v24  ;;  %v6746_v38 = vld [vmem:[%s7577_s15 + $0xb8] sm:$0xff] }
 0x3fe   : > { %v4995_v21 = vmul.f32 %v4989_v10, %v4989_v10  ;;  %v2921_v31 = vsel %vm2920_vm11, %v14342_v15, inf }
 0x3ff   : > { %vm3330_vm12 = vcmp.eq.s32.totalorder %v2479_v22, 1  ;;  %vm3972_vm13 = vcmp.eq.s32.totalorder %v2479_v22, 2  ;;  %v9638_v18 = vadd.s32 %v14341_v46, %v2490_v17  ;;  %v9657_v46 = vpop.xlane.xlu1 %2502  ;;  %v6745_v22 = vld [vmem:[%s7577_s15 + $0xb0] sm:$0xff] }
 0x400   : > { %v3599_v12 = vsel %vm3330_vm12, %v9129_v45, %v9125_v7  ;;  %v3600_v24 = vsel %vm3330_vm12, %v9142_v2, %v9132_v41  ;;  %v3601_v10 = vsel %vm3330_vm12, %v9146_v55, %v9135_v20  ;;  %v3602_v63 = vsel %vm3330_vm12, %v9149_v19, %v9161_v14 }
 0x401   : > { %v3603_v6 = vsel %vm3330_vm12, %v9152_v11, %v9168_v13  ;;  %v3604_v8 = vsel %vm3330_vm12, %v9158_v40, %v9171_v49  ;;  %v4210_v61 = vsel %vm3972_vm13, %v9175_v39, %v3599_v12  ;;  %v4211_v17 = vsel %vm3972_vm13, %v9189_v4, %v3600_v24  ;;  %2922 = vmin.xlane.f32.xlu1 %v2921_v31  ;;  %v6741_v31 = vld [vmem:[%s7577_s15 + $0x90] sm:$0xff] }
 0x402   : > { %v4212_v15 = vsel %vm3972_vm13, %v9205_v53, %v3601_v10  ;;  %v4213_v34 = vsel %vm3972_vm13, %v9208_v43, %v3602_v63  ;;  %v4214_v59 = vsel %vm3972_vm13, %v14305_v52, %v3603_v6  ;;  %v4215_v12 = vsel %vm3972_vm13, %v14306_v60, %v3604_v8  ;;  %4594 = vst [vmem:[%s9411_s24 + $0x90] sm:$0xff] %v4210_v61  ;;  %v6742_v10 = vld [vmem:[%s7577_s15 + $0x98] sm:$0xff]  ;;  %v9677_v6 = vpop.xlane.xlu0 %2974 }
 0x403   : > { %4595 = vst [vmem:[%s9411_s24 + $0x98] sm:$0xff] %v4211_v17  ;;  %4596 = vst [vmem:[%s9411_s24 + $0xa0] sm:$0xff] %v4212_v15  ;;  %v4996_v24 = vsub.f32 %v4210_v61, %v6741_v31  ;;  %v4997_v58 = vsub.f32 %v4211_v17, %v6742_v10  ;;  %v4998_v63 = vsub.f32 %v4212_v15, %v6743_v44  ;;  %vm3331_vm14 = vcmp.eq.s32.totalorder %v9638_v18, 1  ;;  %v6747_v10 = vld [vmem:[%s7577_s15 + $0xc0] sm:$0xff] }
 0x404   : > { %4597 = vst [vmem:[%s9411_s24 + $0xa8] sm:$0xff] %v4213_v34  ;;  %4598 = vst [vmem:[%s9411_s24 + $0xb0] sm:$0xff] %v4214_v59  ;;  %v4999_v1 = vsub.f32 %v4213_v34, %v6744_v54  ;;  %v5000_v8 = vsub.f32 %v4214_v59, %v6745_v22  ;;  %v5001_v23 = vsub.f32 %v4215_v12, %v6746_v38  ;;  %vm3973_vm15 = vcmp.eq.s32.totalorder %v9638_v18, 2  ;;  %v6748_v22 = vld [vmem:[%s7577_s15 + $0xc8] sm:$0xff] }
 0x405   : > { %4599 = vst [vmem:[%s9411_s24 + $0xb8] sm:$0xff] %v4215_v12  ;;  %v5002_v42 = vmul.f32 %v4996_v24, %v4996_v24  ;;  %v5003_v9 = vmul.f32 %v4997_v58, %v4997_v58  ;;  %v5004_v28 = vmul.f32 %v4998_v63, %v4998_v63  ;;  %v3605_v44 = vsel %vm3331_vm14, %v9129_v45, %v9125_v7 }
 0x406   : > { %v5005_v61 = vmul.f32 %v4999_v1, %v4999_v1  ;;  %v5006_v31 = vmul.f32 %v5000_v8, %v5000_v8  ;;  %v5007_v17 = vmul.f32 %v5001_v23, %v5001_v23  ;;  %v3606_v38 = vsel %vm3331_vm14, %v9142_v2, %v9132_v41  ;;  %v9694_v1 = vpop.xlane.xlu1 %2516 }
 0x407   : > { %v5734_v34 = vadd.f32 %v5002_v42, %v9616_v29  ;;  %v5735_v54 = vadd.f32 %v5003_v9, %v9618_v27  ;;  %v5736_v58 = vadd.f32 %v5004_v28, %v9627_v25  ;;  %v3607_v12 = vsel %vm3331_vm14, %v9146_v55, %v9135_v20  ;;  %v9716_v29 = vpop.xlane.xlu0 %3002 }
 0x408   : > { %v5737_v59 = vadd.f32 %v5005_v61, %v4993_v50  ;;  %v5738_v23 = vadd.f32 %v5006_v31, %v4994_v48  ;;  %v5739_v15 = vadd.f32 %v5007_v17, %v4995_v21  ;;  %v3608_v24 = vsel %vm3331_vm14, %v9149_v19, %v9161_v14 }
 0x409   : > { %v9705_v42 = vadd.f32 %v5734_v34, %v9516_v26  ;;  %v9708_v9 = vadd.f32 %v5735_v54, %v9519_v0  ;;  %v9711_v28 = vadd.f32 %v5736_v58, %v9522_v16  ;;  %v3609_v0 = vsel %vm3331_vm14, %v9152_v11, %v9168_v13 }
 0x40a   : > { %v9714_v21 = vadd.f32 %v5737_v59, %v9525_v5  ;;  %v9719_v27 = vadd.f32 %v5738_v23, %v9528_v30  ;;  %v9722_v26 = vadd.f32 %v5739_v15, %v9531_v33  ;;  %v3610_v16 = vsel %vm3331_vm14, %v9158_v40, %v9171_v49  ;;  %v9769_v34 = vpop.xlane.xlu1 %3016  ;;  %v6750_v23 = vld [vmem:[%s7577_s15 + $0xd8] sm:$0xff]  ;;  %v14350_v15 = vld [vmem:[#allocation70_spill] sm:$0xff] }
 0x40b   : > { %v4216_v5 = vsel %vm3973_vm15, %v9175_v39, %v3605_v44  ;;  %v4217_v30 = vsel %vm3973_vm15, %v9189_v4, %v3606_v38  ;;  %v4218_v33 = vsel %vm3973_vm15, %v9205_v53, %v3607_v12  ;;  %v4219_v25 = vsel %vm3973_vm15, %v9208_v43, %v3608_v24  ;;  %v14347_v44 = vld [vmem:[#allocation18_spill] sm:$0xff] }
 0x40c   : > { %v4220_v50 = vsel %vm3973_vm15, %v14305_v52, %v3609_v0  ;;  %v4221_v48 = vsel %vm3973_vm15, %v14306_v60, %v3610_v16  ;;  %4600 = vst [vmem:[%s9411_s24 + $0xc0] sm:$0xff] %v4216_v5  ;;  %4601 = vst [vmem:[%s9411_s24 + $0xc8] sm:$0xff] %v4217_v30  ;;  %v5008_v63 = vsub.f32 %v4216_v5, %v6747_v10  ;;  %v14343_v61 = vcvt.f32.s32 %v9499_v47  ;;  %v6749_v47 = vld [vmem:[%s7577_s15 + $0xd0] sm:$0xff]  ;;  %v6751_v0 = vld [vmem:[%s7577_s15 + $0xe0] sm:$0xff] }
 0x40d   : > { %4602 = vst [vmem:[%s9411_s24 + $0xd0] sm:$0xff] %v4218_v33  ;;  %4603 = vst [vmem:[%s9411_s24 + $0xd8] sm:$0xff] %v4219_v25  ;;  %v5009_v8 = vsub.f32 %v4217_v30, %v6748_v22  ;;  %v14345_v17 = vcvt.f32.s32 %v9465_v37  ;;  %vm2948_vm0 = vcmp.eq.f32.partialorder %v14347_v44, %v9623_v3  ;;  %v2981_v38 = vcvt.f32.s32 %v9677_v6  ;;  %v6752_v5 = vld [vmem:[%s7577_s15 + $0xe8] sm:$0xff] }
 0x40e   : > { %v9758_v31 = vshll.u32 %v14343_v61, 16  ;;  %4604 = vst [vmem:[%s9411_s24 + $0xe0] sm:$0xff] %v4220_v50  ;;  %4605 = vst [vmem:[%s9411_s24 + $0xe8] sm:$0xff] %v4221_v48  ;;  %v14348_v54 = vcvt.f32.s32 %v9555_v51  ;;  %v5010_v59 = vsub.f32 %v4218_v33, %v6749_v47  ;;  %v5011_v37 = vsub.f32 %v4219_v25, %v6750_v23  ;;  %v9786_v51 = vpop.xlane.xlu0 %3030  ;;  %v14353_v25 = vld [vmem:[#allocation89_spill] sm:$0xff]  ;;  %v14357_v47 = vld [vmem:[#allocation22_spill] sm:$0xff] }
 0x40f   : > { %v9762_v18 = vshll.u32 %v14345_v17, 16  ;;  %vm2976_vm1 = vcmp.eq.f32.partialorder %v14350_v15, %v9677_v6  ;;  %v14351_v12 = vcvt.f32.s32 %v9623_v3  ;;  %v5012_v16 = vsub.f32 %v4220_v50, %v6751_v0  ;;  %v14354_v17 = vld [vmem:[#allocation71_spill] sm:$0xff]  ;;  %v14356_v50 = vld [vmem:[#allocation53_spill] sm:$0xff]  ;;  %v14359_v0 = vld [vmem:[#allocation20_spill] sm:$0xff] }
 0x410   : > { %14344 = vst [vmem:[#allocation91_spill] sm:$0xff] %v9758_v31  ;;  %v9773_v58 = vshll.u32 %v14348_v54, 16  ;;  %v5013_v30 = vsub.f32 %v4221_v48, %v6752_v5  ;;  %v9788_v22 = vmul.f32 %v5008_v63, %v5008_v63  ;;  %v9790_v33 = vmul.f32 %v5009_v8, %v5009_v8  ;;  %v14358_v3 = vld [vmem:[#allocation23_spill] sm:$0xff] }
 0x411   : > { %14346 = vst [vmem:[#allocation51_spill] sm:$0xff] %v9762_v18  ;;  %v9781_v24 = vshll.u32 %v14351_v12, 16  ;;  %v2949_v61 = vsel %vm2948_vm0, %v14353_v25, inf  ;;  %vm2990_vm2 = vcmp.eq.f32.partialorder %v14354_v17, %v9625_v36  ;;  %v9798_v54 = vshll.u32 %v2981_v38, 16  ;;  %v14360_v25 = vld [vmem:[#allocation72_spill] sm:$0xff] }
 0x412   : > { %14349 = vst [vmem:[#allocation68_spill] sm:$0xff] %v9773_v58  ;;  %2950 = vmin.xlane.f32.xlu1 %v2949_v61  ;;  %v2991_v48 = vsel %vm2990_vm2, %v14356_v50, inf  ;;  %vm3004_vm3 = vcmp.eq.f32.partialorder %v14357_v47, %v9716_v29  ;;  %v2504_v63 = vcvt.f32.s32 %v9657_v46  ;;  %v9804_v8 = vmul.f32 %v5010_v59, %v5010_v59  ;;  %v9818_v46 = vpop.xlane.xlu1 %2530  ;;  %v14362_v17 = vld [vmem:[#allocation28_spill] sm:$0xff]  ;;  %v14364_v50 = vld [vmem:[#allocation95_spill] sm:$0xff]  ;;  %v14365_v47 = vld [vmem:[#allocation26_spill] sm:$0xff] }
 0x413   : > { %14352 = vst [vmem:[#allocation69_spill] sm:$0xff] %v9781_v24  ;;  %14355 = vst [vmem:[#allocation88_spill] sm:$0xff] %v9798_v54  ;;  %v9806_v23 = vmul.f32 %v5011_v37, %v5011_v37  ;;  %2992 = vmin.xlane.f32.xlu0 %v2991_v48  ;;  %vm3032_vm4 = vcmp.eq.f32.partialorder %v14358_v3, %v9786_v51  ;;  %v2518_v44 = vcvt.f32.s32 %v9694_v1  ;;  %v14361_v37 = vld [vmem:[#allocation90_spill] sm:$0xff]  ;;  %v6758_v58 = vld [vmem:[%s7577_s15 + $0x118] sm:$0xff] }
 0x414   : > { %v9811_v38 = vmul.f32 %v5012_v16, %v5012_v16  ;;  %v9813_v12 = vmul.f32 %v5013_v30, %v5013_v30  ;;  %v2507_v5 = vadd.s32 %v14359_v0, %v2504_v63  ;;  %vm3018_vm5 = vcmp.eq.f32.partialorder %v14360_v25, %v9769_v34  ;;  %v14363_v16 = vld [vmem:[#allocation93_spill] sm:$0xff] }
 0x415   : > { %v2977_v61 = vsel %vm2976_vm1, %v14361_v37, inf  ;;  %v9826_v1 = vadd.s32 %v14362_v17, %v2518_v44  ;;  %v3005_v30 = vsel %vm3004_vm3, %v14363_v16, inf  ;;  %v3033_v48 = vsel %vm3032_vm4, %v14364_v50, inf  ;;  %v6755_v59 = vld [vmem:[%s7577_s15 + $0x100] sm:$0xff] }
 0x416   : > { %vm3332_vm6 = vcmp.eq.s32.totalorder %v2507_v5, 1  ;;  %vm3974_vm7 = vcmp.eq.s32.totalorder %v2507_v5, 2  ;;  %2978 = vmin.xlane.f32.xlu1 %v2977_v61  ;;  %v3019_v63 = vsel %vm3018_vm5, %v14365_v47, inf  ;;  %v9867_v5 = vpop.xlane.xlu1 %2544 }
 0x417   : > { %v3611_v3 = vsel %vm3332_vm6, %v9129_v45, %v9125_v7  ;;  %v3612_v6 = vsel %vm3332_vm6, %v9142_v2, %v9132_v41  ;;  %v3613_v15 = vsel %vm3332_vm6, %v9146_v55, %v9135_v20  ;;  %v3614_v44 = vsel %vm3332_vm6, %v9149_v19, %v9161_v14  ;;  %3020 = vmin.xlane.f32.xlu0 %v3019_v63  ;;  %v9857_v63 = vpop.xlane.xlu0 %3058 }
 0x418   : > { %v3615_v0 = vsel %vm3332_vm6, %v9152_v11, %v9168_v13  ;;  %v3616_v25 = vsel %vm3332_vm6, %v9158_v40, %v9171_v49  ;;  %v4222_v37 = vsel %vm3974_vm7, %v9175_v39, %v3611_v3  ;;  %v4223_v61 = vsel %vm3974_vm7, %v9189_v4, %v3612_v6  ;;  %v6753_v3 = vld [vmem:[%s7577_s15 + $0xf0] sm:$0xff] }
 0x419   : > { %v4224_v17 = vsel %vm3974_vm7, %v9205_v53, %v3613_v15  ;;  %v4225_v16 = vsel %vm3974_vm7, %v9208_v43, %v3614_v44  ;;  %v4226_v50 = vsel %vm3974_vm7, %v14305_v52, %v3615_v0  ;;  %v4227_v47 = vsel %vm3974_vm7, %v14306_v60, %v3616_v25  ;;  %4606 = vst [vmem:[%s9411_s24 + $0xf0] sm:$0xff] %v4222_v37  ;;  %v6754_v15 = vld [vmem:[%s7577_s15 + $0xf8] sm:$0xff]  ;;  %v6756_v0 = vld [vmem:[%s7577_s15 + $0x108] sm:$0xff]  ;;  %v6757_v25 = vld [vmem:[%s7577_s15 + $0x110] sm:$0xff] }
 0x41a   : > { %4607 = vst [vmem:[%s9411_s24 + $0xf8] sm:$0xff] %v4223_v61  ;;  %4608 = vst [vmem:[%s9411_s24 + $0x100] sm:$0xff] %v4224_v17  ;;  %v5020_v6 = vsub.f32 %v4222_v37, %v6753_v3  ;;  %v5021_v44 = vsub.f32 %v4223_v61, %v6754_v15  ;;  %v5022_v10 = vsub.f32 %v4224_v17, %v6755_v59  ;;  %3006 = vmin.xlane.f32.xlu1 %v3005_v30 }
 0x41b   : > { %4609 = vst [vmem:[%s9411_s24 + $0x108] sm:$0xff] %v4225_v16  ;;  %4610 = vst [vmem:[%s9411_s24 + $0x110] sm:$0xff] %v4226_v50  ;;  %v5023_v54 = vsub.f32 %v4225_v16, %v6756_v0  ;;  %v5024_v24 = vsub.f32 %v4226_v50, %v6757_v25  ;;  %v5025_v31 = vsub.f32 %v4227_v47, %v6758_v58  ;;  %vm3333_vm8 = vcmp.eq.s32.totalorder %v9826_v1, 1  ;;  %v6759_v0 = vld [vmem:[%s7577_s15 + $0x120] sm:$0xff] }
 0x41c   : > { %4611 = vst [vmem:[%s9411_s24 + $0x118] sm:$0xff] %v4227_v47  ;;  %vm3975_vm9 = vcmp.eq.s32.totalorder %v9826_v1, 2  ;;  %v5026_v18 = vmul.f32 %v5020_v6, %v5020_v6  ;;  %v5027_v56 = vmul.f32 %v5021_v44, %v5021_v44  ;;  %v5028_v37 = vmul.f32 %v5022_v10, %v5022_v10 }
 0x41d   : > { %v5029_v3 = vmul.f32 %v5023_v54, %v5023_v54  ;;  %v5030_v61 = vmul.f32 %v5024_v24, %v5024_v24  ;;  %v5031_v15 = vmul.f32 %v5025_v31, %v5025_v31  ;;  %v3617_v59 = vsel %vm3333_vm8, %v9129_v45, %v9125_v7 }
 0x41e   : > { %v3618_v58 = vsel %vm3333_vm8, %v9142_v2, %v9132_v41  ;;  %v9882_v30 = vadd.f32 %v5026_v18, %v9788_v22  ;;  %v9885_v17 = vadd.f32 %v5027_v56, %v9790_v33  ;;  %v9888_v10 = vadd.f32 %v5028_v37, %v9804_v8  ;;  %3034 = vmin.xlane.f32.xlu1 %v3033_v48  ;;  %v9907_v22 = vpop.xlane.xlu0 %3086  ;;  %v6760_v37 = vld [vmem:[%s7577_s15 + $0x128] sm:$0xff] }
 0x41f   : > { %v9891_v31 = vadd.f32 %v5029_v3, %v9806_v23  ;;  %v9894_v24 = vadd.f32 %v5030_v61, %v9811_v38  ;;  %v9897_v54 = vadd.f32 %v5031_v15, %v9813_v12  ;;  %v3619_v56 = vsel %vm3333_vm8, %v9146_v55, %v9135_v20  ;;  %14366 = vst [vmem:[#allocation19_spill] sm:$0xff] %v9907_v22  ;;  %v9923_v12 = vpop.xlane.xlu1 %3044  ;;  %v6761_v61 = vld [vmem:[%s7577_s15 + $0x130] sm:$0xff] }
 0x420   : > { %v3620_v18 = vsel %vm3333_vm8, %v9149_v19, %v9161_v14  ;;  %v3621_v33 = vsel %vm3333_vm8, %v9152_v11, %v9168_v13  ;;  %v3622_v8 = vsel %vm3333_vm8, %v9158_v40, %v9171_v49  ;;  %v4228_v23 = vsel %vm3975_vm9, %v9175_v39, %v3617_v59  ;;  %14367 = vst [vmem:[#allocation84_spill] sm:$0xff] %v9923_v12 }
 0x421   : > { %v4229_v38 = vsel %vm3975_vm9, %v9189_v4, %v3618_v58  ;;  %v4230_v48 = vsel %vm3975_vm9, %v9205_v53, %v3619_v56  ;;  %v4231_v16 = vsel %vm3975_vm9, %v9208_v43, %v3620_v18  ;;  %v4232_v50 = vsel %vm3975_vm9, %v14305_v52, %v3621_v33  ;;  %4612 = vst [vmem:[%s9411_s24 + $0x120] sm:$0xff] %v4228_v23  ;;  %v6762_v58 = vld [vmem:[%s7577_s15 + $0x138] sm:$0xff] }
 0x422   : > { %v4233_v47 = vsel %vm3975_vm9, %v14306_v60, %v3622_v8  ;;  %4613 = vst [vmem:[%s9411_s24 + $0x128] sm:$0xff] %v4229_v38  ;;  %v14368_v6 = vcvt.f32.s32 %v9625_v36  ;;  %4614 = vst [vmem:[%s9411_s24 + $0x130] sm:$0xff] %v4230_v48  ;;  %v5032_v25 = vsub.f32 %v4228_v23, %v6759_v0  ;;  %v5033_v3 = vsub.f32 %v4229_v38, %v6760_v37  ;;  %v6763_v36 = vld [vmem:[%s7577_s15 + $0x140] sm:$0xff]  ;;  %v14372_v33 = vld [vmem:[#allocation24_spill] sm:$0xff]  ;;  %v9958_v8 = vpop.xlane.xlu0 %3114 }
 0x423   : > { %4615 = vst [vmem:[%s9411_s24 + $0x138] sm:$0xff] %v4231_v16  ;;  %4616 = vst [vmem:[%s9411_s24 + $0x140] sm:$0xff] %v4232_v50  ;;  %v5034_v1 = vsub.f32 %v4230_v48, %v6761_v61  ;;  %v14370_v15 = vcvt.f32.s32 %v9716_v29  ;;  %v5035_v56 = vsub.f32 %v4231_v16, %v6762_v58  ;;  %v5036_v18 = vsub.f32 %v4232_v50, %v6763_v36  ;;  %v6764_v23 = vld [vmem:[%s7577_s15 + $0x148] sm:$0xff] }
 0x424   : > { %v9941_v44 = vshll.u32 %v14368_v6, 16  ;;  %4617 = vst [vmem:[%s9411_s24 + $0x148] sm:$0xff] %v4233_v47  ;;  %vm3060_vm10 = vcmp.eq.f32.partialorder %v14372_v33, %v9857_v63  ;;  %14373 = vst [vmem:[#allocation85_spill] sm:$0xff] %v9958_v8  ;;  %v5037_v0 = vsub.f32 %v4233_v47, %v6764_v23  ;;  %v9964_v29 = vmul.f32 %v5032_v25, %v5032_v25  ;;  %v14374_v16 = vld [vmem:[#allocation27_spill] sm:$0xff]  ;;  %v14376_v47 = vld [vmem:[#allocation74_spill] sm:$0xff]  ;;  %v9977_v33 = vpop.xlane.xlu1 %2558 }
 0x425   : > { %v9952_v59 = vshll.u32 %v14370_v15, 16  ;;  %v9966_v37 = vmul.f32 %v5033_v3, %v5033_v3  ;;  %vm3088_vm11 = vcmp.eq.f32.partialorder %v14374_v16, %v9907_v22  ;;  %v2532_v50 = vcvt.f32.s32 %v9818_v46  ;;  %v14375_v15 = vld [vmem:[#allocation54_spill] sm:$0xff]  ;;  %v14377_v3 = vld [vmem:[#allocation73_spill] sm:$0xff]  ;;  %v14378_v16 = vld [vmem:[#allocation76_spill] sm:$0xff] }
 0x426   : > { %14369 = vst [vmem:[#allocation92_spill] sm:$0xff] %v9941_v44  ;;  %v9971_v61 = vmul.f32 %v5034_v1, %v5034_v1  ;;  %v3061_v58 = vsel %vm3060_vm10, %v14375_v15, inf  ;;  %v2546_v36 = vcvt.f32.s32 %v9867_v5  ;;  %vm3116_vm12 = vcmp.eq.f32.partialorder %v14376_v47, %v9958_v8  ;;  %v14379_v1 = vld [vmem:[#allocation29_spill] sm:$0xff]  ;;  %v14380_v15 = vld [vmem:[#allocation96_spill] sm:$0xff]  ;;  %v14381_v47 = vld [vmem:[#allocation75_spill] sm:$0xff] }
 0x427   : > { %14371 = vst [vmem:[#allocation52_spill] sm:$0xff] %v9952_v59  ;;  %v5041_v25 = vmul.f32 %v5035_v56, %v5035_v56  ;;  %v5042_v23 = vmul.f32 %v5036_v18, %v5036_v18  ;;  %v2535_v48 = vadd.s32 %v14377_v3, %v2532_v50  ;;  %3062 = vmin.xlane.f32.xlu1 %v3061_v58  ;;  %v3089_v6 = vsel %vm3088_vm11, %v14380_v15, inf  ;;  %v6767_v56 = vld [vmem:[%s7577_s15 + $0x160] sm:$0xff]  ;;  %v6768_v44 = vld [vmem:[%s7577_s15 + $0x168] sm:$0xff] }
 0x428   : > { %vm3046_vm13 = vcmp.eq.f32.partialorder %v14378_v16, %v9923_v12  ;;  %v5043_v46 = vmul.f32 %v5037_v0, %v5037_v0  ;;  %v9983_v38 = vadd.s32 %v14379_v1, %v2546_v36  ;;  %v3117_v5 = vsel %vm3116_vm12, %v9263_v35, inf }
 0x429   : > { %vm3334_vm14 = vcmp.eq.s32.totalorder %v2535_v48, 1  ;;  %vm3976_vm15 = vcmp.eq.s32.totalorder %v2535_v48, 2  ;;  %v3047_v59 = vsel %vm3046_vm13, %v14381_v47, inf  ;;  %v6770_v48 = vld [vmem:[%s7577_s15 + $0x178] sm:$0xff] }
 0x42a   : > { %v3623_v18 = vsel %vm3334_vm14, %v9129_v45, %v9125_v7  ;;  %v3624_v0 = vsel %vm3334_vm14, %v9142_v2, %v9132_v41  ;;  %v3625_v50 = vsel %vm3334_vm14, %v9146_v55, %v9135_v20  ;;  %v3626_v35 = vsel %vm3334_vm14, %v9149_v19, %v9161_v14  ;;  %3048 = vmin.xlane.f32.xlu0 %v3047_v59 }
 0x42b   : > { %v3627_v58 = vsel %vm3334_vm14, %v9152_v11, %v9168_v13  ;;  %v3628_v36 = vsel %vm3334_vm14, %v9158_v40, %v9171_v49  ;;  %v4234_v3 = vsel %vm3976_vm15, %v9175_v39, %v3623_v18  ;;  %v4235_v16 = vsel %vm3976_vm15, %v9189_v4, %v3624_v0  ;;  %3090 = vmin.xlane.f32.xlu1 %v3089_v6  ;;  %v6765_v6 = vld [vmem:[%s7577_s15 + $0x150] sm:$0xff]  ;;  %v6766_v0 = vld [vmem:[%s7577_s15 + $0x158] sm:$0xff] }
 0x42c   : > { %v4236_v1 = vsel %vm3976_vm15, %v9205_v53, %v3625_v50  ;;  %v4237_v59 = vsel %vm3976_vm15, %v9208_v43, %v3626_v35  ;;  %v4238_v15 = vsel %vm3976_vm15, %v14305_v52, %v3627_v58  ;;  %v4239_v47 = vsel %vm3976_vm15, %v14306_v60, %v3628_v36  ;;  %4618 = vst [vmem:[%s9411_s24 + $0x150] sm:$0xff] %v4234_v3  ;;  %v6769_v58 = vld [vmem:[%s7577_s15 + $0x170] sm:$0xff] }
 0x42d   : > { %4619 = vst [vmem:[%s9411_s24 + $0x158] sm:$0xff] %v4235_v16  ;;  %4620 = vst [vmem:[%s9411_s24 + $0x160] sm:$0xff] %v4236_v1  ;;  %v5044_v18 = vsub.f32 %v4234_v3, %v6765_v6  ;;  %v5045_v50 = vsub.f32 %v4235_v16, %v6766_v0  ;;  %v5046_v35 = vsub.f32 %v4236_v1, %v6767_v56  ;;  %vm3335_vm0 = vcmp.eq.s32.totalorder %v9983_v38, 1  ;;  %v6772_v0 = vld [vmem:[%s7577_s15 + $0x188] sm:$0xff] }
 0x42e   : > { %4621 = vst [vmem:[%s9411_s24 + $0x168] sm:$0xff] %v4237_v59  ;;  %4622 = vst [vmem:[%s9411_s24 + $0x170] sm:$0xff] %v4238_v15  ;;  %v5047_v57 = vsub.f32 %v4237_v59, %v6768_v44  ;;  %v5048_v12 = vsub.f32 %v4238_v15, %v6769_v58  ;;  %v5049_v8 = vsub.f32 %v4239_v47, %v6770_v48  ;;  %vm3977_vm1 = vcmp.eq.s32.totalorder %v9983_v38, 2  ;;  %v6774_v48 = vld [vmem:[%s7577_s15 + $0x198] sm:$0xff] }
 0x42f   : > { %4623 = vst [vmem:[%s9411_s24 + $0x178] sm:$0xff] %v4239_v47  ;;  %v5050_v36 = vmul.f32 %v5044_v18, %v5044_v18  ;;  %v5051_v22 = vmul.f32 %v5045_v50, %v5045_v50  ;;  %v5052_v32 = vmul.f32 %v5046_v35, %v5046_v35  ;;  %3118 = vmin.xlane.f32.xlu1 %v3117_v5  ;;  %v6773_v35 = vld [vmem:[%s7577_s15 + $0x190] sm:$0xff] }
 0x430   : > { %v5053_v62 = vmul.f32 %v5047_v57, %v5047_v57  ;;  %v5054_v3 = vmul.f32 %v5048_v12, %v5048_v12  ;;  %v5055_v6 = vmul.f32 %v5049_v8, %v5049_v8  ;;  %v3629_v44 = vsel %vm3335_vm0, %v9129_v45, %v9125_v7 }
 0x431   : > { %v3630_v56 = vsel %vm3335_vm0, %v9142_v2, %v9132_v41  ;;  %v5746_v16 = vadd.f32 %v5050_v36, %v9964_v29  ;;  %v5747_v1 = vadd.f32 %v5051_v22, %v9966_v37  ;;  %v5748_v59 = vadd.f32 %v5052_v32, %v9971_v61 }
 0x432   : > { %v5749_v57 = vadd.f32 %v5053_v62, %v5041_v25  ;;  %v5750_v5 = vadd.f32 %v5054_v3, %v5042_v23  ;;  %v5751_v12 = vadd.f32 %v5055_v6, %v5043_v46  ;;  %v3631_v8 = vsel %vm3335_vm0, %v9146_v55, %v9135_v20  ;;  %v6771_v46 = vld [vmem:[%s7577_s15 + $0x180] sm:$0xff] }
 0x433   : > { %v3632_v15 = vsel %vm3335_vm0, %v9149_v19, %v9161_v14  ;;  %v5926_v47 = vadd.f32 %v5746_v16, %v9882_v30  ;;  %v5927_v29 = vadd.f32 %v5747_v1, %v9885_v17  ;;  %v5928_v22 = vadd.f32 %v5748_v59, %v9888_v10  ;;  %v10060_v17 = vpop.xlane.xlu1 %2572  ;;  %v14394_v59 = vld [vmem:[#allocation32_spill] sm:$0xff] }
 0x434   : > { %v5929_v62 = vadd.f32 %v5749_v57, %v9891_v31  ;;  %v5930_v32 = vadd.f32 %v5750_v5, %v9894_v24  ;;  %v5931_v37 = vadd.f32 %v5751_v12, %v9897_v54  ;;  %v3633_v61 = vsel %vm3335_vm0, %v9152_v11, %v9168_v13  ;;  %v6775_v5 = vld [vmem:[%s7577_s15 + $0x1a0] sm:$0xff] }
 0x435   : > { %v3634_v30 = vsel %vm3335_vm0, %v9158_v40, %v9171_v49  ;;  %v10063_v10 = vadd.f32 %v5926_v47, %v9705_v42  ;;  %v10066_v31 = vadd.f32 %v5927_v29, %v9708_v9  ;;  %v10069_v24 = vadd.f32 %v5928_v22, %v9711_v28 }
 0x436   : > { %v10072_v54 = vadd.f32 %v5929_v62, %v9714_v21  ;;  %v10075_v25 = vadd.f32 %v5930_v32, %v9719_v27  ;;  %v10078_v23 = vadd.f32 %v5931_v37, %v9722_v26  ;;  %v4240_v42 = vsel %vm3977_vm1, %v9175_v39, %v3629_v44 }
 0x437   : > { %14382 = vst [vmem:[#allocation18_spill] sm:$0xff] %v10066_v31  ;;  %14383 = vst [vmem:[#allocation70_spill] sm:$0xff] %v10069_v24  ;;  %v4241_v9 = vsel %vm3977_vm1, %v9189_v4, %v3630_v56  ;;  %v4242_v28 = vsel %vm3977_vm1, %v9205_v53, %v3631_v8  ;;  %v4243_v21 = vsel %vm3977_vm1, %v9208_v43, %v3632_v15  ;;  %v14387_v3 = vcvt.f32.s32 %v9786_v51  ;;  %v6776_v8 = vld [vmem:[%s7577_s15 + $0x1a8] sm:$0xff]  ;;  %v10125_v29 = vpop.xlane.xlu1 %3072 }
 0x438   : > { %14384 = vst [vmem:[#allocation89_spill] sm:$0xff] %v10072_v54  ;;  %14385 = vst [vmem:[#allocation71_spill] sm:$0xff] %v10075_v25  ;;  %v4244_v27 = vsel %vm3977_vm1, %v14305_v52, %v3633_v61  ;;  %v4245_v26 = vsel %vm3977_vm1, %v14306_v60, %v3634_v30  ;;  %v5056_v18 = vsub.f32 %v4240_v42, %v6771_v46  ;;  %v14389_v6 = vcvt.f32.s32 %v9857_v63  ;;  %v6777_v46 = vld [vmem:[%s7577_s15 + $0x1b0] sm:$0xff] }
 0x439   : > { %14386 = vst [vmem:[#allocation53_spill] sm:$0xff] %v10078_v23  ;;  %4624 = vst [vmem:[%s9411_s24 + $0x180] sm:$0xff] %v4240_v42  ;;  %v5057_v50 = vsub.f32 %v4241_v9, %v6772_v0  ;;  %v5058_v58 = vsub.f32 %v4242_v28, %v6773_v35  ;;  %v5059_v36 = vsub.f32 %v4243_v21, %v6774_v48  ;;  %v10110_v38 = vshll.u32 %v14387_v3, 16  ;;  %v6778_v0 = vld [vmem:[%s7577_s15 + $0x1b8] sm:$0xff]  ;;  %v6779_v35 = vld [vmem:[%s7577_s15 + $0x1c0] sm:$0xff] }
 0x43a   : > { %4625 = vst [vmem:[%s9411_s24 + $0x188] sm:$0xff] %v4241_v9  ;;  %4626 = vst [vmem:[%s9411_s24 + $0x190] sm:$0xff] %v4242_v28  ;;  %v10114_v44 = vshll.u32 %v14389_v6, 16  ;;  %v14391_v56 = vcvt.f32.s32 %v9769_v34  ;;  %v14393_v1 = vcvt.f32.s32 %v9977_v33  ;;  %v5060_v12 = vsub.f32 %v4244_v27, %v6775_v5  ;;  %v10141_v9 = vpop.xlane.xlu0 %3142  ;;  %v6780_v48 = vld [vmem:[%s7577_s15 + $0x1c8] sm:$0xff]  ;;  %v6781_v6 = vld [vmem:[%s7577_s15 + $0x1d0] sm:$0xff] }
 0x43b   : > { %4627 = vst [vmem:[%s9411_s24 + $0x198] sm:$0xff] %v4243_v21  ;;  %4628 = vst [vmem:[%s9411_s24 + $0x1a0] sm:$0xff] %v4244_v27  ;;  %v5061_v15 = vsub.f32 %v4245_v26, %v6776_v8  ;;  %v5062_v47 = vmul.f32 %v5056_v18, %v5056_v18  ;;  %v5063_v51 = vmul.f32 %v5057_v50, %v5057_v50  ;;  %v10161_v5 = vpop.xlane.xlu1 %2586  ;;  %v14411_v23 = vld [vmem:[#allocation79_spill] sm:$0xff] }
 0x43c   : > { %4629 = vst [vmem:[%s9411_s24 + $0x1a8] sm:$0xff] %v4245_v26  ;;  %14388 = vst [vmem:[#allocation22_spill] sm:$0xff] %v10110_v38  ;;  %v10118_v16 = vshll.u32 %v14391_v56, 16  ;;  %v2563_v57 = vadd.s32 %v14394_v59, %v14393_v1  ;;  %v5064_v22 = vmul.f32 %v5058_v58, %v5058_v58  ;;  %v5065_v63 = vmul.f32 %v5059_v36, %v5059_v36  ;;  %v6782_v1 = vld [vmem:[%s7577_s15 + $0x1d8] sm:$0xff] }
 0x43d   : > { %14390 = vst [vmem:[#allocation23_spill] sm:$0xff] %v10114_v44  ;;  %v5066_v3 = vmul.f32 %v5060_v12, %v5060_v12  ;;  %v6794_v44 = vld [vmem:[%s7577_s15 + $0x238] sm:$0xff] }
 0x43e   : > { %14392 = vst [vmem:[#allocation20_spill] sm:$0xff] %v10118_v16  ;;  %vm3336_vm2 = vcmp.eq.s32.totalorder %v2563_v57, 1  ;;  %vm3978_vm3 = vcmp.eq.s32.totalorder %v2563_v57, 2  ;;  %v14395_v57 = vld [vmem:[#allocation31_spill] sm:$0xff] }
 0x43f   : > { %v3635_v34 = vsel %vm3336_vm2, %v9129_v45, %v9125_v7  ;;  %v3636_v33 = vsel %vm3336_vm2, %v9142_v2, %v9132_v41  ;;  %v3637_v62 = vsel %vm3336_vm2, %v9146_v55, %v9135_v20  ;;  %v3638_v32 = vsel %vm3336_vm2, %v9149_v19, %v9161_v14 }
 0x440   : > { %v3639_v37 = vsel %vm3336_vm2, %v9152_v11, %v9168_v13  ;;  %v3640_v61 = vsel %vm3336_vm2, %v9158_v40, %v9171_v49  ;;  %v4246_v30 = vsel %vm3978_vm3, %v9175_v39, %v3635_v34  ;;  %v4247_v42 = vsel %vm3978_vm3, %v9189_v4, %v3636_v33 }
 0x441   : > { %v4248_v28 = vsel %vm3978_vm3, %v9205_v53, %v3637_v62  ;;  %v4249_v21 = vsel %vm3978_vm3, %v9208_v43, %v3638_v32  ;;  %v4250_v27 = vsel %vm3978_vm3, %v14305_v52, %v3639_v37  ;;  %v4251_v26 = vsel %vm3978_vm3, %v14306_v60, %v3640_v61  ;;  %4630 = vst [vmem:[%s9411_s24 + $0x1b0] sm:$0xff] %v4246_v30 }
 0x442   : > { %4631 = vst [vmem:[%s9411_s24 + $0x1b8] sm:$0xff] %v4247_v42  ;;  %4632 = vst [vmem:[%s9411_s24 + $0x1c0] sm:$0xff] %v4248_v28  ;;  %v5068_v18 = vsub.f32 %v4246_v30, %v6777_v46  ;;  %v5069_v50 = vsub.f32 %v4247_v42, %v6778_v0  ;;  %v5070_v58 = vsub.f32 %v4248_v28, %v6779_v35  ;;  %v2574_v30 = vcvt.f32.s32 %v10060_v17  ;;  %v10164_v42 = vpop.xlane.xlu0 %3170  ;;  %v14397_v0 = vld [vmem:[#allocation33_spill] sm:$0xff] }
 0x443   : > { %4633 = vst [vmem:[%s9411_s24 + $0x1c8] sm:$0xff] %v4249_v21  ;;  %4634 = vst [vmem:[%s9411_s24 + $0x1d0] sm:$0xff] %v4250_v27  ;;  %v5071_v36 = vsub.f32 %v4249_v21, %v6780_v48  ;;  %v5072_v56 = vsub.f32 %v4250_v27, %v6781_v6  ;;  %v5073_v59 = vsub.f32 %v4251_v26, %v6782_v1  ;;  %v14399_v35 = vld [vmem:[#allocation85_spill] sm:$0xff] }
 0x444   : > { %4635 = vst [vmem:[%s9411_s24 + $0x1d8] sm:$0xff] %v4251_v26  ;;  %vm3144_vm4 = vcmp.eq.f32.partialorder %v14395_v57, %v10141_v9  ;;  %v5074_v8 = vmul.f32 %v5068_v18, %v5068_v18  ;;  %v5075_v34 = vmul.f32 %v5069_v50, %v5069_v50  ;;  %v5076_v33 = vmul.f32 %v5070_v58, %v5070_v58  ;;  %v14396_v18 = vld [vmem:[#allocation30_spill] sm:$0xff]  ;;  %v14398_v50 = vld [vmem:[#allocation19_spill] sm:$0xff]  ;;  %v14402_v58 = vld [vmem:[#allocation56_spill] sm:$0xff] }
 0x445   : > { %v5077_v62 = vmul.f32 %v5071_v36, %v5071_v36  ;;  %v5067_v32 = vmul.f32 %v5061_v15, %v5061_v15  ;;  %v5078_v37 = vmul.f32 %v5072_v56, %v5072_v56  ;;  %v5079_v61 = vmul.f32 %v5073_v59, %v5073_v59 }
 0x446   : > { %v10166_v12 = vadd.f32 %v5074_v8, %v5062_v47  ;;  %v10168_v28 = vadd.f32 %v5075_v34, %v5063_v51  ;;  %v10170_v21 = vadd.f32 %v5076_v33, %v5064_v22  ;;  %v2577_v15 = vadd.s32 %v14396_v18, %v2574_v30  ;;  %v14400_v22 = vld [vmem:[#allocation34_spill] sm:$0xff] }
 0x447   : > { %v10172_v27 = vadd.f32 %v5077_v62, %v5065_v63  ;;  %v10174_v26 = vadd.f32 %v5078_v37, %v5066_v3  ;;  %v10176_v46 = vadd.f32 %v5079_v61, %v5067_v32  ;;  %v3145_v17 = vsel %vm3144_vm4, %v14397_v0, inf  ;;  %v14401_v63 = vld [vmem:[#allocation77_spill] sm:$0xff]  ;;  %v10191_v3 = vpop.xlane.xlu1 %2600  ;;  %v6784_v18 = vld [vmem:[%s7577_s15 + $0x1e8] sm:$0xff] }
 0x448   : > { %v3093_v47 = vcvt.f32.s32 %v14398_v50  ;;  %v3121_v51 = vcvt.f32.s32 %v14399_v35  ;;  %3146 = vmin.xlane.f32.xlu1 %v3145_v17  ;;  %vm3074_vm5 = vcmp.eq.f32.partialorder %v14400_v22, %v10125_v29  ;;  %vm3172_vm6 = vcmp.eq.f32.partialorder %v14401_v63, %v10164_v42  ;;  %v6783_v61 = vld [vmem:[%s7577_s15 + $0x1e0] sm:$0xff]  ;;  %v6785_v17 = vld [vmem:[%s7577_s15 + $0x1f0] sm:$0xff]  ;;  %v6786_v35 = vld [vmem:[%s7577_s15 + $0x1f8] sm:$0xff] }
 0x449   : > { %vm3337_vm7 = vcmp.eq.s32.totalorder %v2577_v15, 1  ;;  %vm3979_vm8 = vcmp.eq.s32.totalorder %v2577_v15, 2  ;;  %v3075_v48 = vsel %vm3074_vm5, %v14402_v58, inf  ;;  %v2588_v36 = vcvt.f32.s32 %v10161_v5 }
 0x44a   : > { %v3641_v6 = vsel %vm3337_vm7, %v9129_v45, %v9125_v7  ;;  %v3642_v56 = vsel %vm3337_vm7, %v9142_v2, %v9132_v41  ;;  %v3643_v1 = vsel %vm3337_vm7, %v9146_v55, %v9135_v20  ;;  %v3644_v59 = vsel %vm3337_vm7, %v9149_v19, %v9161_v14  ;;  %3076 = vmin.xlane.f32.xlu0 %v3075_v48  ;;  %v6787_v48 = vld [vmem:[%s7577_s15 + $0x200] sm:$0xff] }
 0x44b   : > { %v3645_v57 = vsel %vm3337_vm7, %v9152_v11, %v9168_v13  ;;  %v3646_v5 = vsel %vm3337_vm7, %v9158_v40, %v9171_v49  ;;  %v4252_v8 = vsel %vm3979_vm8, %v9175_v39, %v3641_v6  ;;  %v4253_v34 = vsel %vm3979_vm8, %v9189_v4, %v3642_v56  ;;  %v6788_v56 = vld [vmem:[%s7577_s15 + $0x208] sm:$0xff] }
 0x44c   : > { %v4254_v33 = vsel %vm3979_vm8, %v9205_v53, %v3643_v1  ;;  %v4255_v62 = vsel %vm3979_vm8, %v9208_v43, %v3644_v59  ;;  %v4256_v32 = vsel %vm3979_vm8, %v14305_v52, %v3645_v57  ;;  %v4257_v37 = vsel %vm3979_vm8, %v14306_v60, %v3646_v5  ;;  %4636 = vst [vmem:[%s9411_s24 + $0x1e0] sm:$0xff] %v4252_v8  ;;  %v10233_v59 = vpop.xlane.xlu0 %3198  ;;  %v14405_v57 = vld [vmem:[#allocation84_spill] sm:$0xff]  ;;  %v6792_v5 = vld [vmem:[%s7577_s15 + $0x228] sm:$0xff] }
 0x44d   : > { %4637 = vst [vmem:[%s9411_s24 + $0x1e8] sm:$0xff] %v4253_v34  ;;  %4638 = vst [vmem:[%s9411_s24 + $0x1f0] sm:$0xff] %v4254_v33  ;;  %v5080_v30 = vsub.f32 %v4252_v8, %v6783_v61  ;;  %v5081_v0 = vsub.f32 %v4253_v34, %v6784_v18  ;;  %v5082_v50 = vsub.f32 %v4254_v33, %v6785_v17  ;;  %v10227_v58 = vshll.u32 %v3093_v47, 16  ;;  %v10238_v33 = vpop.xlane.xlu1 %3100  ;;  %v14406_v18 = vld [vmem:[#allocation35_spill] sm:$0xff]  ;;  %v14407_v17 = vld [vmem:[#allocation37_spill] sm:$0xff] }
 0x44e   : > { %4639 = vst [vmem:[%s9411_s24 + $0x1f8] sm:$0xff] %v4255_v62  ;;  %4640 = vst [vmem:[%s9411_s24 + $0x200] sm:$0xff] %v4256_v32  ;;  %v5083_v22 = vsub.f32 %v4255_v62, %v6786_v35  ;;  %v10229_v15 = vshll.u32 %v3121_v51, 16  ;;  %v5084_v6 = vsub.f32 %v4256_v32, %v6787_v48  ;;  %v5085_v1 = vsub.f32 %v4257_v37, %v6788_v56  ;;  %v14408_v56 = vld [vmem:[#allocation40_spill] sm:$0xff]  ;;  %v6791_v8 = vld [vmem:[%s7577_s15 + $0x220] sm:$0xff] }
 0x44f   : > { %4641 = vst [vmem:[%s9411_s24 + $0x208] sm:$0xff] %v4257_v37  ;;  %14403 = vst [vmem:[#allocation72_spill] sm:$0xff] %v10227_v58  ;;  %v5086_v61 = vmul.f32 %v5080_v30, %v5080_v30  ;;  %v5087_v62 = vmul.f32 %v5081_v0, %v5081_v0  ;;  %v5088_v47 = vmul.f32 %v5082_v50, %v5082_v50  ;;  %v3173_v32 = vsel %vm3172_vm6, %v14407_v17, inf  ;;  %v14409_v0 = vld [vmem:[#allocation57_spill] sm:$0xff] }
 0x450   : > { %14404 = vst [vmem:[#allocation90_spill] sm:$0xff] %v10229_v15  ;;  %v2591_v51 = vadd.s32 %v14406_v18, %v2588_v36  ;;  %v5089_v37 = vmul.f32 %v5083_v22, %v5083_v22  ;;  %v5090_v35 = vmul.f32 %v5084_v6, %v5084_v6  ;;  %v5091_v48 = vmul.f32 %v5085_v1, %v5085_v1 }
 0x451   : > { %3174 = vmin.xlane.f32.xlu1 %v3173_v32  ;;  %vm3200_vm9 = vcmp.eq.f32.partialorder %v14408_v56, %v10233_v59  ;;  %v2602_v30 = vcvt.f32.s32 %v10191_v3  ;;  %v10269_v34 = vpop.xlane.xlu1 %2614  ;;  %vm3102_vm12 = vcmp.eq.f32.partialorder %v14411_v23, %v10238_v33  ;;  %v14419_v23 = vld [vmem:[#allocation42_spill] sm:$0xff] }
 0x452   : > { %vm3338_vm10 = vcmp.eq.s32.totalorder %v2591_v51, 1  ;;  %vm3980_vm11 = vcmp.eq.s32.totalorder %v2591_v51, 2  ;;  %v3201_v36 = vsel %vm3200_vm9, %v14409_v0, inf }
 0x453   : > { %v3647_v50 = vsel %vm3338_vm10, %v9129_v45, %v9125_v7  ;;  %v3648_v63 = vsel %vm3338_vm10, %v9142_v2, %v9132_v41  ;;  %v3649_v22 = vsel %vm3338_vm10, %v9146_v55, %v9135_v20  ;;  %v3650_v6 = vsel %vm3338_vm10, %v9149_v19, %v9161_v14 }
 0x454   : > { %v3651_v3 = vsel %vm3338_vm10, %v9152_v11, %v9168_v13  ;;  %v3652_v1 = vsel %vm3338_vm10, %v9158_v40, %v9171_v49  ;;  %v4258_v18 = vsel %vm3980_vm11, %v9175_v39, %v3647_v50  ;;  %v4259_v51 = vsel %vm3980_vm11, %v9189_v4, %v3648_v63  ;;  %v6789_v50 = vld [vmem:[%s7577_s15 + $0x210] sm:$0xff] }
 0x455   : > { %v4260_v17 = vsel %vm3980_vm11, %v9205_v53, %v3649_v22  ;;  %v4261_v32 = vsel %vm3980_vm11, %v9208_v43, %v3650_v6  ;;  %v4262_v56 = vsel %vm3980_vm11, %v14305_v52, %v3651_v3  ;;  %v4263_v0 = vsel %vm3980_vm11, %v14306_v60, %v3652_v1  ;;  %4642 = vst [vmem:[%s9411_s24 + $0x210] sm:$0xff] %v4258_v18  ;;  %v6790_v22 = vld [vmem:[%s7577_s15 + $0x218] sm:$0xff]  ;;  %v6793_v1 = vld [vmem:[%s7577_s15 + $0x230] sm:$0xff] }
 0x456   : > { %4643 = vst [vmem:[%s9411_s24 + $0x218] sm:$0xff] %v4259_v51  ;;  %3202 = vmin.xlane.f32.xlu1 %v3201_v36  ;;  %4644 = vst [vmem:[%s9411_s24 + $0x220] sm:$0xff] %v4260_v17  ;;  %v5092_v63 = vsub.f32 %v4258_v18, %v6789_v50  ;;  %v5093_v6 = vsub.f32 %v4259_v51, %v6790_v22  ;;  %v5094_v3 = vsub.f32 %v4260_v17, %v6791_v8  ;;  %v14410_v36 = vld [vmem:[#allocation39_spill] sm:$0xff] }
 0x457   : > { %4645 = vst [vmem:[%s9411_s24 + $0x228] sm:$0xff] %v4261_v32  ;;  %4646 = vst [vmem:[%s9411_s24 + $0x230] sm:$0xff] %v4262_v56  ;;  %v5095_v15 = vsub.f32 %v4261_v32, %v6792_v5  ;;  %v5096_v58 = vsub.f32 %v4262_v56, %v6793_v1  ;;  %v5097_v38 = vsub.f32 %v4263_v0, %v6794_v44 }
 0x458   : > { %4647 = vst [vmem:[%s9411_s24 + $0x238] sm:$0xff] %v4263_v0  ;;  %v2605_v16 = vadd.s32 %v14410_v36, %v2602_v30  ;;  %v5098_v25 = vmul.f32 %v5092_v63, %v5092_v63  ;;  %v5099_v54 = vmul.f32 %v5093_v6, %v5093_v6  ;;  %v5100_v24 = vmul.f32 %v5094_v3, %v5094_v3  ;;  %v10290_v0 = vpop.xlane.xlu1 %2628  ;;  %v6796_v3 = vld [vmem:[%s7577_s15 + $0x248] sm:$0xff] }
 0x459   : > { %v5101_v31 = vmul.f32 %v5095_v15, %v5095_v15  ;;  %v5102_v18 = vmul.f32 %v5096_v58, %v5096_v58  ;;  %v5103_v50 = vmul.f32 %v5097_v38, %v5097_v38  ;;  %v10326_v15 = vpop.xlane.xlu0 %3226  ;;  %v14414_v63 = vcvt.f32.s32 %v10141_v9  ;;  %v6797_v9 = vld [vmem:[%s7577_s15 + $0x250] sm:$0xff] }
 0x45a   : > { %vm3339_vm13 = vcmp.eq.s32.totalorder %v2605_v16, 1  ;;  %vm3981_vm14 = vcmp.eq.s32.totalorder %v2605_v16, 2  ;;  %v5758_v8 = vadd.f32 %v5098_v25, %v5086_v61  ;;  %v5759_v51 = vadd.f32 %v5099_v54, %v5087_v62  ;;  %v6795_v16 = vld [vmem:[%s7577_s15 + $0x240] sm:$0xff] }
 0x45b   : > { %v5760_v5 = vadd.f32 %v5100_v24, %v5088_v47  ;;  %v5761_v17 = vadd.f32 %v5101_v31, %v5089_v37  ;;  %v5762_v32 = vadd.f32 %v5102_v18, %v5090_v35  ;;  %v5763_v56 = vadd.f32 %v5103_v50, %v5091_v48 }
 0x45c   : > { %v3653_v44 = vsel %vm3339_vm13, %v9129_v45, %v9125_v7  ;;  %v3654_v30 = vsel %vm3339_vm13, %v9142_v2, %v9132_v41  ;;  %v10293_v38 = vadd.f32 %v5758_v8, %v10166_v12  ;;  %v10296_v25 = vadd.f32 %v5759_v51, %v10168_v28  ;;  %v14418_v8 = vld [vmem:[#allocation38_spill] sm:$0xff] }
 0x45d   : > { %v10299_v31 = vadd.f32 %v5760_v5, %v10170_v21  ;;  %v10302_v24 = vadd.f32 %v5761_v17, %v10172_v27  ;;  %v10305_v54 = vadd.f32 %v5762_v32, %v10174_v26  ;;  %v10308_v58 = vadd.f32 %v5763_v56, %v10176_v46  ;;  %v10362_v5 = vpop.xlane.xlu1 %3128  ;;  %v6798_v17 = vld [vmem:[%s7577_s15 + $0x258] sm:$0xff]  ;;  %v6799_v56 = vld [vmem:[%s7577_s15 + $0x260] sm:$0xff] }
 0x45e   : > { %v3655_v12 = vsel %vm3339_vm13, %v9146_v55, %v9135_v20  ;;  %v3656_v28 = vsel %vm3339_vm13, %v9149_v19, %v9161_v14  ;;  %v3657_v21 = vsel %vm3339_vm13, %v9152_v11, %v9168_v13  ;;  %v3658_v27 = vsel %vm3339_vm13, %v9158_v40, %v9171_v49 }
 0x45f   : > { %v4264_v26 = vsel %vm3981_vm14, %v9175_v39, %v3653_v44  ;;  %v4265_v46 = vsel %vm3981_vm14, %v9189_v4, %v3654_v30  ;;  %v4266_v61 = vsel %vm3981_vm14, %v9205_v53, %v3655_v12  ;;  %v4267_v62 = vsel %vm3981_vm14, %v9208_v43, %v3656_v28  ;;  %v6800_v30 = vld [vmem:[%s7577_s15 + $0x268] sm:$0xff]  ;;  %v2741_v28 = vpop.xlane.xlu0 %2740 }
 0x460   : > { %v4268_v47 = vsel %vm3981_vm14, %v14305_v52, %v3657_v21  ;;  %v4269_v37 = vsel %vm3981_vm14, %v14306_v60, %v3658_v27  ;;  %4648 = vst [vmem:[%s9411_s24 + $0x240] sm:$0xff] %v4264_v26  ;;  %4649 = vst [vmem:[%s9411_s24 + $0x248] sm:$0xff] %v4265_v46  ;;  %v14412_v35 = vcvt.f32.s32 %v14405_v57  ;;  %v10344_v22 = vshll.u32 %v14414_v63, 16  ;;  %v14422_v63 = vld [vmem:[#allocation78_spill] sm:$0xff] }
 0x461   : > { %4650 = vst [vmem:[%s9411_s24 + $0x250] sm:$0xff] %v4266_v61  ;;  %4651 = vst [vmem:[%s9411_s24 + $0x258] sm:$0xff] %v4267_v62  ;;  %v5104_v6 = vsub.f32 %v4264_v26, %v6795_v16  ;;  %v5105_v1 = vsub.f32 %v4265_v46, %v6796_v3  ;;  %v14416_v36 = vcvt.f32.s32 %v10125_v29  ;;  %v5106_v50 = vsub.f32 %v4266_v61, %v6797_v9  ;;  %v14423_v3 = vld [vmem:[#allocation43_spill] sm:$0xff] }
 0x462   : > { %v10340_v48 = vshll.u32 %v14412_v35, 16  ;;  %14415 = vst [vmem:[#allocation93_spill] sm:$0xff] %v10344_v22  ;;  %4652 = vst [vmem:[%s9411_s24 + $0x260] sm:$0xff] %v4268_v47  ;;  %v3103_v51 = vsel %vm3102_vm12, %v14418_v8, inf  ;;  %v5107_v32 = vsub.f32 %v4267_v62, %v6798_v17  ;;  %v5108_v44 = vsub.f32 %v4268_v47, %v6799_v56  ;;  %v14420_v62 = vld [vmem:[#allocation58_spill] sm:$0xff]  ;;  %v6823_v22 = vld [vmem:[%s7577_s15 + $0x2f0] sm:$0xff] }
 0x463   : > { %4653 = vst [vmem:[%s9411_s24 + $0x268] sm:$0xff] %v4269_v37  ;;  %v10354_v57 = vshll.u32 %v14416_v36, 16  ;;  %v5109_v12 = vsub.f32 %v4269_v37, %v6800_v30  ;;  %3104 = vmin.xlane.f32.xlu0 %v3103_v51  ;;  %v10368_v21 = vmul.f32 %v5104_v6, %v5104_v6  ;;  %v2616_v26 = vcvt.f32.s32 %v10269_v34  ;;  %v14421_v37 = vld [vmem:[#allocation44_spill] sm:$0xff]  ;;  %v14425_v17 = vld [vmem:[#allocation46_spill] sm:$0xff] }
 0x464   : > { %14413 = vst [vmem:[#allocation28_spill] sm:$0xff] %v10340_v48  ;;  %vm3228_vm15 = vcmp.eq.f32.partialorder %v14419_v23, %v10326_v15  ;;  %v5111_v46 = vmul.f32 %v5105_v1, %v5105_v1  ;;  %v2630_v61 = vcvt.f32.s32 %v10290_v0  ;;  %vm3130_vm0 = vcmp.eq.f32.partialorder %v14421_v37, %v10362_v5  ;;  %v14424_v0 = vld [vmem:[#allocation41_spill] sm:$0xff] }
 0x465   : > { %14417 = vst [vmem:[#allocation95_spill] sm:$0xff] %v10354_v57  ;;  %v3229_v47 = vsel %vm3228_vm15, %v14420_v62, inf  ;;  %v5112_v35 = vmul.f32 %v5106_v50, %v5106_v50  ;;  %v2619_v16 = vadd.s32 %v14422_v63, %v2616_v26  ;;  %v2742_v6 = vcvt.f32.s32 %v2741_v28  ;;  %v6801_v63 = vld [vmem:[%s7577_s15 + $0x270] sm:$0xff]  ;;  %v6824_v48 = vld [vmem:[%s7577_s15 + $0x2f8] sm:$0xff] }
 0x466   : > { %3230 = vmin.xlane.f32.xlu1 %v3229_v47  ;;  %v3131_v36 = vsel %vm3130_vm0, %v14423_v3, inf  ;;  %v5113_v9 = vmul.f32 %v5107_v32, %v5107_v32  ;;  %v5114_v34 = vmul.f32 %v5108_v44, %v5108_v44  ;;  %v5115_v8 = vmul.f32 %v5109_v12, %v5109_v12 }
 0x467   : > { %3132 = vmin.xlane.f32.xlu0 %v3131_v36  ;;  %vm3340_vm1 = vcmp.eq.s32.totalorder %v2619_v16, 1  ;;  %vm3982_vm2 = vcmp.eq.s32.totalorder %v2619_v16, 2  ;;  %v2633_v1 = vadd.s32 %v14424_v0, %v2630_v61  ;;  %v10383_v50 = vadd.s32 %v14425_v17, %v2742_v6  ;;  %v6802_v6 = vld [vmem:[%s7577_s15 + $0x278] sm:$0xff]  ;;  %v6803_v36 = vld [vmem:[%s7577_s15 + $0x280] sm:$0xff]  ;;  %v6804_v17 = vld [vmem:[%s7577_s15 + $0x288] sm:$0xff] }
 0x468   : > { %v3659_v56 = vsel %vm3340_vm1, %v9129_v45, %v9125_v7  ;;  %v3660_v32 = vsel %vm3340_vm1, %v9142_v2, %v9132_v41  ;;  %v3661_v44 = vsel %vm3340_vm1, %v9146_v55, %v9135_v20  ;;  %v3662_v30 = vsel %vm3340_vm1, %v9149_v19, %v9161_v14 }
 0x469   : > { %v3663_v12 = vsel %vm3340_vm1, %v9152_v11, %v9168_v13  ;;  %v3664_v28 = vsel %vm3340_vm1, %v9158_v40, %v9171_v49  ;;  %v4270_v26 = vsel %vm3982_vm2, %v9175_v39, %v3659_v56  ;;  %v4271_v23 = vsel %vm3982_vm2, %v9189_v4, %v3660_v32  ;;  %v6805_v32 = vld [vmem:[%s7577_s15 + $0x290] sm:$0xff] }
 0x46a   : > { %v4272_v61 = vsel %vm3982_vm2, %v9205_v53, %v3661_v44  ;;  %v4273_v62 = vsel %vm3982_vm2, %v9208_v43, %v3662_v30  ;;  %v4274_v47 = vsel %vm3982_vm2, %v14305_v52, %v3663_v12  ;;  %v4275_v37 = vsel %vm3982_vm2, %v14306_v60, %v3664_v28  ;;  %4654 = vst [vmem:[%s9411_s24 + $0x270] sm:$0xff] %v4270_v26  ;;  %v6806_v30 = vld [vmem:[%s7577_s15 + $0x298] sm:$0xff] }
 0x46b   : > { %4655 = vst [vmem:[%s9411_s24 + $0x278] sm:$0xff] %v4271_v23  ;;  %4656 = vst [vmem:[%s9411_s24 + $0x280] sm:$0xff] %v4272_v61  ;;  %v5116_v16 = vsub.f32 %v4270_v26, %v6801_v63  ;;  %v5117_v3 = vsub.f32 %v4271_v23, %v6802_v6  ;;  %v5118_v0 = vsub.f32 %v4272_v61, %v6803_v36  ;;  %vm3341_vm3 = vcmp.eq.s32.totalorder %v2633_v1, 1 }
 0x46c   : > { %4657 = vst [vmem:[%s9411_s24 + $0x288] sm:$0xff] %v4273_v62  ;;  %4658 = vst [vmem:[%s9411_s24 + $0x290] sm:$0xff] %v4274_v47  ;;  %v5119_v56 = vsub.f32 %v4273_v62, %v6804_v17  ;;  %v5120_v44 = vsub.f32 %v4274_v47, %v6805_v32  ;;  %v5121_v12 = vsub.f32 %v4275_v37, %v6806_v30  ;;  %vm3983_vm4 = vcmp.eq.s32.totalorder %v2633_v1, 2  ;;  %v10486_v30 = vpop.xlane.xlu0 %3254 }
 0x46d   : > { %4659 = vst [vmem:[%s9411_s24 + $0x298] sm:$0xff] %v4275_v37  ;;  %v5122_v28 = vmul.f32 %v5116_v16, %v5116_v16  ;;  %v5123_v51 = vmul.f32 %v5117_v3, %v5117_v3  ;;  %v5124_v27 = vmul.f32 %v5118_v0, %v5118_v0  ;;  %v3665_v26 = vsel %vm3341_vm3, %v9129_v45, %v9125_v7 }
 0x46e   : > { %v5125_v29 = vmul.f32 %v5119_v56, %v5119_v56  ;;  %v5126_v18 = vmul.f32 %v5120_v44, %v5120_v44  ;;  %v5127_v57 = vmul.f32 %v5121_v12, %v5121_v12  ;;  %v3666_v23 = vsel %vm3341_vm3, %v9142_v2, %v9132_v41  ;;  %v6808_v12 = vld [vmem:[%s7577_s15 + $0x2a8] sm:$0xff] }
 0x46f   : > { %v10422_v61 = vadd.f32 %v5122_v28, %v10368_v21  ;;  %v10424_v62 = vadd.f32 %v5123_v51, %v5111_v46  ;;  %v10426_v47 = vadd.f32 %v5124_v27, %v5112_v35  ;;  %v3667_v6 = vsel %vm3341_vm3, %v9146_v55, %v9135_v20  ;;  %v10450_v46 = vpop.xlane.xlu1 %2642 }
 0x470   : > { %v10428_v37 = vadd.f32 %v5125_v29, %v5113_v9  ;;  %v10430_v63 = vadd.f32 %v5126_v18, %v5114_v34  ;;  %v10432_v16 = vadd.f32 %v5127_v57, %v5115_v8  ;;  %v3668_v21 = vsel %vm3341_vm3, %v9149_v19, %v9161_v14 }
 0x471   : > { %v3669_v27 = vsel %vm3341_vm3, %v9152_v11, %v9168_v13  ;;  %v3670_v57 = vsel %vm3341_vm3, %v9158_v40, %v9171_v49  ;;  %v4276_v18 = vsel %vm3983_vm4, %v9175_v39, %v3665_v26  ;;  %v4277_v29 = vsel %vm3983_vm4, %v9189_v4, %v3666_v23  ;;  %v6809_v26 = vld [vmem:[%s7577_s15 + $0x2b0] sm:$0xff] }
 0x472   : > { %v4278_v35 = vsel %vm3983_vm4, %v9205_v53, %v3667_v6  ;;  %v4279_v9 = vsel %vm3983_vm4, %v9208_v43, %v3668_v21  ;;  %v4280_v34 = vsel %vm3983_vm4, %v14305_v52, %v3669_v27  ;;  %v4281_v8 = vsel %vm3983_vm4, %v14306_v60, %v3670_v57  ;;  %4660 = vst [vmem:[%s9411_s24 + $0x2a0] sm:$0xff] %v4276_v18  ;;  %v6810_v6 = vld [vmem:[%s7577_s15 + $0x2b8] sm:$0xff]  ;;  %v6812_v27 = vld [vmem:[%s7577_s15 + $0x2c8] sm:$0xff] }
 0x473   : > { %4661 = vst [vmem:[%s9411_s24 + $0x2a8] sm:$0xff] %v4277_v29  ;;  %v14426_v51 = vcvt.f32.s32 %v10164_v42  ;;  %v14428_v36 = vcvt.f32.s32 %v10233_v59  ;;  %v14430_v17 = vcvt.f32.s32 %v10238_v33  ;;  %4662 = vst [vmem:[%s9411_s24 + $0x2b0] sm:$0xff] %v4278_v35  ;;  %v3135_v1 = vcvt.f32.s32 %v10362_v5  ;;  %v6807_v59 = vld [vmem:[%s7577_s15 + $0x2a0] sm:$0xff] }
 0x474   : > { %4663 = vst [vmem:[%s9411_s24 + $0x2b8] sm:$0xff] %v4279_v9  ;;  %4664 = vst [vmem:[%s9411_s24 + $0x2c0] sm:$0xff] %v4280_v34  ;;  %v14432_v42 = vcvt.f32.s32 %v10326_v15  ;;  %v5128_v44 = vsub.f32 %v4276_v18, %v6807_v59  ;;  %vm3349_vm5 = vcmp.eq.s32.totalorder %v10383_v50, 1  ;;  %v2644_v33 = vcvt.f32.s32 %v10450_v46  ;;  %v6811_v15 = vld [vmem:[%s7577_s15 + $0x2c0] sm:$0xff] }
 0x475   : > { %v10464_v3 = vshll.u32 %v14426_v51, 16  ;;  %v10468_v0 = vshll.u32 %v14428_v36, 16  ;;  %v10472_v56 = vshll.u32 %v14430_v17, 16  ;;  %4665 = vst [vmem:[%s9411_s24 + $0x2c8] sm:$0xff] %v4281_v8  ;;  %v5129_v28 = vsub.f32 %v4277_v29, %v6808_v12 }
 0x476   : > { %v10481_v32 = vshll.u32 %v14432_v42, 16  ;;  %v5130_v23 = vsub.f32 %v4278_v35, %v6809_v26  ;;  %v5131_v21 = vsub.f32 %v4279_v9, %v6810_v6  ;;  %vm3991_vm6 = vcmp.eq.s32.totalorder %v10383_v50, 2  ;;  %v2657_v50 = vpop.xlane.xlu1 %2656 }
 0x477   : > { %14427 = vst [vmem:[#allocation26_spill] sm:$0xff] %v10464_v3  ;;  %14429 = vst [vmem:[#allocation24_spill] sm:$0xff] %v10468_v0  ;;  %v5132_v5 = vsub.f32 %v4280_v34, %v6811_v15  ;;  %v5133_v57 = vsub.f32 %v4281_v8, %v6812_v27  ;;  %v3713_v18 = vsel %vm3349_vm5, %v9129_v45, %v9125_v7  ;;  %v14434_v8 = vld [vmem:[#allocation48_spill] sm:$0xff]  ;;  %v10534_v12 = vshll.u32 %v3135_v1, 16  ;;  %v6818_v0 = vld [vmem:[%s7577_s15 + $0x448] sm:$0xff] }
 0x478   : > { %14431 = vst [vmem:[#allocation27_spill] sm:$0xff] %v10472_v56  ;;  %14433 = vst [vmem:[#allocation54_spill] sm:$0xff] %v10481_v32  ;;  %v3714_v29 = vsel %vm3349_vm5, %v9142_v2, %v9132_v41  ;;  %v3715_v46 = vsel %vm3349_vm5, %v9146_v55, %v9135_v20  ;;  %v3716_v35 = vsel %vm3349_vm5, %v9149_v19, %v9161_v14  ;;  %v6817_v32 = vld [vmem:[%s7577_s15 + $0x440] sm:$0xff]  ;;  %v6822_v3 = vld [vmem:[%s7577_s15 + $0x2e8] sm:$0xff] }
 0x479   : > { %v3717_v9 = vsel %vm3349_vm5, %v9152_v11, %v9168_v13  ;;  %v3718_v34 = vsel %vm3349_vm5, %v9158_v40, %v9171_v49  ;;  %vm3256_vm7 = vcmp.eq.f32.partialorder %v14434_v8, %v10486_v30  ;;  %v4324_v51 = vsel %vm3991_vm6, %v9175_v39, %v3713_v18  ;;  %14435 = vst [vmem:[#allocation74_spill] sm:$0xff] %v10534_v12 }
 0x47a   : > { %v4325_v36 = vsel %vm3991_vm6, %v9189_v4, %v3714_v29  ;;  %v4326_v17 = vsel %vm3991_vm6, %v9205_v53, %v3715_v46  ;;  %v4327_v42 = vsel %vm3991_vm6, %v9208_v43, %v3716_v35  ;;  %v10532_v59 = vmul.f32 %v5128_v44, %v5128_v44  ;;  %4708 = vst [vmem:[%s9411_s24 + $0x420] sm:$0xff] %v4324_v51  ;;  %v6813_v29 = vld [vmem:[%s7577_s15 + $0x420] sm:$0xff]  ;;  %v6814_v35 = vld [vmem:[%s7577_s15 + $0x428] sm:$0xff] }
 0x47b   : > { %v4328_v26 = vsel %vm3991_vm6, %v14305_v52, %v3717_v9  ;;  %v4329_v6 = vsel %vm3991_vm6, %v14306_v60, %v3718_v34  ;;  %4709 = vst [vmem:[%s9411_s24 + $0x428] sm:$0xff] %v4325_v36  ;;  %4710 = vst [vmem:[%s9411_s24 + $0x430] sm:$0xff] %v4326_v17  ;;  %v10546_v44 = vmul.f32 %v5129_v28, %v5129_v28  ;;  %v14438_v28 = vld [vmem:[#allocation80_spill] sm:$0xff] }
 0x47c   : > { %4711 = vst [vmem:[%s9411_s24 + $0x438] sm:$0xff] %v4327_v42  ;;  %v10548_v15 = vmul.f32 %v5130_v23, %v5130_v23  ;;  %v10550_v1 = vmul.f32 %v5131_v21, %v5131_v21  ;;  %v10552_v27 = vmul.f32 %v5132_v5, %v5132_v5  ;;  %4712 = vst [vmem:[%s9411_s24 + $0x440] sm:$0xff] %v4328_v26  ;;  %v6815_v34 = vld [vmem:[%s7577_s15 + $0x430] sm:$0xff]  ;;  %v6816_v21 = vld [vmem:[%s7577_s15 + $0x438] sm:$0xff] }
 0x47d   : > { %4713 = vst [vmem:[%s9411_s24 + $0x448] sm:$0xff] %v4329_v6  ;;  %v10556_v18 = vmul.f32 %v5133_v57, %v5133_v57  ;;  %v10559_v46 = vsub.f32 %v4324_v51, %v6813_v29  ;;  %v10562_v9 = vsub.f32 %v4325_v36, %v6814_v35  ;;  %v2647_v23 = vadd.s32 %v14438_v28, %v2644_v33 }
 0x47e   : > { %v10566_v12 = vsub.f32 %v4326_v17, %v6815_v34  ;;  %v10569_v5 = vsub.f32 %v4327_v42, %v6816_v21  ;;  %v10572_v56 = vsub.f32 %v4328_v26, %v6817_v32  ;;  %v10575_v57 = vsub.f32 %v4329_v6, %v6818_v0  ;;  %v6819_v34 = vld [vmem:[%s7577_s15 + $0x2d0] sm:$0xff] }
 0x47f   : > { %14436 = vst [vmem:[#allocation73_spill] sm:$0xff] %v10559_v46  ;;  %14437 = vst [vmem:[#allocation76_spill] sm:$0xff] %v10562_v9  ;;  %vm3342_vm8 = vcmp.eq.s32.totalorder %v2647_v23, 1  ;;  %vm3984_vm9 = vcmp.eq.s32.totalorder %v2647_v23, 2  ;;  %v2658_v33 = vcvt.f32.s32 %v2657_v50 }
 0x480   : > { %14439 = vst [vmem:[#allocation29_spill] sm:$0xff] %v10566_v12  ;;  %14440 = vst [vmem:[#allocation96_spill] sm:$0xff] %v10569_v5  ;;  %v3671_v36 = vsel %vm3342_vm8, %v9129_v45, %v9125_v7  ;;  %v3672_v32 = vsel %vm3342_vm8, %v9142_v2, %v9132_v41  ;;  %v3673_v0 = vsel %vm3342_vm8, %v9146_v55, %v9135_v20  ;;  %v14444_v5 = vld [vmem:[#allocation45_spill] sm:$0xff] }
 0x481   : > { %14441 = vst [vmem:[#allocation75_spill] sm:$0xff] %v10572_v56  ;;  %14442 = vst [vmem:[#allocation32_spill] sm:$0xff] %v10575_v57  ;;  %v3674_v17 = vsel %vm3342_vm8, %v9149_v19, %v9161_v14  ;;  %v3675_v42 = vsel %vm3342_vm8, %v9152_v11, %v9168_v13  ;;  %v3676_v26 = vsel %vm3342_vm8, %v9158_v40, %v9171_v49  ;;  %v3257_v12 = vsel %vm3256_vm7, %v14444_v5, inf }
 0x482   : > { %v4282_v6 = vsel %vm3984_vm9, %v9175_v39, %v3671_v36  ;;  %v4283_v50 = vsel %vm3984_vm9, %v9189_v4, %v3672_v32  ;;  %v4284_v29 = vsel %vm3984_vm9, %v9205_v53, %v3673_v0  ;;  %v4285_v35 = vsel %vm3984_vm9, %v9208_v43, %v3674_v17  ;;  %v6820_v36 = vld [vmem:[%s7577_s15 + $0x2d8] sm:$0xff]  ;;  %v6821_v0 = vld [vmem:[%s7577_s15 + $0x2e0] sm:$0xff]  ;;  %3258 = vmin.xlane.f32.xlu1 %v3257_v12 }
 0x483   : > { %v4286_v28 = vsel %vm3984_vm9, %v14305_v52, %v3675_v42  ;;  %v4287_v23 = vsel %vm3984_vm9, %v14306_v60, %v3676_v26  ;;  %4666 = vst [vmem:[%s9411_s24 + $0x2d0] sm:$0xff] %v4282_v6  ;;  %4667 = vst [vmem:[%s9411_s24 + $0x2d8] sm:$0xff] %v4283_v50  ;;  %v5140_v21 = vsub.f32 %v4282_v6, %v6819_v34  ;;  %v14443_v26 = vld [vmem:[#allocation59_spill] sm:$0xff] }
 0x484   : > { %4668 = vst [vmem:[%s9411_s24 + $0x2e0] sm:$0xff] %v4284_v29  ;;  %4669 = vst [vmem:[%s9411_s24 + $0x2e8] sm:$0xff] %v4285_v35  ;;  %v5141_v32 = vsub.f32 %v4283_v50, %v6820_v36  ;;  %v5142_v51 = vsub.f32 %v4284_v29, %v6821_v0  ;;  %v5143_v17 = vsub.f32 %v4285_v35, %v6822_v3  ;;  %v14452_v36 = vld [vmem:[#allocation71_spill] sm:$0xff]  ;;  %v14454_v0 = vld [vmem:[#allocation53_spill] sm:$0xff] }
 0x485   : > { %4670 = vst [vmem:[%s9411_s24 + $0x2f0] sm:$0xff] %v4286_v28  ;;  %4671 = vst [vmem:[%s9411_s24 + $0x2f8] sm:$0xff] %v4287_v23  ;;  %v5144_v42 = vsub.f32 %v4286_v28, %v6823_v22  ;;  %v5145_v57 = vsub.f32 %v4287_v23, %v6824_v48  ;;  %v2661_v56 = vadd.s32 %v14443_v26, %v2658_v33  ;;  %v14450_v23 = vld [vmem:[#allocation89_spill] sm:$0xff] }
 0x486   : > { %v5146_v9 = vmul.f32 %v5140_v21, %v5140_v21  ;;  %v5147_v46 = vmul.f32 %v5141_v32, %v5141_v32  ;;  %v5148_v6 = vmul.f32 %v5142_v51, %v5142_v51  ;;  %v5149_v34 = vmul.f32 %v5143_v17, %v5143_v17  ;;  %v2769_v51 = vpop.xlane.xlu0 %2768 }
 0x487   : > { %v5150_v50 = vmul.f32 %v5144_v42, %v5144_v42  ;;  %v5151_v29 = vmul.f32 %v5145_v57, %v5145_v57  ;;  %vm3343_vm10 = vcmp.eq.s32.totalorder %v2661_v56, 1  ;;  %vm3985_vm11 = vcmp.eq.s32.totalorder %v2661_v56, 2  ;;  %v6825_v56 = vld [vmem:[%s7577_s15 + $0x300] sm:$0xff] }
 0x488   : > { %v5770_v22 = vadd.f32 %v5146_v9, %v10532_v59  ;;  %v5771_v48 = vadd.f32 %v5147_v46, %v10546_v44  ;;  %v5772_v3 = vadd.f32 %v5148_v6, %v10548_v15  ;;  %v5773_v33 = vadd.f32 %v5149_v34, %v10550_v1 }
 0x489   : > { %v5774_v8 = vadd.f32 %v5150_v50, %v10552_v27  ;;  %v5775_v5 = vadd.f32 %v5151_v29, %v10556_v18  ;;  %v3677_v12 = vsel %vm3343_vm10, %v9129_v45, %v9125_v7  ;;  %v3678_v57 = vsel %vm3343_vm10, %v9142_v2, %v9132_v41  ;;  %v14456_v29 = vld [vmem:[#allocation73_spill] sm:$0xff] }
 0x48a   : > { %v5938_v59 = vadd.f32 %v5770_v22, %v10422_v61  ;;  %v5939_v44 = vadd.f32 %v5771_v48, %v10424_v62  ;;  %v5940_v15 = vadd.f32 %v5772_v3, %v10426_v47  ;;  %v5941_v1 = vadd.f32 %v5773_v33, %v10428_v37  ;;  %v14457_v48 = vld [vmem:[#allocation76_spill] sm:$0xff]  ;;  %v14459_v33 = vld [vmem:[#allocation29_spill] sm:$0xff] }
 0x48b   : > { %v5942_v27 = vadd.f32 %v5774_v8, %v10430_v63  ;;  %v5943_v18 = vadd.f32 %v5775_v5, %v10432_v16  ;;  %v3679_v46 = vsel %vm3343_vm10, %v9146_v55, %v9135_v20  ;;  %v3680_v9 = vsel %vm3343_vm10, %v9149_v19, %v9161_v14 }
 0x48c   : > { %v6022_v61 = vadd.f32 %v5938_v59, %v10293_v38  ;;  %v6023_v62 = vadd.f32 %v5939_v44, %v10296_v25  ;;  %v6024_v47 = vadd.f32 %v5940_v15, %v10299_v31  ;;  %v6025_v37 = vadd.f32 %v5941_v1, %v10302_v24  ;;  %v10649_v25 = vpop.xlane.xlu1 %3156  ;;  %v14446_v24 = vld [vmem:[#allocation18_spill] sm:$0xff]  ;;  %v14463_v59 = vld [vmem:[#allocation75_spill] sm:$0xff] }
 0x48d   : > { %v6026_v63 = vadd.f32 %v5942_v27, %v10305_v54  ;;  %v6027_v16 = vadd.f32 %v5943_v18, %v10308_v58  ;;  %v3681_v35 = vsel %vm3343_vm10, %v9152_v11, %v9168_v13  ;;  %v3682_v38 = vsel %vm3343_vm10, %v9158_v40, %v9171_v49  ;;  %v14448_v54 = vld [vmem:[#allocation70_spill] sm:$0xff]  ;;  %v14465_v1 = vld [vmem:[#allocation47_spill] sm:$0xff]  ;;  %v10710_v27 = vpop.xlane.xlu0 %3282  ;;  %v14466_v18 = vld [vmem:[#allocation32_spill] sm:$0xff] }
 0x48e   : > { %v10652_v31 = vadd.f32 %v6022_v61, %v10063_v10  ;;  %v10655_v28 = vadd.f32 %v6023_v62, %v14446_v24  ;;  %v10658_v58 = vadd.f32 %v6024_v47, %v14448_v54  ;;  %v10661_v21 = vadd.f32 %v6025_v37, %v14450_v23  ;;  %v6826_v62 = vld [vmem:[%s7577_s15 + $0x308] sm:$0xff]  ;;  %v6827_v37 = vld [vmem:[%s7577_s15 + $0x310] sm:$0xff] }
 0x48f   : > { %v10664_v32 = vadd.f32 %v6026_v63, %v14452_v36  ;;  %v10667_v17 = vadd.f32 %v6027_v16, %v14454_v0  ;;  %v4288_v10 = vsel %vm3985_vm11, %v9175_v39, %v3677_v12  ;;  %v4289_v42 = vsel %vm3985_vm11, %v9189_v4, %v3678_v57  ;;  %v14461_v12 = vld [vmem:[#allocation96_spill] sm:$0xff]  ;;  %v6830_v54 = vld [vmem:[%s7577_s15 + $0x328] sm:$0xff]  ;;  %v14470_v36 = vld [vmem:[#allocation97_spill] sm:$0xff] }
 0x490   : > { %14445 = vst [vmem:[#allocation31_spill] sm:$0xff] %v10652_v31  ;;  %14447 = vst [vmem:[#allocation30_spill] sm:$0xff] %v10655_v28  ;;  %v4290_v26 = vsel %vm3985_vm11, %v9205_v53, %v3679_v46  ;;  %v4291_v6 = vsel %vm3985_vm11, %v9208_v43, %v3680_v9  ;;  %v4292_v34 = vsel %vm3985_vm11, %v14305_v52, %v3681_v35  ;;  %v2770_v15 = vcvt.f32.s32 %v2769_v51  ;;  %v2671_v16 = vpop.xlane.xlu1 %2670  ;;  %v6828_v35 = vld [vmem:[%s7577_s15 + $0x318] sm:$0xff] }
 0x491   : > { %14449 = vst [vmem:[#allocation33_spill] sm:$0xff] %v10658_v58  ;;  %14451 = vst [vmem:[#allocation19_spill] sm:$0xff] %v10661_v21  ;;  %v4293_v50 = vsel %vm3985_vm11, %v14306_v60, %v3682_v38  ;;  %v10685_v22 = vmul.f32 %v14456_v29, %v14456_v29  ;;  %v10689_v3 = vmul.f32 %v14457_v48, %v14457_v48  ;;  %v14468_v9 = vcvt.f32.s32 %v10486_v30  ;;  %v6829_v38 = vld [vmem:[%s7577_s15 + $0x320] sm:$0xff] }
 0x492   : > { %14453 = vst [vmem:[#allocation85_spill] sm:$0xff] %v10664_v32  ;;  %14455 = vst [vmem:[#allocation34_spill] sm:$0xff] %v10667_v17  ;;  %v10693_v8 = vmul.f32 %v14459_v33, %v14459_v33  ;;  %v5152_v5 = vsub.f32 %v4288_v10, %v6825_v56  ;;  %v10702_v57 = vmul.f32 %v14461_v12, %v14461_v12  ;;  %v3163_v29 = vcvt.f32.s32 %v10649_v25  ;;  %v14471_v30 = vld [vmem:[#allocation82_spill] sm:$0xff]  ;;  %v14472_v48 = vld [vmem:[#allocation81_spill] sm:$0xff] }
 0x493   : > { %4672 = vst [vmem:[%s9411_s24 + $0x300] sm:$0xff] %v4288_v10  ;;  %4673 = vst [vmem:[%s9411_s24 + $0x308] sm:$0xff] %v4289_v42  ;;  %v10706_v44 = vmul.f32 %v14463_v59, %v14463_v59  ;;  %vm3158_vm12 = vcmp.eq.f32.partialorder %v14465_v1, %v10649_v25  ;;  %v10714_v46 = vmul.f32 %v14466_v18, %v14466_v18  ;;  %v10718_v61 = vshll.u32 %v14468_v9, 16  ;;  %v14478_v17 = vld [vmem:[#allocation83_spill] sm:$0xff] }
 0x494   : > { %14458 = vst [vmem:[#allocation77_spill] sm:$0xff] %v10689_v3  ;;  %14460 = vst [vmem:[#allocation56_spill] sm:$0xff] %v10693_v8  ;;  %v5153_v47 = vsub.f32 %v4289_v42, %v6826_v62  ;;  %v5154_v63 = vsub.f32 %v4290_v26, %v6827_v37  ;;  %v5155_v51 = vsub.f32 %v4291_v6, %v6828_v35  ;;  %v3159_v42 = vsel %vm3158_vm12, %v14472_v48, inf  ;;  %v6832_v48 = vld [vmem:[%s7577_s15 + $0x488] sm:$0xff]  ;;  %v14501_v3 = vld [vmem:[#allocation105_spill] sm:$0xff] }
 0x495   : > { %4674 = vst [vmem:[%s9411_s24 + $0x310] sm:$0xff] %v4290_v26  ;;  %4675 = vst [vmem:[%s9411_s24 + $0x318] sm:$0xff] %v4291_v6  ;;  %v5156_v24 = vsub.f32 %v4292_v34, %v6829_v38  ;;  %v5157_v23 = vsub.f32 %v4293_v50, %v6830_v54  ;;  %v2773_v0 = vadd.s32 %v14470_v36, %v2770_v15  ;;  %3160 = vmin.xlane.f32.xlu0 %v3159_v42  ;;  %v14473_v6 = vld [vmem:[#allocation61_spill] sm:$0xff] }
 0x496   : > { %4676 = vst [vmem:[%s9411_s24 + $0x320] sm:$0xff] %v4292_v34  ;;  %4677 = vst [vmem:[%s9411_s24 + $0x328] sm:$0xff] %v4293_v50  ;;  %v10726_v10 = vmul.f32 %v5152_v5, %v5152_v5  ;;  %vm3284_vm13 = vcmp.eq.f32.partialorder %v14471_v30, %v10710_v27  ;;  %v2672_v26 = vcvt.f32.s32 %v2671_v16  ;;  %v10762_v37 = vmul.f32 %v5153_v47, %v5153_v47  ;;  %v6831_v30 = vld [vmem:[%s7577_s15 + $0x480] sm:$0xff] }
 0x497   : > { %14462 = vst [vmem:[#allocation84_spill] sm:$0xff] %v10702_v57  ;;  %14464 = vst [vmem:[#allocation35_spill] sm:$0xff] %v10706_v44  ;;  %vm3351_vm14 = vcmp.eq.s32.totalorder %v2773_v0, 1  ;;  %vm3993_vm15 = vcmp.eq.s32.totalorder %v2773_v0, 2  ;;  %v3285_v34 = vsel %vm3284_vm13, %v14473_v6, inf  ;;  %v10764_v16 = vmul.f32 %v5154_v63, %v5154_v63  ;;  %v14475_v0 = vld [vmem:[#allocation98_spill] sm:$0xff] }
 0x498   : > { %14467 = vst [vmem:[#allocation37_spill] sm:$0xff] %v10714_v46  ;;  %14469 = vst [vmem:[#allocation40_spill] sm:$0xff] %v10718_v61  ;;  %v3725_v50 = vsel %vm3351_vm14, %v9129_v45, %v9125_v7  ;;  %v3726_v33 = vsel %vm3351_vm14, %v9142_v2, %v9132_v41  ;;  %v3727_v56 = vsel %vm3351_vm14, %v9146_v55, %v9135_v20  ;;  %3286 = vmin.xlane.f32.xlu1 %v3285_v34  ;;  %v6834_v34 = vld [vmem:[%s7577_s15 + $0x498] sm:$0xff] }
 0x499   : > { %v3728_v25 = vsel %vm3351_vm14, %v9149_v19, %v9161_v14  ;;  %v3729_v5 = vsel %vm3351_vm14, %v9152_v11, %v9168_v13  ;;  %v3730_v12 = vsel %vm3351_vm14, %v9158_v40, %v9171_v49  ;;  %v4336_v59 = vsel %vm3993_vm15, %v9175_v39, %v3725_v50 }
 0x49a   : > { %v4337_v15 = vsel %vm3993_vm15, %v9189_v4, %v3726_v33  ;;  %v4338_v1 = vsel %vm3993_vm15, %v9205_v53, %v3727_v56  ;;  %v4339_v18 = vsel %vm3993_vm15, %v9208_v43, %v3728_v25  ;;  %v4340_v9 = vsel %vm3993_vm15, %v14305_v52, %v3729_v5  ;;  %4720 = vst [vmem:[%s9411_s24 + $0x480] sm:$0xff] %v4336_v59  ;;  %v6835_v33 = vld [vmem:[%s7577_s15 + $0x4a0] sm:$0xff] }
 0x49b   : > { %v4341_v62 = vsel %vm3993_vm15, %v14306_v60, %v3730_v12  ;;  %4721 = vst [vmem:[%s9411_s24 + $0x488] sm:$0xff] %v4337_v15  ;;  %v10766_v35 = vmul.f32 %v5155_v51, %v5155_v51  ;;  %v10768_v38 = vmul.f32 %v5156_v24, %v5156_v24  ;;  %4722 = vst [vmem:[%s9411_s24 + $0x490] sm:$0xff] %v4338_v1  ;;  %v10776_v36 = vshll.u32 %v3163_v29, 16  ;;  %v6833_v24 = vld [vmem:[%s7577_s15 + $0x490] sm:$0xff]  ;;  %v10800_v12 = vpop.xlane.xlu0 %3310 }
 0x49c   : > { %4723 = vst [vmem:[%s9411_s24 + $0x498] sm:$0xff] %v4339_v18  ;;  %4724 = vst [vmem:[%s9411_s24 + $0x4a0] sm:$0xff] %v4340_v9  ;;  %v10774_v54 = vmul.f32 %v5157_v23, %v5157_v23  ;;  %v3289_v47 = vcvt.f32.s32 %v10710_v27  ;;  %v2675_v63 = vadd.s32 %v14475_v0, %v2672_v26  ;;  %v5248_v51 = vsub.f32 %v4336_v59, %v6831_v30  ;;  %v6836_v23 = vld [vmem:[%s7577_s15 + $0x4a8] sm:$0xff]  ;;  %v2685_v59 = vpop.xlane.xlu1 %2684 }
 0x49d   : > { %4725 = vst [vmem:[%s9411_s24 + $0x4a8] sm:$0xff] %v4341_v62  ;;  %14474 = vst [vmem:[#allocation57_spill] sm:$0xff] %v10776_v36  ;;  %v10782_v42 = vsub.f32 %v4337_v15, %v6832_v48  ;;  %v5250_v6 = vsub.f32 %v4338_v1, %v6833_v24  ;;  %v5251_v50 = vsub.f32 %v4339_v18, %v6834_v34  ;;  %v6837_v48 = vld [vmem:[%s7577_s15 + $0x330] sm:$0xff]  ;;  %v6838_v34 = vld [vmem:[%s7577_s15 + $0x338] sm:$0xff] }
 0x49e   : > { %v10787_v56 = vsub.f32 %v4340_v9, %v6835_v33  ;;  %v10790_v25 = vsub.f32 %v4341_v62, %v6836_v23  ;;  %vm3344_vm0 = vcmp.eq.s32.totalorder %v2675_v63, 1  ;;  %vm3986_vm1 = vcmp.eq.s32.totalorder %v2675_v63, 2  ;;  %14476 = vst [vmem:[#allocation39_spill] sm:$0xff] %v10800_v12  ;;  %v6839_v23 = vld [vmem:[%s7577_s15 + $0x340] sm:$0xff]  ;;  %v6842_v36 = vld [vmem:[%s7577_s15 + $0x358] sm:$0xff] }
 0x49f   : > { %v3683_v27 = vsel %vm3344_vm0, %v9129_v45, %v9125_v7  ;;  %v3684_v29 = vsel %vm3344_vm0, %v9142_v2, %v9132_v41  ;;  %v3685_v26 = vsel %vm3344_vm0, %v9146_v55, %v9135_v20  ;;  %v3686_v5 = vsel %vm3344_vm0, %v9149_v19, %v9161_v14 }
 0x4a0   : > { %v3687_v15 = vsel %vm3344_vm0, %v9152_v11, %v9168_v13  ;;  %v3688_v1 = vsel %vm3344_vm0, %v9158_v40, %v9171_v49  ;;  %v4294_v18 = vsel %vm3986_vm1, %v9175_v39, %v3683_v27  ;;  %v4295_v9 = vsel %vm3986_vm1, %v9189_v4, %v3684_v29  ;;  %v6840_v29 = vld [vmem:[%s7577_s15 + $0x348] sm:$0xff] }
 0x4a1   : > { %v4296_v62 = vsel %vm3986_vm1, %v9205_v53, %v3685_v26  ;;  %v4297_v0 = vsel %vm3986_vm1, %v9208_v43, %v3686_v5  ;;  %v4298_v63 = vsel %vm3986_vm1, %v14305_v52, %v3687_v15  ;;  %v4299_v30 = vsel %vm3986_vm1, %v14306_v60, %v3688_v1  ;;  %4678 = vst [vmem:[%s9411_s24 + $0x330] sm:$0xff] %v4294_v18  ;;  %v6841_v15 = vld [vmem:[%s7577_s15 + $0x350] sm:$0xff] }
 0x4a2   : > { %4679 = vst [vmem:[%s9411_s24 + $0x338] sm:$0xff] %v4295_v9  ;;  %4680 = vst [vmem:[%s9411_s24 + $0x340] sm:$0xff] %v4296_v62  ;;  %v5164_v24 = vsub.f32 %v4294_v18, %v6837_v48  ;;  %v5165_v33 = vsub.f32 %v4295_v9, %v6838_v34  ;;  %v5166_v27 = vsub.f32 %v4296_v62, %v6839_v23  ;;  %v10822_v5 = vshll.u32 %v3289_v47, 16  ;;  %v2797_v34 = vpop.xlane.xlu0 %2796 }
 0x4a3   : > { %4681 = vst [vmem:[%s9411_s24 + $0x348] sm:$0xff] %v4297_v0  ;;  %4682 = vst [vmem:[%s9411_s24 + $0x350] sm:$0xff] %v4298_v63  ;;  %v5167_v26 = vsub.f32 %v4297_v0, %v6840_v29  ;;  %v5168_v1 = vsub.f32 %v4298_v63, %v6841_v15  ;;  %v5169_v61 = vsub.f32 %v4299_v30, %v6842_v36  ;;  %v2686_v62 = vcvt.f32.s32 %v2685_v59  ;;  %v10830_v0 = vpop.xlane.xlu1 %3184  ;;  %v14481_v59 = vld [vmem:[#allocation100_spill] sm:$0xff] }
 0x4a4   : > { %4683 = vst [vmem:[%s9411_s24 + $0x358] sm:$0xff] %v4299_v30  ;;  %14477 = vst [vmem:[#allocation79_spill] sm:$0xff] %v10822_v5  ;;  %vm3312_vm2 = vcmp.eq.f32.partialorder %v14478_v17, %v10800_v12  ;;  %v5170_v32 = vmul.f32 %v5164_v24, %v5164_v24  ;;  %v5171_v21 = vmul.f32 %v5165_v33, %v5165_v33  ;;  %v14482_v33 = vld [vmem:[#allocation62_spill] sm:$0xff] }
 0x4a5   : > { %v5172_v58 = vmul.f32 %v5166_v27, %v5166_v27  ;;  %v5173_v28 = vmul.f32 %v5167_v26, %v5167_v26  ;;  %v10828_v18 = vmul.f32 %v5248_v51, %v5248_v51  ;;  %v5174_v9 = vmul.f32 %v5168_v1, %v5168_v1  ;;  %14480 = vst [vmem:[#allocation42_spill] sm:$0xff] %v10830_v0  ;;  %v6848_v5 = vld [vmem:[%s7577_s15 + $0x388] sm:$0xff] }
 0x4a6   : > { %v5175_v48 = vmul.f32 %v5169_v61, %v5169_v61  ;;  %v10833_v47 = vadd.f32 %v5170_v32, %v10726_v10  ;;  %v10836_v36 = vadd.f32 %v5171_v21, %v10762_v37  ;;  %v2689_v24 = vadd.s32 %v14481_v59, %v2686_v62  ;;  %v14486_v10 = vld [vmem:[#allocation94_spill] sm:$0xff]  ;;  %v2825_v29 = vpop.xlane.xlu0 %2824 }
 0x4a7   : > { %14479 = vst [vmem:[#allocation38_spill] sm:$0xff] %v10828_v18  ;;  %v10839_v63 = vadd.f32 %v5172_v58, %v10764_v16  ;;  %v10842_v30 = vadd.f32 %v5173_v28, %v10766_v35  ;;  %v10845_v51 = vadd.f32 %v5174_v9, %v10768_v38  ;;  %v3313_v21 = vsel %vm3312_vm2, %v14482_v33, inf  ;;  %v14487_v16 = vld [vmem:[#allocation63_spill] sm:$0xff]  ;;  %v10882_v26 = vpop.xlane.xlu1 %2698 }
 0x4a8   : > { %v10848_v61 = vadd.f32 %v5175_v48, %v10774_v54  ;;  %v10857_v58 = vmul.f32 %v10782_v42, %v10782_v42  ;;  %v10859_v32 = vmul.f32 %v5250_v6, %v5250_v6  ;;  %v10861_v28 = vmul.f32 %v5251_v50, %v5251_v50  ;;  %3314 = vmin.xlane.f32.xlu1 %v3313_v21  ;;  %v14490_v21 = vld [vmem:[#allocation99_spill] sm:$0xff] }
 0x4a9   : > { %vm3186_vm3 = vcmp.eq.f32.partialorder %v14486_v10, %v10830_v0  ;;  %vm3345_vm4 = vcmp.eq.s32.totalorder %v2689_v24, 1  ;;  %vm3987_vm5 = vcmp.eq.s32.totalorder %v2689_v24, 2  ;;  %v2798_v37 = vcvt.f32.s32 %v2797_v34  ;;  %v6843_v24 = vld [vmem:[%s7577_s15 + $0x360] sm:$0xff] }
 0x4aa   : > { %14483 = vst [vmem:[#allocation58_spill] sm:$0xff] %v10857_v58  ;;  %14484 = vst [vmem:[#allocation44_spill] sm:$0xff] %v10859_v32  ;;  %v3187_v35 = vsel %vm3186_vm3, %v14487_v16, inf  ;;  %v3689_v17 = vsel %vm3345_vm4, %v9129_v45, %v9125_v7  ;;  %v3690_v38 = vsel %vm3345_vm4, %v9142_v2, %v9132_v41  ;;  %v3691_v54 = vsel %vm3345_vm4, %v9146_v55, %v9135_v20 }
 0x4ab   : > { %14485 = vst [vmem:[#allocation78_spill] sm:$0xff] %v10861_v28  ;;  %v3692_v42 = vsel %vm3345_vm4, %v9149_v19, %v9161_v14  ;;  %3188 = vmin.xlane.f32.xlu0 %v3187_v35  ;;  %v3693_v6 = vsel %vm3345_vm4, %v9152_v11, %v9168_v13  ;;  %v3694_v50 = vsel %vm3345_vm4, %v9158_v40, %v9171_v49  ;;  %v2826_v16 = vcvt.f32.s32 %v2825_v29 }
 0x4ac   : > { %v4300_v23 = vsel %vm3987_vm5, %v9175_v39, %v3689_v17  ;;  %v4301_v27 = vsel %vm3987_vm5, %v9189_v4, %v3690_v38  ;;  %v4302_v15 = vsel %vm3987_vm5, %v9205_v53, %v3691_v54  ;;  %v4303_v1 = vsel %vm3987_vm5, %v9208_v43, %v3692_v42  ;;  %v6845_v38 = vld [vmem:[%s7577_s15 + $0x370] sm:$0xff]  ;;  %v6846_v42 = vld [vmem:[%s7577_s15 + $0x378] sm:$0xff] }
 0x4ad   : > { %v4304_v9 = vsel %vm3987_vm5, %v14305_v52, %v3693_v6  ;;  %v4305_v48 = vsel %vm3987_vm5, %v14306_v60, %v3694_v50  ;;  %4684 = vst [vmem:[%s9411_s24 + $0x360] sm:$0xff] %v4300_v23  ;;  %4685 = vst [vmem:[%s9411_s24 + $0x368] sm:$0xff] %v4301_v27  ;;  %v10896_v62 = vmul.f32 %v10787_v56, %v10787_v56  ;;  %v2700_v35 = vcvt.f32.s32 %v10882_v26  ;;  %v6847_v50 = vld [vmem:[%s7577_s15 + $0x380] sm:$0xff] }
 0x4ae   : > { %v10900_v34 = vmul.f32 %v10790_v25, %v10790_v25  ;;  %4686 = vst [vmem:[%s9411_s24 + $0x370] sm:$0xff] %v4302_v15  ;;  %4687 = vst [vmem:[%s9411_s24 + $0x378] sm:$0xff] %v4303_v1  ;;  %v5176_v33 = vsub.f32 %v4300_v23, %v6843_v24  ;;  %v2801_v10 = vadd.s32 %v14490_v21, %v2798_v37  ;;  %v6844_v25 = vld [vmem:[%s7577_s15 + $0x368] sm:$0xff]  ;;  %v6853_v56 = vld [vmem:[%s7577_s15 + $0x500] sm:$0xff] }
 0x4af   : > { %14488 = vst [vmem:[#allocation43_spill] sm:$0xff] %v10896_v62  ;;  %4688 = vst [vmem:[%s9411_s24 + $0x380] sm:$0xff] %v4304_v9  ;;  %v5177_v17 = vsub.f32 %v4301_v27, %v6844_v25  ;;  %v5178_v54 = vsub.f32 %v4302_v15, %v6845_v38  ;;  %v5179_v6 = vsub.f32 %v4303_v1, %v6846_v42  ;;  %v6849_v38 = vld [vmem:[%s7577_s15 + $0x4e0] sm:$0xff] }
 0x4b0   : > { %14489 = vst [vmem:[#allocation41_spill] sm:$0xff] %v10900_v34  ;;  %4689 = vst [vmem:[%s9411_s24 + $0x388] sm:$0xff] %v4305_v48  ;;  %v5180_v59 = vsub.f32 %v4304_v9, %v6847_v50  ;;  %v5181_v12 = vsub.f32 %v4305_v48, %v6848_v5  ;;  %v10916_v31 = vmul.f32 %v5176_v33, %v5176_v33  ;;  %vm3353_vm6 = vcmp.eq.s32.totalorder %v2801_v10, 1  ;;  %v6854_v34 = vld [vmem:[%s7577_s15 + $0x508] sm:$0xff] }
 0x4b1   : > { %vm3995_vm7 = vcmp.eq.s32.totalorder %v2801_v10, 2  ;;  %v3737_v37 = vsel %vm3353_vm6, %v9129_v45, %v9125_v7  ;;  %v3738_v23 = vsel %vm3353_vm6, %v9142_v2, %v9132_v41  ;;  %v3739_v27 = vsel %vm3353_vm6, %v9146_v55, %v9135_v20 }
 0x4b2   : > { %v3740_v5 = vsel %vm3353_vm6, %v9149_v19, %v9161_v14  ;;  %v3741_v29 = vsel %vm3353_vm6, %v9152_v11, %v9168_v13  ;;  %v3742_v26 = vsel %vm3353_vm6, %v9158_v40, %v9171_v49  ;;  %v4348_v15 = vsel %vm3995_vm7, %v9175_v39, %v3737_v37 }
 0x4b3   : > { %v4349_v1 = vsel %vm3995_vm7, %v9189_v4, %v3738_v23  ;;  %v4350_v9 = vsel %vm3995_vm7, %v9205_v53, %v3739_v27  ;;  %v4351_v48 = vsel %vm3995_vm7, %v9208_v43, %v3740_v5  ;;  %v4352_v24 = vsel %vm3995_vm7, %v14305_v52, %v3741_v29  ;;  %4732 = vst [vmem:[%s9411_s24 + $0x4e0] sm:$0xff] %v4348_v15  ;;  %v6850_v23 = vld [vmem:[%s7577_s15 + $0x4e8] sm:$0xff] }
 0x4b4   : > { %v4353_v33 = vsel %vm3995_vm7, %v14306_v60, %v3742_v26  ;;  %4733 = vst [vmem:[%s9411_s24 + $0x4e8] sm:$0xff] %v4349_v1  ;;  %v10938_v21 = vmul.f32 %v5177_v17, %v5177_v17  ;;  %v10940_v10 = vmul.f32 %v5178_v54, %v5178_v54  ;;  %v10942_v25 = vmul.f32 %v5179_v6, %v5179_v6  ;;  %v14491_v27 = vld [vmem:[#allocation102_spill] sm:$0xff]  ;;  %v6851_v54 = vld [vmem:[%s7577_s15 + $0x4f0] sm:$0xff]  ;;  %v6852_v6 = vld [vmem:[%s7577_s15 + $0x4f8] sm:$0xff] }
 0x4b5   : > { %4734 = vst [vmem:[%s9411_s24 + $0x4f0] sm:$0xff] %v4350_v9  ;;  %4735 = vst [vmem:[%s9411_s24 + $0x4f8] sm:$0xff] %v4351_v48  ;;  %v5272_v42 = vsub.f32 %v4348_v15, %v6849_v38  ;;  %v10949_v50 = vmul.f32 %v5180_v59, %v5180_v59  ;;  %v10951_v37 = vmul.f32 %v5181_v12, %v5181_v12  ;;  %v14493_v12 = vld [vmem:[#allocation101_spill] sm:$0xff] }
 0x4b6   : > { %4736 = vst [vmem:[%s9411_s24 + $0x500] sm:$0xff] %v4352_v24  ;;  %4737 = vst [vmem:[%s9411_s24 + $0x508] sm:$0xff] %v4353_v33  ;;  %v5273_v17 = vsub.f32 %v4349_v1, %v6850_v23  ;;  %v2829_v5 = vadd.s32 %v14491_v27, %v2826_v16  ;;  %v5274_v29 = vsub.f32 %v4350_v9, %v6851_v54  ;;  %v6855_v54 = vld [vmem:[%s7577_s15 + $0x540] sm:$0xff] }
 0x4b7   : > { %v5275_v26 = vsub.f32 %v4351_v48, %v6852_v6  ;;  %v5276_v0 = vsub.f32 %v4352_v24, %v6853_v56  ;;  %v5277_v62 = vsub.f32 %v4353_v33, %v6854_v34  ;;  %v10959_v28 = vmul.f32 %v5272_v42, %v5272_v42 }
 0x4b8   : > { %vm3355_vm8 = vcmp.eq.s32.totalorder %v2829_v5, 1  ;;  %vm3997_vm9 = vcmp.eq.s32.totalorder %v2829_v5, 2  ;;  %v2703_v59 = vadd.s32 %v14493_v12, %v2700_v35  ;;  %v10982_v23 = vmul.f32 %v5273_v17, %v5273_v17  ;;  %v2713_v12 = vpop.xlane.xlu1 %2712  ;;  %v6856_v17 = vld [vmem:[%s7577_s15 + $0x548] sm:$0xff] }
 0x4b9   : > { %14492 = vst [vmem:[#allocation46_spill] sm:$0xff] %v10959_v28  ;;  %v3749_v15 = vsel %vm3355_vm8, %v9129_v45, %v9125_v7  ;;  %v3750_v16 = vsel %vm3355_vm8, %v9142_v2, %v9132_v41  ;;  %v3751_v56 = vsel %vm3355_vm8, %v9146_v55, %v9135_v20  ;;  %v3752_v34 = vsel %vm3355_vm8, %v9149_v19, %v9161_v14  ;;  %v6866_v28 = vld [vmem:[%s7577_s15 + $0x3b8] sm:$0xff] }
 0x4ba   : > { %v3753_v1 = vsel %vm3355_vm8, %v9152_v11, %v9168_v13  ;;  %v3754_v35 = vsel %vm3355_vm8, %v9158_v40, %v9171_v49  ;;  %v4360_v9 = vsel %vm3997_vm9, %v9175_v39, %v3749_v15  ;;  %v4361_v48 = vsel %vm3997_vm9, %v9189_v4, %v3750_v16  ;;  %14494 = vst [vmem:[#allocation48_spill] sm:$0xff] %v10982_v23 }
 0x4bb   : > { %v4362_v24 = vsel %vm3997_vm9, %v9205_v53, %v3751_v56  ;;  %v4363_v33 = vsel %vm3997_vm9, %v9208_v43, %v3752_v34  ;;  %v4364_v38 = vsel %vm3997_vm9, %v14305_v52, %v3753_v1  ;;  %v4365_v42 = vsel %vm3997_vm9, %v14306_v60, %v3754_v35  ;;  %4744 = vst [vmem:[%s9411_s24 + $0x540] sm:$0xff] %v4360_v9  ;;  %v6858_v34 = vld [vmem:[%s7577_s15 + $0x558] sm:$0xff]  ;;  %v6859_v35 = vld [vmem:[%s7577_s15 + $0x560] sm:$0xff] }
 0x4bc   : > { %4745 = vst [vmem:[%s9411_s24 + $0x548] sm:$0xff] %v4361_v48  ;;  %v10984_v27 = vmul.f32 %v5274_v29, %v5274_v29  ;;  %v10986_v5 = vmul.f32 %v5275_v26, %v5275_v26  ;;  %4746 = vst [vmem:[%s9411_s24 + $0x550] sm:$0xff] %v4362_v24  ;;  %v5296_v6 = vsub.f32 %v4360_v9, %v6855_v54  ;;  %vm3346_vm10 = vcmp.eq.s32.totalorder %v2703_v59, 1  ;;  %v6857_v29 = vld [vmem:[%s7577_s15 + $0x550] sm:$0xff]  ;;  %v6860_v9 = vld [vmem:[%s7577_s15 + $0x568] sm:$0xff] }
 0x4bd   : > { %4747 = vst [vmem:[%s9411_s24 + $0x558] sm:$0xff] %v4363_v33  ;;  %4748 = vst [vmem:[%s9411_s24 + $0x560] sm:$0xff] %v4364_v38  ;;  %v10993_v15 = vmul.f32 %v5276_v0, %v5276_v0  ;;  %v10995_v16 = vmul.f32 %v5277_v62, %v5277_v62  ;;  %v10998_v56 = vsub.f32 %v4361_v48, %v6856_v17  ;;  %vm3988_vm11 = vcmp.eq.s32.totalorder %v2703_v59, 2  ;;  %v6865_v59 = vld [vmem:[%s7577_s15 + $0x3b0] sm:$0xff] }
 0x4be   : > { %14495 = vst [vmem:[#allocation80_spill] sm:$0xff] %v10984_v27  ;;  %14496 = vst [vmem:[#allocation59_spill] sm:$0xff] %v10986_v5  ;;  %v11001_v26 = vsub.f32 %v4362_v24, %v6857_v29  ;;  %v11004_v1 = vsub.f32 %v4363_v33, %v6858_v34  ;;  %v11007_v5 = vsub.f32 %v4364_v38, %v6859_v35  ;;  %v2853_v35 = vpop.xlane.xlu0 %2852  ;;  %v2714_v44 = vcvt.f32.s32 %v2713_v12 }
 0x4bf   : > { %4749 = vst [vmem:[%s9411_s24 + $0x568] sm:$0xff] %v4365_v42  ;;  %14497 = vst [vmem:[#allocation45_spill] sm:$0xff] %v10993_v15  ;;  %v11010_v0 = vsub.f32 %v4365_v42, %v6860_v9  ;;  %v11012_v62 = vmul.f32 %v5296_v6, %v5296_v6  ;;  %v3695_v48 = vsel %vm3346_vm10, %v9129_v45, %v9125_v7  ;;  %v11050_v15 = vpop.xlane.xlu1 %3212  ;;  %v2854_v46 = vcvt.f32.s32 %v2853_v35  ;;  %v6867_v35 = vld [vmem:[%s7577_s15 + $0x5a0] sm:$0xff] }
 0x4c0   : > { %14498 = vst [vmem:[#allocation18_spill] sm:$0xff] %v10995_v16  ;;  %v3696_v24 = vsel %vm3346_vm10, %v9142_v2, %v9132_v41  ;;  %v3697_v33 = vsel %vm3346_vm10, %v9146_v55, %v9135_v20  ;;  %v3698_v38 = vsel %vm3346_vm10, %v9149_v19, %v9161_v14  ;;  %v3699_v42 = vsel %vm3346_vm10, %v9152_v11, %v9168_v13 }
 0x4c1   : > { %14499 = vst [vmem:[#allocation70_spill] sm:$0xff] %v11012_v62  ;;  %v3700_v54 = vsel %vm3346_vm10, %v9158_v40, %v9171_v49  ;;  %v4306_v6 = vsel %vm3988_vm11, %v9175_v39, %v3695_v48  ;;  %v4307_v17 = vsel %vm3988_vm11, %v9189_v4, %v3696_v24  ;;  %v4308_v29 = vsel %vm3988_vm11, %v9205_v53, %v3697_v33  ;;  %v6861_v24 = vld [vmem:[%s7577_s15 + $0x390] sm:$0xff]  ;;  %v6862_v62 = vld [vmem:[%s7577_s15 + $0x398] sm:$0xff] }
 0x4c2   : > { %v4309_v34 = vsel %vm3988_vm11, %v9208_v43, %v3698_v38  ;;  %v4310_v9 = vsel %vm3988_vm11, %v14305_v52, %v3699_v42  ;;  %v4311_v48 = vsel %vm3988_vm11, %v14306_v60, %v3700_v54  ;;  %4690 = vst [vmem:[%s9411_s24 + $0x390] sm:$0xff] %v4306_v6  ;;  %4691 = vst [vmem:[%s9411_s24 + $0x398] sm:$0xff] %v4307_v17  ;;  %v6863_v38 = vld [vmem:[%s7577_s15 + $0x3a0] sm:$0xff]  ;;  %v6864_v42 = vld [vmem:[%s7577_s15 + $0x3a8] sm:$0xff] }
 0x4c3   : > { %4692 = vst [vmem:[%s9411_s24 + $0x3a0] sm:$0xff] %v4308_v29  ;;  %4693 = vst [vmem:[%s9411_s24 + $0x3a8] sm:$0xff] %v4309_v34  ;;  %v5188_v33 = vsub.f32 %v4306_v6, %v6861_v24  ;;  %v5189_v16 = vsub.f32 %v4307_v17, %v6862_v62  ;;  %v5190_v27 = vsub.f32 %v4308_v29, %v6863_v38  ;;  %v14502_v38 = vld [vmem:[#allocation104_spill] sm:$0xff] }
 0x4c4   : > { %14500 = vst [vmem:[#allocation89_spill] sm:$0xff] %v11050_v15  ;;  %4694 = vst [vmem:[%s9411_s24 + $0x3b0] sm:$0xff] %v4310_v9  ;;  %v5191_v23 = vsub.f32 %v4309_v34, %v6864_v42  ;;  %v5192_v54 = vsub.f32 %v4310_v9, %v6865_v59  ;;  %v5193_v32 = vsub.f32 %v4311_v48, %v6866_v28  ;;  %v6869_v59 = vld [vmem:[%s7577_s15 + $0x5b0] sm:$0xff] }
 0x4c5   : > { %4695 = vst [vmem:[%s9411_s24 + $0x3b8] sm:$0xff] %v4311_v48  ;;  %v5194_v58 = vmul.f32 %v5188_v33, %v5188_v33  ;;  %v5195_v18 = vmul.f32 %v5189_v16, %v5189_v16  ;;  %v5196_v57 = vmul.f32 %v5190_v27, %v5190_v27  ;;  %v2857_v29 = vadd.s32 %v14501_v3, %v2854_v46  ;;  %v11074_v3 = vpop.xlane.xlu1 %2726  ;;  %v6868_v33 = vld [vmem:[%s7577_s15 + $0x5a8] sm:$0xff] }
 0x4c6   : > { %v5197_v6 = vmul.f32 %v5191_v23, %v5191_v23  ;;  %v5198_v24 = vmul.f32 %v5192_v54, %v5192_v54  ;;  %v5199_v62 = vmul.f32 %v5193_v32, %v5193_v32  ;;  %v11062_v34 = vadd.s32 %v14502_v38, %v2714_v44 }
 0x4c7   : > { %v5782_v17 = vadd.f32 %v5194_v58, %v10916_v31  ;;  %v5783_v8 = vadd.f32 %v5195_v18, %v10938_v21  ;;  %v5784_v9 = vadd.f32 %v5196_v57, %v10940_v10  ;;  %vm3357_vm12 = vcmp.eq.s32.totalorder %v2857_v29, 1 }
 0x4c8   : > { %v5785_v28 = vadd.f32 %v5197_v6, %v10942_v25  ;;  %v5786_v16 = vadd.f32 %v5198_v24, %v10949_v50  ;;  %v5787_v27 = vadd.f32 %v5199_v62, %v10951_v37  ;;  %vm3999_vm13 = vcmp.eq.s32.totalorder %v2857_v29, 2  ;;  %v6870_v6 = vld [vmem:[%s7577_s15 + $0x5b8] sm:$0xff]  ;;  %v6871_v62 = vld [vmem:[%s7577_s15 + $0x5c0] sm:$0xff] }
 0x4c9   : > { %v11069_v23 = vadd.f32 %v5782_v17, %v10833_v47  ;;  %v11072_v31 = vadd.f32 %v5783_v8, %v10836_v36  ;;  %v11077_v44 = vadd.f32 %v5784_v9, %v10839_v63  ;;  %v3761_v8 = vsel %vm3357_vm12, %v9129_v45, %v9125_v7 }
 0x4ca   : > { %v11080_v57 = vadd.f32 %v5785_v28, %v10842_v30  ;;  %v11083_v46 = vadd.f32 %v5786_v16, %v10845_v51  ;;  %v11086_v18 = vadd.f32 %v5787_v27, %v10848_v61  ;;  %v3762_v47 = vsel %vm3357_vm12, %v9142_v2, %v9132_v41 }
 0x4cb   : > { %v3763_v36 = vsel %vm3357_vm12, %v9146_v55, %v9135_v20  ;;  %v3764_v63 = vsel %vm3357_vm12, %v9149_v19, %v9161_v14  ;;  %v3765_v30 = vsel %vm3357_vm12, %v9152_v11, %v9168_v13  ;;  %v3766_v51 = vsel %vm3357_vm12, %v9158_v40, %v9171_v49 }
 0x4cc   : > { %v4372_v61 = vsel %vm3999_vm13, %v9175_v39, %v3761_v8  ;;  %v4373_v58 = vsel %vm3999_vm13, %v9189_v4, %v3762_v47  ;;  %v4374_v32 = vsel %vm3999_vm13, %v9205_v53, %v3763_v36  ;;  %v4375_v21 = vsel %vm3999_vm13, %v9208_v43, %v3764_v63  ;;  %v2881_v47 = vpop.xlane.xlu0 %2880 }
 0x4cd   : > { %v4376_v10 = vsel %vm3999_vm13, %v14305_v52, %v3765_v30  ;;  %v4377_v25 = vsel %vm3999_vm13, %v14306_v60, %v3766_v51  ;;  %4756 = vst [vmem:[%s9411_s24 + $0x5a0] sm:$0xff] %v4372_v61  ;;  %4757 = vst [vmem:[%s9411_s24 + $0x5a8] sm:$0xff] %v4373_v58  ;;  %v11116_v50 = vmul.f32 %v10998_v56, %v10998_v56  ;;  %vm3347_vm14 = vcmp.eq.s32.totalorder %v11062_v34, 1 }
 0x4ce   : > { %v11120_v37 = vmul.f32 %v11001_v26, %v11001_v26  ;;  %v11124_v12 = vmul.f32 %v11004_v1, %v11004_v1  ;;  %4758 = vst [vmem:[%s9411_s24 + $0x5b0] sm:$0xff] %v4374_v32  ;;  %4759 = vst [vmem:[%s9411_s24 + $0x5b8] sm:$0xff] %v4375_v21  ;;  %v5320_v48 = vsub.f32 %v4372_v61, %v6867_v35  ;;  %v11141_v1 = vpop.xlane.xlu1 %3240  ;;  %vm3989_vm15 = vcmp.eq.s32.totalorder %v11062_v34, 2  ;;  %v6875_v34 = vld [vmem:[%s7577_s15 + $0x3d0] sm:$0xff] }
 0x4cf   : > { %4760 = vst [vmem:[%s9411_s24 + $0x5c0] sm:$0xff] %v4376_v10  ;;  %4761 = vst [vmem:[%s9411_s24 + $0x5c8] sm:$0xff] %v4377_v25  ;;  %v11133_v56 = vmul.f32 %v11007_v5, %v11007_v5  ;;  %v11137_v26 = vmul.f32 %v11010_v0, %v11010_v0  ;;  %v5321_v42 = vsub.f32 %v4373_v58, %v6868_v33  ;;  %v6872_v5 = vld [vmem:[%s7577_s15 + $0x5c8] sm:$0xff] }
 0x4d0   : > { %14503 = vst [vmem:[#allocation71_spill] sm:$0xff] %v11124_v12  ;;  %14506 = vst [vmem:[#allocation76_spill] sm:$0xff] %v11141_v1  ;;  %v5322_v54 = vsub.f32 %v4374_v32, %v6869_v59  ;;  %v5323_v24 = vsub.f32 %v4375_v21, %v6870_v6  ;;  %v5324_v17 = vsub.f32 %v4376_v10, %v6871_v62  ;;  %v6873_v32 = vld [vmem:[%s7577_s15 + $0x3c0] sm:$0xff]  ;;  %v6874_v10 = vld [vmem:[%s7577_s15 + $0x3c8] sm:$0xff] }
 0x4d1   : > { %14504 = vst [vmem:[#allocation53_spill] sm:$0xff] %v11133_v56  ;;  %14505 = vst [vmem:[#allocation73_spill] sm:$0xff] %v11137_v26  ;;  %v5325_v29 = vsub.f32 %v4377_v25, %v6872_v5  ;;  %v11148_v0 = vmul.f32 %v5320_v48, %v5320_v48  ;;  %v3701_v38 = vsel %vm3347_vm14, %v9129_v45, %v9125_v7  ;;  %v14535_v12 = vld [vmem:[#allocation64_spill] sm:$0xff] }
 0x4d2   : > { %v3702_v9 = vsel %vm3347_vm14, %v9142_v2, %v9132_v41  ;;  %v3703_v28 = vsel %vm3347_vm14, %v9146_v55, %v9135_v20  ;;  %v3704_v16 = vsel %vm3347_vm14, %v9149_v19, %v9161_v14  ;;  %v3705_v27 = vsel %vm3347_vm14, %v9152_v11, %v9168_v13  ;;  %v2755_v6 = vpop.xlane.xlu1 %2754 }
 0x4d3   : > { %14507 = vst [vmem:[#allocation29_spill] sm:$0xff] %v11148_v0  ;;  %v3706_v8 = vsel %vm3347_vm14, %v9158_v40, %v9171_v49  ;;  %v4312_v36 = vsel %vm3989_vm15, %v9175_v39, %v3701_v38  ;;  %v4313_v63 = vsel %vm3989_vm15, %v9189_v4, %v3702_v9  ;;  %v4314_v30 = vsel %vm3989_vm15, %v9205_v53, %v3703_v28  ;;  %v6876_v38 = vld [vmem:[%s7577_s15 + $0x3d8] sm:$0xff]  ;;  %v14513_v28 = vld [vmem:[#allocation55_spill] sm:$0xff] }
 0x4d4   : > { %v4315_v51 = vsel %vm3989_vm15, %v9208_v43, %v3704_v16  ;;  %v4316_v61 = vsel %vm3989_vm15, %v14305_v52, %v3705_v27  ;;  %v4317_v58 = vsel %vm3989_vm15, %v14306_v60, %v3706_v8  ;;  %4696 = vst [vmem:[%s9411_s24 + $0x3c0] sm:$0xff] %v4312_v36  ;;  %4697 = vst [vmem:[%s9411_s24 + $0x3c8] sm:$0xff] %v4313_v63  ;;  %v6877_v16 = vld [vmem:[%s7577_s15 + $0x3e0] sm:$0xff]  ;;  %v6878_v27 = vld [vmem:[%s7577_s15 + $0x3e8] sm:$0xff] }
 0x4d5   : > { %4698 = vst [vmem:[%s9411_s24 + $0x3d0] sm:$0xff] %v4314_v30  ;;  %4699 = vst [vmem:[%s9411_s24 + $0x3d8] sm:$0xff] %v4315_v51  ;;  %v5200_v21 = vsub.f32 %v4312_v36, %v6873_v32  ;;  %v5201_v25 = vsub.f32 %v4313_v63, %v6874_v10  ;;  %v11198_v35 = vmul.f32 %v5321_v42, %v5321_v42  ;;  %v2909_v42 = vpop.xlane.xlu0 %2908  ;;  %v2728_v32 = vcvt.f32.s32 %v11074_v3  ;;  %v14515_v10 = vld [vmem:[#allocation36_spill] sm:$0xff] }
 0x4d6   : > { %v11200_v48 = vmul.f32 %v5322_v54, %v5322_v54  ;;  %v11202_v33 = vmul.f32 %v5323_v24, %v5323_v24  ;;  %4700 = vst [vmem:[%s9411_s24 + $0x3e0] sm:$0xff] %v4316_v61  ;;  %4701 = vst [vmem:[%s9411_s24 + $0x3e8] sm:$0xff] %v4317_v58  ;;  %v5202_v59 = vsub.f32 %v4314_v30, %v6875_v34  ;;  %v2756_v34 = vcvt.f32.s32 %v2755_v6  ;;  %v14521_v6 = vld [vmem:[#allocation25_spill] sm:$0xff] }
 0x4d7   : > { %14508 = vst [vmem:[#allocation96_spill] sm:$0xff] %v11198_v35  ;;  %v11207_v62 = vmul.f32 %v5324_v17, %v5324_v17  ;;  %v11209_v5 = vmul.f32 %v5325_v29, %v5325_v29  ;;  %v5203_v9 = vsub.f32 %v4315_v51, %v6876_v38  ;;  %vm3214_vm0 = vcmp.eq.f32.partialorder %v14513_v28, %v11050_v15  ;;  %v14514_v17 = vld [vmem:[#allocation103_spill] sm:$0xff]  ;;  %v14517_v38 = vld [vmem:[#allocation106_spill] sm:$0xff]  ;;  %v6882_v63 = vld [vmem:[%s7577_s15 + $0x618] sm:$0xff] }
 0x4d8   : > { %14509 = vst [vmem:[#allocation75_spill] sm:$0xff] %v11200_v48  ;;  %14510 = vst [vmem:[#allocation47_spill] sm:$0xff] %v11202_v33  ;;  %v5204_v54 = vsub.f32 %v4316_v61, %v6877_v16  ;;  %v5205_v24 = vsub.f32 %v4317_v58, %v6878_v27  ;;  %v11216_v8 = vmul.f32 %v5200_v21, %v5200_v21  ;;  %v3215_v30 = vsel %vm3214_vm0, %v14514_v17, inf  ;;  %v14516_v21 = vld [vmem:[#allocation107_spill] sm:$0xff]  ;;  %v14518_v16 = vld [vmem:[#allocation21_spill] sm:$0xff] }
 0x4d9   : > { %14511 = vst [vmem:[#allocation32_spill] sm:$0xff] %v11207_v62  ;;  %14512 = vst [vmem:[#allocation97_spill] sm:$0xff] %v11209_v5  ;;  %v11218_v36 = vmul.f32 %v5201_v25, %v5201_v25  ;;  %v2882_v29 = vcvt.f32.s32 %v2881_v47  ;;  %v11223_v51 = vmul.f32 %v5202_v59, %v5202_v59  ;;  %3216 = vmin.xlane.f32.xlu0 %v3215_v30  ;;  %v2910_v61 = vcvt.f32.s32 %v2909_v42  ;;  %v14519_v59 = vld [vmem:[#allocation65_spill] sm:$0xff] }
 0x4da   : > { %vm3242_vm1 = vcmp.eq.f32.partialorder %v14515_v10, %v11141_v1  ;;  %v11227_v58 = vmul.f32 %v5203_v9, %v5203_v9  ;;  %v2731_v28 = vadd.s32 %v14517_v38, %v2728_v32  ;;  %v11232_v17 = vmul.f32 %v5204_v54, %v5204_v54  ;;  %v11240_v10 = vpop.xlane.xlu1 %3268 }
 0x4db   : > { %v2885_v25 = vadd.s32 %v14516_v21, %v2882_v29  ;;  %v3243_v27 = vsel %vm3242_vm1, %v14518_v16, inf  ;;  %v11234_v47 = vmul.f32 %v5205_v24, %v5205_v24  ;;  %v11238_v30 = vadd.s32 %v14519_v59, %v2910_v61  ;;  %14520 = vst [vmem:[#allocation82_spill] sm:$0xff] %v11240_v10  ;;  %v6879_v59 = vld [vmem:[%s7577_s15 + $0x600] sm:$0xff] }
 0x4dc   : > { %vm3348_vm4 = vcmp.eq.s32.totalorder %v2731_v28, 1  ;;  %v11243_v9 = vadd.s32 %v14521_v6, %v2756_v34  ;;  %vm3990_vm5 = vcmp.eq.s32.totalorder %v2731_v28, 2  ;;  %v6890_v28 = vld [vmem:[%s7577_s15 + $0x418] sm:$0xff] }
 0x4dd   : > { %vm3359_vm2 = vcmp.eq.s32.totalorder %v2885_v25, 1  ;;  %vm4001_vm3 = vcmp.eq.s32.totalorder %v2885_v25, 2  ;;  %3244 = vmin.xlane.f32.xlu0 %v3243_v27  ;;  %vm3361_vm6 = vcmp.eq.s32.totalorder %v11238_v30, 1  ;;  %vm4003_vm7 = vcmp.eq.s32.totalorder %v11238_v30, 2 }
 0x4de   : > { %v3773_v42 = vsel %vm3359_vm2, %v9129_v45, %v9125_v7  ;;  %v3774_v54 = vsel %vm3359_vm2, %v9142_v2, %v9132_v41  ;;  %v3775_v24 = vsel %vm3359_vm2, %v9146_v55, %v9135_v20  ;;  %v3776_v29 = vsel %vm3359_vm2, %v9149_v19, %v9161_v14  ;;  %v11280_v15 = vpop.xlane.xlu1 %2782 }
 0x4df   : > { %v3777_v32 = vsel %vm3359_vm2, %v9152_v11, %v9168_v13  ;;  %v3778_v61 = vsel %vm3359_vm2, %v9158_v40, %v9171_v49  ;;  %v4384_v34 = vsel %vm4001_vm3, %v9175_v39, %v3773_v42  ;;  %v4385_v21 = vsel %vm4001_vm3, %v9189_v4, %v3774_v54  ;;  %v6880_v42 = vld [vmem:[%s7577_s15 + $0x608] sm:$0xff] }
 0x4e0   : > { %v4386_v25 = vsel %vm4001_vm3, %v9205_v53, %v3775_v24  ;;  %v4387_v38 = vsel %vm4001_vm3, %v9208_v43, %v3776_v29  ;;  %v4388_v16 = vsel %vm4001_vm3, %v14305_v52, %v3777_v32  ;;  %v4389_v27 = vsel %vm4001_vm3, %v14306_v60, %v3778_v61  ;;  %4768 = vst [vmem:[%s9411_s24 + $0x600] sm:$0xff] %v4384_v34  ;;  %v6881_v24 = vld [vmem:[%s7577_s15 + $0x610] sm:$0xff] }
 0x4e1   : > { %4769 = vst [vmem:[%s9411_s24 + $0x608] sm:$0xff] %v4385_v21  ;;  %4770 = vst [vmem:[%s9411_s24 + $0x610] sm:$0xff] %v4386_v25  ;;  %v5344_v6 = vsub.f32 %v4384_v34, %v6879_v59  ;;  %v5345_v54 = vsub.f32 %v4385_v21, %v6880_v42  ;;  %v5346_v3 = vsub.f32 %v4386_v25, %v6881_v24  ;;  %v6883_v34 = vld [vmem:[%s7577_s15 + $0x620] sm:$0xff]  ;;  %v6884_v21 = vld [vmem:[%s7577_s15 + $0x628] sm:$0xff]  ;;  %vm3350_vm9 = vcmp.eq.s32.totalorder %v11243_v9, 1 }
 0x4e2   : > { %4771 = vst [vmem:[%s9411_s24 + $0x618] sm:$0xff] %v4387_v38  ;;  %4772 = vst [vmem:[%s9411_s24 + $0x620] sm:$0xff] %v4388_v16  ;;  %v5347_v29 = vsub.f32 %v4387_v38, %v6882_v63  ;;  %v3707_v32 = vsel %vm3348_vm4, %v9129_v45, %v9125_v7  ;;  %v3708_v61 = vsel %vm3348_vm4, %v9142_v2, %v9132_v41  ;;  %vm3992_vm10 = vcmp.eq.s32.totalorder %v11243_v9, 2 }
 0x4e3   : > { %4773 = vst [vmem:[%s9411_s24 + $0x628] sm:$0xff] %v4389_v27  ;;  %v11283_v59 = vsub.f32 %v4388_v16, %v6883_v34  ;;  %v11286_v25 = vsub.f32 %v4389_v27, %v6884_v21  ;;  %v11288_v63 = vmul.f32 %v5344_v6, %v5344_v6  ;;  %v11290_v38 = vmul.f32 %v5345_v54, %v5345_v54 }
 0x4e4   : > { %v11292_v42 = vmul.f32 %v5346_v3, %v5346_v3  ;;  %v11294_v24 = vmul.f32 %v5347_v29, %v5347_v29  ;;  %v3709_v16 = vsel %vm3348_vm4, %v9146_v55, %v9135_v20  ;;  %v3710_v27 = vsel %vm3348_vm4, %v9149_v19, %v9161_v14 }
 0x4e5   : > { %14522 = vst [vmem:[#allocation81_spill] sm:$0xff] %v11288_v63  ;;  %14523 = vst [vmem:[#allocation61_spill] sm:$0xff] %v11290_v38  ;;  %v3711_v6 = vsel %vm3348_vm4, %v9152_v11, %v9168_v13  ;;  %v3712_v3 = vsel %vm3348_vm4, %v9158_v40, %v9171_v49  ;;  %v4318_v54 = vsel %vm3990_vm5, %v9175_v39, %v3707_v32  ;;  %v6885_v32 = vld [vmem:[%s7577_s15 + $0x3f0] sm:$0xff]  ;;  %v6887_v38 = vld [vmem:[%s7577_s15 + $0x400] sm:$0xff] }
 0x4e6   : > { %14524 = vst [vmem:[#allocation98_spill] sm:$0xff] %v11292_v42  ;;  %14525 = vst [vmem:[#allocation83_spill] sm:$0xff] %v11294_v24  ;;  %v4319_v29 = vsel %vm3990_vm5, %v9189_v4, %v3708_v61  ;;  %v4320_v34 = vsel %vm3990_vm5, %v9205_v53, %v3709_v16  ;;  %v4321_v21 = vsel %vm3990_vm5, %v9208_v43, %v3710_v27  ;;  %v6886_v16 = vld [vmem:[%s7577_s15 + $0x3f8] sm:$0xff]  ;;  %v6888_v63 = vld [vmem:[%s7577_s15 + $0x408] sm:$0xff] }
 0x4e7   : > { %v4322_v1 = vsel %vm3990_vm5, %v14305_v52, %v3711_v6  ;;  %v4323_v24 = vsel %vm3990_vm5, %v14306_v60, %v3712_v3  ;;  %4702 = vst [vmem:[%s9411_s24 + $0x3f0] sm:$0xff] %v4318_v54  ;;  %4703 = vst [vmem:[%s9411_s24 + $0x3f8] sm:$0xff] %v4319_v29  ;;  %v5212_v61 = vsub.f32 %v4318_v54, %v6885_v32  ;;  %v6889_v6 = vld [vmem:[%s7577_s15 + $0x410] sm:$0xff]  ;;  %v11334_v3 = vpop.xlane.xlu1 %3296 }
 0x4e8   : > { %4704 = vst [vmem:[%s9411_s24 + $0x400] sm:$0xff] %v4320_v34  ;;  %4705 = vst [vmem:[%s9411_s24 + $0x408] sm:$0xff] %v4321_v21  ;;  %v5213_v42 = vsub.f32 %v4319_v29, %v6886_v16  ;;  %v5214_v27 = vsub.f32 %v4320_v34, %v6887_v38  ;;  %v5215_v5 = vsub.f32 %v4321_v21, %v6888_v63  ;;  %v6891_v16 = vld [vmem:[%s7577_s15 + $0x660] sm:$0xff] }
 0x4e9   : > { %4706 = vst [vmem:[%s9411_s24 + $0x410] sm:$0xff] %v4322_v1  ;;  %4707 = vst [vmem:[%s9411_s24 + $0x418] sm:$0xff] %v4323_v24  ;;  %v5216_v62 = vsub.f32 %v4322_v1, %v6889_v6  ;;  %v5217_v33 = vsub.f32 %v4323_v24, %v6890_v28  ;;  %v5218_v48 = vmul.f32 %v5212_v61, %v5212_v61  ;;  %v6892_v6 = vld [vmem:[%s7577_s15 + $0x668] sm:$0xff] }
 0x4ea   : > { %14526 = vst [vmem:[#allocation100_spill] sm:$0xff] %v11334_v3  ;;  %v5219_v35 = vmul.f32 %v5213_v42, %v5213_v42  ;;  %v5220_v0 = vmul.f32 %v5214_v27, %v5214_v27  ;;  %v5221_v54 = vmul.f32 %v5215_v5, %v5215_v5  ;;  %v3785_v63 = vsel %vm3361_vm6, %v9129_v45, %v9125_v7 }
 0x4eb   : > { %v5222_v32 = vmul.f32 %v5216_v62, %v5216_v62  ;;  %v5223_v29 = vmul.f32 %v5217_v33, %v5217_v33  ;;  %v3786_v1 = vsel %vm3361_vm6, %v9142_v2, %v9132_v41  ;;  %v11345_v38 = vadd.f32 %v5218_v48, %v11216_v8  ;;  %v14527_v48 = vld [vmem:[#allocation60_spill] sm:$0xff]  ;;  %v11400_v61 = vpop.xlane.xlu1 %2810 }
 0x4ec   : > { %v11348_v24 = vadd.f32 %v5219_v35, %v11218_v36  ;;  %v11351_v62 = vadd.f32 %v5220_v0, %v11223_v51  ;;  %v11354_v33 = vadd.f32 %v5221_v54, %v11227_v58  ;;  %v3787_v35 = vsel %vm3361_vm6, %v9146_v55, %v9135_v20  ;;  %v6893_v54 = vld [vmem:[%s7577_s15 + $0x670] sm:$0xff] }
 0x4ed   : > { %v11357_v5 = vadd.f32 %v5222_v32, %v11232_v17  ;;  %v11360_v42 = vadd.f32 %v5223_v29, %v11234_v47  ;;  %v3788_v0 = vsel %vm3361_vm6, %v9149_v19, %v9161_v14  ;;  %vm3270_vm8 = vcmp.eq.f32.partialorder %v14527_v48, %v11240_v10  ;;  %v6894_v29 = vld [vmem:[%s7577_s15 + $0x678] sm:$0xff] }
 0x4ee   : > { %v3789_v8 = vsel %vm3361_vm6, %v9152_v11, %v9168_v13  ;;  %v3790_v36 = vsel %vm3361_vm6, %v9158_v40, %v9171_v49  ;;  %v4396_v51 = vsel %vm4003_vm7, %v9175_v39, %v3785_v63  ;;  %v4397_v58 = vsel %vm4003_vm7, %v9189_v4, %v3786_v1  ;;  %v14540_v48 = vld [vmem:[#allocation37_spill] sm:$0xff] }
 0x4ef   : > { %v4398_v17 = vsel %vm4003_vm7, %v9205_v53, %v3787_v35  ;;  %v4399_v47 = vsel %vm4003_vm7, %v9208_v43, %v3788_v0  ;;  %v4400_v34 = vsel %vm4003_vm7, %v14305_v52, %v3789_v8  ;;  %v4401_v21 = vsel %vm4003_vm7, %v14306_v60, %v3790_v36  ;;  %4780 = vst [vmem:[%s9411_s24 + $0x660] sm:$0xff] %v4396_v51  ;;  %v6895_v35 = vld [vmem:[%s7577_s15 + $0x680] sm:$0xff]  ;;  %v6896_v8 = vld [vmem:[%s7577_s15 + $0x688] sm:$0xff]  ;;  %v6920_v10 = vld [vmem:[%s7577_s15 + $0x538] sm:$0xff] }
 0x4f0   : > { %4781 = vst [vmem:[%s9411_s24 + $0x668] sm:$0xff] %v4397_v58  ;;  %4782 = vst [vmem:[%s9411_s24 + $0x670] sm:$0xff] %v4398_v17  ;;  %v5368_v27 = vsub.f32 %v4396_v51, %v6891_v16  ;;  %v5369_v28 = vsub.f32 %v4397_v58, %v6892_v6  ;;  %v5370_v32 = vsub.f32 %v4398_v17, %v6893_v54 }
 0x4f1   : > { %4783 = vst [vmem:[%s9411_s24 + $0x678] sm:$0xff] %v4399_v47  ;;  %4784 = vst [vmem:[%s9411_s24 + $0x680] sm:$0xff] %v4400_v34  ;;  %v5371_v63 = vsub.f32 %v4399_v47, %v6894_v29  ;;  %v11412_v30 = vmul.f32 %v11283_v59, %v11283_v59  ;;  %v11416_v1 = vmul.f32 %v11286_v25, %v11286_v25 }
 0x4f2   : > { %4785 = vst [vmem:[%s9411_s24 + $0x688] sm:$0xff] %v4401_v21  ;;  %v5372_v0 = vsub.f32 %v4400_v34, %v6895_v35  ;;  %v11421_v36 = vsub.f32 %v4401_v21, %v6896_v8  ;;  %v11423_v51 = vmul.f32 %v5368_v27, %v5368_v27  ;;  %v11425_v58 = vmul.f32 %v5369_v28, %v5369_v28  ;;  %v6897_v35 = vld [vmem:[%s7577_s15 + $0x450] sm:$0xff] }
 0x4f3   : > { %14528 = vst [vmem:[#allocation62_spill] sm:$0xff] %v11412_v30  ;;  %14529 = vst [vmem:[#allocation94_spill] sm:$0xff] %v11416_v1  ;;  %v11428_v59 = vmul.f32 %v5370_v32, %v5370_v32  ;;  %v11430_v17 = vmul.f32 %v5371_v63, %v5371_v63  ;;  %v3719_v25 = vsel %vm3350_vm9, %v9129_v45, %v9125_v7  ;;  %v11448_v32 = vpop.xlane.xlu1 %2838 }
 0x4f4   : > { %14530 = vst [vmem:[#allocation63_spill] sm:$0xff] %v11423_v51  ;;  %14531 = vst [vmem:[#allocation99_spill] sm:$0xff] %v11425_v58  ;;  %v3720_v47 = vsel %vm3350_vm9, %v9142_v2, %v9132_v41  ;;  %v3721_v34 = vsel %vm3350_vm9, %v9146_v55, %v9135_v20  ;;  %v3722_v9 = vsel %vm3350_vm9, %v9149_v19, %v9161_v14  ;;  %v6901_v58 = vld [vmem:[%s7577_s15 + $0x470] sm:$0xff]  ;;  %v6902_v51 = vld [vmem:[%s7577_s15 + $0x478] sm:$0xff] }
 0x4f5   : > { %14532 = vst [vmem:[#allocation102_spill] sm:$0xff] %v11428_v59  ;;  %14533 = vst [vmem:[#allocation101_spill] sm:$0xff] %v11430_v17  ;;  %v3723_v21 = vsel %vm3350_vm9, %v9152_v11, %v9168_v13  ;;  %v3724_v16 = vsel %vm3350_vm9, %v9158_v40, %v9171_v49  ;;  %v4330_v27 = vsel %vm3992_vm10, %v9175_v39, %v3719_v25  ;;  %v6898_v25 = vld [vmem:[%s7577_s15 + $0x458] sm:$0xff]  ;;  %v6900_v17 = vld [vmem:[%s7577_s15 + $0x468] sm:$0xff] }
 0x4f6   : > { %v4331_v6 = vsel %vm3992_vm10, %v9189_v4, %v3720_v47  ;;  %v4332_v28 = vsel %vm3992_vm10, %v9205_v53, %v3721_v34  ;;  %v4333_v54 = vsel %vm3992_vm10, %v9208_v43, %v3722_v9  ;;  %v4334_v29 = vsel %vm3992_vm10, %v14305_v52, %v3723_v21  ;;  %4714 = vst [vmem:[%s9411_s24 + $0x450] sm:$0xff] %v4330_v27  ;;  %v6899_v34 = vld [vmem:[%s7577_s15 + $0x460] sm:$0xff] }
 0x4f7   : > { %v4335_v63 = vsel %vm3992_vm10, %v14306_v60, %v3724_v16  ;;  %4715 = vst [vmem:[%s9411_s24 + $0x458] sm:$0xff] %v4331_v6  ;;  %4716 = vst [vmem:[%s9411_s24 + $0x460] sm:$0xff] %v4332_v28  ;;  %v5236_v8 = vsub.f32 %v4330_v27, %v6897_v35  ;;  %v5237_v47 = vsub.f32 %v4331_v6, %v6898_v25  ;;  %v2937_v16 = vpop.xlane.xlu0 %2936  ;;  %v3271_v27 = vsel %vm3270_vm8, %v14535_v12, inf }
 0x4f8   : > { %4717 = vst [vmem:[%s9411_s24 + $0x468] sm:$0xff] %v4333_v54  ;;  %4718 = vst [vmem:[%s9411_s24 + $0x470] sm:$0xff] %v4334_v29  ;;  %v5238_v9 = vsub.f32 %v4332_v28, %v6899_v34  ;;  %v5239_v59 = vsub.f32 %v4333_v54, %v6900_v17  ;;  %v5240_v21 = vsub.f32 %v4334_v29, %v6901_v58  ;;  %3272 = vmin.xlane.f32.xlu0 %v3271_v27  ;;  %v14536_v58 = vld [vmem:[#allocation77_spill] sm:$0xff]  ;;  %v14537_v29 = vld [vmem:[#allocation56_spill] sm:$0xff] }
 0x4f9   : > { %4719 = vst [vmem:[%s9411_s24 + $0x478] sm:$0xff] %v4335_v63  ;;  %v5241_v1 = vsub.f32 %v4335_v63, %v6902_v51  ;;  %v11464_v30 = vmul.f32 %v5372_v0, %v5372_v0  ;;  %v5242_v26 = vmul.f32 %v5236_v8, %v5236_v8  ;;  %v5243_v56 = vmul.f32 %v5237_v47, %v5237_v47  ;;  %v14538_v8 = vld [vmem:[#allocation84_spill] sm:$0xff]  ;;  %v14539_v34 = vld [vmem:[#allocation35_spill] sm:$0xff] }
 0x4fa   : > { %v5244_v6 = vmul.f32 %v5238_v9, %v5238_v9  ;;  %v5245_v35 = vmul.f32 %v5239_v59, %v5239_v59  ;;  %v5246_v25 = vmul.f32 %v5240_v21, %v5240_v21  ;;  %v2784_v51 = vcvt.f32.s32 %v11280_v15  ;;  %v11477_v9 = vpop.xlane.xlu1 %2866 }
 0x4fb   : > { %14534 = vst [vmem:[#allocation105_spill] sm:$0xff] %v11464_v30  ;;  %v5247_v28 = vmul.f32 %v5241_v1, %v5241_v1  ;;  %v5794_v17 = vadd.f32 %v5242_v26, %v10685_v22  ;;  %v5795_v54 = vadd.f32 %v5243_v56, %v14536_v58  ;;  %v2938_v0 = vcvt.f32.s32 %v2937_v16  ;;  %v14541_v22 = vld [vmem:[#allocation66_spill] sm:$0xff]  ;;  %v14542_v56 = vld [vmem:[#allocation67_spill] sm:$0xff] }
 0x4fc   : > { %v5796_v63 = vadd.f32 %v5244_v6, %v14537_v29  ;;  %v5797_v47 = vadd.f32 %v5245_v35, %v14538_v8  ;;  %v5798_v30 = vadd.f32 %v5246_v25, %v14539_v34  ;;  %v2787_v26 = vadd.s32 %v14541_v22, %v2784_v51  ;;  %v6903_v51 = vld [vmem:[%s7577_s15 + $0x4b0] sm:$0xff]  ;;  %v6904_v29 = vld [vmem:[%s7577_s15 + $0x4b8] sm:$0xff]  ;;  %v6905_v8 = vld [vmem:[%s7577_s15 + $0x4c0] sm:$0xff] }
 0x4fd   : > { %v5799_v12 = vadd.f32 %v5247_v28, %v14540_v48  ;;  %v5950_v1 = vadd.f32 %v5794_v17, %v11345_v38  ;;  %v5951_v59 = vadd.f32 %v5795_v54, %v11348_v24  ;;  %v11483_v21 = vadd.s32 %v14542_v56, %v2938_v0  ;;  %v6906_v34 = vld [vmem:[%s7577_s15 + $0x4c8] sm:$0xff] }
 0x4fe   : > { %v5952_v15 = vadd.f32 %v5796_v63, %v11351_v62  ;;  %v5953_v16 = vadd.f32 %v5797_v47, %v11354_v33  ;;  %v5954_v27 = vadd.f32 %v5798_v30, %v11357_v5  ;;  %vm3352_vm11 = vcmp.eq.s32.totalorder %v2787_v26, 1  ;;  %v11523_v30 = vpop.xlane.xlu1 %2894 }
 0x4ff   : > { %v5955_v6 = vadd.f32 %v5799_v12, %v11360_v42  ;;  %v11490_v35 = vadd.f32 %v5950_v1, %v11069_v23  ;;  %v11493_v38 = vadd.f32 %v5951_v59, %v11072_v31  ;;  %vm3994_vm12 = vcmp.eq.s32.totalorder %v2787_v26, 2  ;;  %v6907_v12 = vld [vmem:[%s7577_s15 + $0x4d0] sm:$0xff]  ;;  %v6908_v59 = vld [vmem:[%s7577_s15 + $0x4d8] sm:$0xff] }
 0x500   : > { %v11496_v24 = vadd.f32 %v5952_v15, %v11077_v44  ;;  %v11499_v25 = vadd.f32 %v5953_v16, %v11080_v57  ;;  %v11502_v62 = vadd.f32 %v5954_v27, %v11083_v46  ;;  %v3731_v23 = vsel %vm3352_vm11, %v9129_v45, %v9125_v7 }
 0x501   : > { %v11505_v33 = vadd.f32 %v5955_v6, %v11086_v18  ;;  %v3732_v31 = vsel %vm3352_vm11, %v9142_v2, %v9132_v41  ;;  %v3733_v44 = vsel %vm3352_vm11, %v9146_v55, %v9135_v20  ;;  %v3734_v57 = vsel %vm3352_vm11, %v9149_v19, %v9161_v14 }
 0x502   : > { %v3735_v46 = vsel %vm3352_vm11, %v9152_v11, %v9168_v13  ;;  %v3736_v18 = vsel %vm3352_vm11, %v9158_v40, %v9171_v49  ;;  %v4342_v5 = vsel %vm3994_vm12, %v9175_v39, %v3731_v23  ;;  %v4343_v42 = vsel %vm3994_vm12, %v9189_v4, %v3732_v31 }
 0x503   : > { %v4344_v28 = vsel %vm3994_vm12, %v9205_v53, %v3733_v44  ;;  %v4345_v17 = vsel %vm3994_vm12, %v9208_v43, %v3734_v57  ;;  %v4346_v58 = vsel %vm3994_vm12, %v14305_v52, %v3735_v46  ;;  %v4347_v54 = vsel %vm3994_vm12, %v14306_v60, %v3736_v18  ;;  %4726 = vst [vmem:[%s9411_s24 + $0x4b0] sm:$0xff] %v4342_v5  ;;  %v14543_v44 = vld [vmem:[#allocation38_spill] sm:$0xff] }
 0x504   : > { %4727 = vst [vmem:[%s9411_s24 + $0x4b8] sm:$0xff] %v4343_v42  ;;  %4728 = vst [vmem:[%s9411_s24 + $0x4c0] sm:$0xff] %v4344_v28  ;;  %v5260_v0 = vsub.f32 %v4342_v5, %v6903_v51  ;;  %v5261_v63 = vsub.f32 %v4343_v42, %v6904_v29  ;;  %v5262_v47 = vsub.f32 %v4344_v28, %v6905_v8  ;;  %vm3363_vm13 = vcmp.eq.s32.totalorder %v11483_v21, 1  ;;  %v14544_v46 = vld [vmem:[#allocation58_spill] sm:$0xff]  ;;  %v14545_v5 = vld [vmem:[#allocation44_spill] sm:$0xff] }
 0x505   : > { %4729 = vst [vmem:[%s9411_s24 + $0x4c8] sm:$0xff] %v4345_v17  ;;  %4730 = vst [vmem:[%s9411_s24 + $0x4d0] sm:$0xff] %v4346_v58  ;;  %v5263_v48 = vsub.f32 %v4345_v17, %v6906_v34  ;;  %v5264_v1 = vsub.f32 %v4346_v58, %v6907_v12  ;;  %v5265_v22 = vsub.f32 %v4347_v54, %v6908_v59  ;;  %vm4005_vm14 = vcmp.eq.s32.totalorder %v11483_v21, 2  ;;  %v14546_v28 = vld [vmem:[#allocation78_spill] sm:$0xff]  ;;  %v2923_v58 = vpop.xlane.xlu1 %2922 }
 0x506   : > { %4731 = vst [vmem:[%s9411_s24 + $0x4d8] sm:$0xff] %v4347_v54  ;;  %v5266_v26 = vmul.f32 %v5260_v0, %v5260_v0  ;;  %v5267_v56 = vmul.f32 %v5261_v63, %v5261_v63  ;;  %v5268_v15 = vmul.f32 %v5262_v47, %v5262_v47  ;;  %v3797_v23 = vsel %vm3363_vm13, %v9129_v45, %v9125_v7  ;;  %v14547_v54 = vld [vmem:[#allocation43_spill] sm:$0xff]  ;;  %v14548_v0 = vld [vmem:[#allocation41_spill] sm:$0xff] }
 0x507   : > { %v5269_v16 = vmul.f32 %v5263_v48, %v5263_v48  ;;  %v5270_v27 = vmul.f32 %v5264_v1, %v5264_v1  ;;  %v5271_v6 = vmul.f32 %v5265_v22, %v5265_v22  ;;  %v3798_v31 = vsel %vm3363_vm13, %v9142_v2, %v9132_v41  ;;  %v2965_v1 = vpop.xlane.xlu0 %2964 }
 0x508   : > { %v11556_v57 = vadd.f32 %v5266_v26, %v14543_v44  ;;  %v11559_v18 = vadd.f32 %v5267_v56, %v14544_v46  ;;  %v11562_v42 = vadd.f32 %v5268_v15, %v14545_v5  ;;  %v3799_v63 = vsel %vm3363_vm13, %v9146_v55, %v9135_v20  ;;  %v6909_v15 = vld [vmem:[%s7577_s15 + $0x6c0] sm:$0xff]  ;;  %v6912_v44 = vld [vmem:[%s7577_s15 + $0x6d8] sm:$0xff] }
 0x509   : > { %v11565_v17 = vadd.f32 %v5269_v16, %v14546_v28  ;;  %v11568_v51 = vadd.f32 %v5270_v27, %v14547_v54  ;;  %v11571_v29 = vadd.f32 %v5271_v6, %v14548_v0  ;;  %v3800_v8 = vsel %vm3363_vm13, %v9149_v19, %v9161_v14  ;;  %v6910_v27 = vld [vmem:[%s7577_s15 + $0x6c8] sm:$0xff]  ;;  %v6913_v5 = vld [vmem:[%s7577_s15 + $0x6e0] sm:$0xff] }
 0x50a   : > { %v3801_v47 = vsel %vm3363_vm13, %v9152_v11, %v9168_v13  ;;  %v3802_v34 = vsel %vm3363_vm13, %v9158_v40, %v9171_v49  ;;  %v4408_v48 = vsel %vm4005_vm14, %v9175_v39, %v3797_v23  ;;  %v4409_v12 = vsel %vm4005_vm14, %v9189_v4, %v3798_v31  ;;  %v6911_v23 = vld [vmem:[%s7577_s15 + $0x6d0] sm:$0xff]  ;;  %v6914_v54 = vld [vmem:[%s7577_s15 + $0x6e8] sm:$0xff] }
 0x50b   : > { %v4410_v59 = vsel %vm4005_vm14, %v9205_v53, %v3799_v63  ;;  %v4411_v22 = vsel %vm4005_vm14, %v9208_v43, %v3800_v8  ;;  %v4412_v26 = vsel %vm4005_vm14, %v14305_v52, %v3801_v47  ;;  %v4413_v56 = vsel %vm4005_vm14, %v14306_v60, %v3802_v34  ;;  %4792 = vst [vmem:[%s9411_s24 + $0x6c0] sm:$0xff] %v4408_v48  ;;  %v14549_v63 = vld [vmem:[#allocation108_spill] sm:$0xff] }
 0x50c   : > { %4793 = vst [vmem:[%s9411_s24 + $0x6c8] sm:$0xff] %v4409_v12  ;;  %4794 = vst [vmem:[%s9411_s24 + $0x6d0] sm:$0xff] %v4410_v59  ;;  %v5392_v16 = vsub.f32 %v4408_v48, %v6909_v15  ;;  %v5393_v6 = vsub.f32 %v4409_v12, %v6910_v27  ;;  %v5394_v31 = vsub.f32 %v4410_v59, %v6911_v23  ;;  %v2993_v12 = vpop.xlane.xlu0 %2992  ;;  %v2951_v59 = vpop.xlane.xlu1 %2950  ;;  %v2840_v27 = vcvt.f32.s32 %v11448_v32  ;;  %v14559_v48 = vld [vmem:[#allocation51_spill] sm:$0xff] }
 0x50d   : > { %4795 = vst [vmem:[%s9411_s24 + $0x6d8] sm:$0xff] %v4411_v22  ;;  %4796 = vst [vmem:[%s9411_s24 + $0x6e0] sm:$0xff] %v4412_v26  ;;  %v5395_v46 = vsub.f32 %v4411_v22, %v6912_v44  ;;  %v11619_v21 = vmul.f32 %v11421_v36, %v11421_v36  ;;  %v5396_v28 = vsub.f32 %v4412_v26, %v6913_v5  ;;  %v2868_v23 = vcvt.f32.s32 %v11477_v9  ;;  %v14561_v32 = vld [vmem:[#allocation91_spill] sm:$0xff]  ;;  %v14562_v9 = vld [vmem:[#allocation68_spill] sm:$0xff] }
 0x50e   : > { %4797 = vst [vmem:[%s9411_s24 + $0x6e8] sm:$0xff] %v4413_v56  ;;  %v5397_v0 = vsub.f32 %v4413_v56, %v6914_v54  ;;  %vm3298_vm15 = vcmp.eq.f32.partialorder %v14549_v63, %v11334_v3  ;;  %v11625_v8 = vmul.f32 %v5392_v16, %v5392_v16  ;;  %v11627_v47 = vmul.f32 %v5393_v6, %v5393_v6  ;;  %v14556_v56 = vld [vmem:[#allocation86_spill] sm:$0xff]  ;;  %v14558_v63 = vld [vmem:[#allocation87_spill] sm:$0xff] }
 0x50f   : > { %v11629_v34 = vmul.f32 %v5394_v31, %v5394_v31  ;;  %v11632_v22 = vmul.f32 %v5395_v46, %v5395_v46  ;;  %v11634_v36 = vmul.f32 %v5396_v28, %v5396_v28  ;;  %v3299_v15 = vsel %vm3298_vm15, %v14556_v56, inf  ;;  %v14557_v54 = vld [vmem:[#allocation50_spill] sm:$0xff] }
 0x510   : > { %14550 = vst [vmem:[#allocation104_spill] sm:$0xff] %v11625_v8  ;;  %14551 = vst [vmem:[#allocation55_spill] sm:$0xff] %v11627_v47  ;;  %v11636_v26 = vmul.f32 %v5397_v0, %v5397_v0  ;;  %3300 = vmin.xlane.f32.xlu0 %v3299_v15  ;;  %v2812_v16 = vcvt.f32.s32 %v11400_v61  ;;  %v2966_v6 = vcvt.f32.s32 %v2965_v1  ;;  %v2896_v31 = vcvt.f32.s32 %v11523_v30  ;;  %v14560_v15 = vld [vmem:[#allocation49_spill] sm:$0xff]  ;;  %v14563_v30 = vld [vmem:[#allocation92_spill] sm:$0xff] }
 0x511   : > { %14552 = vst [vmem:[#allocation103_spill] sm:$0xff] %v11629_v34  ;;  %14553 = vst [vmem:[#allocation36_spill] sm:$0xff] %v11632_v22  ;;  %v2924_v44 = vcvt.f32.s32 %v2923_v58  ;;  %v2994_v5 = vcvt.f32.s32 %v2993_v12  ;;  %v2952_v46 = vcvt.f32.s32 %v2951_v59  ;;  %v11645_v0 = vadd.s32 %v14558_v63, %v2840_v27  ;;  %v14564_v12 = vld [vmem:[#allocation69_spill] sm:$0xff]  ;;  %v14570_v22 = vld [vmem:[#allocation18_spill] sm:$0xff] }
 0x512   : > { %14554 = vst [vmem:[#allocation107_spill] sm:$0xff] %v11634_v36  ;;  %14555 = vst [vmem:[#allocation106_spill] sm:$0xff] %v11636_v26  ;;  %v2815_v28 = vadd.s32 %v14557_v54, %v2812_v16  ;;  %v11648_v56 = vadd.s32 %v14559_v48, %v2966_v6  ;;  %v11651_v61 = vadd.s32 %v14560_v15, %v2868_v23  ;;  %v6915_v15 = vld [vmem:[%s7577_s15 + $0x510] sm:$0xff] }
 0x513   : > { %v11654_v1 = vadd.s32 %v14561_v32, %v2896_v31  ;;  %v11657_v3 = vadd.s32 %v14562_v9, %v2924_v44  ;;  %v11660_v58 = vadd.s32 %v14563_v30, %v2994_v5  ;;  %v11663_v59 = vadd.s32 %v14564_v12, %v2952_v46  ;;  %v6916_v9 = vld [vmem:[%s7577_s15 + $0x518] sm:$0xff]  ;;  %v6917_v12 = vld [vmem:[%s7577_s15 + $0x520] sm:$0xff] }
 0x514   : > { %vm3354_vm0 = vcmp.eq.s32.totalorder %v2815_v28, 1  ;;  %vm3996_vm1 = vcmp.eq.s32.totalorder %v2815_v28, 2  ;;  %vm3356_vm2 = vcmp.eq.s32.totalorder %v11645_v0, 1  ;;  %vm3998_vm3 = vcmp.eq.s32.totalorder %v11645_v0, 2  ;;  %v6926_v0 = vld [vmem:[%s7577_s15 + $0x598] sm:$0xff] }
 0x515   : > { %v3743_v48 = vsel %vm3354_vm0, %v9129_v45, %v9125_v7  ;;  %v3744_v16 = vsel %vm3354_vm0, %v9142_v2, %v9132_v41  ;;  %v3745_v27 = vsel %vm3354_vm0, %v9146_v55, %v9135_v20  ;;  %v3746_v6 = vsel %vm3354_vm0, %v9149_v19, %v9161_v14  ;;  %v14582_v8 = vld [vmem:[#allocation96_spill] sm:$0xff] }
 0x516   : > { %v3747_v23 = vsel %vm3354_vm0, %v9152_v11, %v9168_v13  ;;  %v3748_v31 = vsel %vm3354_vm0, %v9158_v40, %v9171_v49  ;;  %v4354_v44 = vsel %vm3996_vm1, %v9175_v39, %v3743_v48  ;;  %v4355_v5 = vsel %vm3996_vm1, %v9189_v4, %v3744_v16  ;;  %v6918_v16 = vld [vmem:[%s7577_s15 + $0x528] sm:$0xff] }
 0x517   : > { %v4356_v46 = vsel %vm3996_vm1, %v9205_v53, %v3745_v27  ;;  %v4357_v54 = vsel %vm3996_vm1, %v9208_v43, %v3746_v6  ;;  %v4358_v28 = vsel %vm3996_vm1, %v14305_v52, %v3747_v23  ;;  %v4359_v63 = vsel %vm3996_vm1, %v14306_v60, %v3748_v31  ;;  %4738 = vst [vmem:[%s9411_s24 + $0x510] sm:$0xff] %v4354_v44  ;;  %v6919_v6 = vld [vmem:[%s7577_s15 + $0x530] sm:$0xff] }
 0x518   : > { %4739 = vst [vmem:[%s9411_s24 + $0x518] sm:$0xff] %v4355_v5  ;;  %4740 = vst [vmem:[%s9411_s24 + $0x520] sm:$0xff] %v4356_v46  ;;  %v5284_v32 = vsub.f32 %v4354_v44, %v6915_v15  ;;  %v5285_v30 = vsub.f32 %v4355_v5, %v6916_v9  ;;  %v5286_v48 = vsub.f32 %v4356_v46, %v6917_v12  ;;  %vm3365_vm4 = vcmp.eq.s32.totalorder %v11648_v56, 1 }
 0x519   : > { %4741 = vst [vmem:[%s9411_s24 + $0x528] sm:$0xff] %v4357_v54  ;;  %4742 = vst [vmem:[%s9411_s24 + $0x530] sm:$0xff] %v4358_v28  ;;  %v5287_v27 = vsub.f32 %v4357_v54, %v6918_v16  ;;  %v5288_v23 = vsub.f32 %v4358_v28, %v6919_v6  ;;  %v5289_v26 = vsub.f32 %v4359_v63, %v6920_v10  ;;  %v14566_v6 = vld [vmem:[#allocation48_spill] sm:$0xff]  ;;  %vm4007_vm5 = vcmp.eq.s32.totalorder %v11648_v56, 2  ;;  %v6932_v56 = vld [vmem:[%s7577_s15 + $0x748] sm:$0xff] }
 0x51a   : > { %4743 = vst [vmem:[%s9411_s24 + $0x538] sm:$0xff] %v4359_v63  ;;  %v3755_v31 = vsel %vm3356_vm2, %v9129_v45, %v9125_v7  ;;  %v3756_v44 = vsel %vm3356_vm2, %v9142_v2, %v9132_v41  ;;  %v5290_v15 = vmul.f32 %v5284_v32, %v5284_v32  ;;  %v5291_v5 = vmul.f32 %v5285_v30, %v5285_v30  ;;  %v14565_v63 = vld [vmem:[#allocation46_spill] sm:$0xff]  ;;  %v14567_v32 = vld [vmem:[#allocation80_spill] sm:$0xff] }
 0x51b   : > { %v5292_v9 = vmul.f32 %v5286_v48, %v5286_v48  ;;  %v5293_v46 = vmul.f32 %v5287_v27, %v5287_v27  ;;  %v5294_v12 = vmul.f32 %v5288_v23, %v5288_v23  ;;  %v5295_v54 = vmul.f32 %v5289_v26, %v5289_v26  ;;  %v14568_v48 = vld [vmem:[#allocation59_spill] sm:$0xff]  ;;  %v14569_v23 = vld [vmem:[#allocation45_spill] sm:$0xff] }
 0x51c   : > { %v3757_v10 = vsel %vm3356_vm2, %v9146_v55, %v9135_v20  ;;  %v3758_v28 = vsel %vm3356_vm2, %v9149_v19, %v9161_v14  ;;  %v5806_v16 = vadd.f32 %v5290_v15, %v14565_v63  ;;  %v5807_v36 = vadd.f32 %v5291_v5, %v14566_v6  ;;  %v6924_v63 = vld [vmem:[%s7577_s15 + $0x588] sm:$0xff] }
 0x51d   : > { %v5808_v30 = vadd.f32 %v5292_v9, %v14567_v32  ;;  %v5809_v27 = vadd.f32 %v5293_v46, %v14568_v48  ;;  %v5810_v26 = vadd.f32 %v5294_v12, %v14569_v23  ;;  %v5811_v34 = vadd.f32 %v5295_v54, %v14570_v22 }
 0x51e   : > { %v3759_v47 = vsel %vm3356_vm2, %v9152_v11, %v9168_v13  ;;  %v3760_v15 = vsel %vm3356_vm2, %v9158_v40, %v9171_v49  ;;  %v11728_v5 = vadd.f32 %v5806_v16, %v11556_v57  ;;  %v11731_v9 = vadd.f32 %v5807_v36, %v11559_v18  ;;  %v6925_v16 = vld [vmem:[%s7577_s15 + $0x590] sm:$0xff] }
 0x51f   : > { %v11734_v22 = vadd.f32 %v5808_v30, %v11562_v42  ;;  %v11737_v46 = vadd.f32 %v5809_v27, %v11565_v17  ;;  %v11740_v12 = vadd.f32 %v5810_v26, %v11568_v51  ;;  %v11743_v54 = vadd.f32 %v5811_v34, %v11571_v29  ;;  %v6921_v34 = vld [vmem:[%s7577_s15 + $0x570] sm:$0xff] }
 0x520   : > { %v4366_v57 = vsel %vm3998_vm3, %v9175_v39, %v3755_v31  ;;  %v4367_v18 = vsel %vm3998_vm3, %v9189_v4, %v3756_v44  ;;  %v4368_v42 = vsel %vm3998_vm3, %v9205_v53, %v3757_v10  ;;  %v4369_v17 = vsel %vm3998_vm3, %v9208_v43, %v3758_v28  ;;  %v6922_v31 = vld [vmem:[%s7577_s15 + $0x578] sm:$0xff]  ;;  %v6923_v10 = vld [vmem:[%s7577_s15 + $0x580] sm:$0xff] }
 0x521   : > { %v4370_v51 = vsel %vm3998_vm3, %v14305_v52, %v3759_v47  ;;  %v4371_v29 = vsel %vm3998_vm3, %v14306_v60, %v3760_v15  ;;  %4750 = vst [vmem:[%s9411_s24 + $0x570] sm:$0xff] %v4366_v57  ;;  %4751 = vst [vmem:[%s9411_s24 + $0x578] sm:$0xff] %v4367_v18  ;;  %v5308_v36 = vsub.f32 %v4366_v57, %v6921_v34  ;;  %v14572_v34 = vld [vmem:[#allocation71_spill] sm:$0xff]  ;;  %vm3358_vm6 = vcmp.eq.s32.totalorder %v11651_v61, 1 }
 0x522   : > { %4752 = vst [vmem:[%s9411_s24 + $0x580] sm:$0xff] %v4368_v42  ;;  %4753 = vst [vmem:[%s9411_s24 + $0x588] sm:$0xff] %v4369_v17  ;;  %v5309_v44 = vsub.f32 %v4367_v18, %v6922_v31  ;;  %v5310_v28 = vsub.f32 %v4368_v42, %v6923_v10  ;;  %v5311_v47 = vsub.f32 %v4369_v17, %v6924_v63  ;;  %v14571_v42 = vld [vmem:[#allocation70_spill] sm:$0xff]  ;;  %v14573_v31 = vld [vmem:[#allocation53_spill] sm:$0xff]  ;;  %vm4000_vm7 = vcmp.eq.s32.totalorder %v11651_v61, 2 }
 0x523   : > { %4754 = vst [vmem:[%s9411_s24 + $0x590] sm:$0xff] %v4370_v51  ;;  %4755 = vst [vmem:[%s9411_s24 + $0x598] sm:$0xff] %v4371_v29  ;;  %v5312_v6 = vsub.f32 %v4370_v51, %v6925_v16  ;;  %v5313_v32 = vsub.f32 %v4371_v29, %v6926_v0  ;;  %v5314_v30 = vmul.f32 %v5308_v36, %v5308_v36  ;;  %v14574_v10 = vld [vmem:[#allocation73_spill] sm:$0xff]  ;;  %vm3360_vm8 = vcmp.eq.s32.totalorder %v11654_v1, 1 }
 0x524   : > { %v5315_v48 = vmul.f32 %v5309_v44, %v5309_v44  ;;  %v5316_v27 = vmul.f32 %v5310_v28, %v5310_v28  ;;  %v5317_v23 = vmul.f32 %v5311_v47, %v5311_v47  ;;  %v3809_v57 = vsel %vm3365_vm4, %v9129_v45, %v9125_v7  ;;  %v6938_v61 = vld [vmem:[%s7577_s15 + $0x5f8] sm:$0xff] }
 0x525   : > { %v5318_v26 = vmul.f32 %v5312_v6, %v5312_v6  ;;  %v5319_v15 = vmul.f32 %v5313_v32, %v5313_v32  ;;  %v3810_v18 = vsel %vm3365_vm4, %v9142_v2, %v9132_v41  ;;  %v11786_v17 = vadd.f32 %v5314_v30, %v14571_v42  ;;  %v6930_v42 = vld [vmem:[%s7577_s15 + $0x738] sm:$0xff] }
 0x526   : > { %v11789_v51 = vadd.f32 %v5315_v48, %v11116_v50  ;;  %v11792_v29 = vadd.f32 %v5316_v27, %v11120_v37  ;;  %v11795_v36 = vadd.f32 %v5317_v23, %v14572_v34  ;;  %v3811_v50 = vsel %vm3365_vm4, %v9146_v55, %v9135_v20  ;;  %v6927_v27 = vld [vmem:[%s7577_s15 + $0x720] sm:$0xff] }
 0x527   : > { %v11798_v44 = vadd.f32 %v5318_v26, %v14573_v31  ;;  %v11801_v28 = vadd.f32 %v5319_v15, %v14574_v10  ;;  %v3812_v37 = vsel %vm3365_vm4, %v9149_v19, %v9161_v14  ;;  %v3813_v63 = vsel %vm3365_vm4, %v9152_v11, %v9168_v13  ;;  %v6928_v26 = vld [vmem:[%s7577_s15 + $0x728] sm:$0xff]  ;;  %v6931_v31 = vld [vmem:[%s7577_s15 + $0x740] sm:$0xff] }
 0x528   : > { %v3814_v47 = vsel %vm3365_vm4, %v9158_v40, %v9171_v49  ;;  %v4420_v16 = vsel %vm4007_vm5, %v9175_v39, %v3809_v57  ;;  %v4421_v6 = vsel %vm4007_vm5, %v9189_v4, %v3810_v18  ;;  %v4422_v0 = vsel %vm4007_vm5, %v9205_v53, %v3811_v50  ;;  %v6929_v57 = vld [vmem:[%s7577_s15 + $0x730] sm:$0xff] }
 0x529   : > { %v4423_v32 = vsel %vm4007_vm5, %v9208_v43, %v3812_v37  ;;  %v4424_v30 = vsel %vm4007_vm5, %v14305_v52, %v3813_v63  ;;  %v4425_v48 = vsel %vm4007_vm5, %v14306_v60, %v3814_v47  ;;  %4804 = vst [vmem:[%s9411_s24 + $0x720] sm:$0xff] %v4420_v16  ;;  %4805 = vst [vmem:[%s9411_s24 + $0x728] sm:$0xff] %v4421_v6  ;;  %vm4002_vm9 = vcmp.eq.s32.totalorder %v11654_v1, 2 }
 0x52a   : > { %4806 = vst [vmem:[%s9411_s24 + $0x730] sm:$0xff] %v4422_v0  ;;  %4807 = vst [vmem:[%s9411_s24 + $0x738] sm:$0xff] %v4423_v32  ;;  %v5416_v23 = vsub.f32 %v4420_v16, %v6927_v27  ;;  %v5417_v15 = vsub.f32 %v4421_v6, %v6928_v26  ;;  %v5418_v18 = vsub.f32 %v4422_v0, %v6929_v57  ;;  %vm3362_vm10 = vcmp.eq.s32.totalorder %v11657_v3, 1 }
 0x52b   : > { %4808 = vst [vmem:[%s9411_s24 + $0x740] sm:$0xff] %v4424_v30  ;;  %4809 = vst [vmem:[%s9411_s24 + $0x748] sm:$0xff] %v4425_v48  ;;  %v5419_v34 = vsub.f32 %v4423_v32, %v6930_v42  ;;  %v5420_v10 = vsub.f32 %v4424_v30, %v6931_v31  ;;  %v5421_v50 = vsub.f32 %v4425_v48, %v6932_v56  ;;  %vm4004_vm11 = vcmp.eq.s32.totalorder %v11657_v3, 2  ;;  %v6950_v3 = vld [vmem:[%s7577_s15 + $0x6b8] sm:$0xff] }
 0x52c   : > { %v11851_v37 = vmul.f32 %v5416_v23, %v5416_v23  ;;  %v11853_v63 = vmul.f32 %v5417_v15, %v5417_v15  ;;  %v11855_v47 = vmul.f32 %v5418_v18, %v5418_v18  ;;  %v3767_v32 = vsel %vm3358_vm6, %v9129_v45, %v9125_v7 }
 0x52d   : > { %v11857_v16 = vmul.f32 %v5419_v34, %v5419_v34  ;;  %v11859_v6 = vmul.f32 %v5420_v10, %v5420_v10  ;;  %v11861_v0 = vmul.f32 %v5421_v50, %v5421_v50  ;;  %v3768_v30 = vsel %vm3358_vm6, %v9142_v2, %v9132_v41  ;;  %v6933_v10 = vld [vmem:[%s7577_s15 + $0x5d0] sm:$0xff]  ;;  %v6934_v50 = vld [vmem:[%s7577_s15 + $0x5d8] sm:$0xff] }
 0x52e   : > { %14575 = vst [vmem:[#allocation21_spill] sm:$0xff] %v11851_v37  ;;  %14576 = vst [vmem:[#allocation65_spill] sm:$0xff] %v11853_v63  ;;  %v3769_v48 = vsel %vm3358_vm6, %v9146_v55, %v9135_v20  ;;  %v3770_v27 = vsel %vm3358_vm6, %v9149_v19, %v9161_v14  ;;  %v3771_v23 = vsel %vm3358_vm6, %v9152_v11, %v9168_v13  ;;  %vm3367_vm12 = vcmp.eq.s32.totalorder %v11660_v58, 1 }
 0x52f   : > { %14577 = vst [vmem:[#allocation25_spill] sm:$0xff] %v11855_v47  ;;  %14578 = vst [vmem:[#allocation60_spill] sm:$0xff] %v11857_v16  ;;  %v3772_v26 = vsel %vm3358_vm6, %v9158_v40, %v9171_v49  ;;  %v4378_v15 = vsel %vm4000_vm7, %v9175_v39, %v3767_v32  ;;  %v4379_v57 = vsel %vm4000_vm7, %v9189_v4, %v3768_v30  ;;  %v6935_v30 = vld [vmem:[%s7577_s15 + $0x5e0] sm:$0xff]  ;;  %vm4009_vm13 = vcmp.eq.s32.totalorder %v11660_v58, 2 }
 0x530   : > { %14579 = vst [vmem:[#allocation64_spill] sm:$0xff] %v11859_v6  ;;  %14580 = vst [vmem:[#allocation77_spill] sm:$0xff] %v11861_v0  ;;  %v4380_v18 = vsel %vm4000_vm7, %v9205_v53, %v3769_v48  ;;  %v4381_v42 = vsel %vm4000_vm7, %v9208_v43, %v3770_v27  ;;  %v4382_v34 = vsel %vm4000_vm7, %v14305_v52, %v3771_v23  ;;  %v6936_v27 = vld [vmem:[%s7577_s15 + $0x5e8] sm:$0xff]  ;;  %v6937_v0 = vld [vmem:[%s7577_s15 + $0x5f0] sm:$0xff]  ;;  %vm3364_vm14 = vcmp.eq.s32.totalorder %v11663_v59, 1 }
 0x531   : > { %v4383_v31 = vsel %vm4000_vm7, %v14306_v60, %v3772_v26  ;;  %4762 = vst [vmem:[%s9411_s24 + $0x5d0] sm:$0xff] %v4378_v15  ;;  %4763 = vst [vmem:[%s9411_s24 + $0x5d8] sm:$0xff] %v4379_v57  ;;  %v5332_v56 = vsub.f32 %v4378_v15, %v6933_v10  ;;  %v5333_v32 = vsub.f32 %v4379_v57, %v6934_v50  ;;  %v14581_v50 = vld [vmem:[#allocation29_spill] sm:$0xff]  ;;  %vm4006_vm15 = vcmp.eq.s32.totalorder %v11663_v59, 2 }
 0x532   : > { %4764 = vst [vmem:[%s9411_s24 + $0x5e0] sm:$0xff] %v4380_v18  ;;  %4765 = vst [vmem:[%s9411_s24 + $0x5e8] sm:$0xff] %v4381_v42  ;;  %v5334_v48 = vsub.f32 %v4380_v18, %v6935_v30  ;;  %v5335_v23 = vsub.f32 %v4381_v42, %v6936_v27  ;;  %v5336_v6 = vsub.f32 %v4382_v34, %v6937_v0  ;;  %v14586_v30 = vld [vmem:[#allocation97_spill] sm:$0xff] }
 0x533   : > { %4766 = vst [vmem:[%s9411_s24 + $0x5f0] sm:$0xff] %v4382_v34  ;;  %4767 = vst [vmem:[%s9411_s24 + $0x5f8] sm:$0xff] %v4383_v31  ;;  %v5337_v16 = vsub.f32 %v4383_v31, %v6938_v61  ;;  %v5338_v26 = vmul.f32 %v5332_v56, %v5332_v56  ;;  %v5339_v47 = vmul.f32 %v5333_v32, %v5333_v32  ;;  %v14583_v34 = vld [vmem:[#allocation75_spill] sm:$0xff]  ;;  %v6955_v58 = vld [vmem:[%s7577_s15 + $0x7a0] sm:$0xff] }
 0x534   : > { %v5340_v63 = vmul.f32 %v5334_v48, %v5334_v48  ;;  %v5341_v15 = vmul.f32 %v5335_v23, %v5335_v23  ;;  %v5342_v10 = vmul.f32 %v5336_v6, %v5336_v6  ;;  %v3779_v0 = vsel %vm3360_vm8, %v9129_v45, %v9125_v7  ;;  %v14584_v56 = vld [vmem:[#allocation47_spill] sm:$0xff]  ;;  %v14585_v6 = vld [vmem:[#allocation32_spill] sm:$0xff] }
 0x535   : > { %v5343_v57 = vmul.f32 %v5337_v16, %v5337_v16  ;;  %v5818_v37 = vadd.f32 %v5338_v26, %v14581_v50  ;;  %v5819_v18 = vadd.f32 %v5339_v47, %v14582_v8  ;;  %v3780_v42 = vsel %vm3360_vm8, %v9142_v2, %v9132_v41  ;;  %v6962_v59 = vld [vmem:[%s7577_s15 + $0x718] sm:$0xff] }
 0x536   : > { %v5820_v31 = vadd.f32 %v5340_v63, %v14583_v34  ;;  %v5821_v32 = vadd.f32 %v5341_v15, %v14584_v56  ;;  %v5822_v16 = vadd.f32 %v5342_v10, %v14585_v6  ;;  %v3781_v27 = vsel %vm3360_vm8, %v9146_v55, %v9135_v20 }
 0x537   : > { %v5823_v48 = vadd.f32 %v5343_v57, %v14586_v30  ;;  %v5962_v8 = vadd.f32 %v5818_v37, %v11786_v17  ;;  %v5963_v47 = vadd.f32 %v5819_v18, %v11789_v51  ;;  %v3782_v63 = vsel %vm3360_vm8, %v9149_v19, %v9161_v14  ;;  %v14589_v18 = vld [vmem:[#allocation30_spill] sm:$0xff] }
 0x538   : > { %v5964_v23 = vadd.f32 %v5820_v31, %v11792_v29  ;;  %v5965_v61 = vadd.f32 %v5821_v32, %v11795_v36  ;;  %v5966_v26 = vadd.f32 %v5822_v16, %v11798_v44  ;;  %v3783_v15 = vsel %vm3360_vm8, %v9152_v11, %v9168_v13  ;;  %v14595_v31 = vld [vmem:[#allocation85_spill] sm:$0xff]  ;;  %v14597_v32 = vld [vmem:[#allocation34_spill] sm:$0xff] }
 0x539   : > { %v5967_v17 = vadd.f32 %v5823_v48, %v11801_v28  ;;  %v6034_v51 = vadd.f32 %v5962_v8, %v11728_v5  ;;  %v6035_v37 = vadd.f32 %v5963_v47, %v11731_v9  ;;  %v3784_v29 = vsel %vm3360_vm8, %v9158_v40, %v9171_v49  ;;  %v6939_v48 = vld [vmem:[%s7577_s15 + $0x630] sm:$0xff]  ;;  %v6940_v47 = vld [vmem:[%s7577_s15 + $0x638] sm:$0xff] }
 0x53a   : > { %v6036_v36 = vadd.f32 %v5964_v23, %v11734_v22  ;;  %v6037_v44 = vadd.f32 %v5965_v61, %v11737_v46  ;;  %v6038_v5 = vadd.f32 %v5966_v26, %v11740_v12  ;;  %v4390_v57 = vsel %vm4002_vm9, %v9175_v39, %v3779_v0  ;;  %v6942_v61 = vld [vmem:[%s7577_s15 + $0x648] sm:$0xff] }
 0x53b   : > { %v6039_v28 = vadd.f32 %v5967_v17, %v11743_v54  ;;  %v6070_v9 = vadd.f32 %v6034_v51, %v11490_v35  ;;  %v6071_v10 = vadd.f32 %v6035_v37, %v11493_v38  ;;  %v4391_v50 = vsel %vm4002_vm9, %v9189_v4, %v3780_v42  ;;  %4774 = vst [vmem:[%s9411_s24 + $0x630] sm:$0xff] %v4390_v57  ;;  %v14587_v38 = vld [vmem:[#allocation31_spill] sm:$0xff]  ;;  %v6944_v37 = vld [vmem:[%s7577_s15 + $0x658] sm:$0xff] }
 0x53c   : > { %v6072_v22 = vadd.f32 %v6036_v36, %v11496_v24  ;;  %v6073_v46 = vadd.f32 %v6037_v44, %v11499_v25  ;;  %v6074_v12 = vadd.f32 %v6038_v5, %v11502_v62  ;;  %4775 = vst [vmem:[%s9411_s24 + $0x638] sm:$0xff] %v4391_v50  ;;  %v4392_v24 = vsel %vm4002_vm9, %v9205_v53, %v3781_v27  ;;  %v14591_v62 = vld [vmem:[#allocation33_spill] sm:$0xff]  ;;  %v14593_v42 = vld [vmem:[#allocation19_spill] sm:$0xff] }
 0x53d   : > { %v6075_v35 = vadd.f32 %v6039_v28, %v11505_v33  ;;  %v11964_v54 = vadd.f32 %v6070_v9, %v14587_v38  ;;  %v11967_v0 = vadd.f32 %v6071_v10, %v14589_v18  ;;  %v4393_v25 = vsel %vm4002_vm9, %v9208_v43, %v3782_v63  ;;  %4776 = vst [vmem:[%s9411_s24 + $0x640] sm:$0xff] %v4392_v24  ;;  %v6941_v63 = vld [vmem:[%s7577_s15 + $0x640] sm:$0xff]  ;;  %v6943_v17 = vld [vmem:[%s7577_s15 + $0x650] sm:$0xff] }
 0x53e   : > { %v11976_v33 = vadd.f32 %v6072_v22, %v14591_v62  ;;  %v11979_v34 = vadd.f32 %v6073_v46, %v14593_v42  ;;  %v11982_v56 = vadd.f32 %v6074_v12, %v14595_v31  ;;  %4777 = vst [vmem:[%s9411_s24 + $0x648] sm:$0xff] %v4393_v25  ;;  %v4394_v16 = vsel %vm4002_vm9, %v14305_v52, %v3783_v15  ;;  %v14599_v9 = vld [vmem:[#allocation81_spill] sm:$0xff]  ;;  %v14601_v12 = vld [vmem:[#allocation98_spill] sm:$0xff]  ;;  %v14602_v38 = vld [vmem:[#allocation83_spill] sm:$0xff] }
 0x53f   : > { %14588 = vst [vmem:[#allocation56_spill] sm:$0xff] %v11964_v54  ;;  %14590 = vst [vmem:[#allocation84_spill] sm:$0xff] %v11967_v0  ;;  %v11985_v6 = vadd.f32 %v6075_v35, %v14597_v32  ;;  %v4395_v30 = vsel %vm4002_vm9, %v14306_v60, %v3784_v29  ;;  %v5356_v8 = vsub.f32 %v4390_v57, %v6939_v48  ;;  %v14600_v57 = vld [vmem:[#allocation61_spill] sm:$0xff]  ;;  %v14604_v62 = vld [vmem:[#allocation94_spill] sm:$0xff] }
 0x540   : > { %14592 = vst [vmem:[#allocation35_spill] sm:$0xff] %v11976_v33  ;;  %14594 = vst [vmem:[#allocation37_spill] sm:$0xff] %v11979_v34  ;;  %v5357_v27 = vsub.f32 %v4391_v50, %v6940_v47  ;;  %v5358_v23 = vsub.f32 %v4392_v24, %v6941_v63  ;;  %v5359_v26 = vsub.f32 %v4393_v25, %v6942_v61  ;;  %v14603_v24 = vld [vmem:[#allocation62_spill] sm:$0xff]  ;;  %v6945_v61 = vld [vmem:[%s7577_s15 + $0x690] sm:$0xff] }
 0x541   : > { %14596 = vst [vmem:[#allocation66_spill] sm:$0xff] %v11982_v56  ;;  %14598 = vst [vmem:[#allocation67_spill] sm:$0xff] %v11985_v6  ;;  %v5360_v51 = vsub.f32 %v4394_v16, %v6943_v17  ;;  %v5361_v36 = vsub.f32 %v4395_v30, %v6944_v37  ;;  %v5362_v44 = vmul.f32 %v5356_v8, %v5356_v8  ;;  %v6946_v17 = vld [vmem:[%s7577_s15 + $0x698] sm:$0xff]  ;;  %v6947_v37 = vld [vmem:[%s7577_s15 + $0x6a0] sm:$0xff] }
 0x542   : > { %4778 = vst [vmem:[%s9411_s24 + $0x650] sm:$0xff] %v4394_v16  ;;  %4779 = vst [vmem:[%s9411_s24 + $0x658] sm:$0xff] %v4395_v30  ;;  %v5363_v15 = vmul.f32 %v5357_v27, %v5357_v27  ;;  %v5364_v1 = vmul.f32 %v5358_v23, %v5358_v23  ;;  %v5365_v29 = vmul.f32 %v5359_v26, %v5359_v26 }
 0x543   : > { %v5366_v5 = vmul.f32 %v5360_v51, %v5360_v51  ;;  %v5367_v28 = vmul.f32 %v5361_v36, %v5361_v36  ;;  %v5824_v10 = vadd.f32 %v5362_v44, %v14599_v9  ;;  %v3791_v22 = vsel %vm3362_vm10, %v9129_v45, %v9125_v7  ;;  %v6948_v44 = vld [vmem:[%s7577_s15 + $0x6a8] sm:$0xff] }
 0x544   : > { %v5825_v50 = vadd.f32 %v5363_v15, %v14600_v57  ;;  %v3792_v46 = vsel %vm3362_vm10, %v9142_v2, %v9132_v41  ;;  %v5826_v35 = vadd.f32 %v5364_v1, %v14601_v12  ;;  %v5827_v18 = vadd.f32 %v5365_v29, %v14602_v38  ;;  %v6949_v1 = vld [vmem:[%s7577_s15 + $0x6b0] sm:$0xff] }
 0x545   : > { %v5828_v25 = vadd.f32 %v5366_v5, %v14603_v24  ;;  %v5829_v42 = vadd.f32 %v5367_v28, %v14604_v62  ;;  %v3793_v31 = vsel %vm3362_vm10, %v9146_v55, %v9135_v20  ;;  %v3794_v32 = vsel %vm3362_vm10, %v9149_v19, %v9161_v14  ;;  %v14605_v38 = vld [vmem:[#allocation63_spill] sm:$0xff] }
 0x546   : > { %v3795_v16 = vsel %vm3362_vm10, %v9152_v11, %v9168_v13  ;;  %v3796_v30 = vsel %vm3362_vm10, %v9158_v40, %v9171_v49  ;;  %v4402_v48 = vsel %vm4004_vm11, %v9175_v39, %v3791_v22  ;;  %v4403_v8 = vsel %vm4004_vm11, %v9189_v4, %v3792_v46  ;;  %v14606_v62 = vld [vmem:[#allocation99_spill] sm:$0xff] }
 0x547   : > { %v4404_v47 = vsel %vm4004_vm11, %v9205_v53, %v3793_v31  ;;  %v4405_v27 = vsel %vm4004_vm11, %v9208_v43, %v3794_v32  ;;  %v4406_v63 = vsel %vm4004_vm11, %v14305_v52, %v3795_v16  ;;  %v4407_v23 = vsel %vm4004_vm11, %v14306_v60, %v3796_v30  ;;  %4786 = vst [vmem:[%s9411_s24 + $0x690] sm:$0xff] %v4402_v48  ;;  %v14607_v30 = vld [vmem:[#allocation102_spill] sm:$0xff] }
 0x548   : > { %4787 = vst [vmem:[%s9411_s24 + $0x698] sm:$0xff] %v4403_v8  ;;  %4788 = vst [vmem:[%s9411_s24 + $0x6a0] sm:$0xff] %v4404_v47  ;;  %v5380_v26 = vsub.f32 %v4402_v48, %v6945_v61  ;;  %v5381_v51 = vsub.f32 %v4403_v8, %v6946_v17  ;;  %v5382_v36 = vsub.f32 %v4404_v47, %v6947_v37  ;;  %v14608_v8 = vld [vmem:[#allocation101_spill] sm:$0xff] }
 0x549   : > { %4789 = vst [vmem:[%s9411_s24 + $0x6a8] sm:$0xff] %v4405_v27  ;;  %4790 = vst [vmem:[%s9411_s24 + $0x6b0] sm:$0xff] %v4406_v63  ;;  %v5383_v15 = vsub.f32 %v4405_v27, %v6948_v44  ;;  %v5384_v29 = vsub.f32 %v4406_v63, %v6949_v1  ;;  %v5385_v5 = vsub.f32 %v4407_v23, %v6950_v3  ;;  %v14609_v27 = vld [vmem:[#allocation105_spill] sm:$0xff] }
 0x54a   : > { %4791 = vst [vmem:[%s9411_s24 + $0x6b8] sm:$0xff] %v4407_v23  ;;  %v5386_v28 = vmul.f32 %v5380_v26, %v5380_v26  ;;  %v5387_v9 = vmul.f32 %v5381_v51, %v5381_v51  ;;  %v5388_v57 = vmul.f32 %v5382_v36, %v5382_v36  ;;  %v3821_v32 = vsel %vm3367_vm12, %v9129_v45, %v9125_v7  ;;  %v6951_v3 = vld [vmem:[%s7577_s15 + $0x780] sm:$0xff] }
 0x54b   : > { %v5389_v22 = vmul.f32 %v5383_v15, %v5383_v15  ;;  %v5390_v46 = vmul.f32 %v5384_v29, %v5384_v29  ;;  %v5391_v12 = vmul.f32 %v5385_v5, %v5385_v5  ;;  %v3822_v16 = vsel %vm3367_vm12, %v9142_v2, %v9132_v41  ;;  %v12129_v29 = vpop.xlane.xlu1 %2978 }
 0x54c   : > { %v5830_v24 = vadd.f32 %v5386_v28, %v14605_v38  ;;  %v5831_v31 = vadd.f32 %v5387_v9, %v14606_v62  ;;  %v5832_v48 = vadd.f32 %v5388_v57, %v14607_v30  ;;  %v3823_v17 = vsel %vm3367_vm12, %v9146_v55, %v9135_v20  ;;  %v6952_v28 = vld [vmem:[%s7577_s15 + $0x788] sm:$0xff]  ;;  %v6953_v57 = vld [vmem:[%s7577_s15 + $0x790] sm:$0xff] }
 0x54d   : > { %v5833_v47 = vadd.f32 %v5389_v22, %v14608_v8  ;;  %v5834_v63 = vadd.f32 %v5390_v46, %v14609_v27  ;;  %v5835_v23 = vadd.f32 %v5391_v12, %v11619_v21  ;;  %v3824_v51 = vsel %vm3367_vm12, %v9149_v19, %v9161_v14  ;;  %v6954_v46 = vld [vmem:[%s7577_s15 + $0x798] sm:$0xff] }
 0x54e   : > { %v12081_v61 = vadd.f32 %v5830_v24, %v5824_v10  ;;  %v12083_v26 = vadd.f32 %v5831_v31, %v5825_v50  ;;  %v12093_v37 = vadd.f32 %v5832_v48, %v5826_v35  ;;  %v3825_v36 = vsel %vm3367_vm12, %v9152_v11, %v9168_v13  ;;  %v6956_v24 = vld [vmem:[%s7577_s15 + $0x7a8] sm:$0xff] }
 0x54f   : > { %v12095_v21 = vadd.f32 %v5833_v47, %v5827_v18  ;;  %v12097_v10 = vadd.f32 %v5834_v63, %v5828_v25  ;;  %v12099_v50 = vadd.f32 %v5835_v23, %v5829_v42  ;;  %v3826_v35 = vsel %vm3367_vm12, %v9158_v40, %v9171_v49 }
 0x550   : > { %v4432_v18 = vsel %vm4009_vm13, %v9175_v39, %v3821_v32  ;;  %v4433_v25 = vsel %vm4009_vm13, %v9189_v4, %v3822_v16  ;;  %v4434_v42 = vsel %vm4009_vm13, %v9205_v53, %v3823_v17  ;;  %v4435_v44 = vsel %vm4009_vm13, %v9208_v43, %v3824_v51 }
 0x551   : > { %v4436_v15 = vsel %vm4009_vm13, %v14305_v52, %v3825_v36  ;;  %v4437_v1 = vsel %vm4009_vm13, %v14306_v60, %v3826_v35  ;;  %4816 = vst [vmem:[%s9411_s24 + $0x780] sm:$0xff] %v4432_v18  ;;  %4817 = vst [vmem:[%s9411_s24 + $0x788] sm:$0xff] %v4433_v25  ;;  %v5440_v5 = vsub.f32 %v4432_v18, %v6951_v3 }
 0x552   : > { %4818 = vst [vmem:[%s9411_s24 + $0x790] sm:$0xff] %v4434_v42  ;;  %4819 = vst [vmem:[%s9411_s24 + $0x798] sm:$0xff] %v4435_v44  ;;  %v5441_v9 = vsub.f32 %v4433_v25, %v6952_v28  ;;  %v5442_v22 = vsub.f32 %v4434_v42, %v6953_v57  ;;  %v5443_v12 = vsub.f32 %v4435_v44, %v6954_v46  ;;  %v3007_v42 = vpop.xlane.xlu1 %3006 }
 0x553   : > { %4820 = vst [vmem:[%s9411_s24 + $0x7a0] sm:$0xff] %v4436_v15  ;;  %4821 = vst [vmem:[%s9411_s24 + $0x7a8] sm:$0xff] %v4437_v1  ;;  %v5444_v38 = vsub.f32 %v4436_v15, %v6955_v58  ;;  %v5445_v62 = vsub.f32 %v4437_v1, %v6956_v24  ;;  %v12143_v31 = vmul.f32 %v5440_v5, %v5440_v5  ;;  %v6957_v1 = vld [vmem:[%s7577_s15 + $0x6f0] sm:$0xff]  ;;  %v6958_v5 = vld [vmem:[%s7577_s15 + $0x6f8] sm:$0xff] }
 0x554   : > { %v12145_v32 = vmul.f32 %v5441_v9, %v5441_v9  ;;  %v12147_v16 = vmul.f32 %v5442_v22, %v5442_v22  ;;  %v12149_v30 = vmul.f32 %v5443_v12, %v5443_v12  ;;  %v3803_v47 = vsel %vm3364_vm14, %v9129_v45, %v9125_v7  ;;  %v6959_v9 = vld [vmem:[%s7577_s15 + $0x700] sm:$0xff]  ;;  %v6960_v22 = vld [vmem:[%s7577_s15 + $0x708] sm:$0xff]  ;;  %v6961_v12 = vld [vmem:[%s7577_s15 + $0x710] sm:$0xff] }
 0x555   : > { %v12151_v48 = vmul.f32 %v5444_v38, %v5444_v38  ;;  %v12153_v8 = vmul.f32 %v5445_v62, %v5445_v62  ;;  %v3804_v27 = vsel %vm3364_vm14, %v9142_v2, %v9132_v41  ;;  %v3805_v63 = vsel %vm3364_vm14, %v9146_v55, %v9135_v20 }
 0x556   : > { %v3806_v23 = vsel %vm3364_vm14, %v9149_v19, %v9161_v14  ;;  %v3807_v17 = vsel %vm3364_vm14, %v9152_v11, %v9168_v13  ;;  %v3808_v51 = vsel %vm3364_vm14, %v9158_v40, %v9171_v49  ;;  %v4414_v36 = vsel %vm4006_vm15, %v9175_v39, %v3803_v47 }
 0x557   : > { %v4415_v35 = vsel %vm4006_vm15, %v9189_v4, %v3804_v27  ;;  %v4416_v18 = vsel %vm4006_vm15, %v9205_v53, %v3805_v63  ;;  %v4417_v25 = vsel %vm4006_vm15, %v9208_v43, %v3806_v23  ;;  %v4418_v44 = vsel %vm4006_vm15, %v14305_v52, %v3807_v17  ;;  %4798 = vst [vmem:[%s9411_s24 + $0x6f0] sm:$0xff] %v4414_v36 }
 0x558   : > { %v4419_v15 = vsel %vm4006_vm15, %v14306_v60, %v3808_v51  ;;  %4799 = vst [vmem:[%s9411_s24 + $0x6f8] sm:$0xff] %v4415_v35  ;;  %4800 = vst [vmem:[%s9411_s24 + $0x700] sm:$0xff] %v4416_v18  ;;  %v5404_v3 = vsub.f32 %v4414_v36, %v6957_v1  ;;  %v5405_v28 = vsub.f32 %v4415_v35, %v6958_v5  ;;  %v2980_v47 = vcvt.f32.s32 %v12129_v29  ;;  %v14610_v36 = vld [vmem:[#allocation104_spill] sm:$0xff]  ;;  %v14611_v1 = vld [vmem:[#allocation55_spill] sm:$0xff] }
 0x559   : > { %4801 = vst [vmem:[%s9411_s24 + $0x708] sm:$0xff] %v4417_v25  ;;  %4802 = vst [vmem:[%s9411_s24 + $0x710] sm:$0xff] %v4418_v44  ;;  %v5406_v57 = vsub.f32 %v4416_v18, %v6959_v9  ;;  %v5407_v46 = vsub.f32 %v4417_v25, %v6960_v22  ;;  %v5408_v58 = vsub.f32 %v4418_v44, %v6961_v12  ;;  %v3008_v27 = vcvt.f32.s32 %v3007_v42  ;;  %v14612_v18 = vld [vmem:[#allocation88_spill] sm:$0xff]  ;;  %v14614_v44 = vld [vmem:[#allocation103_spill] sm:$0xff] }
 0x55a   : > { %4803 = vst [vmem:[%s9411_s24 + $0x718] sm:$0xff] %v4419_v15  ;;  %v5409_v38 = vsub.f32 %v4419_v15, %v6962_v59  ;;  %v5410_v24 = vmul.f32 %v5404_v3, %v5404_v3  ;;  %v5411_v62 = vmul.f32 %v5405_v28, %v5405_v28  ;;  %v2983_v9 = vadd.s32 %v14612_v18, %v2980_v47  ;;  %v14613_v25 = vld [vmem:[#allocation52_spill] sm:$0xff]  ;;  %v14616_v12 = vld [vmem:[#allocation107_spill] sm:$0xff]  ;;  %v14617_v42 = vld [vmem:[#allocation106_spill] sm:$0xff] }
 0x55b   : > { %v5412_v63 = vmul.f32 %v5406_v57, %v5406_v57  ;;  %v5413_v23 = vmul.f32 %v5407_v46, %v5407_v46  ;;  %v5414_v17 = vmul.f32 %v5408_v58, %v5408_v58  ;;  %v12202_v22 = vadd.s32 %v14613_v25, %v3008_v27  ;;  %v14615_v3 = vld [vmem:[#allocation36_spill] sm:$0xff]  ;;  %v6965_v25 = vld [vmem:[%s7577_s15 + $0x760] sm:$0xff] }
 0x55c   : > { %v5415_v51 = vmul.f32 %v5409_v38, %v5409_v38  ;;  %v5836_v35 = vadd.f32 %v5410_v24, %v14610_v36  ;;  %v5837_v5 = vadd.f32 %v5411_v62, %v14611_v1  ;;  %vm3366_vm0 = vcmp.eq.s32.totalorder %v2983_v9, 1  ;;  %v6963_v36 = vld [vmem:[%s7577_s15 + $0x750] sm:$0xff]  ;;  %v6964_v18 = vld [vmem:[%s7577_s15 + $0x758] sm:$0xff] }
 0x55d   : > { %v5838_v15 = vadd.f32 %v5412_v63, %v14614_v44  ;;  %v5839_v28 = vadd.f32 %v5413_v23, %v14615_v3  ;;  %v5840_v29 = vadd.f32 %v5414_v17, %v14616_v12  ;;  %vm4008_vm1 = vcmp.eq.s32.totalorder %v2983_v9, 2  ;;  %v6966_v3 = vld [vmem:[%s7577_s15 + $0x768] sm:$0xff] }
 0x55e   : > { %v5841_v57 = vadd.f32 %v5415_v51, %v14617_v42  ;;  %vm3368_vm2 = vcmp.eq.s32.totalorder %v12202_v22, 1  ;;  %vm4010_vm3 = vcmp.eq.s32.totalorder %v12202_v22, 2  ;;  %v3815_v46 = vsel %vm3366_vm0, %v9129_v45, %v9125_v7  ;;  %v6967_v42 = vld [vmem:[%s7577_s15 + $0x770] sm:$0xff] }
 0x55f   : > { %v3816_v58 = vsel %vm3366_vm0, %v9142_v2, %v9132_v41  ;;  %v3817_v59 = vsel %vm3366_vm0, %v9146_v55, %v9135_v20  ;;  %v3818_v38 = vsel %vm3366_vm0, %v9149_v19, %v9161_v14  ;;  %v3819_v24 = vsel %vm3366_vm0, %v9152_v11, %v9168_v13 }
 0x560   : > { %v3820_v62 = vsel %vm3366_vm0, %v9158_v40, %v9171_v49  ;;  %v4426_v47 = vsel %vm4008_vm1, %v9175_v39, %v3815_v46  ;;  %v4427_v27 = vsel %vm4008_vm1, %v9189_v4, %v3816_v58  ;;  %v4428_v63 = vsel %vm4008_vm1, %v9205_v53, %v3817_v59  ;;  %v6968_v58 = vld [vmem:[%s7577_s15 + $0x778] sm:$0xff] }
 0x561   : > { %v4429_v23 = vsel %vm4008_vm1, %v9208_v43, %v3818_v38  ;;  %v4430_v17 = vsel %vm4008_vm1, %v14305_v52, %v3819_v24  ;;  %v4431_v51 = vsel %vm4008_vm1, %v14306_v60, %v3820_v62  ;;  %4810 = vst [vmem:[%s9411_s24 + $0x750] sm:$0xff] %v4426_v47  ;;  %4811 = vst [vmem:[%s9411_s24 + $0x758] sm:$0xff] %v4427_v27 }
 0x562   : > { %4812 = vst [vmem:[%s9411_s24 + $0x760] sm:$0xff] %v4428_v63  ;;  %4813 = vst [vmem:[%s9411_s24 + $0x768] sm:$0xff] %v4429_v23  ;;  %v5428_v1 = vsub.f32 %v4426_v47, %v6963_v36  ;;  %v5429_v9 = vsub.f32 %v4427_v27, %v6964_v18  ;;  %v5430_v44 = vsub.f32 %v4428_v63, %v6965_v25  ;;  %v14618_v18 = vld [vmem:[#allocation21_spill] sm:$0xff] }
 0x563   : > { %4814 = vst [vmem:[%s9411_s24 + $0x770] sm:$0xff] %v4430_v17  ;;  %4815 = vst [vmem:[%s9411_s24 + $0x778] sm:$0xff] %v4431_v51  ;;  %v5431_v12 = vsub.f32 %v4429_v23, %v6966_v3  ;;  %v5432_v46 = vsub.f32 %v4430_v17, %v6967_v42  ;;  %v5433_v59 = vsub.f32 %v4431_v51, %v6968_v58  ;;  %v14619_v3 = vld [vmem:[#allocation65_spill] sm:$0xff] }
 0x564   : > { %v3827_v38 = vsel %vm3368_vm2, %v9129_v45, %v9125_v7  ;;  %v3828_v24 = vsel %vm3368_vm2, %v9142_v2, %v9132_v41  ;;  %v5434_v62 = vmul.f32 %v5428_v1, %v5428_v1  ;;  %v5435_v47 = vmul.f32 %v5429_v9, %v5429_v9  ;;  %v14620_v1 = vld [vmem:[#allocation25_spill] sm:$0xff] }
 0x565   : > { %v5436_v27 = vmul.f32 %v5430_v44, %v5430_v44  ;;  %v5437_v63 = vmul.f32 %v5431_v12, %v5431_v12  ;;  %v5438_v36 = vmul.f32 %v5432_v46, %v5432_v46  ;;  %v5439_v23 = vmul.f32 %v5433_v59, %v5433_v59  ;;  %v14621_v44 = vld [vmem:[#allocation60_spill] sm:$0xff]  ;;  %v14623_v59 = vld [vmem:[#allocation77_spill] sm:$0xff] }
 0x566   : > { %v3829_v17 = vsel %vm3368_vm2, %v9146_v55, %v9135_v20  ;;  %v3830_v51 = vsel %vm3368_vm2, %v9149_v19, %v9161_v14  ;;  %v5842_v25 = vadd.f32 %v5434_v62, %v14618_v18  ;;  %v5843_v42 = vadd.f32 %v5435_v47, %v14619_v3  ;;  %v14622_v46 = vld [vmem:[#allocation64_spill] sm:$0xff] }
 0x567   : > { %v5844_v9 = vadd.f32 %v5436_v27, %v14620_v1  ;;  %v5845_v12 = vadd.f32 %v5437_v63, %v14621_v44  ;;  %v5846_v58 = vadd.f32 %v5438_v36, %v14622_v46  ;;  %v5847_v6 = vadd.f32 %v5439_v23, %v14623_v59 }
 0x568   : > { %v3831_v56 = vsel %vm3368_vm2, %v9152_v11, %v9168_v13  ;;  %v3832_v62 = vsel %vm3368_vm2, %v9158_v40, %v9171_v49  ;;  %v5974_v47 = vadd.f32 %v5842_v25, %v5836_v35  ;;  %v5975_v27 = vadd.f32 %v5843_v42, %v5837_v5  ;;  %v6972_v25 = vld [vmem:[%s7577_s15 + $0x7c8] sm:$0xff] }
 0x569   : > { %v5976_v18 = vadd.f32 %v5844_v9, %v5838_v15  ;;  %v5977_v63 = vadd.f32 %v5845_v12, %v5839_v28  ;;  %v5978_v3 = vadd.f32 %v5846_v58, %v5840_v29  ;;  %v5979_v36 = vadd.f32 %v5847_v6, %v5841_v57  ;;  %v3035_v28 = vpop.xlane.xlu1 %3034  ;;  %v6969_v29 = vld [vmem:[%s7577_s15 + $0x7b0] sm:$0xff] }
 0x56a   : > { %v4438_v23 = vsel %vm4010_vm3, %v9175_v39, %v3827_v38  ;;  %v4439_v1 = vsel %vm4010_vm3, %v9189_v4, %v3828_v24  ;;  %v12277_v44 = vadd.f32 %v5974_v47, %v12081_v61  ;;  %v12280_v35 = vadd.f32 %v5975_v27, %v12083_v26  ;;  %v6970_v38 = vld [vmem:[%s7577_s15 + $0x7b8] sm:$0xff]  ;;  %v6973_v9 = vld [vmem:[%s7577_s15 + $0x7d0] sm:$0xff] }
 0x56b   : > { %v12283_v5 = vadd.f32 %v5976_v18, %v12093_v37  ;;  %v12286_v6 = vadd.f32 %v5977_v63, %v12095_v21  ;;  %4822 = vst [vmem:[%s9411_s24 + $0x7b0] sm:$0xff] %v4438_v23  ;;  %4823 = vst [vmem:[%s9411_s24 + $0x7b8] sm:$0xff] %v4439_v1  ;;  %v12291_v15 = vadd.f32 %v5978_v3, %v12097_v10  ;;  %v3021_v21 = vpop.xlane.xlu0 %3020 }
 0x56c   : > { %14624 = vst [vmem:[#allocation38_spill] sm:$0xff] %v12280_v35  ;;  %v12294_v61 = vadd.f32 %v5979_v36, %v12099_v50  ;;  %v4440_v26 = vsel %vm4010_vm3, %v9205_v53, %v3829_v17  ;;  %v4441_v37 = vsel %vm4010_vm3, %v9208_v43, %v3830_v51  ;;  %v4442_v10 = vsel %vm4010_vm3, %v14305_v52, %v3831_v56  ;;  %v6971_v17 = vld [vmem:[%s7577_s15 + $0x7c0] sm:$0xff]  ;;  %v6974_v56 = vld [vmem:[%s7577_s15 + $0x7d8] sm:$0xff] }
 0x56d   : > { %14625 = vst [vmem:[#allocation58_spill] sm:$0xff] %v12283_v5  ;;  %14626 = vst [vmem:[#allocation44_spill] sm:$0xff] %v12286_v6  ;;  %v4443_v50 = vsel %vm4010_vm3, %v14306_v60, %v3832_v62  ;;  %v5452_v57 = vsub.f32 %v4438_v23, %v6969_v29  ;;  %v5453_v24 = vsub.f32 %v4439_v1, %v6970_v38  ;;  %v3022_v59 = vcvt.f32.s32 %v3021_v21  ;;  %v14629_v23 = vld [vmem:[#allocation20_spill] sm:$0xff]  ;;  %v12352_v38 = vpop.xlane.xlu1 %3062 }
 0x56e   : > { %14627 = vst [vmem:[#allocation78_spill] sm:$0xff] %v12291_v15  ;;  %14628 = vst [vmem:[#allocation43_spill] sm:$0xff] %v12294_v61  ;;  %v5454_v51 = vsub.f32 %v4440_v26, %v6971_v17  ;;  %v5455_v42 = vsub.f32 %v4441_v37, %v6972_v25  ;;  %v5456_v12 = vsub.f32 %v4442_v10, %v6973_v9  ;;  %v3036_v62 = vcvt.f32.s32 %v3035_v28  ;;  %v7008_v61 = vld [vmem:[%s7577_s15 + $0x948] sm:$0xff]  ;;  %v7009_v6 = vld [vmem:[%s7577_s15 + $0x950] sm:$0xff] }
 0x56f   : > { %4824 = vst [vmem:[%s9411_s24 + $0x7c0] sm:$0xff] %v4440_v26  ;;  %4825 = vst [vmem:[%s9411_s24 + $0x7c8] sm:$0xff] %v4441_v37  ;;  %v5457_v46 = vsub.f32 %v4443_v50, %v6974_v56  ;;  %v5458_v58 = vmul.f32 %v5452_v57, %v5452_v57  ;;  %v5459_v22 = vmul.f32 %v5453_v24, %v5453_v24  ;;  %v14630_v26 = vld [vmem:[#allocation22_spill] sm:$0xff] }
 0x570   : > { %4826 = vst [vmem:[%s9411_s24 + $0x7d0] sm:$0xff] %v4442_v10  ;;  %4827 = vst [vmem:[%s9411_s24 + $0x7d8] sm:$0xff] %v4443_v50  ;;  %v5460_v47 = vmul.f32 %v5454_v51, %v5454_v51  ;;  %v5461_v27 = vmul.f32 %v5455_v42, %v5455_v42  ;;  %v5462_v18 = vmul.f32 %v5456_v12, %v5456_v12  ;;  %v6975_v42 = vld [vmem:[%s7577_s15 + $0x7e0] sm:$0xff]  ;;  %v6976_v12 = vld [vmem:[%s7577_s15 + $0x7e8] sm:$0xff] }
 0x571   : > { %v5463_v63 = vmul.f32 %v5457_v46, %v5457_v46  ;;  %v12319_v3 = vadd.f32 %v5458_v58, %v12143_v31  ;;  %v12322_v36 = vadd.f32 %v5459_v22, %v12145_v32  ;;  %v3025_v1 = vadd.s32 %v14629_v23, %v3022_v59  ;;  %v6977_v46 = vld [vmem:[%s7577_s15 + $0x7f0] sm:$0xff]  ;;  %v6978_v22 = vld [vmem:[%s7577_s15 + $0x7f8] sm:$0xff] }
 0x572   : > { %v3039_v37 = vadd.s32 %v14630_v26, %v3036_v62  ;;  %v12327_v10 = vadd.f32 %v5460_v47, %v12147_v16  ;;  %v12330_v21 = vadd.f32 %v5461_v27, %v12149_v30  ;;  %v12333_v28 = vadd.f32 %v5462_v18, %v12151_v48  ;;  %v6979_v62 = vld [vmem:[%s7577_s15 + $0x800] sm:$0xff]  ;;  %v6980_v27 = vld [vmem:[%s7577_s15 + $0x808] sm:$0xff] }
 0x573   : > { %v12336_v50 = vadd.f32 %v5463_v63, %v12153_v8  ;;  %vm3369_vm4 = vcmp.eq.s32.totalorder %v3025_v1, 1  ;;  %vm4011_vm5 = vcmp.eq.s32.totalorder %v3025_v1, 2 }
 0x574   : > { %vm3370_vm6 = vcmp.eq.s32.totalorder %v3039_v37, 1  ;;  %vm4012_vm7 = vcmp.eq.s32.totalorder %v3039_v37, 2  ;;  %v3833_v31 = vsel %vm3369_vm4, %v9129_v45, %v9125_v7  ;;  %v3834_v32 = vsel %vm3369_vm4, %v9142_v2, %v9132_v41  ;;  %v6986_v37 = vld [vmem:[%s7577_s15 + $0x838] sm:$0xff] }
 0x575   : > { %v3835_v16 = vsel %vm3369_vm4, %v9146_v55, %v9135_v20  ;;  %v3836_v30 = vsel %vm3369_vm4, %v9149_v19, %v9161_v14  ;;  %v3837_v48 = vsel %vm3369_vm4, %v9152_v11, %v9168_v13  ;;  %v3838_v8 = vsel %vm3369_vm4, %v9158_v40, %v9171_v49 }
 0x576   : > { %v4444_v29 = vsel %vm4011_vm5, %v9175_v39, %v3833_v31  ;;  %v4445_v57 = vsel %vm4011_vm5, %v9189_v4, %v3834_v32  ;;  %v4446_v24 = vsel %vm4011_vm5, %v9205_v53, %v3835_v16  ;;  %v4447_v17 = vsel %vm4011_vm5, %v9208_v43, %v3836_v30 }
 0x577   : > { %v4448_v51 = vsel %vm4011_vm5, %v14305_v52, %v3837_v48  ;;  %v4449_v25 = vsel %vm4011_vm5, %v14306_v60, %v3838_v8  ;;  %4828 = vst [vmem:[%s9411_s24 + $0x7e0] sm:$0xff] %v4444_v29  ;;  %4829 = vst [vmem:[%s9411_s24 + $0x7e8] sm:$0xff] %v4445_v57  ;;  %v5464_v9 = vsub.f32 %v4444_v29, %v6975_v42 }
 0x578   : > { %4830 = vst [vmem:[%s9411_s24 + $0x7f0] sm:$0xff] %v4446_v24  ;;  %4831 = vst [vmem:[%s9411_s24 + $0x7f8] sm:$0xff] %v4447_v17  ;;  %v5465_v56 = vsub.f32 %v4445_v57, %v6976_v12  ;;  %v5466_v58 = vsub.f32 %v4446_v24, %v6977_v46  ;;  %v5467_v59 = vsub.f32 %v4447_v17, %v6978_v22 }
 0x579   : > { %4832 = vst [vmem:[%s9411_s24 + $0x800] sm:$0xff] %v4448_v51  ;;  %4833 = vst [vmem:[%s9411_s24 + $0x808] sm:$0xff] %v4449_v25  ;;  %v5468_v47 = vsub.f32 %v4448_v51, %v6979_v62  ;;  %v5469_v18 = vsub.f32 %v4449_v25, %v6980_v27  ;;  %v3839_v63 = vsel %vm3370_vm6, %v9129_v45, %v9125_v7  ;;  %v3091_v51 = vpop.xlane.xlu1 %3090 }
 0x57a   : > { %v3840_v23 = vsel %vm3370_vm6, %v9142_v2, %v9132_v41  ;;  %v5470_v1 = vmul.f32 %v5464_v9, %v5464_v9  ;;  %v5471_v26 = vmul.f32 %v5465_v56, %v5465_v56  ;;  %v5472_v31 = vmul.f32 %v5466_v58, %v5466_v58  ;;  %v6981_v56 = vld [vmem:[%s7577_s15 + $0x810] sm:$0xff]  ;;  %v6982_v58 = vld [vmem:[%s7577_s15 + $0x818] sm:$0xff] }
 0x57b   : > { %v5473_v32 = vmul.f32 %v5467_v59, %v5467_v59  ;;  %v5474_v16 = vmul.f32 %v5468_v47, %v5468_v47  ;;  %v5475_v30 = vmul.f32 %v5469_v18, %v5469_v18  ;;  %v3841_v48 = vsel %vm3370_vm6, %v9146_v55, %v9135_v20  ;;  %v6983_v59 = vld [vmem:[%s7577_s15 + $0x820] sm:$0xff]  ;;  %v6984_v47 = vld [vmem:[%s7577_s15 + $0x828] sm:$0xff]  ;;  %v6985_v18 = vld [vmem:[%s7577_s15 + $0x830] sm:$0xff] }
 0x57c   : > { %v3842_v8 = vsel %vm3370_vm6, %v9149_v19, %v9161_v14  ;;  %v3843_v29 = vsel %vm3370_vm6, %v9152_v11, %v9168_v13  ;;  %v3844_v57 = vsel %vm3370_vm6, %v9158_v40, %v9171_v49  ;;  %v4450_v24 = vsel %vm4012_vm7, %v9175_v39, %v3839_v63 }
 0x57d   : > { %v4451_v17 = vsel %vm4012_vm7, %v9189_v4, %v3840_v23  ;;  %v4452_v25 = vsel %vm4012_vm7, %v9205_v53, %v3841_v48  ;;  %v4453_v42 = vsel %vm4012_vm7, %v9208_v43, %v3842_v8  ;;  %v4454_v9 = vsel %vm4012_vm7, %v14305_v52, %v3843_v29  ;;  %4834 = vst [vmem:[%s9411_s24 + $0x810] sm:$0xff] %v4450_v24 }
 0x57e   : > { %v4455_v12 = vsel %vm4012_vm7, %v14306_v60, %v3844_v57  ;;  %4835 = vst [vmem:[%s9411_s24 + $0x818] sm:$0xff] %v4451_v17  ;;  %4836 = vst [vmem:[%s9411_s24 + $0x820] sm:$0xff] %v4452_v25  ;;  %v5476_v46 = vsub.f32 %v4450_v24, %v6981_v56  ;;  %v5477_v22 = vsub.f32 %v4451_v17, %v6982_v58  ;;  %v3064_v48 = vcvt.f32.s32 %v12352_v38  ;;  %v14631_v24 = vld [vmem:[#allocation23_spill] sm:$0xff]  ;;  %v14632_v17 = vld [vmem:[#allocation72_spill] sm:$0xff] }
 0x57f   : > { %4837 = vst [vmem:[%s9411_s24 + $0x828] sm:$0xff] %v4453_v42  ;;  %4838 = vst [vmem:[%s9411_s24 + $0x830] sm:$0xff] %v4454_v9  ;;  %v5478_v62 = vsub.f32 %v4452_v25, %v6983_v59  ;;  %v5479_v27 = vsub.f32 %v4453_v42, %v6984_v47  ;;  %v5480_v63 = vsub.f32 %v4454_v9, %v6985_v18  ;;  %v3092_v8 = vcvt.f32.s32 %v3091_v51 }
 0x580   : > { %4839 = vst [vmem:[%s9411_s24 + $0x838] sm:$0xff] %v4455_v12  ;;  %v5481_v23 = vsub.f32 %v4455_v12, %v6986_v37  ;;  %v5482_v29 = vmul.f32 %v5476_v46, %v5476_v46  ;;  %v5483_v57 = vmul.f32 %v5477_v22, %v5477_v22  ;;  %v3067_v56 = vadd.s32 %v14631_v24, %v3064_v48  ;;  %v14639_v37 = vld [vmem:[#allocation89_spill] sm:$0xff]  ;;  %v14645_v24 = vld [vmem:[#allocation82_spill] sm:$0xff] }
 0x581   : > { %v5484_v34 = vmul.f32 %v5478_v62, %v5478_v62  ;;  %v5485_v33 = vmul.f32 %v5479_v27, %v5479_v27  ;;  %v5486_v0 = vmul.f32 %v5480_v63, %v5480_v63  ;;  %v12415_v58 = vadd.s32 %v14632_v17, %v3092_v8  ;;  %v14642_v8 = vld [vmem:[#allocation76_spill] sm:$0xff] }
 0x582   : > { %v5487_v54 = vmul.f32 %v5481_v23, %v5481_v23  ;;  %v5854_v25 = vadd.f32 %v5482_v29, %v5470_v1  ;;  %v5855_v42 = vadd.f32 %v5483_v57, %v5471_v26  ;;  %vm3372_vm8 = vcmp.eq.s32.totalorder %v3067_v56, 1 }
 0x583   : > { %v5856_v59 = vadd.f32 %v5484_v34, %v5472_v31  ;;  %v5857_v9 = vadd.f32 %v5485_v33, %v5473_v32  ;;  %v5858_v47 = vadd.f32 %v5486_v0, %v5474_v16  ;;  %vm4014_vm9 = vcmp.eq.s32.totalorder %v3067_v56, 2  ;;  %v14633_v31 = vld [vmem:[#allocation39_spill] sm:$0xff]  ;;  %v14648_v56 = vld [vmem:[#allocation100_spill] sm:$0xff] }
 0x584   : > { %v5859_v12 = vadd.f32 %v5487_v54, %v5475_v30  ;;  %v12418_v38 = vadd.f32 %v5854_v25, %v12319_v3  ;;  %v12421_v51 = vadd.f32 %v5855_v42, %v12322_v36  ;;  %v3851_v0 = vsel %vm3372_vm8, %v9129_v45, %v9125_v7  ;;  %v14636_v30 = vld [vmem:[#allocation42_spill] sm:$0xff] }
 0x585   : > { %v12424_v46 = vadd.f32 %v5856_v59, %v12327_v10  ;;  %v12427_v22 = vadd.f32 %v5857_v9, %v12330_v21  ;;  %v12430_v1 = vadd.f32 %v5858_v47, %v12333_v28  ;;  %v3852_v33 = vsel %vm3372_vm8, %v9142_v2, %v9132_v41  ;;  %v6987_v9 = vld [vmem:[%s7577_s15 + $0x870] sm:$0xff] }
 0x586   : > { %v12433_v54 = vadd.f32 %v5859_v12, %v12336_v50  ;;  %v3853_v34 = vsel %vm3372_vm8, %v9146_v55, %v9135_v20  ;;  %v3854_v3 = vsel %vm3372_vm8, %v9149_v19, %v9161_v14  ;;  %v3855_v36 = vsel %vm3372_vm8, %v9152_v11, %v9168_v13  ;;  %v6988_v12 = vld [vmem:[%s7577_s15 + $0x878] sm:$0xff] }
 0x587   : > { %v3856_v10 = vsel %vm3372_vm8, %v9158_v40, %v9171_v49  ;;  %v4462_v21 = vsel %vm4014_vm9, %v9175_v39, %v3851_v0  ;;  %v4463_v28 = vsel %vm4014_vm9, %v9189_v4, %v3852_v33  ;;  %v4464_v50 = vsel %vm4014_vm9, %v9205_v53, %v3853_v34  ;;  %v6989_v33 = vld [vmem:[%s7577_s15 + $0x880] sm:$0xff] }
 0x588   : > { %v4465_v26 = vsel %vm4014_vm9, %v9208_v43, %v3854_v3  ;;  %v14634_v32 = vcvt.f32.s32 %v14633_v31  ;;  %v14637_v62 = vcvt.f32.s32 %v14636_v30  ;;  %v4466_v18 = vsel %vm4014_vm9, %v14305_v52, %v3855_v36  ;;  %4846 = vst [vmem:[%s9411_s24 + $0x870] sm:$0xff] %v4462_v21  ;;  %4847 = vst [vmem:[%s9411_s24 + $0x878] sm:$0xff] %v4463_v28  ;;  %v6990_v3 = vld [vmem:[%s7577_s15 + $0x888] sm:$0xff] }
 0x589   : > { %v4467_v63 = vsel %vm4014_vm9, %v14306_v60, %v3856_v10  ;;  %4848 = vst [vmem:[%s9411_s24 + $0x880] sm:$0xff] %v4464_v50  ;;  %4849 = vst [vmem:[%s9411_s24 + $0x888] sm:$0xff] %v4465_v26  ;;  %v14640_v23 = vcvt.f32.s32 %v14639_v37  ;;  %v14643_v29 = vcvt.f32.s32 %v14642_v8  ;;  %v14646_v17 = vcvt.f32.s32 %v14645_v24  ;;  %v6991_v10 = vld [vmem:[%s7577_s15 + $0x890] sm:$0xff] }
 0x58a   : > { %v12457_v16 = vshll.u32 %v14634_v32, 16  ;;  %v12461_v27 = vshll.u32 %v14637_v62, 16  ;;  %v14649_v42 = vcvt.f32.s32 %v14648_v56  ;;  %4850 = vst [vmem:[%s9411_s24 + $0x890] sm:$0xff] %v4466_v18  ;;  %4851 = vst [vmem:[%s9411_s24 + $0x898] sm:$0xff] %v4467_v63  ;;  %v5500_v47 = vsub.f32 %v4462_v21, %v6987_v9  ;;  %v6992_v32 = vld [vmem:[%s7577_s15 + $0x898] sm:$0xff]  ;;  %v3049_v62 = vpop.xlane.xlu0 %3048 }
 0x58b   : > { %v12473_v48 = vshll.u32 %v14640_v23, 16  ;;  %v12477_v57 = vshll.u32 %v14643_v29, 16  ;;  %v12481_v25 = vshll.u32 %v14646_v17, 16  ;;  %v5501_v0 = vsub.f32 %v4463_v28, %v6988_v12  ;;  %v6993_v12 = vld [vmem:[%s7577_s15 + $0x8d0] sm:$0xff] }
 0x58c   : > { %14635 = vst [vmem:[#allocation41_spill] sm:$0xff] %v12457_v16  ;;  %14638 = vst [vmem:[#allocation108_spill] sm:$0xff] %v12461_v27  ;;  %v12485_v59 = vshll.u32 %v14649_v42, 16  ;;  %vm3374_vm10 = vcmp.eq.s32.totalorder %v12415_v58, 1  ;;  %vm4016_vm11 = vcmp.eq.s32.totalorder %v12415_v58, 2  ;;  %v5502_v34 = vsub.f32 %v4464_v50, %v6989_v33  ;;  %v7004_v27 = vld [vmem:[%s7577_s15 + $0x868] sm:$0xff] }
 0x58d   : > { %14641 = vst [vmem:[#allocation86_spill] sm:$0xff] %v12473_v48  ;;  %14644 = vst [vmem:[#allocation50_spill] sm:$0xff] %v12477_v57  ;;  %v5503_v36 = vsub.f32 %v4465_v26, %v6990_v3  ;;  %v5504_v31 = vsub.f32 %v4466_v18, %v6991_v10  ;;  %v5505_v30 = vsub.f32 %v4467_v63, %v6992_v32  ;;  %v3119_v18 = vpop.xlane.xlu1 %3118  ;;  %v6994_v3 = vld [vmem:[%s7577_s15 + $0x8d8] sm:$0xff]  ;;  %v7003_v48 = vld [vmem:[%s7577_s15 + $0x860] sm:$0xff] }
 0x58e   : > { %14647 = vst [vmem:[#allocation87_spill] sm:$0xff] %v12481_v25  ;;  %14650 = vst [vmem:[#allocation51_spill] sm:$0xff] %v12485_v59  ;;  %v3863_v21 = vsel %vm3374_vm10, %v9129_v45, %v9125_v7  ;;  %v3864_v28 = vsel %vm3374_vm10, %v9142_v2, %v9132_v41  ;;  %v3865_v50 = vsel %vm3374_vm10, %v9146_v55, %v9135_v20  ;;  %v14652_v59 = vld [vmem:[#allocation90_spill] sm:$0xff]  ;;  %v7002_v57 = vld [vmem:[%s7577_s15 + $0x858] sm:$0xff] }
 0x58f   : > { %v3866_v26 = vsel %vm3374_vm10, %v9149_v19, %v9161_v14  ;;  %v3867_v63 = vsel %vm3374_vm10, %v9152_v11, %v9168_v13  ;;  %v3868_v37 = vsel %vm3374_vm10, %v9158_v40, %v9171_v49  ;;  %v4474_v23 = vsel %vm4016_vm11, %v9175_v39, %v3863_v21 }
 0x590   : > { %v4475_v8 = vsel %vm4016_vm11, %v9189_v4, %v3864_v28  ;;  %v4476_v29 = vsel %vm4016_vm11, %v9205_v53, %v3865_v50  ;;  %v4477_v24 = vsel %vm4016_vm11, %v9208_v43, %v3866_v26  ;;  %v4478_v17 = vsel %vm4016_vm11, %v14305_v52, %v3867_v63  ;;  %4858 = vst [vmem:[%s9411_s24 + $0x8d0] sm:$0xff] %v4474_v23  ;;  %v12557_v28 = vpop.xlane.xlu0 %3076  ;;  %v6995_v63 = vld [vmem:[%s7577_s15 + $0x8e0] sm:$0xff] }
 0x591   : > { %v4479_v56 = vsel %vm4016_vm11, %v14306_v60, %v3868_v37  ;;  %4859 = vst [vmem:[%s9411_s24 + $0x8d8] sm:$0xff] %v4475_v8  ;;  %v12541_v42 = vmul.f32 %v5500_v47, %v5500_v47  ;;  %v12543_v9 = vmul.f32 %v5501_v0, %v5501_v0  ;;  %4860 = vst [vmem:[%s9411_s24 + $0x8e0] sm:$0xff] %v4476_v29  ;;  %v3050_v47 = vcvt.f32.s32 %v3049_v62  ;;  %v12555_v0 = vpop.xlane.xlu1 %3146 }
 0x592   : > { %4861 = vst [vmem:[%s9411_s24 + $0x8e8] sm:$0xff] %v4477_v24  ;;  %4862 = vst [vmem:[%s9411_s24 + $0x8f0] sm:$0xff] %v4478_v17  ;;  %v5524_v33 = vsub.f32 %v4474_v23, %v6993_v12  ;;  %v5525_v10 = vsub.f32 %v4475_v8, %v6994_v3  ;;  %v12551_v58 = vmul.f32 %v5502_v34, %v5502_v34  ;;  %v3120_v21 = vcvt.f32.s32 %v3119_v18  ;;  %v6996_v23 = vld [vmem:[%s7577_s15 + $0x8e8] sm:$0xff]  ;;  %v6997_v34 = vld [vmem:[%s7577_s15 + $0x8f0] sm:$0xff] }
 0x593   : > { %4863 = vst [vmem:[%s9411_s24 + $0x8f8] sm:$0xff] %v4479_v56  ;;  %v12553_v32 = vmul.f32 %v5503_v36, %v5503_v36  ;;  %v12559_v50 = vmul.f32 %v5504_v31, %v5504_v31  ;;  %v12561_v26 = vmul.f32 %v5505_v30, %v5505_v30  ;;  %v12564_v37 = vsub.f32 %v4476_v29, %v6995_v63  ;;  %v6998_v36 = vld [vmem:[%s7577_s15 + $0x8f8] sm:$0xff] }
 0x594   : > { %v12567_v12 = vsub.f32 %v4477_v24, %v6996_v23  ;;  %v12570_v8 = vsub.f32 %v4478_v17, %v6997_v34  ;;  %v12573_v62 = vsub.f32 %v4479_v56, %v6998_v36  ;;  %v14651_v18 = vld [vmem:[#allocation28_spill] sm:$0xff]  ;;  %v12577_v25 = vadd.s32 %v14652_v59, %v3120_v21 }
 0x595   : > { %v3053_v3 = vadd.s32 %v14651_v18, %v3050_v47  ;;  %v12579_v31 = vmul.f32 %v5524_v33, %v5524_v33  ;;  %v12581_v30 = vmul.f32 %v5525_v10, %v5525_v10 }
 0x596   : > { %vm3376_vm14 = vcmp.eq.s32.totalorder %v12577_v25, 1  ;;  %vm4018_vm15 = vcmp.eq.s32.totalorder %v12577_v25, 2  ;;  %v12700_v25 = vmul.f32 %v12573_v62, %v12573_v62 }
 0x597   : > { %vm3371_vm12 = vcmp.eq.s32.totalorder %v3053_v3, 1  ;;  %vm4013_vm13 = vcmp.eq.s32.totalorder %v3053_v3, 2  ;;  %v6999_v3 = vld [vmem:[%s7577_s15 + $0x840] sm:$0xff] }
 0x598   : > { %v3845_v59 = vsel %vm3371_vm12, %v9129_v45, %v9125_v7  ;;  %v3846_v17 = vsel %vm3371_vm12, %v9142_v2, %v9132_v41  ;;  %v3847_v56 = vsel %vm3371_vm12, %v9146_v55, %v9135_v20  ;;  %v3848_v33 = vsel %vm3371_vm12, %v9149_v19, %v9161_v14 }
 0x599   : > { %v3849_v10 = vsel %vm3371_vm12, %v9152_v11, %v9168_v13  ;;  %v3850_v47 = vsel %vm3371_vm12, %v9158_v40, %v9171_v49  ;;  %v4456_v21 = vsel %vm4013_vm13, %v9175_v39, %v3845_v59  ;;  %v4457_v63 = vsel %vm4013_vm13, %v9189_v4, %v3846_v17  ;;  %v7000_v17 = vld [vmem:[%s7577_s15 + $0x848] sm:$0xff] }
 0x59a   : > { %v4458_v23 = vsel %vm4013_vm13, %v9205_v53, %v3847_v56  ;;  %v4459_v34 = vsel %vm4013_vm13, %v9208_v43, %v3848_v33  ;;  %v4460_v36 = vsel %vm4013_vm13, %v14305_v52, %v3849_v10  ;;  %v4461_v18 = vsel %vm4013_vm13, %v14306_v60, %v3850_v47  ;;  %4840 = vst [vmem:[%s9411_s24 + $0x840] sm:$0xff] %v4456_v21  ;;  %v7001_v56 = vld [vmem:[%s7577_s15 + $0x850] sm:$0xff] }
 0x59b   : > { %4841 = vst [vmem:[%s9411_s24 + $0x848] sm:$0xff] %v4457_v63  ;;  %4842 = vst [vmem:[%s9411_s24 + $0x850] sm:$0xff] %v4458_v23  ;;  %v5488_v59 = vsub.f32 %v4456_v21, %v6999_v3  ;;  %v5489_v24 = vsub.f32 %v4457_v63, %v7000_v17  ;;  %v5490_v29 = vsub.f32 %v4458_v23, %v7001_v56  ;;  %v12625_v56 = vpop.xlane.xlu1 %3174 }
 0x59c   : > { %4843 = vst [vmem:[%s9411_s24 + $0x858] sm:$0xff] %v4459_v34  ;;  %4844 = vst [vmem:[%s9411_s24 + $0x860] sm:$0xff] %v4460_v36  ;;  %v5491_v33 = vsub.f32 %v4459_v34, %v7002_v57  ;;  %v5492_v10 = vsub.f32 %v4460_v36, %v7003_v48  ;;  %v5493_v16 = vsub.f32 %v4461_v18, %v7004_v27 }
 0x59d   : > { %4845 = vst [vmem:[%s9411_s24 + $0x868] sm:$0xff] %v4461_v18  ;;  %v3875_v47 = vsel %vm3376_vm14, %v9129_v45, %v9125_v7  ;;  %v3876_v21 = vsel %vm3376_vm14, %v9142_v2, %v9132_v41  ;;  %v5494_v3 = vmul.f32 %v5488_v59, %v5488_v59  ;;  %v5495_v63 = vmul.f32 %v5489_v24, %v5489_v24 }
 0x59e   : > { %v5496_v17 = vmul.f32 %v5490_v29, %v5490_v29  ;;  %v5497_v23 = vmul.f32 %v5491_v33, %v5491_v33  ;;  %v5498_v57 = vmul.f32 %v5492_v10, %v5492_v10  ;;  %v5499_v48 = vmul.f32 %v5493_v16, %v5493_v16 }
 0x59f   : > { %v3877_v27 = vsel %vm3376_vm14, %v9146_v55, %v9135_v20  ;;  %v3878_v34 = vsel %vm3376_vm14, %v9149_v19, %v9161_v14  ;;  %v12636_v36 = vadd.f32 %v12541_v42, %v5494_v3  ;;  %v12639_v29 = vadd.f32 %v12543_v9, %v5495_v63  ;;  %v12673_v33 = vpop.xlane.xlu1 %3202  ;;  %v7005_v3 = vld [vmem:[%s7577_s15 + $0x930] sm:$0xff] }
 0x5a0   : > { %v12642_v16 = vadd.f32 %v12551_v58, %v5496_v17  ;;  %v12645_v24 = vadd.f32 %v12553_v32, %v5497_v23  ;;  %v12648_v18 = vadd.f32 %v12559_v50, %v5498_v57  ;;  %v12651_v42 = vadd.f32 %v12561_v26, %v5499_v48  ;;  %v7006_v57 = vld [vmem:[%s7577_s15 + $0x938] sm:$0xff] }
 0x5a1   : > { %v3879_v9 = vsel %vm3376_vm14, %v9152_v11, %v9168_v13  ;;  %v3880_v58 = vsel %vm3376_vm14, %v9158_v40, %v9171_v49  ;;  %v4486_v32 = vsel %vm4018_vm15, %v9175_v39, %v3875_v47  ;;  %v4487_v50 = vsel %vm4018_vm15, %v9189_v4, %v3876_v21  ;;  %v7010_v23 = vld [vmem:[%s7577_s15 + $0x958] sm:$0xff] }
 0x5a2   : > { %v4488_v26 = vsel %vm4018_vm15, %v9205_v53, %v3877_v27  ;;  %v4489_v59 = vsel %vm4018_vm15, %v9208_v43, %v3878_v34  ;;  %v12677_v10 = vmul.f32 %v12564_v37, %v12564_v37  ;;  %v4490_v47 = vsel %vm4018_vm15, %v14305_v52, %v3879_v9  ;;  %4870 = vst [vmem:[%s9411_s24 + $0x930] sm:$0xff] %v4486_v32  ;;  %v14654_v34 = vld [vmem:[#allocation93_spill] sm:$0xff] }
 0x5a3   : > { %v4491_v21 = vsel %vm4018_vm15, %v14306_v60, %v3880_v58  ;;  %4871 = vst [vmem:[%s9411_s24 + $0x938] sm:$0xff] %v4487_v50  ;;  %4872 = vst [vmem:[%s9411_s24 + $0x940] sm:$0xff] %v4488_v26  ;;  %v5548_v63 = vsub.f32 %v4486_v32, %v7005_v3  ;;  %v12692_v37 = vmul.f32 %v12567_v12, %v12567_v12  ;;  %v14653_v27 = vcvt.f32.s32 %v12555_v0  ;;  %v14656_v58 = vld [vmem:[#allocation95_spill] sm:$0xff]  ;;  %v7007_v3 = vld [vmem:[%s7577_s15 + $0x940] sm:$0xff] }
 0x5a4   : > { %4873 = vst [vmem:[%s9411_s24 + $0x948] sm:$0xff] %v4489_v59  ;;  %v12696_v17 = vmul.f32 %v12570_v8, %v12570_v8  ;;  %4874 = vst [vmem:[%s9411_s24 + $0x950] sm:$0xff] %v4490_v47  ;;  %v5549_v48 = vsub.f32 %v4487_v50, %v7006_v57  ;;  %v14655_v9 = vcvt.f32.s32 %v12557_v28  ;;  %v5550_v62 = vsub.f32 %v4488_v26, %v7007_v3 }
 0x5a5   : > { %4875 = vst [vmem:[%s9411_s24 + $0x958] sm:$0xff] %v4491_v21  ;;  %v3151_v12 = vadd.s32 %v14654_v34, %v14653_v27  ;;  %v5551_v15 = vsub.f32 %v4489_v59, %v7008_v61  ;;  %v5552_v5 = vsub.f32 %v4490_v47, %v7009_v6  ;;  %v5553_v35 = vsub.f32 %v4491_v21, %v7010_v23 }
 0x5a6   : > { %v12712_v8 = vadd.s32 %v14656_v58, %v14655_v9  ;;  %v12719_v50 = vmul.f32 %v5548_v63, %v5548_v63  ;;  %v12742_v34 = vmul.f32 %v5549_v48, %v5549_v48 }
 0x5a7   : > { %vm3378_vm0 = vcmp.eq.s32.totalorder %v3151_v12, 1  ;;  %vm4020_vm1 = vcmp.eq.s32.totalorder %v3151_v12, 2  ;;  %v12744_v12 = vmul.f32 %v5550_v62, %v5550_v62  ;;  %v12746_v9 = vmul.f32 %v5551_v15, %v5551_v15 }
 0x5a8   : > { %14657 = vst [vmem:[#allocation49_spill] sm:$0xff] %v12719_v50  ;;  %vm3373_vm2 = vcmp.eq.s32.totalorder %v12712_v8, 1  ;;  %v3887_v0 = vsel %vm3378_vm0, %v9129_v45, %v9125_v7  ;;  %v3888_v28 = vsel %vm3378_vm0, %v9142_v2, %v9132_v41  ;;  %v3889_v61 = vsel %vm3378_vm0, %v9146_v55, %v9135_v20  ;;  %14658 = vst [vmem:[#allocation91_spill] sm:$0xff] %v12742_v34 }
 0x5a9   : > { %v3890_v6 = vsel %vm3378_vm0, %v9149_v19, %v9161_v14  ;;  %v3891_v26 = vsel %vm3378_vm0, %v9152_v11, %v9168_v13  ;;  %v3892_v59 = vsel %vm3378_vm0, %v9158_v40, %v9171_v49  ;;  %v4498_v47 = vsel %vm4020_vm1, %v9175_v39, %v3887_v0  ;;  %14659 = vst [vmem:[#allocation68_spill] sm:$0xff] %v12744_v12  ;;  %v7012_v0 = vld [vmem:[%s7577_s15 + $0x998] sm:$0xff]  ;;  %v7021_v12 = vld [vmem:[%s7577_s15 + $0x8c0] sm:$0xff] }
 0x5aa   : > { %v4499_v21 = vsel %vm4020_vm1, %v9189_v4, %v3888_v28  ;;  %v4500_v63 = vsel %vm4020_vm1, %v9205_v53, %v3889_v61  ;;  %v4501_v23 = vsel %vm4020_vm1, %v9208_v43, %v3890_v6  ;;  %v4502_v57 = vsel %vm4020_vm1, %v14305_v52, %v3891_v26  ;;  %4882 = vst [vmem:[%s9411_s24 + $0x990] sm:$0xff] %v4498_v47  ;;  %v7014_v6 = vld [vmem:[%s7577_s15 + $0x9a8] sm:$0xff] }
 0x5ab   : > { %v4503_v27 = vsel %vm4020_vm1, %v14306_v60, %v3892_v59  ;;  %4883 = vst [vmem:[%s9411_s24 + $0x998] sm:$0xff] %v4499_v21  ;;  %14660 = vst [vmem:[#allocation92_spill] sm:$0xff] %v12746_v9  ;;  %v12748_v58 = vmul.f32 %v5552_v5, %v5552_v5  ;;  %v12754_v3 = vmul.f32 %v5553_v35, %v5553_v35  ;;  %vm4015_vm3 = vcmp.eq.s32.totalorder %v12712_v8, 2  ;;  %v7011_v5 = vld [vmem:[%s7577_s15 + $0x990] sm:$0xff]  ;;  %v7013_v35 = vld [vmem:[%s7577_s15 + $0x9a0] sm:$0xff] }
 0x5ac   : > { %4884 = vst [vmem:[%s9411_s24 + $0x9a0] sm:$0xff] %v4500_v63  ;;  %4885 = vst [vmem:[%s9411_s24 + $0x9a8] sm:$0xff] %v4501_v23  ;;  %v3857_v48 = vsel %vm3373_vm2, %v9129_v45, %v9125_v7  ;;  %v3858_v15 = vsel %vm3373_vm2, %v9142_v2, %v9132_v41  ;;  %v12766_v62 = vsub.f32 %v4498_v47, %v7011_v5  ;;  %v7015_v59 = vld [vmem:[%s7577_s15 + $0x9b0] sm:$0xff]  ;;  %v7020_v9 = vld [vmem:[%s7577_s15 + $0x8b8] sm:$0xff] }
 0x5ad   : > { %14661 = vst [vmem:[#allocation69_spill] sm:$0xff] %v12748_v58  ;;  %4886 = vst [vmem:[%s9411_s24 + $0x9b0] sm:$0xff] %v4502_v57  ;;  %v12769_v28 = vsub.f32 %v4499_v21, %v7012_v0  ;;  %v12772_v61 = vsub.f32 %v4500_v63, %v7013_v35  ;;  %v12775_v26 = vsub.f32 %v4501_v23, %v7014_v6  ;;  %v7022_v8 = vld [vmem:[%s7577_s15 + $0x8c8] sm:$0xff] }
 0x5ae   : > { %4887 = vst [vmem:[%s9411_s24 + $0x9b8] sm:$0xff] %v4503_v27  ;;  %14662 = vst [vmem:[#allocation46_spill] sm:$0xff] %v12754_v3  ;;  %v12778_v32 = vsub.f32 %v4502_v57, %v7015_v59  ;;  %v7016_v3 = vld [vmem:[%s7577_s15 + $0x9b8] sm:$0xff]  ;;  %v3859_v21 = vsel %vm3373_vm2, %v9146_v55, %v9135_v20  ;;  %v3860_v63 = vsel %vm3373_vm2, %v9149_v19, %v9161_v14  ;;  %v7018_v59 = vld [vmem:[%s7577_s15 + $0x8a8] sm:$0xff] }
 0x5af   : > { %14663 = vst [vmem:[#allocation48_spill] sm:$0xff] %v12769_v28  ;;  %14664 = vst [vmem:[#allocation80_spill] sm:$0xff] %v12772_v61  ;;  %v12781_v47 = vsub.f32 %v4503_v27, %v7016_v3  ;;  %v3861_v23 = vsel %vm3373_vm2, %v9152_v11, %v9168_v13  ;;  %v3862_v57 = vsel %vm3373_vm2, %v9158_v40, %v9171_v49  ;;  %v14671_v61 = vld [vmem:[#allocation24_spill] sm:$0xff] }
 0x5b0   : > { %14665 = vst [vmem:[#allocation59_spill] sm:$0xff] %v12775_v26  ;;  %14666 = vst [vmem:[#allocation45_spill] sm:$0xff] %v12778_v32  ;;  %v4468_v27 = vsel %vm4015_vm3, %v9175_v39, %v3857_v48  ;;  %v4469_v3 = vsel %vm4015_vm3, %v9189_v4, %v3858_v15  ;;  %v4470_v5 = vsel %vm4015_vm3, %v9205_v53, %v3859_v21  ;;  %v7017_v15 = vld [vmem:[%s7577_s15 + $0x8a0] sm:$0xff]  ;;  %v14670_v26 = vcvt.f32.s32 %v12673_v33 }
 0x5b1   : > { %14667 = vst [vmem:[#allocation18_spill] sm:$0xff] %v12781_v47  ;;  %v4471_v0 = vsel %vm4015_vm3, %v9208_v43, %v3860_v63  ;;  %v4472_v35 = vsel %vm4015_vm3, %v14305_v52, %v3861_v23  ;;  %v4473_v48 = vsel %vm4015_vm3, %v14306_v60, %v3862_v57  ;;  %4852 = vst [vmem:[%s9411_s24 + $0x8a0] sm:$0xff] %v4468_v27  ;;  %v7019_v63 = vld [vmem:[%s7577_s15 + $0x8b0] sm:$0xff]  ;;  %v14668_v57 = vcvt.f32.s32 %v12625_v56  ;;  %v14669_v47 = vld [vmem:[#allocation26_spill] sm:$0xff] }
 0x5b2   : > { %4853 = vst [vmem:[%s9411_s24 + $0x8a8] sm:$0xff] %v4469_v3  ;;  %4854 = vst [vmem:[%s9411_s24 + $0x8b0] sm:$0xff] %v4470_v5  ;;  %v5512_v6 = vsub.f32 %v4468_v27, %v7017_v15  ;;  %v5513_v21 = vsub.f32 %v4469_v3, %v7018_v59  ;;  %v5514_v58 = vsub.f32 %v4470_v5, %v7019_v63 }
 0x5b3   : > { %4855 = vst [vmem:[%s9411_s24 + $0x8b8] sm:$0xff] %v4471_v0  ;;  %4856 = vst [vmem:[%s9411_s24 + $0x8c0] sm:$0xff] %v4472_v35  ;;  %v5515_v23 = vsub.f32 %v4471_v0, %v7020_v9  ;;  %v5516_v34 = vsub.f32 %v4472_v35, %v7021_v12  ;;  %v5517_v50 = vsub.f32 %v4473_v48, %v7022_v8 }
 0x5b4   : > { %4857 = vst [vmem:[%s9411_s24 + $0x8c8] sm:$0xff] %v4473_v48  ;;  %v3179_v32 = vadd.s32 %v14669_v47, %v14668_v57  ;;  %v12835_v28 = vadd.s32 %v14671_v61, %v14670_v26  ;;  %v5518_v27 = vmul.f32 %v5512_v6, %v5512_v6  ;;  %v5519_v15 = vmul.f32 %v5513_v21, %v5513_v21  ;;  %v14677_v48 = vld [vmem:[#allocation44_spill] sm:$0xff]  ;;  %v14679_v6 = vld [vmem:[#allocation78_spill] sm:$0xff] }
 0x5b5   : > { %v5520_v3 = vmul.f32 %v5514_v58, %v5514_v58  ;;  %v5521_v59 = vmul.f32 %v5515_v23, %v5515_v23  ;;  %v5522_v5 = vmul.f32 %v5516_v34, %v5516_v34  ;;  %v5523_v63 = vmul.f32 %v5517_v50, %v5517_v50  ;;  %v14681_v23 = vld [vmem:[#allocation43_spill] sm:$0xff] }
 0x5b6   : > { %vm3380_vm4 = vcmp.eq.s32.totalorder %v3179_v32, 1  ;;  %vm4022_vm5 = vcmp.eq.s32.totalorder %v3179_v32, 2  ;;  %v5866_v12 = vadd.f32 %v12579_v31, %v5518_v27  ;;  %v5867_v9 = vadd.f32 %v12581_v30, %v5519_v15 }
 0x5b7   : > { %v5868_v56 = vadd.f32 %v12677_v10, %v5520_v3  ;;  %v5869_v47 = vadd.f32 %v12692_v37, %v5521_v59  ;;  %v5870_v33 = vadd.f32 %v12696_v17, %v5522_v5  ;;  %v5871_v61 = vadd.f32 %v12700_v25, %v5523_v63  ;;  %v14683_v63 = vld [vmem:[#allocation48_spill] sm:$0xff] }
 0x5b8   : > { %v3899_v58 = vsel %vm3380_vm4, %v9129_v45, %v9125_v7  ;;  %v3900_v50 = vsel %vm3380_vm4, %v9142_v2, %v9132_v41  ;;  %v5986_v31 = vadd.f32 %v5866_v12, %v12636_v36  ;;  %v5987_v30 = vadd.f32 %v5867_v9, %v12639_v29  ;;  %v14684_v9 = vld [vmem:[#allocation80_spill] sm:$0xff] }
 0x5b9   : > { %v5988_v10 = vadd.f32 %v5868_v56, %v12642_v16  ;;  %v5989_v37 = vadd.f32 %v5869_v47, %v12645_v24  ;;  %v5990_v17 = vadd.f32 %v5870_v33, %v12648_v18  ;;  %v5991_v25 = vadd.f32 %v5871_v61, %v12651_v42  ;;  %v14685_v47 = vld [vmem:[#allocation59_spill] sm:$0xff]  ;;  %v14687_v61 = vld [vmem:[#allocation18_spill] sm:$0xff] }
 0x5ba   : > { %v3901_v34 = vsel %vm3380_vm4, %v9146_v55, %v9135_v20  ;;  %v3902_v26 = vsel %vm3380_vm4, %v9149_v19, %v9161_v14  ;;  %v6046_v36 = vadd.f32 %v5986_v31, %v12418_v38  ;;  %v6047_v29 = vadd.f32 %v5987_v30, %v12421_v51  ;;  %v7024_v30 = vld [vmem:[%s7577_s15 + $0x9f8] sm:$0xff] }
 0x5bb   : > { %v6048_v16 = vadd.f32 %v5988_v10, %v12424_v46  ;;  %v6049_v24 = vadd.f32 %v5989_v37, %v12427_v22  ;;  %v6050_v18 = vadd.f32 %v5990_v17, %v12430_v1  ;;  %v6051_v42 = vadd.f32 %v5991_v25, %v12433_v54  ;;  %v14673_v46 = vld [vmem:[#allocation38_spill] sm:$0xff] }
 0x5bc   : > { %v3903_v0 = vsel %vm3380_vm4, %v9152_v11, %v9168_v13  ;;  %v3904_v38 = vsel %vm3380_vm4, %v9158_v40, %v9171_v49  ;;  %v12874_v51 = vadd.f32 %v6046_v36, %v12277_v44  ;;  %v12877_v35 = vadd.f32 %v6047_v29, %v14673_v46  ;;  %v14675_v22 = vld [vmem:[#allocation58_spill] sm:$0xff]  ;;  %v7028_v29 = vld [vmem:[%s7577_s15 + $0xa18] sm:$0xff] }
 0x5bd   : > { %v12880_v1 = vadd.f32 %v6048_v16, %v14675_v22  ;;  %v12883_v54 = vadd.f32 %v6049_v24, %v14677_v48  ;;  %v12886_v21 = vadd.f32 %v6050_v18, %v14679_v6  ;;  %v12889_v8 = vadd.f32 %v6051_v42, %v14681_v23  ;;  %v7025_v37 = vld [vmem:[%s7577_s15 + $0xa00] sm:$0xff]  ;;  %v7026_v25 = vld [vmem:[%s7577_s15 + $0xa08] sm:$0xff]  ;;  %v3105_v22 = vpop.xlane.xlu0 %3104  ;;  %v3231_v48 = vpop.xlane.xlu1 %3230 }
 0x5be   : > { %14672 = vst [vmem:[#allocation70_spill] sm:$0xff] %v12874_v51  ;;  %14674 = vst [vmem:[#allocation71_spill] sm:$0xff] %v12877_v35  ;;  %v4510_v44 = vsel %vm4022_vm5, %v9175_v39, %v3899_v58  ;;  %v4511_v57 = vsel %vm4022_vm5, %v9189_v4, %v3900_v50  ;;  %v4512_v27 = vsel %vm4022_vm5, %v9205_v53, %v3901_v34  ;;  %v7023_v50 = vld [vmem:[%s7577_s15 + $0x9f0] sm:$0xff]  ;;  %vm3382_vm6 = vcmp.eq.s32.totalorder %v12835_v28, 1  ;;  %v14705_v51 = vld [vmem:[#allocation74_spill] sm:$0xff] }
 0x5bf   : > { %14676 = vst [vmem:[#allocation53_spill] sm:$0xff] %v12880_v1  ;;  %14678 = vst [vmem:[#allocation73_spill] sm:$0xff] %v12883_v54  ;;  %v4513_v15 = vsel %vm4022_vm5, %v9208_v43, %v3902_v26  ;;  %v4514_v3 = vsel %vm4022_vm5, %v14305_v52, %v3903_v0  ;;  %v4515_v59 = vsel %vm4022_vm5, %v14306_v60, %v3904_v38  ;;  %vm4024_vm7 = vcmp.eq.s32.totalorder %v12835_v28, 2  ;;  %v7027_v26 = vld [vmem:[%s7577_s15 + $0xa10] sm:$0xff]  ;;  %v14699_v1 = vld [vmem:[#allocation46_spill] sm:$0xff] }
 0x5c0   : > { %14680 = vst [vmem:[#allocation29_spill] sm:$0xff] %v12886_v21  ;;  %14682 = vst [vmem:[#allocation96_spill] sm:$0xff] %v12889_v8  ;;  %v12907_v5 = vmul.f32 %v12766_v62, %v12766_v62  ;;  %v12911_v12 = vmul.f32 %v14683_v63, %v14683_v63  ;;  %v12915_v56 = vmul.f32 %v14684_v9, %v14684_v9  ;;  %v14686_v62 = vld [vmem:[#allocation45_spill] sm:$0xff]  ;;  %v14695_v21 = vld [vmem:[#allocation91_spill] sm:$0xff] }
 0x5c1   : > { %4894 = vst [vmem:[%s9411_s24 + $0x9f0] sm:$0xff] %v4510_v44  ;;  %4895 = vst [vmem:[%s9411_s24 + $0x9f8] sm:$0xff] %v4511_v57  ;;  %v12919_v32 = vmul.f32 %v14685_v47, %v14685_v47  ;;  %v12927_v33 = vmul.f32 %v14686_v62, %v14686_v62  ;;  %v12931_v58 = vmul.f32 %v14687_v61, %v14687_v61  ;;  %v7030_v63 = vld [vmem:[%s7577_s15 + $0xa58] sm:$0xff]  ;;  %v7031_v61 = vld [vmem:[%s7577_s15 + $0xa60] sm:$0xff] }
 0x5c2   : > { %4896 = vst [vmem:[%s9411_s24 + $0xa00] sm:$0xff] %v4512_v27  ;;  %4897 = vst [vmem:[%s9411_s24 + $0xa08] sm:$0xff] %v4513_v15  ;;  %v5596_v31 = vsub.f32 %v4510_v44, %v7023_v50  ;;  %v5597_v10 = vsub.f32 %v4511_v57, %v7024_v30  ;;  %v5598_v17 = vsub.f32 %v4512_v27, %v7025_v37  ;;  %v7032_v50 = vld [vmem:[%s7577_s15 + $0xa68] sm:$0xff] }
 0x5c3   : > { %4898 = vst [vmem:[%s9411_s24 + $0xa10] sm:$0xff] %v4514_v3  ;;  %4899 = vst [vmem:[%s9411_s24 + $0xa18] sm:$0xff] %v4515_v59  ;;  %v5599_v34 = vsub.f32 %v4513_v15, %v7026_v25  ;;  %v5600_v36 = vsub.f32 %v4514_v3, %v7027_v26  ;;  %v5601_v16 = vsub.f32 %v4515_v59, %v7028_v29  ;;  %v7029_v3 = vld [vmem:[%s7577_s15 + $0xa50] sm:$0xff]  ;;  %v3106_v26 = vcvt.f32.s32 %v3105_v22 }
 0x5c4   : > { %v3911_v24 = vsel %vm3382_vm6, %v9129_v45, %v9125_v7  ;;  %v3912_v18 = vsel %vm3382_vm6, %v9142_v2, %v9132_v41  ;;  %v3913_v42 = vsel %vm3382_vm6, %v9146_v55, %v9135_v20  ;;  %v3914_v0 = vsel %vm3382_vm6, %v9149_v19, %v9161_v14  ;;  %v14690_v22 = vld [vmem:[#allocation27_spill] sm:$0xff] }
 0x5c5   : > { %v3915_v38 = vsel %vm3382_vm6, %v9152_v11, %v9168_v13  ;;  %v3916_v46 = vsel %vm3382_vm6, %v9158_v40, %v9171_v49  ;;  %v4522_v6 = vsel %vm4024_vm7, %v9175_v39, %v3911_v24  ;;  %v4523_v23 = vsel %vm4024_vm7, %v9189_v4, %v3912_v18  ;;  %v13001_v24 = vpop.xlane.xlu0 %3132 }
 0x5c6   : > { %v4524_v44 = vsel %vm4024_vm7, %v9205_v53, %v3913_v42  ;;  %v4525_v57 = vsel %vm4024_vm7, %v9208_v43, %v3914_v0  ;;  %v4526_v27 = vsel %vm4024_vm7, %v14305_v52, %v3915_v38  ;;  %v4527_v15 = vsel %vm4024_vm7, %v14306_v60, %v3916_v46  ;;  %4906 = vst [vmem:[%s9411_s24 + $0xa50] sm:$0xff] %v4522_v6  ;;  %v7033_v42 = vld [vmem:[%s7577_s15 + $0xa70] sm:$0xff]  ;;  %v7034_v38 = vld [vmem:[%s7577_s15 + $0xa78] sm:$0xff] }
 0x5c7   : > { %4907 = vst [vmem:[%s9411_s24 + $0xa58] sm:$0xff] %v4523_v23  ;;  %4908 = vst [vmem:[%s9411_s24 + $0xa60] sm:$0xff] %v4524_v44  ;;  %v5620_v59 = vsub.f32 %v4522_v6, %v7029_v3  ;;  %v5621_v9 = vsub.f32 %v4523_v23, %v7030_v63  ;;  %v12989_v47 = vmul.f32 %v5596_v31, %v5596_v31  ;;  %v3232_v29 = vcvt.f32.s32 %v3231_v48  ;;  %v13003_v31 = vpop.xlane.xlu1 %3258  ;;  %v14691_v6 = vld [vmem:[#allocation54_spill] sm:$0xff] }
 0x5c8   : > { %4909 = vst [vmem:[%s9411_s24 + $0xa68] sm:$0xff] %v4525_v57  ;;  %v12991_v62 = vmul.f32 %v5597_v10, %v5597_v10  ;;  %4910 = vst [vmem:[%s9411_s24 + $0xa70] sm:$0xff] %v4526_v27  ;;  %v5622_v28 = vsub.f32 %v4524_v44, %v7031_v61  ;;  %v5623_v30 = vsub.f32 %v4525_v57, %v7032_v50  ;;  %v7040_v57 = vld [vmem:[%s7577_s15 + $0x928] sm:$0xff] }
 0x5c9   : > { %4911 = vst [vmem:[%s9411_s24 + $0xa78] sm:$0xff] %v4527_v15  ;;  %v12997_v37 = vmul.f32 %v5598_v17, %v5598_v17  ;;  %v12999_v25 = vmul.f32 %v5599_v34, %v5599_v34  ;;  %v13005_v18 = vmul.f32 %v5600_v36, %v5600_v36  ;;  %v13007_v10 = vmul.f32 %v5601_v16, %v5601_v16 }
 0x5ca   : > { %v13010_v0 = vsub.f32 %v4526_v27, %v7033_v42  ;;  %v13013_v46 = vsub.f32 %v4527_v15, %v7034_v38  ;;  %v13015_v17 = vmul.f32 %v5620_v59, %v5620_v59  ;;  %v13017_v34 = vmul.f32 %v5621_v9, %v5621_v9  ;;  %v7035_v38 = vld [vmem:[%s7577_s15 + $0x900] sm:$0xff] }
 0x5cb   : > { %v3109_v48 = vadd.s32 %v14690_v22, %v3106_v26  ;;  %v13021_v23 = vadd.s32 %v14691_v6, %v3232_v29  ;;  %v13023_v44 = vmul.f32 %v5622_v28, %v5622_v28  ;;  %v13025_v36 = vmul.f32 %v5623_v30, %v5623_v30  ;;  %v13051_v42 = vpop.xlane.xlu1 %3286 }
 0x5cc   : > { %14688 = vst [vmem:[#allocation75_spill] sm:$0xff] %v13015_v17  ;;  %14689 = vst [vmem:[#allocation47_spill] sm:$0xff] %v13017_v34  ;;  %v7050_v34 = vld [vmem:[%s7577_s15 + $0x978] sm:$0xff]  ;;  %v7051_v17 = vld [vmem:[%s7577_s15 + $0x980] sm:$0xff] }
 0x5cd   : > { %14692 = vst [vmem:[#allocation32_spill] sm:$0xff] %v13023_v44  ;;  %14693 = vst [vmem:[#allocation97_spill] sm:$0xff] %v13025_v36  ;;  %vm3375_vm8 = vcmp.eq.s32.totalorder %v3109_v48, 1  ;;  %vm4017_vm9 = vcmp.eq.s32.totalorder %v3109_v48, 2  ;;  %vm3384_vm10 = vcmp.eq.s32.totalorder %v13021_v23, 1  ;;  %vm4026_vm11 = vcmp.eq.s32.totalorder %v13021_v23, 2 }
 0x5ce   : > { %v3869_v27 = vsel %vm3375_vm8, %v9129_v45, %v9125_v7  ;;  %v3870_v15 = vsel %vm3375_vm8, %v9142_v2, %v9132_v41  ;;  %v3871_v3 = vsel %vm3375_vm8, %v9146_v55, %v9135_v20  ;;  %v3872_v59 = vsel %vm3375_vm8, %v9149_v19, %v9161_v14  ;;  %v7036_v48 = vld [vmem:[%s7577_s15 + $0x908] sm:$0xff]  ;;  %v7041_v23 = vld [vmem:[%s7577_s15 + $0xab0] sm:$0xff] }
 0x5cf   : > { %v3873_v63 = vsel %vm3375_vm8, %v9152_v11, %v9168_v13  ;;  %v3874_v9 = vsel %vm3375_vm8, %v9158_v40, %v9171_v49  ;;  %v4480_v61 = vsel %vm4017_vm9, %v9175_v39, %v3869_v27  ;;  %v4481_v28 = vsel %vm4017_vm9, %v9189_v4, %v3870_v15  ;;  %v7037_v27 = vld [vmem:[%s7577_s15 + $0x910] sm:$0xff] }
 0x5d0   : > { %v4482_v50 = vsel %vm4017_vm9, %v9205_v53, %v3871_v3  ;;  %v4483_v30 = vsel %vm4017_vm9, %v9208_v43, %v3872_v59  ;;  %v4484_v26 = vsel %vm4017_vm9, %v14305_v52, %v3873_v63  ;;  %v4485_v29 = vsel %vm4017_vm9, %v14306_v60, %v3874_v9  ;;  %4864 = vst [vmem:[%s9411_s24 + $0x900] sm:$0xff] %v4480_v61  ;;  %v7038_v3 = vld [vmem:[%s7577_s15 + $0x918] sm:$0xff]  ;;  %v7039_v63 = vld [vmem:[%s7577_s15 + $0x920] sm:$0xff] }
 0x5d1   : > { %4865 = vst [vmem:[%s9411_s24 + $0x908] sm:$0xff] %v4481_v28  ;;  %4866 = vst [vmem:[%s9411_s24 + $0x910] sm:$0xff] %v4482_v50  ;;  %v5536_v22 = vsub.f32 %v4480_v61, %v7035_v38  ;;  %v5537_v6 = vsub.f32 %v4481_v28, %v7036_v48  ;;  %v5538_v15 = vsub.f32 %v4482_v50, %v7037_v27  ;;  %v13071_v38 = vpop.xlane.xlu0 %3160 }
 0x5d2   : > { %4867 = vst [vmem:[%s9411_s24 + $0x918] sm:$0xff] %v4483_v30  ;;  %4868 = vst [vmem:[%s9411_s24 + $0x920] sm:$0xff] %v4484_v26  ;;  %v5539_v59 = vsub.f32 %v4483_v30, %v7038_v3  ;;  %v5540_v9 = vsub.f32 %v4484_v26, %v7039_v63  ;;  %v5541_v16 = vsub.f32 %v4485_v29, %v7040_v57  ;;  %v14694_v3 = vld [vmem:[#allocation49_spill] sm:$0xff] }
 0x5d3   : > { %4869 = vst [vmem:[%s9411_s24 + $0x928] sm:$0xff] %v4485_v29  ;;  %v3923_v8 = vsel %vm3384_vm10, %v9129_v45, %v9125_v7  ;;  %v3924_v61 = vsel %vm3384_vm10, %v9142_v2, %v9132_v41  ;;  %v5542_v28 = vmul.f32 %v5536_v22, %v5536_v22  ;;  %v5543_v50 = vmul.f32 %v5537_v6, %v5537_v6  ;;  %v14696_v6 = vld [vmem:[#allocation68_spill] sm:$0xff] }
 0x5d4   : > { %v5544_v48 = vmul.f32 %v5538_v15, %v5538_v15  ;;  %v5545_v30 = vmul.f32 %v5539_v59, %v5539_v59  ;;  %v5546_v27 = vmul.f32 %v5540_v9, %v5540_v9  ;;  %v5547_v26 = vmul.f32 %v5541_v16, %v5541_v16  ;;  %v14697_v16 = vld [vmem:[#allocation92_spill] sm:$0xff]  ;;  %v14698_v9 = vld [vmem:[#allocation69_spill] sm:$0xff] }
 0x5d5   : > { %v3925_v57 = vsel %vm3384_vm10, %v9146_v55, %v9135_v20  ;;  %v3926_v29 = vsel %vm3384_vm10, %v9149_v19, %v9161_v14  ;;  %v13082_v63 = vadd.f32 %v14694_v3, %v5542_v28  ;;  %v13085_v22 = vadd.f32 %v14695_v21, %v5543_v50  ;;  %v13107_v50 = vpop.xlane.xlu1 %3314 }
 0x5d6   : > { %v13088_v15 = vadd.f32 %v14696_v6, %v5544_v48  ;;  %v13091_v59 = vadd.f32 %v14697_v16, %v5545_v30  ;;  %v13094_v54 = vadd.f32 %v14698_v9, %v5546_v27  ;;  %v13097_v35 = vadd.f32 %v14699_v1, %v5547_v26  ;;  %14700 = vst [vmem:[#allocation31_spill] sm:$0xff] %v13107_v50  ;;  %v13109_v48 = vpop.xlane.xlu0 %3188  ;;  %v7042_v9 = vld [vmem:[%s7577_s15 + $0xab8] sm:$0xff] }
 0x5d7   : > { %v3927_v21 = vsel %vm3384_vm10, %v9152_v11, %v9168_v13  ;;  %v3928_v28 = vsel %vm3384_vm10, %v9158_v40, %v9171_v49  ;;  %14701 = vst [vmem:[#allocation30_spill] sm:$0xff] %v13109_v48  ;;  %v4534_v1 = vsel %vm4026_vm11, %v9175_v39, %v3923_v8  ;;  %v4535_v30 = vsel %vm4026_vm11, %v9189_v4, %v3924_v61  ;;  %v7052_v48 = vld [vmem:[%s7577_s15 + $0x988] sm:$0xff] }
 0x5d8   : > { %v4536_v27 = vsel %vm4026_vm11, %v9205_v53, %v3925_v57  ;;  %v4537_v26 = vsel %vm4026_vm11, %v9208_v43, %v3926_v29  ;;  %v13125_v3 = vmul.f32 %v13010_v0, %v13010_v0  ;;  %v13129_v8 = vmul.f32 %v13013_v46, %v13013_v46  ;;  %4918 = vst [vmem:[%s9411_s24 + $0xab0] sm:$0xff] %v4534_v1  ;;  %v14707_v0 = vld [vmem:[#allocation40_spill] sm:$0xff]  ;;  %v7043_v46 = vld [vmem:[%s7577_s15 + $0xac0] sm:$0xff]  ;;  %v7044_v29 = vld [vmem:[%s7577_s15 + $0xac8] sm:$0xff] }
 0x5d9   : > { %v4538_v61 = vsel %vm4026_vm11, %v14305_v52, %v3927_v21  ;;  %v4539_v57 = vsel %vm4026_vm11, %v14306_v60, %v3928_v28  ;;  %4919 = vst [vmem:[%s9411_s24 + $0xab8] sm:$0xff] %v4535_v30  ;;  %4920 = vst [vmem:[%s9411_s24 + $0xac0] sm:$0xff] %v4536_v27  ;;  %v13148_v16 = vsub.f32 %v4534_v1, %v7041_v23  ;;  %v14704_v28 = vcvt.f32.s32 %v13001_v24  ;;  %v7045_v1 = vld [vmem:[%s7577_s15 + $0xad0] sm:$0xff] }
 0x5da   : > { %14702 = vst [vmem:[#allocation33_spill] sm:$0xff] %v13125_v3  ;;  %14703 = vst [vmem:[#allocation19_spill] sm:$0xff] %v13129_v8  ;;  %v13151_v21 = vsub.f32 %v4535_v30, %v7042_v9  ;;  %v14706_v3 = vcvt.f32.s32 %v13003_v31  ;;  %v13162_v44 = vsub.f32 %v4536_v27, %v7043_v46  ;;  %v13165_v6 = vsub.f32 %v4537_v26, %v7044_v29  ;;  %v7046_v30 = vld [vmem:[%s7577_s15 + $0xad8] sm:$0xff] }
 0x5db   : > { %4921 = vst [vmem:[%s9411_s24 + $0xac8] sm:$0xff] %v4537_v26  ;;  %4922 = vst [vmem:[%s9411_s24 + $0xad0] sm:$0xff] %v4538_v61  ;;  %v3137_v8 = vadd.s32 %v14705_v51, %v14704_v28  ;;  %v13168_v23 = vsub.f32 %v4538_v61, %v7045_v1  ;;  %v13171_v9 = vsub.f32 %v4539_v57, %v7046_v30  ;;  %v7047_v28 = vld [vmem:[%s7577_s15 + $0x960] sm:$0xff]  ;;  %v7048_v30 = vld [vmem:[%s7577_s15 + $0x968] sm:$0xff] }
 0x5dc   : > { %4923 = vst [vmem:[%s9411_s24 + $0xad8] sm:$0xff] %v4539_v57  ;;  %v13159_v36 = vadd.s32 %v14707_v0, %v14706_v3 }
 0x5dd   : > { %vm3377_vm12 = vcmp.eq.s32.totalorder %v3137_v8, 1  ;;  %vm4019_vm13 = vcmp.eq.s32.totalorder %v3137_v8, 2 }
 0x5de   : > { %vm3386_vm14 = vcmp.eq.s32.totalorder %v13159_v36, 1  ;;  %vm4028_vm15 = vcmp.eq.s32.totalorder %v13159_v36, 2  ;;  %v3881_v51 = vsel %vm3377_vm12, %v9129_v45, %v9125_v7  ;;  %v3882_v24 = vsel %vm3377_vm12, %v9142_v2, %v9132_v41 }
 0x5df   : > { %v3883_v31 = vsel %vm3377_vm12, %v9146_v55, %v9135_v20  ;;  %v3884_v27 = vsel %vm3377_vm12, %v9149_v19, %v9161_v14  ;;  %v3885_v26 = vsel %vm3377_vm12, %v9152_v11, %v9168_v13  ;;  %v3886_v3 = vsel %vm3377_vm12, %v9158_v40, %v9171_v49 }
 0x5e0   : > { %v4492_v8 = vsel %vm4019_vm13, %v9175_v39, %v3881_v51  ;;  %v4493_v61 = vsel %vm4019_vm13, %v9189_v4, %v3882_v24  ;;  %v4494_v57 = vsel %vm4019_vm13, %v9205_v53, %v3883_v31  ;;  %v4495_v0 = vsel %vm4019_vm13, %v9208_v43, %v3884_v27  ;;  %v7049_v24 = vld [vmem:[%s7577_s15 + $0x970] sm:$0xff] }
 0x5e1   : > { %v4496_v46 = vsel %vm4019_vm13, %v14305_v52, %v3885_v26  ;;  %v4497_v29 = vsel %vm4019_vm13, %v14306_v60, %v3886_v3  ;;  %4876 = vst [vmem:[%s9411_s24 + $0x960] sm:$0xff] %v4492_v8  ;;  %4877 = vst [vmem:[%s9411_s24 + $0x968] sm:$0xff] %v4493_v61  ;;  %v5560_v1 = vsub.f32 %v4492_v8, %v7047_v28 }
 0x5e2   : > { %4878 = vst [vmem:[%s9411_s24 + $0x970] sm:$0xff] %v4494_v57  ;;  %4879 = vst [vmem:[%s9411_s24 + $0x978] sm:$0xff] %v4495_v0  ;;  %v5561_v51 = vsub.f32 %v4493_v61, %v7048_v30  ;;  %v5562_v31 = vsub.f32 %v4494_v57, %v7049_v24  ;;  %v5563_v27 = vsub.f32 %v4495_v0, %v7050_v34 }
 0x5e3   : > { %4880 = vst [vmem:[%s9411_s24 + $0x980] sm:$0xff] %v4496_v46  ;;  %4881 = vst [vmem:[%s9411_s24 + $0x988] sm:$0xff] %v4497_v29  ;;  %v5564_v26 = vsub.f32 %v4496_v46, %v7051_v17  ;;  %v5565_v50 = vsub.f32 %v4497_v29, %v7052_v48  ;;  %v3935_v3 = vsel %vm3386_vm14, %v9129_v45, %v9125_v7 }
 0x5e4   : > { %v3936_v8 = vsel %vm3386_vm14, %v9142_v2, %v9132_v41  ;;  %v5566_v28 = vmul.f32 %v5560_v1, %v5560_v1  ;;  %v5567_v61 = vmul.f32 %v5561_v51, %v5561_v51  ;;  %v5568_v30 = vmul.f32 %v5562_v31, %v5562_v31 }
 0x5e5   : > { %v5569_v57 = vmul.f32 %v5563_v27, %v5563_v27  ;;  %v5570_v24 = vmul.f32 %v5564_v26, %v5564_v26  ;;  %v5571_v34 = vmul.f32 %v5565_v50, %v5565_v50  ;;  %v3937_v17 = vsel %vm3386_vm14, %v9146_v55, %v9135_v20 }
 0x5e6   : > { %v3938_v48 = vsel %vm3386_vm14, %v9149_v19, %v9161_v14  ;;  %v5878_v0 = vadd.f32 %v12907_v5, %v5566_v28  ;;  %v5879_v46 = vadd.f32 %v12911_v12, %v5567_v61  ;;  %v5880_v29 = vadd.f32 %v12915_v56, %v5568_v30 }
 0x5e7   : > { %v5881_v1 = vadd.f32 %v12919_v32, %v5569_v57  ;;  %v5882_v50 = vadd.f32 %v12927_v33, %v5570_v24  ;;  %v5883_v51 = vadd.f32 %v12931_v58, %v5571_v34  ;;  %v3939_v31 = vsel %vm3386_vm14, %v9152_v11, %v9168_v13  ;;  %v7054_v57 = vld [vmem:[%s7577_s15 + $0xb18] sm:$0xff]  ;;  %v7055_v34 = vld [vmem:[%s7577_s15 + $0xb20] sm:$0xff] }
 0x5e8   : > { %v3940_v5 = vsel %vm3386_vm14, %v9158_v40, %v9171_v49  ;;  %v13236_v12 = vadd.f32 %v5878_v0, %v13082_v63  ;;  %v13239_v56 = vadd.f32 %v5879_v46, %v13085_v22  ;;  %v13242_v32 = vadd.f32 %v5880_v29, %v13088_v15  ;;  %v7057_v46 = vld [vmem:[%s7577_s15 + $0xb30] sm:$0xff] }
 0x5e9   : > { %v13245_v33 = vadd.f32 %v5881_v1, %v13091_v59  ;;  %v13248_v58 = vadd.f32 %v5882_v50, %v13094_v54  ;;  %v13251_v27 = vadd.f32 %v5883_v51, %v13097_v35  ;;  %v4546_v63 = vsel %vm4028_vm15, %v9175_v39, %v3935_v3  ;;  %v14712_v50 = vld [vmem:[#allocation79_spill] sm:$0xff] }
 0x5ea   : > { %v4547_v22 = vsel %vm4028_vm15, %v9189_v4, %v3936_v8  ;;  %v4548_v15 = vsel %vm4028_vm15, %v9205_v53, %v3937_v17  ;;  %v4549_v54 = vsel %vm4028_vm15, %v9208_v43, %v3938_v48  ;;  %v4550_v35 = vsel %vm4028_vm15, %v14305_v52, %v3939_v31  ;;  %4930 = vst [vmem:[%s9411_s24 + $0xb10] sm:$0xff] %v4546_v63  ;;  %v7056_v48 = vld [vmem:[%s7577_s15 + $0xb28] sm:$0xff] }
 0x5eb   : > { %v4551_v59 = vsel %vm4028_vm15, %v14306_v60, %v3940_v5  ;;  %4931 = vst [vmem:[%s9411_s24 + $0xb18] sm:$0xff] %v4547_v22  ;;  %v13275_v26 = vmul.f32 %v13148_v16, %v13148_v16  ;;  %v13279_v3 = vmul.f32 %v13151_v21, %v13151_v21  ;;  %v13283_v8 = vmul.f32 %v13162_v44, %v13162_v44  ;;  %v7053_v44 = vld [vmem:[%s7577_s15 + $0xb10] sm:$0xff] }
 0x5ec   : > { %v13287_v36 = vmul.f32 %v13165_v6, %v13165_v6  ;;  %4932 = vst [vmem:[%s9411_s24 + $0xb20] sm:$0xff] %v4548_v15  ;;  %4933 = vst [vmem:[%s9411_s24 + $0xb28] sm:$0xff] %v4549_v54  ;;  %v13295_v16 = vmul.f32 %v13168_v23, %v13168_v23  ;;  %v13299_v21 = vmul.f32 %v13171_v9, %v13171_v9  ;;  %v14709_v61 = vcvt.f32.s32 %v13071_v38  ;;  %v14710_v6 = vld [vmem:[#allocation57_spill] sm:$0xff] }
 0x5ed   : > { %4934 = vst [vmem:[%s9411_s24 + $0xb30] sm:$0xff] %v4550_v35  ;;  %4935 = vst [vmem:[%s9411_s24 + $0xb38] sm:$0xff] %v4551_v59  ;;  %v5668_v28 = vsub.f32 %v4546_v63, %v7053_v44  ;;  %v5669_v24 = vsub.f32 %v4547_v22, %v7054_v57  ;;  %v5670_v17 = vsub.f32 %v4548_v15, %v7055_v34  ;;  %v7058_v23 = vld [vmem:[%s7577_s15 + $0xb38] sm:$0xff]  ;;  %v14711_v9 = vcvt.f32.s32 %v13051_v42  ;;  %v7060_v57 = vld [vmem:[%s7577_s15 + $0x9c8] sm:$0xff] }
 0x5ee   : > { %14708 = vst [vmem:[#allocation85_spill] sm:$0xff] %v13299_v21  ;;  %v3165_v30 = vadd.s32 %v14710_v6, %v14709_v61  ;;  %v5671_v0 = vsub.f32 %v4549_v54, %v7056_v48  ;;  %v5672_v29 = vsub.f32 %v4550_v35, %v7057_v46  ;;  %v5673_v1 = vsub.f32 %v4551_v59, %v7058_v23  ;;  %v7059_v6 = vld [vmem:[%s7577_s15 + $0x9c0] sm:$0xff]  ;;  %v7061_v48 = vld [vmem:[%s7577_s15 + $0x9d0] sm:$0xff]  ;;  %v7062_v23 = vld [vmem:[%s7577_s15 + $0x9d8] sm:$0xff] }
 0x5ef   : > { %v3291_v38 = vadd.s32 %v14712_v50, %v14711_v9  ;;  %v13341_v50 = vmul.f32 %v5668_v28, %v5668_v28 }
 0x5f0   : > { %vm3379_vm0 = vcmp.eq.s32.totalorder %v3165_v30, 1  ;;  %vm4021_vm1 = vcmp.eq.s32.totalorder %v3165_v30, 2  ;;  %v13349_v21 = vmul.f32 %v5671_v0, %v5671_v0 }
 0x5f1   : > { %v3893_v51 = vsel %vm3379_vm0, %v9129_v45, %v9125_v7  ;;  %v3894_v31 = vsel %vm3379_vm0, %v9142_v2, %v9132_v41  ;;  %v3895_v5 = vsel %vm3379_vm0, %v9146_v55, %v9135_v20  ;;  %v3896_v63 = vsel %vm3379_vm0, %v9149_v19, %v9161_v14  ;;  %14713 = vst [vmem:[#allocation34_spill] sm:$0xff] %v13341_v50  ;;  %v14739_v50 = vld [vmem:[#allocation86_spill] sm:$0xff] }
 0x5f2   : > { %v3897_v42 = vsel %vm3379_vm0, %v9152_v11, %v9168_v13  ;;  %v3898_v22 = vsel %vm3379_vm0, %v9158_v40, %v9171_v49  ;;  %v4504_v15 = vsel %vm4021_vm1, %v9175_v39, %v3893_v51  ;;  %v4505_v54 = vsel %vm4021_vm1, %v9189_v4, %v3894_v31  ;;  %v7063_v51 = vld [vmem:[%s7577_s15 + $0x9e0] sm:$0xff]  ;;  %14716 = vst [vmem:[#allocation98_spill] sm:$0xff] %v13349_v21 }
 0x5f3   : > { %v4506_v35 = vsel %vm4021_vm1, %v9205_v53, %v3895_v5  ;;  %v4507_v59 = vsel %vm4021_vm1, %v9208_v43, %v3896_v63  ;;  %v4508_v44 = vsel %vm4021_vm1, %v14305_v52, %v3897_v42  ;;  %v4509_v61 = vsel %vm4021_vm1, %v14306_v60, %v3898_v22  ;;  %4888 = vst [vmem:[%s9411_s24 + $0x9c0] sm:$0xff] %v4504_v15  ;;  %v7064_v5 = vld [vmem:[%s7577_s15 + $0x9e8] sm:$0xff] }
 0x5f4   : > { %4889 = vst [vmem:[%s9411_s24 + $0x9c8] sm:$0xff] %v4505_v54  ;;  %4890 = vst [vmem:[%s9411_s24 + $0x9d0] sm:$0xff] %v4506_v35  ;;  %v5584_v30 = vsub.f32 %v4504_v15, %v7059_v6  ;;  %v5585_v34 = vsub.f32 %v4505_v54, %v7060_v57  ;;  %v5586_v46 = vsub.f32 %v4506_v35, %v7061_v48  ;;  %vm3388_vm2 = vcmp.eq.s32.totalorder %v3291_v38, 1 }
 0x5f5   : > { %4891 = vst [vmem:[%s9411_s24 + $0x9d8] sm:$0xff] %v4507_v59  ;;  %4892 = vst [vmem:[%s9411_s24 + $0x9e0] sm:$0xff] %v4508_v44  ;;  %v5587_v9 = vsub.f32 %v4507_v59, %v7062_v23  ;;  %v5588_v31 = vsub.f32 %v4508_v44, %v7063_v51  ;;  %v5589_v63 = vsub.f32 %v4509_v61, %v7064_v5  ;;  %vm4030_vm3 = vcmp.eq.s32.totalorder %v3291_v38, 2 }
 0x5f6   : > { %4893 = vst [vmem:[%s9411_s24 + $0x9e8] sm:$0xff] %v4509_v61  ;;  %v13345_v42 = vmul.f32 %v5669_v24, %v5669_v24  ;;  %v13347_v22 = vmul.f32 %v5670_v17, %v5670_v17  ;;  %v13351_v15 = vmul.f32 %v5672_v29, %v5672_v29  ;;  %v13353_v54 = vmul.f32 %v5673_v1, %v5673_v1 }
 0x5f7   : > { %v3947_v28 = vsel %vm3388_vm2, %v9129_v45, %v9125_v7  ;;  %v3948_v35 = vsel %vm3388_vm2, %v9142_v2, %v9132_v41  ;;  %v5590_v59 = vmul.f32 %v5584_v30, %v5584_v30  ;;  %v5591_v24 = vmul.f32 %v5585_v34, %v5585_v34 }
 0x5f8   : > { %14714 = vst [vmem:[#allocation81_spill] sm:$0xff] %v13345_v42  ;;  %14715 = vst [vmem:[#allocation61_spill] sm:$0xff] %v13347_v22  ;;  %v5592_v17 = vmul.f32 %v5586_v46, %v5586_v46  ;;  %v5593_v0 = vmul.f32 %v5587_v9, %v5587_v9  ;;  %v5594_v44 = vmul.f32 %v5588_v31, %v5588_v31 }
 0x5f9   : > { %14717 = vst [vmem:[#allocation83_spill] sm:$0xff] %v13351_v15  ;;  %14718 = vst [vmem:[#allocation62_spill] sm:$0xff] %v13353_v54  ;;  %v5595_v29 = vmul.f32 %v5589_v63, %v5589_v63  ;;  %v3949_v1 = vsel %vm3388_vm2, %v9146_v55, %v9135_v20  ;;  %v3950_v61 = vsel %vm3388_vm2, %v9149_v19, %v9161_v14  ;;  %v7070_v15 = vld [vmem:[%s7577_s15 + $0xb98] sm:$0xff] }
 0x5fa   : > { %v3951_v6 = vsel %vm3388_vm2, %v9152_v11, %v9168_v13  ;;  %v3952_v30 = vsel %vm3388_vm2, %v9158_v40, %v9171_v49  ;;  %v4558_v57 = vsel %vm4030_vm3, %v9175_v39, %v3947_v28  ;;  %v4559_v34 = vsel %vm4030_vm3, %v9189_v4, %v3948_v35  ;;  %v14719_v35 = vld [vmem:[#allocation31_spill] sm:$0xff] }
 0x5fb   : > { %v4560_v48 = vsel %vm4030_vm3, %v9205_v53, %v3949_v1  ;;  %v4561_v46 = vsel %vm4030_vm3, %v9208_v43, %v3950_v61  ;;  %v4562_v23 = vsel %vm4030_vm3, %v14305_v52, %v3951_v6  ;;  %v4563_v9 = vsel %vm4030_vm3, %v14306_v60, %v3952_v30  ;;  %4942 = vst [vmem:[%s9411_s24 + $0xb70] sm:$0xff] %v4558_v57  ;;  %v7068_v61 = vld [vmem:[%s7577_s15 + $0xb88] sm:$0xff]  ;;  %v7069_v30 = vld [vmem:[%s7577_s15 + $0xb90] sm:$0xff] }
 0x5fc   : > { %4943 = vst [vmem:[%s9411_s24 + $0xb78] sm:$0xff] %v4559_v34  ;;  %v13388_v51 = vadd.f32 %v12989_v47, %v5590_v59  ;;  %v13391_v31 = vadd.f32 %v12991_v62, %v5591_v24  ;;  %v13394_v5 = vadd.f32 %v12997_v37, %v5592_v17  ;;  %v13397_v63 = vadd.f32 %v12999_v25, %v5593_v0  ;;  %v7065_v62 = vld [vmem:[%s7577_s15 + $0xb70] sm:$0xff]  ;;  %v14721_v59 = vld [vmem:[#allocation41_spill] sm:$0xff] }
 0x5fd   : > { %4944 = vst [vmem:[%s9411_s24 + $0xb80] sm:$0xff] %v4560_v48  ;;  %4945 = vst [vmem:[%s9411_s24 + $0xb88] sm:$0xff] %v4561_v46  ;;  %v13404_v38 = vadd.f32 %v13005_v18, %v5594_v44  ;;  %v13407_v47 = vadd.f32 %v13007_v10, %v5595_v29  ;;  %v5692_v28 = vsub.f32 %v4558_v57, %v7065_v62  ;;  %v14720_v37 = vcvt.f32.s32 %v14719_v35  ;;  %v7066_v25 = vld [vmem:[%s7577_s15 + $0xb78] sm:$0xff]  ;;  %v7067_v0 = vld [vmem:[%s7577_s15 + $0xb80] sm:$0xff] }
 0x5fe   : > { %4946 = vst [vmem:[%s9411_s24 + $0xb90] sm:$0xff] %v4562_v23  ;;  %4947 = vst [vmem:[%s9411_s24 + $0xb98] sm:$0xff] %v4563_v9  ;;  %v5693_v17 = vsub.f32 %v4559_v34, %v7066_v25  ;;  %v5694_v1 = vsub.f32 %v4560_v48, %v7067_v0  ;;  %v5695_v6 = vsub.f32 %v4561_v46, %v7068_v61  ;;  %v14722_v10 = vld [vmem:[#allocation30_spill] sm:$0xff]  ;;  %v14724_v29 = vld [vmem:[#allocation108_spill] sm:$0xff] }
 0x5ff   : > { %v3319_v24 = vadd.s32 %v14721_v59, %v14720_v37  ;;  %v5696_v54 = vsub.f32 %v4562_v23, %v7069_v30  ;;  %v5697_v18 = vsub.f32 %v4563_v9, %v7070_v15  ;;  %v14723_v44 = vcvt.f32.s32 %v14722_v10 }
 0x600   : > { %v13441_v0 = vmul.f32 %v5692_v28, %v5692_v28  ;;  %v13443_v61 = vmul.f32 %v5693_v17, %v5693_v17  ;;  %v13445_v30 = vmul.f32 %v5694_v1, %v5694_v1  ;;  %v13447_v10 = vmul.f32 %v5695_v6, %v5695_v6  ;;  %v7071_v28 = vld [vmem:[%s7577_s15 + $0xbd0] sm:$0xff]  ;;  %v3217_v17 = vpop.xlane.xlu0 %3216  ;;  %v7072_v1 = vld [vmem:[%s7577_s15 + $0xbd8] sm:$0xff]  ;;  %v7073_v6 = vld [vmem:[%s7577_s15 + $0xbe0] sm:$0xff] }
 0x601   : > { %vm3390_vm4 = vcmp.eq.s32.totalorder %v3319_v24, 1  ;;  %vm4032_vm5 = vcmp.eq.s32.totalorder %v3319_v24, 2  ;;  %v3193_v57 = vadd.s32 %v14724_v29, %v14723_v44  ;;  %v13453_v44 = vmul.f32 %v5696_v54, %v5696_v54 }
 0x602   : > { %v3959_v62 = vsel %vm3390_vm4, %v9129_v45, %v9125_v7  ;;  %v3960_v34 = vsel %vm3390_vm4, %v9142_v2, %v9132_v41  ;;  %v3961_v48 = vsel %vm3390_vm4, %v9146_v55, %v9135_v20  ;;  %v3962_v15 = vsel %vm3390_vm4, %v9149_v19, %v9161_v14  ;;  %14725 = vst [vmem:[#allocation94_spill] sm:$0xff] %v13441_v0 }
 0x603   : > { %v3963_v46 = vsel %vm3390_vm4, %v9152_v11, %v9168_v13  ;;  %v3964_v23 = vsel %vm3390_vm4, %v9158_v40, %v9171_v49  ;;  %v4570_v9 = vsel %vm4032_vm5, %v9175_v39, %v3959_v62  ;;  %v4571_v35 = vsel %vm4032_vm5, %v9189_v4, %v3960_v34  ;;  %14726 = vst [vmem:[#allocation63_spill] sm:$0xff] %v13443_v61  ;;  %v7080_v61 = vld [vmem:[%s7577_s15 + $0xa38] sm:$0xff] }
 0x604   : > { %v4572_v37 = vsel %vm4032_vm5, %v9205_v53, %v3961_v48  ;;  %v4573_v59 = vsel %vm4032_vm5, %v9208_v43, %v3962_v15  ;;  %v4574_v24 = vsel %vm4032_vm5, %v14305_v52, %v3963_v46  ;;  %v4575_v25 = vsel %vm4032_vm5, %v14306_v60, %v3964_v23  ;;  %4954 = vst [vmem:[%s9411_s24 + $0xbd0] sm:$0xff] %v4570_v9  ;;  %v7074_v15 = vld [vmem:[%s7577_s15 + $0xbe8] sm:$0xff]  ;;  %v7075_v23 = vld [vmem:[%s7577_s15 + $0xbf0] sm:$0xff] }
 0x605   : > { %4955 = vst [vmem:[%s9411_s24 + $0xbd8] sm:$0xff] %v4571_v35  ;;  %14727 = vst [vmem:[#allocation99_spill] sm:$0xff] %v13445_v30  ;;  %v13455_v29 = vmul.f32 %v5697_v18, %v5697_v18  ;;  %v13458_v62 = vsub.f32 %v4570_v9, %v7071_v28  ;;  %vm3381_vm6 = vcmp.eq.s32.totalorder %v3193_v57, 1  ;;  %v13461_v34 = vsub.f32 %v4571_v35, %v7072_v1  ;;  %v7076_v18 = vld [vmem:[%s7577_s15 + $0xbf8] sm:$0xff] }
 0x606   : > { %14728 = vst [vmem:[#allocation102_spill] sm:$0xff] %v13447_v10  ;;  %4956 = vst [vmem:[%s9411_s24 + $0xbe0] sm:$0xff] %v4572_v37  ;;  %v13464_v48 = vsub.f32 %v4572_v37, %v7073_v6  ;;  %v13467_v46 = vsub.f32 %v4573_v59, %v7074_v15  ;;  %vm4023_vm7 = vcmp.eq.s32.totalorder %v3193_v57, 2  ;;  %v13470_v54 = vsub.f32 %v4574_v24, %v7075_v23  ;;  %v7082_v57 = vld [vmem:[%s7577_s15 + $0xa48] sm:$0xff] }
 0x607   : > { %4957 = vst [vmem:[%s9411_s24 + $0xbe8] sm:$0xff] %v4573_v59  ;;  %4958 = vst [vmem:[%s9411_s24 + $0xbf0] sm:$0xff] %v4574_v24  ;;  %v13473_v9 = vsub.f32 %v4575_v25, %v7076_v18  ;;  %v3905_v35 = vsel %vm3381_vm6, %v9129_v45, %v9125_v7  ;;  %v3906_v37 = vsel %vm3381_vm6, %v9142_v2, %v9132_v41  ;;  %v3245_v18 = vpop.xlane.xlu0 %3244 }
 0x608   : > { %4959 = vst [vmem:[%s9411_s24 + $0xbf8] sm:$0xff] %v4575_v25  ;;  %14729 = vst [vmem:[#allocation101_spill] sm:$0xff] %v13453_v44  ;;  %v3907_v59 = vsel %vm3381_vm6, %v9146_v55, %v9135_v20  ;;  %v3908_v24 = vsel %vm3381_vm6, %v9149_v19, %v9161_v14  ;;  %v3909_v25 = vsel %vm3381_vm6, %v9152_v11, %v9168_v13 }
 0x609   : > { %14730 = vst [vmem:[#allocation105_spill] sm:$0xff] %v13455_v29  ;;  %14731 = vst [vmem:[#allocation104_spill] sm:$0xff] %v13458_v62  ;;  %v3910_v28 = vsel %vm3381_vm6, %v9158_v40, %v9171_v49  ;;  %v4516_v1 = vsel %vm4023_vm7, %v9175_v39, %v3905_v35  ;;  %v4517_v6 = vsel %vm4023_vm7, %v9189_v4, %v3906_v37  ;;  %v7077_v37 = vld [vmem:[%s7577_s15 + $0xa20] sm:$0xff] }
 0x60a   : > { %14732 = vst [vmem:[#allocation55_spill] sm:$0xff] %v13461_v34  ;;  %14733 = vst [vmem:[#allocation88_spill] sm:$0xff] %v13464_v48  ;;  %v4518_v15 = vsel %vm4023_vm7, %v9205_v53, %v3907_v59  ;;  %v4519_v23 = vsel %vm4023_vm7, %v9208_v43, %v3908_v24  ;;  %v4520_v29 = vsel %vm4023_vm7, %v14305_v52, %v3909_v25  ;;  %v7078_v59 = vld [vmem:[%s7577_s15 + $0xa28] sm:$0xff]  ;;  %v7079_v24 = vld [vmem:[%s7577_s15 + $0xa30] sm:$0xff]  ;;  %v3218_v48 = vcvt.f32.s32 %v3217_v17 }
 0x60b   : > { %14734 = vst [vmem:[#allocation52_spill] sm:$0xff] %v13467_v46  ;;  %14735 = vst [vmem:[#allocation103_spill] sm:$0xff] %v13470_v54  ;;  %v4521_v35 = vsel %vm4023_vm7, %v14306_v60, %v3910_v28  ;;  %v5608_v44 = vsub.f32 %v4516_v1, %v7077_v37  ;;  %v5609_v10 = vsub.f32 %v4517_v6, %v7078_v59  ;;  %v7081_v25 = vld [vmem:[%s7577_s15 + $0xa40] sm:$0xff]  ;;  %v3246_v34 = vcvt.f32.s32 %v3245_v18  ;;  %v14737_v37 = vld [vmem:[#allocation75_spill] sm:$0xff] }
 0x60c   : > { %14736 = vst [vmem:[#allocation36_spill] sm:$0xff] %v13473_v9  ;;  %4900 = vst [vmem:[%s9411_s24 + $0xa20] sm:$0xff] %v4516_v1  ;;  %v5610_v30 = vsub.f32 %v4518_v15, %v7079_v24  ;;  %v5611_v0 = vsub.f32 %v4519_v23, %v7080_v61  ;;  %v5612_v9 = vsub.f32 %v4520_v29, %v7081_v25  ;;  %v14738_v59 = vld [vmem:[#allocation47_spill] sm:$0xff]  ;;  %v14740_v24 = vld [vmem:[#allocation50_spill] sm:$0xff] }
 0x60d   : > { %4901 = vst [vmem:[%s9411_s24 + $0xa28] sm:$0xff] %v4517_v6  ;;  %4902 = vst [vmem:[%s9411_s24 + $0xa30] sm:$0xff] %v4518_v15  ;;  %v5613_v54 = vsub.f32 %v4521_v35, %v7082_v57  ;;  %v5614_v28 = vmul.f32 %v5608_v44, %v5608_v44  ;;  %v5615_v46 = vmul.f32 %v5609_v10, %v5609_v10  ;;  %v14743_v10 = vld [vmem:[#allocation33_spill] sm:$0xff]  ;;  %v14744_v18 = vld [vmem:[#allocation19_spill] sm:$0xff] }
 0x60e   : > { %4903 = vst [vmem:[%s9411_s24 + $0xa38] sm:$0xff] %v4519_v23  ;;  %4904 = vst [vmem:[%s9411_s24 + $0xa40] sm:$0xff] %v4520_v29  ;;  %v5616_v62 = vmul.f32 %v5610_v30, %v5610_v30  ;;  %v5617_v21 = vmul.f32 %v5611_v0, %v5611_v0  ;;  %v5618_v22 = vmul.f32 %v5612_v9, %v5612_v9  ;;  %v14741_v29 = vld [vmem:[#allocation32_spill] sm:$0xff]  ;;  %v7083_v57 = vld [vmem:[%s7577_s15 + $0xa80] sm:$0xff] }
 0x60f   : > { %4905 = vst [vmem:[%s9411_s24 + $0xa48] sm:$0xff] %v4521_v35  ;;  %v5619_v1 = vmul.f32 %v5613_v54, %v5613_v54  ;;  %v5890_v6 = vadd.f32 %v14737_v37, %v5614_v28  ;;  %v5891_v42 = vadd.f32 %v14738_v59, %v5615_v46  ;;  %v3221_v15 = vadd.s32 %v14739_v50, %v3218_v48  ;;  %v14742_v35 = vld [vmem:[#allocation97_spill] sm:$0xff] }
 0x610   : > { %v13521_v61 = vadd.s32 %v14740_v24, %v3246_v34  ;;  %v5892_v23 = vadd.f32 %v14741_v29, %v5616_v62  ;;  %v5893_v44 = vadd.f32 %v14742_v35, %v5617_v21  ;;  %v5894_v17 = vadd.f32 %v14743_v10, %v5618_v22  ;;  %v7086_v24 = vld [vmem:[%s7577_s15 + $0xa98] sm:$0xff] }
 0x611   : > { %v5895_v30 = vadd.f32 %v14744_v18, %v5619_v1  ;;  %v5998_v0 = vadd.f32 %v5890_v6, %v13388_v51  ;;  %v5999_v54 = vadd.f32 %v5891_v42, %v13391_v31  ;;  %vm3383_vm8 = vcmp.eq.s32.totalorder %v3221_v15, 1  ;;  %v7084_v1 = vld [vmem:[%s7577_s15 + $0xa88] sm:$0xff]  ;;  %v7085_v6 = vld [vmem:[%s7577_s15 + $0xa90] sm:$0xff] }
 0x612   : > { %vm4025_vm9 = vcmp.eq.s32.totalorder %v3221_v15, 2  ;;  %v6000_v46 = vadd.f32 %v5892_v23, %v13394_v5  ;;  %v6001_v50 = vadd.f32 %v5893_v44, %v13397_v63  ;;  %v6002_v34 = vadd.f32 %v5894_v17, %v13404_v38  ;;  %v7087_v23 = vld [vmem:[%s7577_s15 + $0xaa0] sm:$0xff]  ;;  %v7088_v15 = vld [vmem:[%s7577_s15 + $0xaa8] sm:$0xff] }
 0x613   : > { %v6003_v62 = vadd.f32 %v5895_v30, %v13407_v47  ;;  %v13534_v21 = vadd.f32 %v5998_v0, %v13236_v12  ;;  %v13537_v22 = vadd.f32 %v5999_v54, %v13239_v56  ;;  %v3917_v42 = vsel %vm3383_vm8, %v9129_v45, %v9125_v7 }
 0x614   : > { %v3918_v51 = vsel %vm3383_vm8, %v9142_v2, %v9132_v41  ;;  %v13546_v31 = vadd.f32 %v6000_v46, %v13242_v32  ;;  %v13549_v12 = vadd.f32 %v6001_v50, %v13245_v33  ;;  %v13552_v56 = vadd.f32 %v6002_v34, %v13248_v58  ;;  %v3273_v46 = vpop.xlane.xlu0 %3272 }
 0x615   : > { %v13555_v5 = vadd.f32 %v6003_v62, %v13251_v27  ;;  %v3919_v63 = vsel %vm3383_vm8, %v9146_v55, %v9135_v20  ;;  %v3920_v32 = vsel %vm3383_vm8, %v9149_v19, %v9161_v14  ;;  %v3921_v33 = vsel %vm3383_vm8, %v9152_v11, %v9168_v13 }
 0x616   : > { %v3922_v58 = vsel %vm3383_vm8, %v9158_v40, %v9171_v49  ;;  %v4528_v27 = vsel %vm4025_vm9, %v9175_v39, %v3917_v42  ;;  %v4529_v38 = vsel %vm4025_vm9, %v9189_v4, %v3918_v51  ;;  %v4530_v47 = vsel %vm4025_vm9, %v9205_v53, %v3919_v63 }
 0x617   : > { %v4531_v48 = vsel %vm4025_vm9, %v9208_v43, %v3920_v32  ;;  %v4532_v9 = vsel %vm4025_vm9, %v14305_v52, %v3921_v33  ;;  %v4533_v25 = vsel %vm4025_vm9, %v14306_v60, %v3922_v58  ;;  %4912 = vst [vmem:[%s9411_s24 + $0xa80] sm:$0xff] %v4528_v27  ;;  %4913 = vst [vmem:[%s9411_s24 + $0xa88] sm:$0xff] %v4529_v38  ;;  %vm3385_vm10 = vcmp.eq.s32.totalorder %v13521_v61, 1 }
 0x618   : > { %4914 = vst [vmem:[%s9411_s24 + $0xa90] sm:$0xff] %v4530_v47  ;;  %4915 = vst [vmem:[%s9411_s24 + $0xa98] sm:$0xff] %v4531_v48  ;;  %v5632_v28 = vsub.f32 %v4528_v27, %v7083_v57  ;;  %v5633_v37 = vsub.f32 %v4529_v38, %v7084_v1  ;;  %v5634_v59 = vsub.f32 %v4530_v47, %v7085_v6  ;;  %vm4027_vm11 = vcmp.eq.s32.totalorder %v13521_v61, 2  ;;  %v7089_v57 = vld [vmem:[%s7577_s15 + $0xae0] sm:$0xff]  ;;  %v7090_v1 = vld [vmem:[%s7577_s15 + $0xae8] sm:$0xff] }
 0x619   : > { %4916 = vst [vmem:[%s9411_s24 + $0xaa0] sm:$0xff] %v4532_v9  ;;  %4917 = vst [vmem:[%s9411_s24 + $0xaa8] sm:$0xff] %v4533_v25  ;;  %v5635_v29 = vsub.f32 %v4531_v48, %v7086_v24  ;;  %v5636_v35 = vsub.f32 %v4532_v9, %v7087_v23  ;;  %v5637_v44 = vsub.f32 %v4533_v25, %v7088_v15  ;;  %v3301_v48 = vpop.xlane.xlu0 %3300  ;;  %v7091_v6 = vld [vmem:[%s7577_s15 + $0xaf0] sm:$0xff]  ;;  %v7092_v24 = vld [vmem:[%s7577_s15 + $0xaf8] sm:$0xff] }
 0x61a   : > { %v5638_v10 = vmul.f32 %v5632_v28, %v5632_v28  ;;  %v5639_v17 = vmul.f32 %v5633_v37, %v5633_v37  ;;  %v5640_v18 = vmul.f32 %v5634_v59, %v5634_v59  ;;  %v3929_v62 = vsel %vm3385_vm10, %v9129_v45, %v9125_v7  ;;  %v7093_v23 = vld [vmem:[%s7577_s15 + $0xb00] sm:$0xff]  ;;  %v7094_v61 = vld [vmem:[%s7577_s15 + $0xb08] sm:$0xff] }
 0x61b   : > { %v5641_v30 = vmul.f32 %v5635_v29, %v5635_v29  ;;  %v5642_v0 = vmul.f32 %v5636_v35, %v5636_v35  ;;  %v5643_v54 = vmul.f32 %v5637_v44, %v5637_v44  ;;  %v3930_v42 = vsel %vm3385_vm10, %v9142_v2, %v9132_v41 }
 0x61c   : > { %v5896_v50 = vadd.f32 %v13275_v26, %v5638_v10  ;;  %v5897_v34 = vadd.f32 %v13279_v3, %v5639_v17  ;;  %v5898_v51 = vadd.f32 %v13283_v8, %v5640_v18  ;;  %v14745_v3 = vld [vmem:[#allocation85_spill] sm:$0xff]  ;;  %v3931_v33 = vsel %vm3385_vm10, %v9146_v55, %v9135_v20 }
 0x61d   : > { %v5899_v63 = vadd.f32 %v13287_v36, %v5641_v30  ;;  %v5900_v26 = vadd.f32 %v13295_v16, %v5642_v0  ;;  %v5901_v32 = vadd.f32 %v14745_v3, %v5643_v54  ;;  %v3932_v8 = vsel %vm3385_vm10, %v9149_v19, %v9161_v14 }
 0x61e   : > { %v3933_v36 = vsel %vm3385_vm10, %v9152_v11, %v9168_v13  ;;  %v3934_v16 = vsel %vm3385_vm10, %v9158_v40, %v9171_v49  ;;  %v4540_v58 = vsel %vm4027_vm11, %v9175_v39, %v3929_v62  ;;  %v4541_v27 = vsel %vm4027_vm11, %v9189_v4, %v3930_v42  ;;  %v14746_v42 = vld [vmem:[#allocation34_spill] sm:$0xff] }
 0x61f   : > { %v4542_v38 = vsel %vm4027_vm11, %v9205_v53, %v3931_v33  ;;  %v4543_v47 = vsel %vm4027_vm11, %v9208_v43, %v3932_v8  ;;  %v4544_v9 = vsel %vm4027_vm11, %v14305_v52, %v3933_v36  ;;  %v4545_v25 = vsel %vm4027_vm11, %v14306_v60, %v3934_v16  ;;  %4924 = vst [vmem:[%s9411_s24 + $0xae0] sm:$0xff] %v4540_v58  ;;  %v14747_v33 = vld [vmem:[#allocation81_spill] sm:$0xff]  ;;  %v14748_v36 = vld [vmem:[#allocation87_spill] sm:$0xff] }
 0x620   : > { %4925 = vst [vmem:[%s9411_s24 + $0xae8] sm:$0xff] %v4541_v27  ;;  %4926 = vst [vmem:[%s9411_s24 + $0xaf0] sm:$0xff] %v4542_v38  ;;  %v5656_v28 = vsub.f32 %v4540_v58, %v7089_v57  ;;  %v5657_v37 = vsub.f32 %v4541_v27, %v7090_v1  ;;  %v5658_v59 = vsub.f32 %v4542_v38, %v7091_v6  ;;  %v3274_v17 = vcvt.f32.s32 %v3273_v46  ;;  %v14749_v58 = vld [vmem:[#allocation51_spill] sm:$0xff]  ;;  %v14750_v38 = vld [vmem:[#allocation61_spill] sm:$0xff] }
 0x621   : > { %4927 = vst [vmem:[%s9411_s24 + $0xaf8] sm:$0xff] %v4543_v47  ;;  %4928 = vst [vmem:[%s9411_s24 + $0xb00] sm:$0xff] %v4544_v9  ;;  %v5659_v29 = vsub.f32 %v4543_v47, %v7092_v24  ;;  %v5660_v35 = vsub.f32 %v4544_v9, %v7093_v23  ;;  %v5661_v15 = vsub.f32 %v4545_v25, %v7094_v61  ;;  %v3302_v18 = vcvt.f32.s32 %v3301_v48  ;;  %v14751_v9 = vld [vmem:[#allocation98_spill] sm:$0xff]  ;;  %v14752_v57 = vld [vmem:[#allocation83_spill] sm:$0xff] }
 0x622   : > { %4929 = vst [vmem:[%s9411_s24 + $0xb08] sm:$0xff] %v4545_v25  ;;  %v5662_v44 = vmul.f32 %v5656_v28, %v5656_v28  ;;  %v5663_v10 = vmul.f32 %v5657_v37, %v5657_v37  ;;  %v5664_v30 = vmul.f32 %v5658_v59, %v5658_v59  ;;  %v3277_v16 = vadd.s32 %v14748_v36, %v3274_v17  ;;  %v14753_v48 = vld [vmem:[#allocation62_spill] sm:$0xff] }
 0x623   : > { %v5665_v0 = vmul.f32 %v5659_v29, %v5659_v29  ;;  %v5666_v54 = vmul.f32 %v5660_v35, %v5660_v35  ;;  %v5667_v62 = vmul.f32 %v5661_v15, %v5661_v15  ;;  %v13659_v27 = vadd.s32 %v14749_v58, %v3302_v18  ;;  %v7095_v17 = vld [vmem:[%s7577_s15 + $0xb40] sm:$0xff]  ;;  %v7100_v58 = vld [vmem:[%s7577_s15 + $0xb68] sm:$0xff] }
 0x624   : > { %v5902_v3 = vadd.f32 %v14746_v42, %v5662_v44  ;;  %v5903_v8 = vadd.f32 %v14747_v33, %v5663_v10  ;;  %v5904_v47 = vadd.f32 %v14750_v38, %v5664_v30  ;;  %vm3387_vm12 = vcmp.eq.s32.totalorder %v3277_v16, 1  ;;  %v7096_v30 = vld [vmem:[%s7577_s15 + $0xb48] sm:$0xff]  ;;  %v7098_v42 = vld [vmem:[%s7577_s15 + $0xb58] sm:$0xff]  ;;  %v7099_v36 = vld [vmem:[%s7577_s15 + $0xb60] sm:$0xff] }
 0x625   : > { %v5905_v25 = vadd.f32 %v14751_v9, %v5665_v0  ;;  %v5906_v46 = vadd.f32 %v14752_v57, %v5666_v54  ;;  %v5907_v28 = vadd.f32 %v14753_v48, %v5667_v62  ;;  %vm4029_vm13 = vcmp.eq.s32.totalorder %v3277_v16, 2  ;;  %v7097_v54 = vld [vmem:[%s7577_s15 + $0xb50] sm:$0xff] }
 0x626   : > { %v13665_v1 = vadd.f32 %v5902_v3, %v5896_v50  ;;  %v13667_v37 = vadd.f32 %v5903_v8, %v5897_v34  ;;  %v13669_v6 = vadd.f32 %v5904_v47, %v5898_v51  ;;  %v3941_v50 = vsel %vm3387_vm12, %v9129_v45, %v9125_v7  ;;  %v14754_v33 = vld [vmem:[#allocation104_spill] sm:$0xff]  ;;  %v14755_v47 = vld [vmem:[#allocation55_spill] sm:$0xff] }
 0x627   : > { %v13671_v59 = vadd.f32 %v5905_v25, %v5899_v63  ;;  %v13673_v24 = vadd.f32 %v5906_v46, %v5900_v26  ;;  %v13675_v29 = vadd.f32 %v5907_v28, %v5901_v32  ;;  %v3942_v34 = vsel %vm3387_vm12, %v9142_v2, %v9132_v41  ;;  %v14756_v25 = vld [vmem:[#allocation88_spill] sm:$0xff]  ;;  %v14758_v28 = vld [vmem:[#allocation103_spill] sm:$0xff] }
 0x628   : > { %v3943_v51 = vsel %vm3387_vm12, %v9146_v55, %v9135_v20  ;;  %v3944_v63 = vsel %vm3387_vm12, %v9149_v19, %v9161_v14  ;;  %v3945_v26 = vsel %vm3387_vm12, %v9152_v11, %v9168_v13  ;;  %v3946_v32 = vsel %vm3387_vm12, %v9158_v40, %v9171_v49  ;;  %v14757_v46 = vld [vmem:[#allocation52_spill] sm:$0xff] }
 0x629   : > { %v4552_v23 = vsel %vm4029_vm13, %v9175_v39, %v3941_v50  ;;  %v4553_v35 = vsel %vm4029_vm13, %v9189_v4, %v3942_v34  ;;  %v4554_v61 = vsel %vm4029_vm13, %v9205_v53, %v3943_v51  ;;  %v4555_v15 = vsel %vm4029_vm13, %v9208_v43, %v3944_v63  ;;  %v14759_v34 = vld [vmem:[#allocation36_spill] sm:$0xff] }
 0x62a   : > { %v4556_v44 = vsel %vm4029_vm13, %v14305_v52, %v3945_v26  ;;  %v4557_v10 = vsel %vm4029_vm13, %v14306_v60, %v3946_v32  ;;  %4936 = vst [vmem:[%s9411_s24 + $0xb40] sm:$0xff] %v4552_v23  ;;  %4937 = vst [vmem:[%s9411_s24 + $0xb48] sm:$0xff] %v4553_v35  ;;  %v5680_v18 = vsub.f32 %v4552_v23, %v7095_v17  ;;  %vm3389_vm14 = vcmp.eq.s32.totalorder %v13659_v27, 1  ;;  %v14761_v17 = vld [vmem:[#allocation63_spill] sm:$0xff] }
 0x62b   : > { %4938 = vst [vmem:[%s9411_s24 + $0xb50] sm:$0xff] %v4554_v61  ;;  %4939 = vst [vmem:[%s9411_s24 + $0xb58] sm:$0xff] %v4555_v15  ;;  %v5681_v0 = vsub.f32 %v4553_v35, %v7096_v30  ;;  %v5682_v62 = vsub.f32 %v4554_v61, %v7097_v54  ;;  %v5683_v3 = vsub.f32 %v4555_v15, %v7098_v42  ;;  %vm4031_vm15 = vcmp.eq.s32.totalorder %v13659_v27, 2  ;;  %v7104_v27 = vld [vmem:[%s7577_s15 + $0xbb8] sm:$0xff]  ;;  %v7105_v30 = vld [vmem:[%s7577_s15 + $0xbc0] sm:$0xff] }
 0x62c   : > { %4940 = vst [vmem:[%s9411_s24 + $0xb60] sm:$0xff] %v4556_v44  ;;  %4941 = vst [vmem:[%s9411_s24 + $0xb68] sm:$0xff] %v4557_v10  ;;  %v13713_v8 = vmul.f32 %v14754_v33, %v14754_v33  ;;  %v5684_v16 = vsub.f32 %v4556_v44, %v7099_v36  ;;  %v5685_v38 = vsub.f32 %v4557_v10, %v7100_v58  ;;  %v14760_v44 = vld [vmem:[#allocation94_spill] sm:$0xff] }
 0x62d   : > { %v13721_v9 = vmul.f32 %v14755_v47, %v14755_v47  ;;  %v13725_v57 = vmul.f32 %v14756_v25, %v14756_v25  ;;  %v13729_v48 = vmul.f32 %v14757_v46, %v14757_v46  ;;  %v13733_v50 = vmul.f32 %v14758_v28, %v14758_v28  ;;  %v7106_v54 = vld [vmem:[%s7577_s15 + $0xbc8] sm:$0xff] }
 0x62e   : > { %v13737_v51 = vmul.f32 %v14759_v34, %v14759_v34  ;;  %v3953_v63 = vsel %vm3389_vm14, %v9129_v45, %v9125_v7  ;;  %v3954_v26 = vsel %vm3389_vm14, %v9142_v2, %v9132_v41  ;;  %v5686_v32 = vmul.f32 %v5680_v18, %v5680_v18 }
 0x62f   : > { %v5687_v23 = vmul.f32 %v5681_v0, %v5681_v0  ;;  %v13749_v35 = vmul.f32 %v5682_v62, %v5682_v62  ;;  %v13751_v61 = vmul.f32 %v5683_v3, %v5683_v3  ;;  %v13753_v15 = vmul.f32 %v5684_v16, %v5684_v16 }
 0x630   : > { %v13755_v7 = vmul.f32 %v5685_v38, %v5685_v38  ;;  %v3955_v45 = vsel %vm3389_vm14, %v9146_v55, %v9135_v20  ;;  %v3956_v41 = vsel %vm3389_vm14, %v9149_v19, %v9161_v14  ;;  %v3957_v2 = vsel %vm3389_vm14, %v9152_v11, %v9168_v13 }
 0x631   : > { %v3958_v20 = vsel %vm3389_vm14, %v9158_v40, %v9171_v49  ;;  %v4564_v55 = vsel %vm4031_vm15, %v9175_v39, %v3953_v63  ;;  %v4565_v19 = vsel %vm4031_vm15, %v9189_v4, %v3954_v26  ;;  %v4566_v13 = vsel %vm4031_vm15, %v9205_v53, %v3955_v45  ;;  %v7101_v49 = vld [vmem:[%s7577_s15 + $0xba0] sm:$0xff]  ;;  %v7102_v39 = vld [vmem:[%s7577_s15 + $0xba8] sm:$0xff]  ;;  %v7103_v53 = vld [vmem:[%s7577_s15 + $0xbb0] sm:$0xff] }
 0x632   : > { %v4567_v40 = vsel %vm4031_vm15, %v9208_v43, %v3956_v41  ;;  %v4568_v11 = vsel %vm4031_vm15, %v14305_v52, %v3957_v2  ;;  %v4569_v14 = vsel %vm4031_vm15, %v14306_v60, %v3958_v20  ;;  %4948 = vst [vmem:[%s9411_s24 + $0xba0] sm:$0xff] %v4564_v55  ;;  %4949 = vst [vmem:[%s9411_s24 + $0xba8] sm:$0xff] %v4565_v19 }
 0x633   : > { %4950 = vst [vmem:[%s9411_s24 + $0xbb0] sm:$0xff] %v4566_v13  ;;  %4951 = vst [vmem:[%s9411_s24 + $0xbb8] sm:$0xff] %v4567_v40  ;;  %v5704_v43 = vsub.f32 %v4564_v55, %v7101_v49  ;;  %v5705_v4 = vsub.f32 %v4565_v19, %v7102_v39  ;;  %v5706_v52 = vsub.f32 %v4566_v13, %v7103_v53 }
 0x634   : > { %4952 = vst [vmem:[%s9411_s24 + $0xbc0] sm:$0xff] %v4568_v11  ;;  %4953 = vst [vmem:[%s9411_s24 + $0xbc8] sm:$0xff] %v4569_v14  ;;  %v5707_v60 = vsub.f32 %v4567_v40, %v7104_v27  ;;  %v5908_v10 = vadd.f32 %v14760_v44, %v5686_v32  ;;  %v5909_v18 = vadd.f32 %v14761_v17, %v5687_v23 }
 0x635   : > { %v5708_v0 = vsub.f32 %v4568_v11, %v7105_v30  ;;  %v5709_v62 = vsub.f32 %v4569_v14, %v7106_v54 }
 0x636   : > { %7234 = shalt.err (!%p7231_p4)
}
 0x637   : > { %s7235_s9 = scalar_lea.hbm %s13768_s30, 49152  ;;  %s7239_s15 = scalar_lea.hbm %s13927_s4, 98304 }
 0x638   : > { %p7236_p9 = scmp.ne.s32.totalorder %s13768_s30, %s7235_s9  ;;  %p7240_p8 = scmp.lt.u32.totalorder %s13768_s30, %s13927_s4 }
 0x639   : > { %p7241_p13 = scmp.lt.u32.totalorder %s7239_s15, %s7235_s9  ;;  %p7243_p10 = scmp.lt.u32.totalorder %s7235_s9, %s13768_s30 }
 0x63a   : > { %p7237_p0 = pnand %p7236_p9, %p7520_p5 }
 0x63b   : > { %p7242_p6 = por %p7241_p13, %p7240_p8 }
 0x63c   : > { %p7238_p11 = pneg %p7237_p0 }
 0x63d   : > { %p7244_p3 = por %p7243_p10, %p7242_p6 }
 0x63f   : > { %p7245_p7 = pnand %p7244_p3, %p7238_p11 }
 0x641   : > { %7248 = shalt.err (!%p7245_p7)
}
 0x642   : > { %s7338_s6 = smov 768   ;;  %s7339_s17 = smov 48   ;;  %v5710_v42 = vmul.f32 %v5704_v43, %v5704_v43  ;;  %v5711_v3 = vmul.f32 %v5705_v4, %v5705_v4  ;;  %v5712_v33 = vmul.f32 %v5706_v52, %v5706_v52  ;;  %v5713_v36 = vmul.f32 %v5707_v60, %v5707_v60  ;;  %v14762_v16 = vld [vmem:[#allocation99_spill] sm:$0xff]  ;;  %v14763_v38 = vld [vmem:[#allocation102_spill] sm:$0xff]  ;;  %v14764_v32 = vld [vmem:[#allocation101_spill] sm:$0xff] }
 0x643   : > { %6576 = dma.vmem_to_hbm [thread:$0]  (%p7520_p5), %s13784_s27, 49152, %s13768_s30, %s6113_s28, %s7338_s6, %s7338_s6, %s7339_s17   ;;  %v5910_v58 = vadd.f32 %v14762_v16, %v13749_v35  ;;  %v5911_v47 = vadd.f32 %v14763_v38, %v13751_v61  ;;  %v5714_v25 = vmul.f32 %v5708_v0, %v5708_v0  ;;  %v5715_v46 = vmul.f32 %v5709_v62, %v5709_v62  ;;  %v14765_v45 = vld [vmem:[#allocation105_spill] sm:$0xff]  ;;  %v14772_v53 = vld [vmem:[#allocation56_spill] sm:$0xff]  ;;  %v14774_v27 = vld [vmem:[#allocation35_spill] sm:$0xff] }
 0x644   : > { %v5914_v28 = vadd.f32 %v13713_v8, %v5710_v42  ;;  %v5915_v34 = vadd.f32 %v13721_v9, %v5711_v3  ;;  %v5916_v63 = vadd.f32 %v13725_v57, %v5712_v33  ;;  %v5917_v26 = vadd.f32 %v13729_v48, %v5713_v36  ;;  %s6559_s27 = smul.u32 48, %s7571_s10  ;;  %v14773_v52 = vld [vmem:[#allocation84_spill] sm:$0xff]  ;;  %v14775_v44 = vld [vmem:[#allocation37_spill] sm:$0xff]  ;;  %v14776_v17 = vld [vmem:[#allocation66_spill] sm:$0xff]  ;;  %s6118_s23 = scalar_lea.sflag [#allocation12], %s7571_s10 }
 0x645   : > { %v5912_v23 = vadd.f32 %v14764_v32, %v13753_v15  ;;  %v5913_v41 = vadd.f32 %v14765_v45, %v13755_v7  ;;  %v5918_v35 = vadd.f32 %v13733_v50, %v5714_v25  ;;  %v5919_v61 = vadd.f32 %v13737_v51, %v5715_v46  ;;  %s6561_s30 = smul.u32 768, %s7392_s22  ;;  %v14777_v30 = vld [vmem:[#allocation67_spill] sm:$0xff]  ;;  %s7340_s13 = smov [#allocation11]  }
 0x646   : > { %v6010_v2 = vadd.f32 %v5914_v28, %v5908_v10  ;;  %v6011_v20 = vadd.f32 %v5915_v34, %v5909_v18  ;;  %v6012_v8 = vadd.f32 %v5916_v63, %v5910_v58  ;;  %v6013_v9 = vadd.f32 %v5917_v26, %v5911_v47  ;;  %s296_s28 = scalar_lea.vmem [#allocation11], %s6559_s27  ;;  %s7253_s16 = sshll.u32 %s7340_s13, 4  ;;  %s7254_s16 = int_to_ptr.vmem [resolvable:$false] %s7253_s16 }
 0x647   : > { %v6014_v55 = vadd.f32 %v5918_v35, %v5912_v23  ;;  %v6015_v57 = vadd.f32 %v5919_v61, %v5913_v41  ;;  %s6149_s29 = sshll.u32 %s296_s28, 4  ;;  %s13879_s14 = scalar_lea.hbm %s13928_s5, %s6561_s30  ;;  %s13881_s29 = int_to_ptr.vmem [resolvable:$true] %s6149_s29 }
 0x648   : > { %v6058_v48 = vadd.f32 %v6010_v2, %v13665_v1  ;;  %v6059_v19 = vadd.f32 %v6011_v20, %v13667_v37  ;;  %v6060_v15 = vadd.f32 %v6012_v8, %v13669_v6  ;;  %v6061_v7 = vadd.f32 %v6013_v9, %v13671_v59  ;;  %v14766_v6 = vld [vmem:[#allocation70_spill] sm:$0xff]  ;;  %v14767_v59 = vld [vmem:[#allocation71_spill] sm:$0xff]  ;;  %s7249_s9 = scalar_lea.vmem %s13881_s29, 768  ;;  %s7255_s15 = scalar_lea.vmem %s7254_s16, 1536 }
 0x649   : > { %v6062_v50 = vadd.f32 %v6014_v55, %v13673_v24  ;;  %v6063_v51 = vadd.f32 %v6015_v57, %v13675_v29  ;;  %v14768_v24 = vld [vmem:[#allocation53_spill] sm:$0xff]  ;;  %p7250_p12 = scmp.ne.s32.totalorder %s13881_s29, %s7249_s9  ;;  %p7256_p4 = scmp.lt.s32.totalorder %s13881_s29, %s7254_s16 }
 0x64a   : > { %v6082_v13 = vadd.f32 %v6058_v48, %v13534_v21  ;;  %v6083_v40 = vadd.f32 %v6059_v19, %v13537_v22  ;;  %v6084_v11 = vadd.f32 %v6060_v15, %v13546_v31  ;;  %v6085_v14 = vadd.f32 %v6061_v7, %v13549_v12  ;;  %v14769_v29 = vld [vmem:[#allocation73_spill] sm:$0xff]  ;;  %v14771_v31 = vld [vmem:[#allocation96_spill] sm:$0xff]  ;;  %p7257_p9 = scmp.lt.s32.totalorder %s7255_s15, %s7249_s9 }
 0x64b   : > { %v6086_v1 = vadd.f32 %v6062_v50, %v13552_v56  ;;  %v6087_v37 = vadd.f32 %v6063_v51, %v13555_v5  ;;  %v14770_v21 = vld [vmem:[#allocation29_spill] sm:$0xff]  ;;  %p7251_p1 = pnand %p7250_p12, %p7520_p5 }
 0x64c   : > { %v6094_v49 = vadd.f32 %v6082_v13, %v14766_v6  ;;  %v6095_v43 = vadd.f32 %v6083_v40, %v14767_v59  ;;  %v6096_v39 = vadd.f32 %v6084_v11, %v14768_v24  ;;  %v6097_v4 = vadd.f32 %v6085_v14, %v14769_v29  ;;  %p7258_p0 = por %p7257_p9, %p7256_p4 }
 0x64d   : > { %v6098_v22 = vadd.f32 %v6086_v1, %v14770_v21  ;;  %v6099_v12 = vadd.f32 %v6087_v37, %v14771_v31  ;;  %p7252_p2 = pneg %p7251_p1 }
 0x64e   : > { %v6100_v56 = vadd.f32 %v6094_v49, %v14772_v53  ;;  %v6101_v5 = vadd.f32 %v6095_v43, %v14773_v52  ;;  %v6102_v60 = vadd.f32 %v6096_v39, %v14774_v27  ;;  %v6103_v10 = vadd.f32 %v6097_v4, %v14775_v44 }
 0x64f   : > { %v6104_v18 = vadd.f32 %v6098_v22, %v14776_v17  ;;  %v6105_v0 = vadd.f32 %v6099_v12, %v14777_v30  ;;  %p7259_p11 = pnand %p7258_p0, %p7252_p2 }
 0x650   : > { %6106 = vst [vmem:[%s296_s28] sm:$0xff] %v6100_v56  ;;  %6107 = vst [vmem:[%s296_s28 + $0x8] sm:$0xff] %v6101_v5 }
 0x651   : > { %6108 = vst [vmem:[%s296_s28 + $0x10] sm:$0xff] %v6102_v60  ;;  %6109 = vst [vmem:[%s296_s28 + $0x18] sm:$0xff] %v6103_v10 }
 0x652   : > { %6110 = vst [vmem:[%s296_s28 + $0x20] sm:$0xff] %v6104_v18  ;;  %6111 = vst [vmem:[%s296_s28 + $0x28] sm:$0xff] %v6105_v0 }
 0x653   : > { %7262 = shalt.err (!%p7259_p11)
}
 0x654   : > { %s7263_s10 = scalar_lea.hbm %s13879_s14, 768  ;;  %s7267_s6 = scalar_lea.hbm %s13928_s5, 1536 }
 0x655   : > { %p7264_p8 = scmp.ne.s32.totalorder %s13879_s14, %s7263_s10  ;;  %p7268_p10 = scmp.lt.u32.totalorder %s13879_s14, %s13928_s5 }
 0x656   : > { %p7269_p3 = scmp.lt.u32.totalorder %s7267_s6, %s7263_s10  ;;  %p7271_p12 = scmp.lt.u32.totalorder %s7263_s10, %s13879_s14 }
 0x657   : > { %p7265_p13 = pnand %p7264_p8, %p7520_p5 }
 0x658   : > { %p7270_p7 = por %p7269_p3, %p7268_p10 }
 0x659   : > { %p7266_p6 = pneg %p7265_p13 }
 0x65a   : > { %p7272_p1 = por %p7271_p12, %p7270_p7 }
 0x65c   : > { %p7273_p2 = pnand %p7272_p1, %p7266_p6 }
 0x65e   : > { %7276 = shalt.err (!%p7273_p2)
}
 0x65f   : > { %6577 = dma.vmem_to_hbm [thread:$0]  (%p7520_p5), %s13881_s29, 768, %s13879_s14, %s6118_s23  }
 0x660 PF: > { %s6161_s30 = sand.u32 1, %s7315_s18   ;;  %p14778_p4 = scmp.ne.s32.totalorder %s14061_s25, 0 }
 0x661   : > { %p14779_p9 = scmp.ge.s32.totalorder %s7327_s21, 2  ;;  %s6162_s28 = scalar_lea.sflag [#allocation4], %s6161_s30 }
 0x663   : > { %p6595_p0 = pnand %p14779_p9, %p14778_p4 }
 0x665   : > { %7306 = dma.done.wait (!%p6595_p0), %s6162_s28, 49152  }
 0x666   : > { %7308 = vsyncadd (!%p6595_p0), %s6162_s28, 4294918144  ;;  %s6171_s22 = scalar_lea.sflag [#allocation12], %s6161_s30 }
 0x667   : > { %7310 = dma.done.wait (!%p6595_p0), %s6171_s22, 768  }
 0x668   : > { %7312 = vsyncadd (!%p6595_p0), %s6171_s22, 4294966528  ;;  %p24_p5 = scmp.ge.s32.totalorder %s7506_s7, 4   ;;  %s14780_s18 = smov %s7319_s19 }
 0x669   : > { %s14781_s19 = smov %s7323_s20  ;;  %s14782_s20 = smov %s7516_s11 }
 0x66a   : > { %s14783_s21 = smov %s7506_s7  ;;  %26 = sbr.rel (!%p24_p5) target bundleno = 9 (0x9), region = 112 }
 0x671   :  { %6176 = vsyncpa [#allocation3], 1 }
 0x672   :  { %6178 = vsyncpa [#allocation3 + $0x1], 1 }
 0x673   :  { %6179 = vsyncpa [#allocation6], 1 }
 0x674   :  { %6180 = vsyncpa [#allocation9], 1 }
 0x675   :  { %6181 = vsyncpa [#allocation4], 1 }
 0x676   :  { %6183 = vsyncpa [#allocation4 + $0x1], 1 }
 0x677   :  { %6184 = vsyncpa [#allocation12], 1 }
 0x678   :  { %6186 = vsyncpa [#allocation12 + $0x1], 1 }

</bundles_post_ra>
